<compile_context>
chip_gen: v7x
topology: tpu7x:2x2x1
jax: 0.10.0
libtpu: 0.0.40
codegen_flags: <defaults>
</compile_context>

<pallas_src>
import functools

import numpy as np
import jax
import jax.numpy as jnp
from jax import lax
from jax.experimental import pallas as pl
from jax.experimental.pallas import tpu as pltpu

# TODO(synk): verify slope against the original WNetGenerator (PyTorch
# nn.LeakyReLU default is 0.01; W-Net style generators typically use 0.2).
LEAKY_SLOPE = 0.2


# ----------------------------------------------------------------------------
# Pallas kernels
# ----------------------------------------------------------------------------
def _enc_conv_kernel(xe_ref, xo_ref, b0_ref, b1_ref, b2_ref, bias_ref, o_ref,
                     *, act):
    """3x3 stride-2 pad-1 conv on one image, W-direction folded into band mats.

    xe/xo: even/odd rows of the H-padded input, shape (1, Ho+1, Win*Cin).
    b0/b1/b2: band matrices for row taps di=0,1,2, shape (Win*Cin, Wo*Cout).
    o: (1, Ho, Wo*Cout)  -- lane-dense row store.
    """
    ho = o_ref.shape[1]
    a0 = xe_ref[0, 0:ho, :]          # padded rows 2*t   (di = 0)
    a1 = xo_ref[0, 0:ho, :]          # padded rows 2*t+1 (di = 1)
    a2 = xe_ref[0, 1:ho + 1, :]      # padded rows 2*t+2 (di = 2)
    r = jnp.dot(a0, b0_ref[...], preferred_element_type=jnp.float32)
    r = r + jnp.dot(a1, b1_ref[...], preferred_element_type=jnp.float32)
    r = r + jnp.dot(a2, b2_ref[...], preferred_element_type=jnp.float32)
    r = r + bias_ref[...]
    if act == "leaky":
        r = jnp.where(r > 0, r, LEAKY_SLOPE * r)
    elif act == "tanh":
        r = jnp.tanh(r)
    o_ref[0, :, :] = r.astype(o_ref.dtype)


def _dec_conv_kernel(zp_ref, bea_ref, beb_ref, boa_ref, bob_ref, bias_ref,
                     o_ref, *, act):
    """(2x nearest upsample) + 3x3 stride-1 pad-1 conv on one image.

    zp: H-padded pre-upsample input, shape (1, Hz+2, Wz*Cin).
    Band matrices (Wz*Cin, 2*Wz*Cout) already encode the W-upsample, W taps
    and W padding.  Even/odd output rows are emitted as one lane-concat so
    the store is 2*(2*Wz*Cout) lanes wide.
    """
    hz = zp_ref.shape[1] - 2
    za = zp_ref[0, 0:hz, :]
    zb = zp_ref[0, 1:hz + 1, :]
    zc = zp_ref[0, 2:hz + 2, :]
    bias = bias_ref[...]
    ev = jnp.dot(za, bea_ref[...], preferred_element_type=jnp.float32)
    ev = ev + jnp.dot(zb, beb_ref[...], preferred_element_type=jnp.float32)
    ev = ev + bias
    od = jnp.dot(zb, boa_ref[...], preferred_element_type=jnp.float32)
    od = od + jnp.dot(zc, bob_ref[...], preferred_element_type=jnp.float32)
    od = od + bias
    if act == "leaky":
        ev = jnp.where(ev > 0, ev, LEAKY_SLOPE * ev)
        od = jnp.where(od > 0, od, LEAKY_SLOPE * od)
    elif act == "tanh":
        ev = jnp.tanh(ev)
        od = jnp.tanh(od)
    o_ref[0, :, :] = jnp.concatenate([ev, od], axis=-1).astype(o_ref.dtype)


def enc_conv(xe, xo, layer, *, act="leaky", out_dtype=jnp.bfloat16):
    n, hp1, k = xe.shape
    ho = hp1 - 1
    nw = layer["b0"].shape[1]
    return pl.pallas_call(
        functools.partial(_enc_conv_kernel, act=act),
        out_shape=jax.ShapeDtypeStruct((n, ho, nw), out_dtype),
        grid=(n,),
        in_specs=[
            pl.BlockSpec((1, hp1, k), lambda i: (i, 0, 0)),
            pl.BlockSpec((1, hp1, k), lambda i: (i, 0, 0)),
            pl.BlockSpec((k, nw), lambda i: (0, 0)),
            pl.BlockSpec((k, nw), lambda i: (0, 0)),
            pl.BlockSpec((k, nw), lambda i: (0, 0)),
            pl.BlockSpec((1, nw), lambda i: (0, 0)),
        ],
        out_specs=pl.BlockSpec((1, ho, nw), lambda i: (i, 0, 0)),
        compiler_params=pltpu.CompilerParams(
            dimension_semantics=("parallel",)),
    )(xe, xo, layer["b0"], layer["b1"], layer["b2"], layer["bias"])


def dec_conv(zp, layer, *, act="leaky", out_dtype=jnp.bfloat16):
    n, hp2, k = zp.shape
    hz = hp2 - 2
    nw = layer["bea"].shape[1]
    return pl.pallas_call(
        functools.partial(_dec_conv_kernel, act=act),
        out_shape=jax.ShapeDtypeStruct((n, hz, 2 * nw), out_dtype),
        grid=(n,),
        in_specs=[
            pl.BlockSpec((1, hp2, k), lambda i: (i, 0, 0)),
            pl.BlockSpec((k, nw), lambda i: (0, 0)),
            pl.BlockSpec((k, nw), lambda i: (0, 0)),
            pl.BlockSpec((k, nw), lambda i: (0, 0)),
            pl.BlockSpec((k, nw), lambda i: (0, 0)),
            pl.BlockSpec((1, nw), lambda i: (0, 0)),
        ],
        out_specs=pl.BlockSpec((1, hz, 2 * nw), lambda i: (i, 0, 0)),
        compiler_params=pltpu.CompilerParams(
            dimension_semantics=("parallel",)),
    )(zp, layer["bea"], layer["beb"], layer["boa"], layer["bob"],
      layer["bias"])


# ----------------------------------------------------------------------------
# Parameter init + one-time packing into bf16 band matrices
# ----------------------------------------------------------------------------
def init_raw_params(key, config):
    G = config["generator_dim"]
    nc_in = config["inputContentNum"]
    s_in = config["in_channels"]
    n_ccls = config["contentClassNum"]
    n_scls = config["styleClassNum"]

    def w(k, shape, scale=0.05):
        return scale * jax.random.normal(k, shape, jnp.float32)

    keys = jax.random.split(key, 24)
    p = {
        # content encoder (64 -> 32 -> 16 -> 8), weights HWIO (3,3,Cin,Cout)
        "ce1_w": w(keys[0], (3, 3, nc_in, G)),     "ce1_b": w(keys[11], (G,)),
        "ce2_w": w(keys[1], (3, 3, G, 2 * G)),     "ce2_b": w(keys[12], (2 * G,)),
        "ce3_w": w(keys[2], (3, 3, 2 * G, 4 * G)), "ce3_b": w(keys[13], (4 * G,)),
        # style encoder (GT branch shares these weights)
        "se1_w": w(keys[3], (3, 3, s_in, G)),      "se1_b": w(keys[14], (G,)),
        "se2_w": w(keys[4], (3, 3, G, 2 * G)),     "se2_b": w(keys[15], (2 * G,)),
        "se3_w": w(keys[5], (3, 3, 2 * G, 4 * G)), "se3_b": w(keys[16], (4 * G,)),
        # category heads
        "chead_w": w(keys[6], (4 * G, n_ccls)),    "chead_b": w(keys[17], (n_ccls,)),
        "shead_w": w(keys[7], (4 * G, n_scls)),    "shead_b": w(keys[18], (n_scls,)),
        # decoder (8 -> 16 -> 32 -> 64)
        "d1_w": w(keys[8], (3, 3, 8 * G, 2 * G)),  "d1_b": w(keys[19], (2 * G,)),
        "d2_w": w(keys[9], (3, 3, 2 * G, G)),      "d2_b": w(keys[20], (G,)),
        "d3_w": w(keys[10], (3, 3, G, 1)),         "d3_b": w(keys[21], (1,)),
    }
    return p


def _stride2_bands(w_np, win):
    """3x3 stride-2 pad-1 conv: fold W taps + W padding into 3 band matrices
    (one per row tap di), each (Win*Cin, (Win//2)*Cout)."""
    _, _, cin, cout = w_np.shape
    wout = win // 2
    mats = []
    for di in range(3):
        m = np.zeros((win * cin, wout * cout), np.float32)
        for dj in range(3):
            for wo in range(wout):
                wi = 2 * wo + dj - 1
                if 0 <= wi < win:
                    m[wi * cin:(wi + 1) * cin,
                      wo * cout:(wo + 1) * cout] += w_np[di, dj]
        mats.append(m)
    return mats


def _upsample_bands(w_np, wz):
    """(2x nearest upsample along W) + 3x3 stride-1 pad-1 conv: fold into 3
    band matrices (one per row tap di), each (Wz*Cin, 2*Wz*Cout)."""
    _, _, cin, cout = w_np.shape
    wout = 2 * wz
    mats = []
    for di in range(3):
        m = np.zeros((wz * cin, wout * cout), np.float32)
        for dj in range(3):
            for wo in range(wout):
                u = wo + dj - 1
                if 0 <= u < wout:
                    wi = u // 2
                    m[wi * cin:(wi + 1) * cin,
                      wo * cout:(wo + 1) * cout] += w_np[di, dj]
        mats.append(m)
    return mats


def pack_conv_params(raw, config):
    """One-time packing: conv weights -> bf16 band matrices, biases -> tiled
    f32 rows.  Done once so the jitted forward has zero weight prep ops."""
    packed = {}

    def enc(name, win):
        w_np = np.asarray(raw[name + "_w"], np.float32)
        b_np = np.asarray(raw[name + "_b"], np.float32)
        b0, b1, b2 = _stride2_bands(w_np, win)
        packed[name] = {
            "b0": jnp.asarray(b0, jnp.bfloat16),
            "b1": jnp.asarray(b1, jnp.bfloat16),
            "b2": jnp.asarray(b2, jnp.bfloat16),
            "bias": jnp.asarray(np.tile(b_np, win // 2)[None, :], jnp.float32),
        }

    def dec(name, wz):
        w_np = np.asarray(raw[name + "_w"], np.float32)
        b_np = np.asarray(raw[name + "_b"], np.float32)
        m0, m1, m2 = _upsample_bands(w_np, wz)
        packed[name] = {
            "bea": jnp.asarray(m0, jnp.bfloat16),        # even rows, zp[t]
            "beb": jnp.asarray(m1 + m2, jnp.bfloat16),   # even rows, zp[t+1]
            "boa": jnp.asarray(m0 + m1, jnp.bfloat16),   # odd  rows, zp[t+1]
            "bob": jnp.asarray(m2, jnp.bfloat16),        # odd  rows, zp[t+2]
            "bias": jnp.asarray(np.tile(b_np, 2 * wz)[None, :], jnp.float32),
        }

    enc("ce1", 64); enc("ce2", 32); enc("ce3", 16)
    enc("se1", 64); enc("se2", 32); enc("se3", 16)
    dec("d1", 8); dec("d2", 16); dec("d3", 32)

    for k in ("chead_w", "chead_b", "shead_w", "shead_b"):
        packed[k] = raw[k]
    return packed


# ----------------------------------------------------------------------------
# Wrapper glue (all tiny, fused by XLA; no 9x/4x expansions hit HBM)
# ----------------------------------------------------------------------------
def _to_rows(x_nchw):
    """NCHW -> (N, H, W*C) bf16 row layout (free reshape of NHWC)."""
    x = jnp.transpose(x_nchw, (0, 2, 3, 1))
    n, h, w, c = x.shape
    return x.reshape(n, h, w * c).astype(jnp.bfloat16)


def _parity_split(rows):
    """H-pad by 1 on each side, then split padded rows into even/odd planes
    so the stride-2 kernel never needs strided VMEM access."""
    p = jnp.pad(rows, ((0, 0), (1, 1), (0, 0)))
    return p[:, 0::2, :], p[:, 1::2, :]


def _pad_rows(rows):
    return jnp.pad(rows, ((0, 0), (1, 1), (0, 0)))


def wnet_forward(packed, contents, reshape_styles, gt_style, config):
    """Inputs in NCHW (PyTorch convention):
         contents:       (B, inputContentNum, 64, 64)
         reshape_styles: (B*inputStyleNum, 1, 64, 64)
         gt_style:       (B, 1, 64, 64)
    """
    B = contents.shape[0]
    Ns = config["inputStyleNum"]
    G = config["generator_dim"]
    BS = reshape_styles.shape[0]

    # ---- content encoder ----
    c_rows = _to_rows(contents)                               # (B, 64, 64*Cin)
    xe, xo = _parity_split(c_rows)
    cf1 = enc_conv(xe, xo, packed["ce1"])                     # (B, 32, 32*G)
    xe, xo = _parity_split(cf1)
    cf2 = enc_conv(xe, xo, packed["ce2"])                     # (B, 16, 16*2G)
    xe, xo = _parity_split(cf2)
    cf3 = enc_conv(xe, xo, packed["ce3"])                     # (B, 8, 8*4G)

    cf1_4d = cf1.reshape(B, 32, 32, G)
    cf2_4d = cf2.reshape(B, 16, 16, 2 * G)
    cf3_4d = cf3.reshape(B, 8, 8, 4 * G)
    # tiny head: plain XLA matmul (not worth a pallas_call)
    content_category = (cf3_4d.astype(jnp.float32).mean(axis=(1, 2))
                        @ packed["chead_w"] + packed["chead_b"])

    # ---- style encoder, GT branch folded in (shared weights) ----
    # TODO(synk): assumes the GT branch reuses the style-encoder weights and
    # that the original generator has no norm layers; verify vs. WNetGenerator.
    sg = jnp.concatenate([reshape_styles, gt_style], axis=0)  # (B*Ns+B,1,64,64)
    s_rows = _to_rows(sg)
    xe, xo = _parity_split(s_rows)
    sgf1 = enc_conv(xe, xo, packed["se1"])
    xe, xo = _parity_split(sgf1)
    sgf2 = enc_conv(xe, xo, packed["se2"])
    xe, xo = _parity_split(sgf2)
    sgf3 = enc_conv(xe, xo, packed["se3"])

    sf1_5d = sgf1[:BS].reshape(B, Ns, 32, 32, G)
    sf2_5d = sgf2[:BS].reshape(B, Ns, 16, 16, 2 * G)
    sf3_5d = sgf3[:BS].reshape(B, Ns, 8, 8, 4 * G)
    gt_4d = sgf3[BS:].reshape(B, 8, 8, 4 * G)
    style_category = (sgf3[:BS].reshape(BS, 8, 8, 4 * G).astype(jnp.float32)
                      .mean(axis=(1, 2)) @ packed["shead_w"]
                      + packed["shead_b"])

    # ---- decoder: content bottleneck + mean style bottleneck ----
    style_bn = sf3_5d.astype(jnp.float32).mean(axis=1).astype(jnp.bfloat16)
    z = jnp.concatenate([cf3_4d, style_bn], axis=-1)          # (B, 8, 8, 8G)
    z_rows = z.reshape(B, 8, 8 * 8 * G)
    d1 = dec_conv(_pad_rows(z_rows), packed["d1"])            # (B, 8, 2*16*2G)
    d1_rows = d1.reshape(B, 16, 16 * 2 * G)
    d2 = dec_conv(_pad_rows(d1_rows), packed["d2"])           # (B, 16, 2*32*G)
    d2_rows = d2.reshape(B, 32, 32 * G)
    d3 = dec_conv(_pad_rows(d2_rows), packed["d3"], act="tanh",
                  out_dtype=jnp.float32)                      # (B, 32, 2*64)
    d3_rows = d3.reshape(B, 64, 64)

    d1_4d = d1_rows.reshape(B, 16, 16, 2 * G)
    d2_4d = d2_rows.reshape(B, 32, 32, G)
    d3_4d = d3_rows.reshape(B, 64, 64, 1)

    # Back to NCHW f32 at the public boundary (PyTorch convention)
    to_nchw = lambda t: jnp.transpose(t, (0, 3, 1, 2)).astype(jnp.float32)
    enc_content_list = [to_nchw(cf1_4d), to_nchw(cf2_4d), to_nchw(cf3_4d)]
    reshaped_enc_style_list = [
        jnp.transpose(sf1_5d, (0, 1, 4, 2, 3)).astype(jnp.float32),
        jnp.transpose(sf2_5d, (0, 1, 4, 2, 3)).astype(jnp.float32),
        jnp.transpose(sf3_5d, (0, 1, 4, 2, 3)).astype(jnp.float32),
    ]
    decode_output_list = [to_nchw(d1_4d), to_nchw(d2_4d), to_nchw(d3_4d)]
    GT_output = to_nchw(gt_4d)

    return (enc_content_list, content_category, reshaped_enc_style_list,
            style_category, decode_output_list, GT_output)


# ----------------------------------------------------------------------------
# Pure-JAX reference (same bf16-between-layers numerics) for a tolerance check
# ----------------------------------------------------------------------------
def _conv_ref(x, w, b, stride, act):
    y = lax.conv_general_dilated(
        x.astype(jnp.bfloat16), w.astype(jnp.bfloat16),
        window_strides=(stride, stride), padding=((1, 1), (1, 1)),
        dimension_numbers=("NHWC", "HWIO", "NHWC"),
        preferred_element_type=jnp.float32)
    y = y + b.astype(jnp.float32)
    if act == "leaky":
        y = jnp.where(y > 0, y, LEAKY_SLOPE * y)
    elif act == "tanh":
        y = jnp.tanh(y)
    return y.astype(jnp.bfloat16)


def _upsample2x(x):
    return jnp.repeat(jnp.repeat(x, 2, axis=1), 2, axis=2)


def wnet_forward_ref(raw, contents, reshape_styles, gt_style, config):
    B = contents.shape[0]
    Ns = config["inputStyleNum"]
    G = config["generator_dim"]
    BS = reshape_styles.shape[0]
    c = jnp.transpose(contents, (0, 2, 3, 1)).astype(jnp.bfloat16)
    sg = jnp.transpose(jnp.concatenate([reshape_styles, gt_style], axis=0),
                       (0, 2, 3, 1)).astype(jnp.bfloat16)

    cf1 = _conv_ref(c, raw["ce1_w"], raw["ce1_b"], 2, "leaky")
    cf2 = _conv_ref(cf1, raw["ce2_w"], raw["ce2_b"], 2, "leaky")
    cf3 = _conv_ref(cf2, raw["ce3_w"], raw["ce3_b"], 2, "leaky")
    content_category = (cf3.astype(jnp.float32).mean(axis=(1, 2))
                        @ raw["chead_w"] + raw["chead_b"])

    sgf1 = _conv_ref(sg, raw["se1_w"], raw["se1_b"], 2, "leaky")
    sgf2 = _conv_ref(sgf1, raw["se2_w"], raw["se2_b"], 2, "leaky")
    sgf3 = _conv_ref(sgf2, raw["se3_w"], raw["se3_b"], 2, "leaky")
    sf3, gt = sgf3[:BS], sgf3[BS:]
    style_category = (sf3.astype(jnp.float32).mean(axis=(1, 2))
                      @ raw["shead_w"] + raw["shead_b"])

    style_bn = (sf3.reshape(B, Ns, 8, 8, 4 * G).astype(jnp.float32)
                .mean(axis=1).astype(jnp.bfloat16))
    z = jnp.concatenate([cf3, style_bn], axis=-1)
    d1 = _conv_ref(_upsample2x(z), raw["d1_w"], raw["d1_b"], 1, "leaky")
    d2 = _conv_ref(_upsample2x(d1), raw["d2_w"], raw["d2_b"], 1, "leaky")
    d3 = _conv_ref(_upsample2x(d2), raw["d3_w"], raw["d3_b"], 1, "tanh")

    to_nchw = lambda t: jnp.transpose(t, (0, 3, 1, 2)).astype(jnp.float32)
    return dict(cf3=to_nchw(cf3), content_category=content_category,
                style_category=style_category, GT_output=to_nchw(gt),
                d3=to_nchw(d3))


# ----------------------------------------------------------------------------
# Driver
# ----------------------------------------------------------------------------
if __name__ == "__main__":
    config = {
        "in_channels": 1,
        "generator_dim": 8,
        "batch_size": 2,
        "val_batch_size": 2,
        "inputContentNum": 4,
        "inputStyleNum": 4,
        "contentClassNum": 10,
        "styleClassNum": 10,
        "max_epoch": 1,
    }

    key = jax.random.PRNGKey(0)
    kp, kc, ks, kg = jax.random.split(key, 4)
    raw_params = init_raw_params(kp, config)
    packed_params = pack_conv_params(raw_params, config)   # one-time packing

    B = config["val_batch_size"]
    Nc = config["inputContentNum"]
    Ns = config["inputStyleNum"]

    contents = jax.random.uniform(kc, (B, Nc, 64, 64), jnp.float32,
                                  minval=-1.0, maxval=1.0)
    styles = jax.random.uniform(ks, (B, Ns, 64, 64), jnp.float32,
                                minval=-1.0, maxval=1.0)
    gt_style = jax.random.uniform(kg, (B, 1, 64, 64), jnp.float32,
                                  minval=-1.0, maxval=1.0)
    reshape_styles = styles.reshape(B * Ns, 1, 64, 64)

    fwd = jax.jit(functools.partial(wnet_forward, config=config))
    outs = jax.block_until_ready(
        fwd(packed_params, contents, reshape_styles, gt_style))

    (enc_content_list, content_category, reshaped_enc_style_list,
     style_category, decode_output_list, GT_output) = outs

    G = config["generator_dim"]
    assert enc_content_list[0].shape == (B, G, 32, 32)
    assert enc_content_list[2].shape == (B, 4 * G, 8, 8)
    assert reshaped_enc_style_list[0].shape == (B, Ns, G, 32, 32)
    assert decode_output_list[0].shape == (B, 2 * G, 16, 16)
    assert decode_output_list[-1].shape == (B, 1, 64, 64)
    assert content_category.shape == (B, config["contentClassNum"])
    assert style_category.shape == (B * Ns, config["styleClassNum"])
    assert GT_output.shape == (B, 4 * G, 8, 8)
    assert bool(jnp.all(jnp.isfinite(decode_output_list[-1])))
    assert bool(jnp.all(jnp.isfinite(content_category)))
    assert bool(jnp.all(jnp.isfinite(style_category)))

    # Numerics check against a pure-JAX reference with matching bf16 casts.
    ref = jax.jit(functools.partial(wnet_forward_ref, config=config))(
        raw_params, contents, reshape_styles, gt_style)
    ref = jax.block_until_ready(ref)

    def _close(a, b, tol=0.05):
        return float(jnp.max(jnp.abs(a - b))) < tol

    assert _close(enc_content_list[-1], ref["cf3"])
    assert _close(content_category, ref["content_category"])
    assert _close(style_category, ref["style_category"])
    assert _close(GT_output, ref["GT_output"])
    assert _close(decode_output_list[-1], ref["d3"])

    print("KERNEL_OK")
</pallas_src>

<mosaic_0001>
module attributes {stable_mosaic.version = 11 : i64} {
  func.func @_enc_conv_kernel(%arg0: i32, %arg1: memref<1x33x64xbf16, #tpu.memory_space<vmem>>, %arg2: memref<1x33x64xbf16, #tpu.memory_space<vmem>>, %arg3: memref<64x256xbf16, #tpu.memory_space<vmem>>, %arg4: memref<64x256xbf16, #tpu.memory_space<vmem>>, %arg5: memref<64x256xbf16, #tpu.memory_space<vmem>>, %arg6: memref<1x256xf32, #tpu.memory_space<vmem>>, %arg7: memref<1x32x256xbf16, #tpu.memory_space<vmem>>) attributes {dimension_semantics = [#tpu.dimension_semantics<parallel>], iteration_bounds = array<i64: 10>, scalar_prefetch = 0 : i64, scratch_operands = 0 : i64, tpu.core_type = #tpu.core_type<tc>, window_params = [{transform_indices = @transform_0, window_bounds = array<i64: 1, 33, 64>}, {transform_indices = @transform_1, window_bounds = array<i64: 1, 33, 64>}, {pipeline_mode = #tpu.pipeline_mode<synchronous>, transform_indices = @transform_2, window_bounds = array<i64: 64, 256>}, {pipeline_mode = #tpu.pipeline_mode<synchronous>, transform_indices = @transform_3, window_bounds = array<i64: 64, 256>}, {pipeline_mode = #tpu.pipeline_mode<synchronous>, transform_indices = @transform_4, window_bounds = array<i64: 64, 256>}, {pipeline_mode = #tpu.pipeline_mode<synchronous>, transform_indices = @transform_5, window_bounds = array<i64: 1, 256>}, {transform_indices = @transform_6, window_bounds = array<i64: 1, 32, 256>}]} {
    %c0 = arith.constant 0 : index
    %c0_0 = arith.constant 0 : index
    %c0_1 = arith.constant 0 : index
    %0 = vector.load %arg1[%c0, %c0_0, %c0_1] : memref<1x33x64xbf16, #tpu.memory_space<vmem>>, vector<1x32x64xbf16>
    %1 = vector.shape_cast %0 : vector<1x32x64xbf16> to vector<32x64xbf16>
    %c0_2 = arith.constant 0 : index
    %c0_3 = arith.constant 0 : index
    %c0_4 = arith.constant 0 : index
    %2 = vector.load %arg2[%c0_2, %c0_3, %c0_4] : memref<1x33x64xbf16, #tpu.memory_space<vmem>>, vector<1x32x64xbf16>
    %3 = vector.shape_cast %2 : vector<1x32x64xbf16> to vector<32x64xbf16>
    %c0_5 = arith.constant 0 : index
    %c1 = arith.constant 1 : index
    %c0_6 = arith.constant 0 : index
    %4 = vector.load %arg1[%c0_5, %c1, %c0_6] : memref<1x33x64xbf16, #tpu.memory_space<vmem>>, vector<1x32x64xbf16>
    %5 = vector.shape_cast %4 : vector<1x32x64xbf16> to vector<32x64xbf16>
    %c0_7 = arith.constant 0 : index
    %c0_8 = arith.constant 0 : index
    %6 = vector.load %arg3[%c0_7, %c0_8] : memref<64x256xbf16, #tpu.memory_space<vmem>>, vector<64x256xbf16>
    %cst = arith.constant dense<0.000000e+00> : vector<32x256xf32>
    %7 = tpu.matmul %1, %6, %cst {dimension_numbers = #tpu.dot_dimension_numbers<[1], [0], [0], [1], [0, 0, 1, 1], [], []>} : vector<32x64xbf16>, vector<64x256xbf16>, vector<32x256xf32> -> vector<32x256xf32>
    %c0_9 = arith.constant 0 : index
    %c0_10 = arith.constant 0 : index
    %8 = vector.load %arg4[%c0_9, %c0_10] : memref<64x256xbf16, #tpu.memory_space<vmem>>, vector<64x256xbf16>
    %cst_11 = arith.constant dense<0.000000e+00> : vector<32x256xf32>
    %9 = tpu.matmul %3, %8, %cst_11 {dimension_numbers = #tpu.dot_dimension_numbers<[1], [0], [0], [1], [0, 0, 1, 1], [], []>} : vector<32x64xbf16>, vector<64x256xbf16>, vector<32x256xf32> -> vector<32x256xf32>
    %10 = arith.addf %7, %9 : vector<32x256xf32>
    %c0_12 = arith.constant 0 : index
    %c0_13 = arith.constant 0 : index
    %11 = vector.load %arg5[%c0_12, %c0_13] : memref<64x256xbf16, #tpu.memory_space<vmem>>, vector<64x256xbf16>
    %cst_14 = arith.constant dense<0.000000e+00> : vector<32x256xf32>
    %12 = tpu.matmul %5, %11, %cst_14 {dimension_numbers = #tpu.dot_dimension_numbers<[1], [0], [0], [1], [0, 0, 1, 1], [], []>} : vector<32x64xbf16>, vector<64x256xbf16>, vector<32x256xf32> -> vector<32x256xf32>
    %13 = arith.addf %10, %12 : vector<32x256xf32>
    %c0_15 = arith.constant 0 : index
    %c0_16 = arith.constant 0 : index
    %14 = vector.load %arg6[%c0_15, %c0_16] : memref<1x256xf32, #tpu.memory_space<vmem>>, vector<1x256xf32>
    %15 = vector.broadcast %14 : vector<1x256xf32> to vector<32x256xf32>
    %16 = arith.addf %13, %15 : vector<32x256xf32>
    %cst_17 = arith.constant 0.000000e+00 : f32
    %17 = vector.broadcast %cst_17 : f32 to vector<32x256xf32>
    %18 = arith.cmpf ogt, %16, %17 : vector<32x256xf32>
    %cst_18 = arith.constant 2.000000e-01 : f32
    %19 = vector.broadcast %cst_18 : f32 to vector<32x256xf32>
    %20 = arith.mulf %19, %16 : vector<32x256xf32>
    %21 = arith.select %18, %16, %20 : vector<32x256xi1>, vector<32x256xf32>
    %22 = arith.truncf %21 : vector<32x256xf32> to vector<32x256xbf16>
    %c0_19 = arith.constant 0 : index
    %c0_20 = arith.constant 0 : index
    %c0_21 = arith.constant 0 : index
    %23 = vector.load %arg7[%c0_19, %c0_20, %c0_21] : memref<1x32x256xbf16, #tpu.memory_space<vmem>>, vector<1x32x256xbf16>
    %24 = vector.shape_cast %23 : vector<1x32x256xbf16> to vector<32x256xbf16>
    %25 = vector.shape_cast %22 : vector<32x256xbf16> to vector<1x32x256xbf16>
    tpu.vector_store %arg7[%c0_19, %c0_20, %c0_21], %25 {strides = array<i32>} : memref<1x32x256xbf16, #tpu.memory_space<vmem>>, vector<1x32x256xbf16>,
    return
  }
  func.func @transform_0(%arg0: i32) -> (i32, i32, i32) {
    %c0_i32 = arith.constant 0 : i32
    %c0_i32_0 = arith.constant 0 : i32
    %c0_i32_1 = arith.constant 0 : i32
    return %arg0, %c0_i32, %c0_i32_0 : i32, i32, i32
  }
  func.func @transform_1(%arg0: i32) -> (i32, i32, i32) {
    %c0_i32 = arith.constant 0 : i32
    %c0_i32_0 = arith.constant 0 : i32
    %c0_i32_1 = arith.constant 0 : i32
    return %arg0, %c0_i32, %c0_i32_0 : i32, i32, i32
  }
  func.func @transform_2(%arg0: i32) -> (i32, i32) {
    %c0_i32 = arith.constant 0 : i32
    %c0_i32_0 = arith.constant 0 : i32
    %c0_i32_1 = arith.constant 0 : i32
    return %c0_i32, %c0_i32_0 : i32, i32
  }
  func.func @transform_3(%arg0: i32) -> (i32, i32) {
    %c0_i32 = arith.constant 0 : i32
    %c0_i32_0 = arith.constant 0 : i32
    %c0_i32_1 = arith.constant 0 : i32
    return %c0_i32, %c0_i32_0 : i32, i32
  }
  func.func @transform_4(%arg0: i32) -> (i32, i32) {
    %c0_i32 = arith.constant 0 : i32
    %c0_i32_0 = arith.constant 0 : i32
    %c0_i32_1 = arith.constant 0 : i32
    return %c0_i32, %c0_i32_0 : i32, i32
  }
  func.func @transform_5(%arg0: i32) -> (i32, i32) {
    %c0_i32 = arith.constant 0 : i32
    %c0_i32_0 = arith.constant 0 : i32
    %c0_i32_1 = arith.constant 0 : i32
    return %c0_i32, %c0_i32_0 : i32, i32
  }
  func.func @transform_6(%arg0: i32) -> (i32, i32, i32) {
    %c0_i32 = arith.constant 0 : i32
    %c0_i32_0 = arith.constant 0 : i32
    %c0_i32_1 = arith.constant 0 : i32
    return %arg0, %c0_i32, %c0_i32_0 : i32, i32, i32
  }
}

module attributes {stable_mosaic.version = 11 : i64} {
  func.func @_enc_conv_kernel(%arg0: i32, %arg1: memref<1x17x256xbf16, #tpu.memory_space<vmem>>, %arg2: memref<1x17x256xbf16, #tpu.memory_space<vmem>>, %arg3: memref<256x256xbf16, #tpu.memory_space<vmem>>, %arg4: memref<256x256xbf16, #tpu.memory_space<vmem>>, %arg5: memref<256x256xbf16, #tpu.memory_space<vmem>>, %arg6: memref<1x256xf32, #tpu.memory_space<vmem>>, %arg7: memref<1x16x256xbf16, #tpu.memory_space<vmem>>) attributes {dimension_semantics = [#tpu.dimension_semantics<parallel>], iteration_bounds = array<i64: 10>, scalar_prefetch = 0 : i64, scratch_operands = 0 : i64, tpu.core_type = #tpu.core_type<tc>, window_params = [{transform_indices = @transform_0, window_bounds = array<i64: 1, 17, 256>}, {transform_indices = @transform_1, window_bounds = array<i64: 1, 17, 256>}, {pipeline_mode = #tpu.pipeline_mode<synchronous>, transform_indices = @transform_2, window_bounds = array<i64: 256, 256>}, {pipeline_mode = #tpu.pipeline_mode<synchronous>, transform_indices = @transform_3, window_bounds = array<i64: 256, 256>}, {pipeline_mode = #tpu.pipeline_mode<synchronous>, transform_indices = @transform_4, window_bounds = array<i64: 256, 256>}, {pipeline_mode = #tpu.pipeline_mode<synchronous>, transform_indices = @transform_5, window_bounds = array<i64: 1, 256>}, {transform_indices = @transform_6, window_bounds = array<i64: 1, 16, 256>}]} {
    %c0 = arith.constant 0 : index
    %c0_0 = arith.constant 0 : index
    %c0_1 = arith.constant 0 : index
    %0 = vector.load %arg1[%c0, %c0_0, %c0_1] : memref<1x17x256xbf16, #tpu.memory_space<vmem>>, vector<1x16x256xbf16>
    %1 = vector.shape_cast %0 : vector<1x16x256xbf16> to vector<16x256xbf16>
    %c0_2 = arith.constant 0 : index
    %c0_3 = arith.constant 0 : index
    %c0_4 = arith.constant 0 : index
    %2 = vector.load %arg2[%c0_2, %c0_3, %c0_4] : memref<1x17x256xbf16, #tpu.memory_space<vmem>>, vector<1x16x256xbf16>
    %3 = vector.shape_cast %2 : vector<1x16x256xbf16> to vector<16x256xbf16>
    %c0_5 = arith.constant 0 : index
    %c1 = arith.constant 1 : index
    %c0_6 = arith.constant 0 : index
    %4 = vector.load %arg1[%c0_5, %c1, %c0_6] : memref<1x17x256xbf16, #tpu.memory_space<vmem>>, vector<1x16x256xbf16>
    %5 = vector.shape_cast %4 : vector<1x16x256xbf16> to vector<16x256xbf16>
    %c0_7 = arith.constant 0 : index
    %c0_8 = arith.constant 0 : index
    %6 = vector.load %arg3[%c0_7, %c0_8] : memref<256x256xbf16, #tpu.memory_space<vmem>>, vector<256x256xbf16>
    %cst = arith.constant dense<0.000000e+00> : vector<16x256xf32>
    %7 = tpu.matmul %1, %6, %cst {dimension_numbers = #tpu.dot_dimension_numbers<[1], [0], [0], [1], [0, 0, 1, 1], [], []>} : vector<16x256xbf16>, vector<256x256xbf16>, vector<16x256xf32> -> vector<16x256xf32>
    %c0_9 = arith.constant 0 : index
    %c0_10 = arith.constant 0 : index
    %8 = vector.load %arg4[%c0_9, %c0_10] : memref<256x256xbf16, #tpu.memory_space<vmem>>, vector<256x256xbf16>
    %cst_11 = arith.constant dense<0.000000e+00> : vector<16x256xf32>
    %9 = tpu.matmul %3, %8, %cst_11 {dimension_numbers = #tpu.dot_dimension_numbers<[1], [0], [0], [1], [0, 0, 1, 1], [], []>} : vector<16x256xbf16>, vector<256x256xbf16>, vector<16x256xf32> -> vector<16x256xf32>
    %10 = arith.addf %7, %9 : vector<16x256xf32>
    %c0_12 = arith.constant 0 : index
    %c0_13 = arith.constant 0 : index
    %11 = vector.load %arg5[%c0_12, %c0_13] : memref<256x256xbf16, #tpu.memory_space<vmem>>, vector<256x256xbf16>
    %cst_14 = arith.constant dense<0.000000e+00> : vector<16x256xf32>
    %12 = tpu.matmul %5, %11, %cst_14 {dimension_numbers = #tpu.dot_dimension_numbers<[1], [0], [0], [1], [0, 0, 1, 1], [], []>} : vector<16x256xbf16>, vector<256x256xbf16>, vector<16x256xf32> -> vector<16x256xf32>
    %13 = arith.addf %10, %12 : vector<16x256xf32>
    %c0_15 = arith.constant 0 : index
    %c0_16 = arith.constant 0 : index
    %14 = vector.load %arg6[%c0_15, %c0_16] : memref<1x256xf32, #tpu.memory_space<vmem>>, vector<1x256xf32>
    %15 = vector.broadcast %14 : vector<1x256xf32> to vector<16x256xf32>
    %16 = arith.addf %13, %15 : vector<16x256xf32>
    %cst_17 = arith.constant 0.000000e+00 : f32
    %17 = vector.broadcast %cst_17 : f32 to vector<16x256xf32>
    %18 = arith.cmpf ogt, %16, %17 : vector<16x256xf32>
    %cst_18 = arith.constant 2.000000e-01 : f32
    %19 = vector.broadcast %cst_18 : f32 to vector<16x256xf32>
    %20 = arith.mulf %19, %16 : vector<16x256xf32>
    %21 = arith.select %18, %16, %20 : vector<16x256xi1>, vector<16x256xf32>
    %22 = arith.truncf %21 : vector<16x256xf32> to vector<16x256xbf16>
    %c0_19 = arith.constant 0 : index
    %c0_20 = arith.constant 0 : index
    %c0_21 = arith.constant 0 : index
    %23 = vector.load %arg7[%c0_19, %c0_20, %c0_21] : memref<1x16x256xbf16, #tpu.memory_space<vmem>>, vector<1x16x256xbf16>
    %24 = vector.shape_cast %23 : vector<1x16x256xbf16> to vector<16x256xbf16>
    %25 = vector.shape_cast %22 : vector<16x256xbf16> to vector<1x16x256xbf16>
    tpu.vector_store %arg7[%c0_19, %c0_20, %c0_21], %25 {strides = array<i32>} : memref<1x16x256xbf16, #tpu.memory_space<vmem>>, vector<1x16x256xbf16>,
    return
  }
  func.func @transform_0(%arg0: i32) -> (i32, i32, i32) {
    %c0_i32 = arith.constant 0 : i32
    %c0_i32_0 = arith.constant 0 : i32
    %c0_i32_1 = arith.constant 0 : i32
    return %arg0, %c0_i32, %c0_i32_0 : i32, i32, i32
  }
  func.func @transform_1(%arg0: i32) -> (i32, i32, i32) {
    %c0_i32 = arith.constant 0 : i32
    %c0_i32_0 = arith.constant 0 : i32
    %c0_i32_1 = arith.constant 0 : i32
    return %arg0, %c0_i32, %c0_i32_0 : i32, i32, i32
  }
  func.func @transform_2(%arg0: i32) -> (i32, i32) {
    %c0_i32 = arith.constant 0 : i32
    %c0_i32_0 = arith.constant 0 : i32
    %c0_i32_1 = arith.constant 0 : i32
    return %c0_i32, %c0_i32_0 : i32, i32
  }
  func.func @transform_3(%arg0: i32) -> (i32, i32) {
    %c0_i32 = arith.constant 0 : i32
    %c0_i32_0 = arith.constant 0 : i32
    %c0_i32_1 = arith.constant 0 : i32
    return %c0_i32, %c0_i32_0 : i32, i32
  }
  func.func @transform_4(%arg0: i32) -> (i32, i32) {
    %c0_i32 = arith.constant 0 : i32
    %c0_i32_0 = arith.constant 0 : i32
    %c0_i32_1 = arith.constant 0 : i32
    return %c0_i32, %c0_i32_0 : i32, i32
  }
  func.func @transform_5(%arg0: i32) -> (i32, i32) {
    %c0_i32 = arith.constant 0 : i32
    %c0_i32_0 = arith.constant 0 : i32
    %c0_i32_1 = arith.constant 0 : i32
    return %c0_i32, %c0_i32_0 : i32, i32
  }
  func.func @transform_6(%arg0: i32) -> (i32, i32, i32) {
    %c0_i32 = arith.constant 0 : i32
    %c0_i32_0 = arith.constant 0 : i32
    %c0_i32_1 = arith.constant 0 : i32
    return %arg0, %c0_i32, %c0_i32_0 : i32, i32, i32
  }
}

module attributes {stable_mosaic.version = 11 : i64} {
  func.func @_enc_conv_kernel(%arg0: i32, %arg1: memref<1x9x256xbf16, #tpu.memory_space<vmem>>, %arg2: memref<1x9x256xbf16, #tpu.memory_space<vmem>>, %arg3: memref<256x256xbf16, #tpu.memory_space<vmem>>, %arg4: memref<256x256xbf16, #tpu.memory_space<vmem>>, %arg5: memref<256x256xbf16, #tpu.memory_space<vmem>>, %arg6: memref<1x256xf32, #tpu.memory_space<vmem>>, %arg7: memref<1x8x256xbf16, #tpu.memory_space<vmem>>) attributes {dimension_semantics = [#tpu.dimension_semantics<parallel>], iteration_bounds = array<i64: 10>, scalar_prefetch = 0 : i64, scratch_operands = 0 : i64, tpu.core_type = #tpu.core_type<tc>, window_params = [{transform_indices = @transform_0, window_bounds = array<i64: 1, 9, 256>}, {transform_indices = @transform_1, window_bounds = array<i64: 1, 9, 256>}, {pipeline_mode = #tpu.pipeline_mode<synchronous>, transform_indices = @transform_2, window_bounds = array<i64: 256, 256>}, {pipeline_mode = #tpu.pipeline_mode<synchronous>, transform_indices = @transform_3, window_bounds = array<i64: 256, 256>}, {pipeline_mode = #tpu.pipeline_mode<synchronous>, transform_indices = @transform_4, window_bounds = array<i64: 256, 256>}, {pipeline_mode = #tpu.pipeline_mode<synchronous>, transform_indices = @transform_5, window_bounds = array<i64: 1, 256>}, {transform_indices = @transform_6, window_bounds = array<i64: 1, 8, 256>}]} {
    %c0 = arith.constant 0 : index
    %c0_0 = arith.constant 0 : index
    %c0_1 = arith.constant 0 : index
    %0 = vector.load %arg1[%c0, %c0_0, %c0_1] : memref<1x9x256xbf16, #tpu.memory_space<vmem>>, vector<1x8x256xbf16>
    %1 = vector.shape_cast %0 : vector<1x8x256xbf16> to vector<8x256xbf16>
    %c0_2 = arith.constant 0 : index
    %c0_3 = arith.constant 0 : index
    %c0_4 = arith.constant 0 : index
    %2 = vector.load %arg2[%c0_2, %c0_3, %c0_4] : memref<1x9x256xbf16, #tpu.memory_space<vmem>>, vector<1x8x256xbf16>
    %3 = vector.shape_cast %2 : vector<1x8x256xbf16> to vector<8x256xbf16>
    %c0_5 = arith.constant 0 : index
    %c1 = arith.constant 1 : index
    %c0_6 = arith.constant 0 : index
    %4 = vector.load %arg1[%c0_5, %c1, %c0_6] : memref<1x9x256xbf16, #tpu.memory_space<vmem>>, vector<1x8x256xbf16>
    %5 = vector.shape_cast %4 : vector<1x8x256xbf16> to vector<8x256xbf16>
    %c0_7 = arith.constant 0 : index
    %c0_8 = arith.constant 0 : index
    %6 = vector.load %arg3[%c0_7, %c0_8] : memref<256x256xbf16, #tpu.memory_space<vmem>>, vector<256x256xbf16>
    %cst = arith.constant dense<0.000000e+00> : vector<8x256xf32>
    %7 = tpu.matmul %1, %6, %cst {dimension_numbers = #tpu.dot_dimension_numbers<[1], [0], [0], [1], [0, 0, 1, 1], [], []>} : vector<8x256xbf16>, vector<256x256xbf16>, vector<8x256xf32> -> vector<8x256xf32>
    %c0_9 = arith.constant 0 : index
    %c0_10 = arith.constant 0 : index
    %8 = vector.load %arg4[%c0_9, %c0_10] : memref<256x256xbf16, #tpu.memory_space<vmem>>, vector<256x256xbf16>
    %cst_11 = arith.constant dense<0.000000e+00> : vector<8x256xf32>
    %9 = tpu.matmul %3, %8, %cst_11 {dimension_numbers = #tpu.dot_dimension_numbers<[1], [0], [0], [1], [0, 0, 1, 1], [], []>} : vector<8x256xbf16>, vector<256x256xbf16>, vector<8x256xf32> -> vector<8x256xf32>
    %10 = arith.addf %7, %9 : vector<8x256xf32>
    %c0_12 = arith.constant 0 : index
    %c0_13 = arith.constant 0 : index
    %11 = vector.load %arg5[%c0_12, %c0_13] : memref<256x256xbf16, #tpu.memory_space<vmem>>, vector<256x256xbf16>
    %cst_14 = arith.constant dense<0.000000e+00> : vector<8x256xf32>
    %12 = tpu.matmul %5, %11, %cst_14 {dimension_numbers = #tpu.dot_dimension_numbers<[1], [0], [0], [1], [0, 0, 1, 1], [], []>} : vector<8x256xbf16>, vector<256x256xbf16>, vector<8x256xf32> -> vector<8x256xf32>
    %13 = arith.addf %10, %12 : vector<8x256xf32>
    %c0_15 = arith.constant 0 : index
    %c0_16 = arith.constant 0 : index
    %14 = vector.load %arg6[%c0_15, %c0_16] : memref<1x256xf32, #tpu.memory_space<vmem>>, vector<1x256xf32>
    %15 = vector.broadcast %14 : vector<1x256xf32> to vector<8x256xf32>
    %16 = arith.addf %13, %15 : vector<8x256xf32>
    %cst_17 = arith.constant 0.000000e+00 : f32
    %17 = vector.broadcast %cst_17 : f32 to vector<8x256xf32>
    %18 = arith.cmpf ogt, %16, %17 : vector<8x256xf32>
    %cst_18 = arith.constant 2.000000e-01 : f32
    %19 = vector.broadcast %cst_18 : f32 to vector<8x256xf32>
    %20 = arith.mulf %19, %16 : vector<8x256xf32>
    %21 = arith.select %18, %16, %20 : vector<8x256xi1>, vector<8x256xf32>
    %22 = arith.truncf %21 : vector<8x256xf32> to vector<8x256xbf16>
    %c0_19 = arith.constant 0 : index
    %c0_20 = arith.constant 0 : index
    %c0_21 = arith.constant 0 : index
    %23 = vector.load %arg7[%c0_19, %c0_20, %c0_21] : memref<1x8x256xbf16, #tpu.memory_space<vmem>>, vector<1x8x256xbf16>
    %24 = vector.shape_cast %23 : vector<1x8x256xbf16> to vector<8x256xbf16>
    %25 = vector.shape_cast %22 : vector<8x256xbf16> to vector<1x8x256xbf16>
    tpu.vector_store %arg7[%c0_19, %c0_20, %c0_21], %25 {strides = array<i32>} : memref<1x8x256xbf16, #tpu.memory_space<vmem>>, vector<1x8x256xbf16>,
    return
  }
  func.func @transform_0(%arg0: i32) -> (i32, i32, i32) {
    %c0_i32 = arith.constant 0 : i32
    %c0_i32_0 = arith.constant 0 : i32
    %c0_i32_1 = arith.constant 0 : i32
    return %arg0, %c0_i32, %c0_i32_0 : i32, i32, i32
  }
  func.func @transform_1(%arg0: i32) -> (i32, i32, i32) {
    %c0_i32 = arith.constant 0 : i32
    %c0_i32_0 = arith.constant 0 : i32
    %c0_i32_1 = arith.constant 0 : i32
    return %arg0, %c0_i32, %c0_i32_0 : i32, i32, i32
  }
  func.func @transform_2(%arg0: i32) -> (i32, i32) {
    %c0_i32 = arith.constant 0 : i32
    %c0_i32_0 = arith.constant 0 : i32
    %c0_i32_1 = arith.constant 0 : i32
    return %c0_i32, %c0_i32_0 : i32, i32
  }
  func.func @transform_3(%arg0: i32) -> (i32, i32) {
    %c0_i32 = arith.constant 0 : i32
    %c0_i32_0 = arith.constant 0 : i32
    %c0_i32_1 = arith.constant 0 : i32
    return %c0_i32, %c0_i32_0 : i32, i32
  }
  func.func @transform_4(%arg0: i32) -> (i32, i32) {
    %c0_i32 = arith.constant 0 : i32
    %c0_i32_0 = arith.constant 0 : i32
    %c0_i32_1 = arith.constant 0 : i32
    return %c0_i32, %c0_i32_0 : i32, i32
  }
  func.func @transform_5(%arg0: i32) -> (i32, i32) {
    %c0_i32 = arith.constant 0 : i32
    %c0_i32_0 = arith.constant 0 : i32
    %c0_i32_1 = arith.constant 0 : i32
    return %c0_i32, %c0_i32_0 : i32, i32
  }
  func.func @transform_6(%arg0: i32) -> (i32, i32, i32) {
    %c0_i32 = arith.constant 0 : i32
    %c0_i32_0 = arith.constant 0 : i32
    %c0_i32_1 = arith.constant 0 : i32
    return %arg0, %c0_i32, %c0_i32_0 : i32, i32, i32
  }
}

module attributes {stable_mosaic.version = 11 : i64} {
  func.func @_enc_conv_kernel(%arg0: i32, %arg1: memref<1x17x256xbf16, #tpu.memory_space<vmem>>, %arg2: memref<1x17x256xbf16, #tpu.memory_space<vmem>>, %arg3: memref<256x256xbf16, #tpu.memory_space<vmem>>, %arg4: memref<256x256xbf16, #tpu.memory_space<vmem>>, %arg5: memref<256x256xbf16, #tpu.memory_space<vmem>>, %arg6: memref<1x256xf32, #tpu.memory_space<vmem>>, %arg7: memref<1x16x256xbf16, #tpu.memory_space<vmem>>) attributes {dimension_semantics = [#tpu.dimension_semantics<parallel>], iteration_bounds = array<i64: 2>, scalar_prefetch = 0 : i64, scratch_operands = 0 : i64, tpu.core_type = #tpu.core_type<tc>, window_params = [{transform_indices = @transform_0, window_bounds = array<i64: 1, 17, 256>}, {transform_indices = @transform_1, window_bounds = array<i64: 1, 17, 256>}, {pipeline_mode = #tpu.pipeline_mode<synchronous>, transform_indices = @transform_2, window_bounds = array<i64: 256, 256>}, {pipeline_mode = #tpu.pipeline_mode<synchronous>, transform_indices = @transform_3, window_bounds = array<i64: 256, 256>}, {pipeline_mode = #tpu.pipeline_mode<synchronous>, transform_indices = @transform_4, window_bounds = array<i64: 256, 256>}, {pipeline_mode = #tpu.pipeline_mode<synchronous>, transform_indices = @transform_5, window_bounds = array<i64: 1, 256>}, {transform_indices = @transform_6, window_bounds = array<i64: 1, 16, 256>}]} {
    %c0 = arith.constant 0 : index
    %c0_0 = arith.constant 0 : index
    %c0_1 = arith.constant 0 : index
    %0 = vector.load %arg1[%c0, %c0_0, %c0_1] : memref<1x17x256xbf16, #tpu.memory_space<vmem>>, vector<1x16x256xbf16>
    %1 = vector.shape_cast %0 : vector<1x16x256xbf16> to vector<16x256xbf16>
    %c0_2 = arith.constant 0 : index
    %c0_3 = arith.constant 0 : index
    %c0_4 = arith.constant 0 : index
    %2 = vector.load %arg2[%c0_2, %c0_3, %c0_4] : memref<1x17x256xbf16, #tpu.memory_space<vmem>>, vector<1x16x256xbf16>
    %3 = vector.shape_cast %2 : vector<1x16x256xbf16> to vector<16x256xbf16>
    %c0_5 = arith.constant 0 : index
    %c1 = arith.constant 1 : index
    %c0_6 = arith.constant 0 : index
    %4 = vector.load %arg1[%c0_5, %c1, %c0_6] : memref<1x17x256xbf16, #tpu.memory_space<vmem>>, vector<1x16x256xbf16>
    %5 = vector.shape_cast %4 : vector<1x16x256xbf16> to vector<16x256xbf16>
    %c0_7 = arith.constant 0 : index
    %c0_8 = arith.constant 0 : index
    %6 = vector.load %arg3[%c0_7, %c0_8] : memref<256x256xbf16, #tpu.memory_space<vmem>>, vector<256x256xbf16>
    %cst = arith.constant dense<0.000000e+00> : vector<16x256xf32>
    %7 = tpu.matmul %1, %6, %cst {dimension_numbers = #tpu.dot_dimension_numbers<[1], [0], [0], [1], [0, 0, 1, 1], [], []>} : vector<16x256xbf16>, vector<256x256xbf16>, vector<16x256xf32> -> vector<16x256xf32>
    %c0_9 = arith.constant 0 : index
    %c0_10 = arith.constant 0 : index
    %8 = vector.load %arg4[%c0_9, %c0_10] : memref<256x256xbf16, #tpu.memory_space<vmem>>, vector<256x256xbf16>
    %cst_11 = arith.constant dense<0.000000e+00> : vector<16x256xf32>
    %9 = tpu.matmul %3, %8, %cst_11 {dimension_numbers = #tpu.dot_dimension_numbers<[1], [0], [0], [1], [0, 0, 1, 1], [], []>} : vector<16x256xbf16>, vector<256x256xbf16>, vector<16x256xf32> -> vector<16x256xf32>
    %10 = arith.addf %7, %9 : vector<16x256xf32>
    %c0_12 = arith.constant 0 : index
    %c0_13 = arith.constant 0 : index
    %11 = vector.load %arg5[%c0_12, %c0_13] : memref<256x256xbf16, #tpu.memory_space<vmem>>, vector<256x256xbf16>
    %cst_14 = arith.constant dense<0.000000e+00> : vector<16x256xf32>
    %12 = tpu.matmul %5, %11, %cst_14 {dimension_numbers = #tpu.dot_dimension_numbers<[1], [0], [0], [1], [0, 0, 1, 1], [], []>} : vector<16x256xbf16>, vector<256x256xbf16>, vector<16x256xf32> -> vector<16x256xf32>
    %13 = arith.addf %10, %12 : vector<16x256xf32>
    %c0_15 = arith.constant 0 : index
    %c0_16 = arith.constant 0 : index
    %14 = vector.load %arg6[%c0_15, %c0_16] : memref<1x256xf32, #tpu.memory_space<vmem>>, vector<1x256xf32>
    %15 = vector.broadcast %14 : vector<1x256xf32> to vector<16x256xf32>
    %16 = arith.addf %13, %15 : vector<16x256xf32>
    %cst_17 = arith.constant 0.000000e+00 : f32
    %17 = vector.broadcast %cst_17 : f32 to vector<16x256xf32>
    %18 = arith.cmpf ogt, %16, %17 : vector<16x256xf32>
    %cst_18 = arith.constant 2.000000e-01 : f32
    %19 = vector.broadcast %cst_18 : f32 to vector<16x256xf32>
    %20 = arith.mulf %19, %16 : vector<16x256xf32>
    %21 = arith.select %18, %16, %20 : vector<16x256xi1>, vector<16x256xf32>
    %22 = arith.truncf %21 : vector<16x256xf32> to vector<16x256xbf16>
    %c0_19 = arith.constant 0 : index
    %c0_20 = arith.constant 0 : index
    %c0_21 = arith.constant 0 : index
    %23 = vector.load %arg7[%c0_19, %c0_20, %c0_21] : memref<1x16x256xbf16, #tpu.memory_space<vmem>>, vector<1x16x256xbf16>
    %24 = vector.shape_cast %23 : vector<1x16x256xbf16> to vector<16x256xbf16>
    %25 = vector.shape_cast %22 : vector<16x256xbf16> to vector<1x16x256xbf16>
    tpu.vector_store %arg7[%c0_19, %c0_20, %c0_21], %25 {strides = array<i32>} : memref<1x16x256xbf16, #tpu.memory_space<vmem>>, vector<1x16x256xbf16>,
    return
  }
  func.func @transform_0(%arg0: i32) -> (i32, i32, i32) {
    %c0_i32 = arith.constant 0 : i32
    %c0_i32_0 = arith.constant 0 : i32
    %c0_i32_1 = arith.constant 0 : i32
    return %arg0, %c0_i32, %c0_i32_0 : i32, i32, i32
  }
  func.func @transform_1(%arg0: i32) -> (i32, i32, i32) {
    %c0_i32 = arith.constant 0 : i32
    %c0_i32_0 = arith.constant 0 : i32
    %c0_i32_1 = arith.constant 0 : i32
    return %arg0, %c0_i32, %c0_i32_0 : i32, i32, i32
  }
  func.func @transform_2(%arg0: i32) -> (i32, i32) {
    %c0_i32 = arith.constant 0 : i32
    %c0_i32_0 = arith.constant 0 : i32
    %c0_i32_1 = arith.constant 0 : i32
    return %c0_i32, %c0_i32_0 : i32, i32
  }
  func.func @transform_3(%arg0: i32) -> (i32, i32) {
    %c0_i32 = arith.constant 0 : i32
    %c0_i32_0 = arith.constant 0 : i32
    %c0_i32_1 = arith.constant 0 : i32
    return %c0_i32, %c0_i32_0 : i32, i32
  }
  func.func @transform_4(%arg0: i32) -> (i32, i32) {
    %c0_i32 = arith.constant 0 : i32
    %c0_i32_0 = arith.constant 0 : i32
    %c0_i32_1 = arith.constant 0 : i32
    return %c0_i32, %c0_i32_0 : i32, i32
  }
  func.func @transform_5(%arg0: i32) -> (i32, i32) {
    %c0_i32 = arith.constant 0 : i32
    %c0_i32_0 = arith.constant 0 : i32
    %c0_i32_1 = arith.constant 0 : i32
    return %c0_i32, %c0_i32_0 : i32, i32
  }
  func.func @transform_6(%arg0: i32) -> (i32, i32, i32) {
    %c0_i32 = arith.constant 0 : i32
    %c0_i32_0 = arith.constant 0 : i32
    %c0_i32_1 = arith.constant 0 : i32
    return %arg0, %c0_i32, %c0_i32_0 : i32, i32, i32
  }
}

module attributes {stable_mosaic.version = 11 : i64} {
  func.func @_enc_conv_kernel(%arg0: i32, %arg1: memref<1x33x256xbf16, #tpu.memory_space<vmem>>, %arg2: memref<1x33x256xbf16, #tpu.memory_space<vmem>>, %arg3: memref<256x256xbf16, #tpu.memory_space<vmem>>, %arg4: memref<256x256xbf16, #tpu.memory_space<vmem>>, %arg5: memref<256x256xbf16, #tpu.memory_space<vmem>>, %arg6: memref<1x256xf32, #tpu.memory_space<vmem>>, %arg7: memref<1x32x256xbf16, #tpu.memory_space<vmem>>) attributes {dimension_semantics = [#tpu.dimension_semantics<parallel>], iteration_bounds = array<i64: 2>, scalar_prefetch = 0 : i64, scratch_operands = 0 : i64, tpu.core_type = #tpu.core_type<tc>, window_params = [{transform_indices = @transform_0, window_bounds = array<i64: 1, 33, 256>}, {transform_indices = @transform_1, window_bounds = array<i64: 1, 33, 256>}, {pipeline_mode = #tpu.pipeline_mode<synchronous>, transform_indices = @transform_2, window_bounds = array<i64: 256, 256>}, {pipeline_mode = #tpu.pipeline_mode<synchronous>, transform_indices = @transform_3, window_bounds = array<i64: 256, 256>}, {pipeline_mode = #tpu.pipeline_mode<synchronous>, transform_indices = @transform_4, window_bounds = array<i64: 256, 256>}, {pipeline_mode = #tpu.pipeline_mode<synchronous>, transform_indices = @transform_5, window_bounds = array<i64: 1, 256>}, {transform_indices = @transform_6, window_bounds = array<i64: 1, 32, 256>}]} {
    %c0 = arith.constant 0 : index
    %c0_0 = arith.constant 0 : index
    %c0_1 = arith.constant 0 : index
    %0 = vector.load %arg1[%c0, %c0_0, %c0_1] : memref<1x33x256xbf16, #tpu.memory_space<vmem>>, vector<1x32x256xbf16>
    %1 = vector.shape_cast %0 : vector<1x32x256xbf16> to vector<32x256xbf16>
    %c0_2 = arith.constant 0 : index
    %c0_3 = arith.constant 0 : index
    %c0_4 = arith.constant 0 : index
    %2 = vector.load %arg2[%c0_2, %c0_3, %c0_4] : memref<1x33x256xbf16, #tpu.memory_space<vmem>>, vector<1x32x256xbf16>
    %3 = vector.shape_cast %2 : vector<1x32x256xbf16> to vector<32x256xbf16>
    %c0_5 = arith.constant 0 : index
    %c1 = arith.constant 1 : index
    %c0_6 = arith.constant 0 : index
    %4 = vector.load %arg1[%c0_5, %c1, %c0_6] : memref<1x33x256xbf16, #tpu.memory_space<vmem>>, vector<1x32x256xbf16>
    %5 = vector.shape_cast %4 : vector<1x32x256xbf16> to vector<32x256xbf16>
    %c0_7 = arith.constant 0 : index
    %c0_8 = arith.constant 0 : index
    %6 = vector.load %arg3[%c0_7, %c0_8] : memref<256x256xbf16, #tpu.memory_space<vmem>>, vector<256x256xbf16>
    %cst = arith.constant dense<0.000000e+00> : vector<32x256xf32>
    %7 = tpu.matmul %1, %6, %cst {dimension_numbers = #tpu.dot_dimension_numbers<[1], [0], [0], [1], [0, 0, 1, 1], [], []>} : vector<32x256xbf16>, vector<256x256xbf16>, vector<32x256xf32> -> vector<32x256xf32>
    %c0_9 = arith.constant 0 : index
    %c0_10 = arith.constant 0 : index
    %8 = vector.load %arg4[%c0_9, %c0_10] : memref<256x256xbf16, #tpu.memory_space<vmem>>, vector<256x256xbf16>
    %cst_11 = arith.constant dense<0.000000e+00> : vector<32x256xf32>
    %9 = tpu.matmul %3, %8, %cst_11 {dimension_numbers = #tpu.dot_dimension_numbers<[1], [0], [0], [1], [0, 0, 1, 1], [], []>} : vector<32x256xbf16>, vector<256x256xbf16>, vector<32x256xf32> -> vector<32x256xf32>
    %10 = arith.addf %7, %9 : vector<32x256xf32>
    %c0_12 = arith.constant 0 : index
    %c0_13 = arith.constant 0 : index
    %11 = vector.load %arg5[%c0_12, %c0_13] : memref<256x256xbf16, #tpu.memory_space<vmem>>, vector<256x256xbf16>
    %cst_14 = arith.constant dense<0.000000e+00> : vector<32x256xf32>
    %12 = tpu.matmul %5, %11, %cst_14 {dimension_numbers = #tpu.dot_dimension_numbers<[1], [0], [0], [1], [0, 0, 1, 1], [], []>} : vector<32x256xbf16>, vector<256x256xbf16>, vector<32x256xf32> -> vector<32x256xf32>
    %13 = arith.addf %10, %12 : vector<32x256xf32>
    %c0_15 = arith.constant 0 : index
    %c0_16 = arith.constant 0 : index
    %14 = vector.load %arg6[%c0_15, %c0_16] : memref<1x256xf32, #tpu.memory_space<vmem>>, vector<1x256xf32>
    %15 = vector.broadcast %14 : vector<1x256xf32> to vector<32x256xf32>
    %16 = arith.addf %13, %15 : vector<32x256xf32>
    %cst_17 = arith.constant 0.000000e+00 : f32
    %17 = vector.broadcast %cst_17 : f32 to vector<32x256xf32>
    %18 = arith.cmpf ogt, %16, %17 : vector<32x256xf32>
    %cst_18 = arith.constant 2.000000e-01 : f32
    %19 = vector.broadcast %cst_18 : f32 to vector<32x256xf32>
    %20 = arith.mulf %19, %16 : vector<32x256xf32>
    %21 = arith.select %18, %16, %20 : vector<32x256xi1>, vector<32x256xf32>
    %22 = arith.truncf %21 : vector<32x256xf32> to vector<32x256xbf16>
    %c0_19 = arith.constant 0 : index
    %c0_20 = arith.constant 0 : index
    %c0_21 = arith.constant 0 : index
    %23 = vector.load %arg7[%c0_19, %c0_20, %c0_21] : memref<1x32x256xbf16, #tpu.memory_space<vmem>>, vector<1x32x256xbf16>
    %24 = vector.shape_cast %23 : vector<1x32x256xbf16> to vector<32x256xbf16>
    %25 = vector.shape_cast %22 : vector<32x256xbf16> to vector<1x32x256xbf16>
    tpu.vector_store %arg7[%c0_19, %c0_20, %c0_21], %25 {strides = array<i32>} : memref<1x32x256xbf16, #tpu.memory_space<vmem>>, vector<1x32x256xbf16>,
    return
  }
  func.func @transform_0(%arg0: i32) -> (i32, i32, i32) {
    %c0_i32 = arith.constant 0 : i32
    %c0_i32_0 = arith.constant 0 : i32
    %c0_i32_1 = arith.constant 0 : i32
    return %arg0, %c0_i32, %c0_i32_0 : i32, i32, i32
  }
  func.func @transform_1(%arg0: i32) -> (i32, i32, i32) {
    %c0_i32 = arith.constant 0 : i32
    %c0_i32_0 = arith.constant 0 : i32
    %c0_i32_1 = arith.constant 0 : i32
    return %arg0, %c0_i32, %c0_i32_0 : i32, i32, i32
  }
  func.func @transform_2(%arg0: i32) -> (i32, i32) {
    %c0_i32 = arith.constant 0 : i32
    %c0_i32_0 = arith.constant 0 : i32
    %c0_i32_1 = arith.constant 0 : i32
    return %c0_i32, %c0_i32_0 : i32, i32
  }
  func.func @transform_3(%arg0: i32) -> (i32, i32) {
    %c0_i32 = arith.constant 0 : i32
    %c0_i32_0 = arith.constant 0 : i32
    %c0_i32_1 = arith.constant 0 : i32
    return %c0_i32, %c0_i32_0 : i32, i32
  }
  func.func @transform_4(%arg0: i32) -> (i32, i32) {
    %c0_i32 = arith.constant 0 : i32
    %c0_i32_0 = arith.constant 0 : i32
    %c0_i32_1 = arith.constant 0 : i32
    return %c0_i32, %c0_i32_0 : i32, i32
  }
  func.func @transform_5(%arg0: i32) -> (i32, i32) {
    %c0_i32 = arith.constant 0 : i32
    %c0_i32_0 = arith.constant 0 : i32
    %c0_i32_1 = arith.constant 0 : i32
    return %c0_i32, %c0_i32_0 : i32, i32
  }
  func.func @transform_6(%arg0: i32) -> (i32, i32, i32) {
    %c0_i32 = arith.constant 0 : i32
    %c0_i32_0 = arith.constant 0 : i32
    %c0_i32_1 = arith.constant 0 : i32
    return %arg0, %c0_i32, %c0_i32_0 : i32, i32, i32
  }
}

module attributes {stable_mosaic.version = 11 : i64} {
  func.func @_enc_conv_kernel(%arg0: i32, %arg1: memref<1x9x256xbf16, #tpu.memory_space<vmem>>, %arg2: memref<1x9x256xbf16, #tpu.memory_space<vmem>>, %arg3: memref<256x256xbf16, #tpu.memory_space<vmem>>, %arg4: memref<256x256xbf16, #tpu.memory_space<vmem>>, %arg5: memref<256x256xbf16, #tpu.memory_space<vmem>>, %arg6: memref<1x256xf32, #tpu.memory_space<vmem>>, %arg7: memref<1x8x256xbf16, #tpu.memory_space<vmem>>) attributes {dimension_semantics = [#tpu.dimension_semantics<parallel>], iteration_bounds = array<i64: 2>, scalar_prefetch = 0 : i64, scratch_operands = 0 : i64, tpu.core_type = #tpu.core_type<tc>, window_params = [{transform_indices = @transform_0, window_bounds = array<i64: 1, 9, 256>}, {transform_indices = @transform_1, window_bounds = array<i64: 1, 9, 256>}, {pipeline_mode = #tpu.pipeline_mode<synchronous>, transform_indices = @transform_2, window_bounds = array<i64: 256, 256>}, {pipeline_mode = #tpu.pipeline_mode<synchronous>, transform_indices = @transform_3, window_bounds = array<i64: 256, 256>}, {pipeline_mode = #tpu.pipeline_mode<synchronous>, transform_indices = @transform_4, window_bounds = array<i64: 256, 256>}, {pipeline_mode = #tpu.pipeline_mode<synchronous>, transform_indices = @transform_5, window_bounds = array<i64: 1, 256>}, {transform_indices = @transform_6, window_bounds = array<i64: 1, 8, 256>}]} {
    %c0 = arith.constant 0 : index
    %c0_0 = arith.constant 0 : index
    %c0_1 = arith.constant 0 : index
    %0 = vector.load %arg1[%c0, %c0_0, %c0_1] : memref<1x9x256xbf16, #tpu.memory_space<vmem>>, vector<1x8x256xbf16>
    %1 = vector.shape_cast %0 : vector<1x8x256xbf16> to vector<8x256xbf16>
    %c0_2 = arith.constant 0 : index
    %c0_3 = arith.constant 0 : index
    %c0_4 = arith.constant 0 : index
    %2 = vector.load %arg2[%c0_2, %c0_3, %c0_4] : memref<1x9x256xbf16, #tpu.memory_space<vmem>>, vector<1x8x256xbf16>
    %3 = vector.shape_cast %2 : vector<1x8x256xbf16> to vector<8x256xbf16>
    %c0_5 = arith.constant 0 : index
    %c1 = arith.constant 1 : index
    %c0_6 = arith.constant 0 : index
    %4 = vector.load %arg1[%c0_5, %c1, %c0_6] : memref<1x9x256xbf16, #tpu.memory_space<vmem>>, vector<1x8x256xbf16>
    %5 = vector.shape_cast %4 : vector<1x8x256xbf16> to vector<8x256xbf16>
    %c0_7 = arith.constant 0 : index
    %c0_8 = arith.constant 0 : index
    %6 = vector.load %arg3[%c0_7, %c0_8] : memref<256x256xbf16, #tpu.memory_space<vmem>>, vector<256x256xbf16>
    %cst = arith.constant dense<0.000000e+00> : vector<8x256xf32>
    %7 = tpu.matmul %1, %6, %cst {dimension_numbers = #tpu.dot_dimension_numbers<[1], [0], [0], [1], [0, 0, 1, 1], [], []>} : vector<8x256xbf16>, vector<256x256xbf16>, vector<8x256xf32> -> vector<8x256xf32>
    %c0_9 = arith.constant 0 : index
    %c0_10 = arith.constant 0 : index
    %8 = vector.load %arg4[%c0_9, %c0_10] : memref<256x256xbf16, #tpu.memory_space<vmem>>, vector<256x256xbf16>
    %cst_11 = arith.constant dense<0.000000e+00> : vector<8x256xf32>
    %9 = tpu.matmul %3, %8, %cst_11 {dimension_numbers = #tpu.dot_dimension_numbers<[1], [0], [0], [1], [0, 0, 1, 1], [], []>} : vector<8x256xbf16>, vector<256x256xbf16>, vector<8x256xf32> -> vector<8x256xf32>
    %10 = arith.addf %7, %9 : vector<8x256xf32>
    %c0_12 = arith.constant 0 : index
    %c0_13 = arith.constant 0 : index
    %11 = vector.load %arg5[%c0_12, %c0_13] : memref<256x256xbf16, #tpu.memory_space<vmem>>, vector<256x256xbf16>
    %cst_14 = arith.constant dense<0.000000e+00> : vector<8x256xf32>
    %12 = tpu.matmul %5, %11, %cst_14 {dimension_numbers = #tpu.dot_dimension_numbers<[1], [0], [0], [1], [0, 0, 1, 1], [], []>} : vector<8x256xbf16>, vector<256x256xbf16>, vector<8x256xf32> -> vector<8x256xf32>
    %13 = arith.addf %10, %12 : vector<8x256xf32>
    %c0_15 = arith.constant 0 : index
    %c0_16 = arith.constant 0 : index
    %14 = vector.load %arg6[%c0_15, %c0_16] : memref<1x256xf32, #tpu.memory_space<vmem>>, vector<1x256xf32>
    %15 = vector.broadcast %14 : vector<1x256xf32> to vector<8x256xf32>
    %16 = arith.addf %13, %15 : vector<8x256xf32>
    %cst_17 = arith.constant 0.000000e+00 : f32
    %17 = vector.broadcast %cst_17 : f32 to vector<8x256xf32>
    %18 = arith.cmpf ogt, %16, %17 : vector<8x256xf32>
    %cst_18 = arith.constant 2.000000e-01 : f32
    %19 = vector.broadcast %cst_18 : f32 to vector<8x256xf32>
    %20 = arith.mulf %19, %16 : vector<8x256xf32>
    %21 = arith.select %18, %16, %20 : vector<8x256xi1>, vector<8x256xf32>
    %22 = arith.truncf %21 : vector<8x256xf32> to vector<8x256xbf16>
    %c0_19 = arith.constant 0 : index
    %c0_20 = arith.constant 0 : index
    %c0_21 = arith.constant 0 : index
    %23 = vector.load %arg7[%c0_19, %c0_20, %c0_21] : memref<1x8x256xbf16, #tpu.memory_space<vmem>>, vector<1x8x256xbf16>
    %24 = vector.shape_cast %23 : vector<1x8x256xbf16> to vector<8x256xbf16>
    %25 = vector.shape_cast %22 : vector<8x256xbf16> to vector<1x8x256xbf16>
    tpu.vector_store %arg7[%c0_19, %c0_20, %c0_21], %25 {strides = array<i32>} : memref<1x8x256xbf16, #tpu.memory_space<vmem>>, vector<1x8x256xbf16>,
    return
  }
  func.func @transform_0(%arg0: i32) -> (i32, i32, i32) {
    %c0_i32 = arith.constant 0 : i32
    %c0_i32_0 = arith.constant 0 : i32
    %c0_i32_1 = arith.constant 0 : i32
    return %arg0, %c0_i32, %c0_i32_0 : i32, i32, i32
  }
  func.func @transform_1(%arg0: i32) -> (i32, i32, i32) {
    %c0_i32 = arith.constant 0 : i32
    %c0_i32_0 = arith.constant 0 : i32
    %c0_i32_1 = arith.constant 0 : i32
    return %arg0, %c0_i32, %c0_i32_0 : i32, i32, i32
  }
  func.func @transform_2(%arg0: i32) -> (i32, i32) {
    %c0_i32 = arith.constant 0 : i32
    %c0_i32_0 = arith.constant 0 : i32
    %c0_i32_1 = arith.constant 0 : i32
    return %c0_i32, %c0_i32_0 : i32, i32
  }
  func.func @transform_3(%arg0: i32) -> (i32, i32) {
    %c0_i32 = arith.constant 0 : i32
    %c0_i32_0 = arith.constant 0 : i32
    %c0_i32_1 = arith.constant 0 : i32
    return %c0_i32, %c0_i32_0 : i32, i32
  }
  func.func @transform_4(%arg0: i32) -> (i32, i32) {
    %c0_i32 = arith.constant 0 : i32
    %c0_i32_0 = arith.constant 0 : i32
    %c0_i32_1 = arith.constant 0 : i32
    return %c0_i32, %c0_i32_0 : i32, i32
  }
  func.func @transform_5(%arg0: i32) -> (i32, i32) {
    %c0_i32 = arith.constant 0 : i32
    %c0_i32_0 = arith.constant 0 : i32
    %c0_i32_1 = arith.constant 0 : i32
    return %c0_i32, %c0_i32_0 : i32, i32
  }
  func.func @transform_6(%arg0: i32) -> (i32, i32, i32) {
    %c0_i32 = arith.constant 0 : i32
    %c0_i32_0 = arith.constant 0 : i32
    %c0_i32_1 = arith.constant 0 : i32
    return %arg0, %c0_i32, %c0_i32_0 : i32, i32, i32
  }
}

module attributes {stable_mosaic.version = 11 : i64} {
  func.func @_dec_conv_kernel(%arg0: i32, %arg1: memref<1x10x512xbf16, #tpu.memory_space<vmem>>, %arg2: memref<512x256xbf16, #tpu.memory_space<vmem>>, %arg3: memref<512x256xbf16, #tpu.memory_space<vmem>>, %arg4: memref<512x256xbf16, #tpu.memory_space<vmem>>, %arg5: memref<512x256xbf16, #tpu.memory_space<vmem>>, %arg6: memref<1x256xf32, #tpu.memory_space<vmem>>, %arg7: memref<1x8x512xbf16, #tpu.memory_space<vmem>>) attributes {dimension_semantics = [#tpu.dimension_semantics<parallel>], iteration_bounds = array<i64: 2>, scalar_prefetch = 0 : i64, scratch_operands = 0 : i64, tpu.core_type = #tpu.core_type<tc>, window_params = [{transform_indices = @transform_0, window_bounds = array<i64: 1, 10, 512>}, {pipeline_mode = #tpu.pipeline_mode<synchronous>, transform_indices = @transform_1, window_bounds = array<i64: 512, 256>}, {pipeline_mode = #tpu.pipeline_mode<synchronous>, transform_indices = @transform_2, window_bounds = array<i64: 512, 256>}, {pipeline_mode = #tpu.pipeline_mode<synchronous>, transform_indices = @transform_3, window_bounds = array<i64: 512, 256>}, {pipeline_mode = #tpu.pipeline_mode<synchronous>, transform_indices = @transform_4, window_bounds = array<i64: 512, 256>}, {pipeline_mode = #tpu.pipeline_mode<synchronous>, transform_indices = @transform_5, window_bounds = array<i64: 1, 256>}, {transform_indices = @transform_6, window_bounds = array<i64: 1, 8, 512>}]} {
    %c0 = arith.constant 0 : index
    %c0_0 = arith.constant 0 : index
    %c0_1 = arith.constant 0 : index
    %0 = vector.load %arg1[%c0, %c0_0, %c0_1] : memref<1x10x512xbf16, #tpu.memory_space<vmem>>, vector<1x8x512xbf16>
    %1 = vector.shape_cast %0 : vector<1x8x512xbf16> to vector<8x512xbf16>
    %c0_2 = arith.constant 0 : index
    %c1 = arith.constant 1 : index
    %c0_3 = arith.constant 0 : index
    %2 = vector.load %arg1[%c0_2, %c1, %c0_3] : memref<1x10x512xbf16, #tpu.memory_space<vmem>>, vector<1x8x512xbf16>
    %3 = vector.shape_cast %2 : vector<1x8x512xbf16> to vector<8x512xbf16>
    %c0_4 = arith.constant 0 : index
    %c2 = arith.constant 2 : index
    %c0_5 = arith.constant 0 : index
    %4 = vector.load %arg1[%c0_4, %c2, %c0_5] : memref<1x10x512xbf16, #tpu.memory_space<vmem>>, vector<1x8x512xbf16>
    %5 = vector.shape_cast %4 : vector<1x8x512xbf16> to vector<8x512xbf16>
    %c0_6 = arith.constant 0 : index
    %c0_7 = arith.constant 0 : index
    %6 = vector.load %arg6[%c0_6, %c0_7] : memref<1x256xf32, #tpu.memory_space<vmem>>, vector<1x256xf32>
    %c0_8 = arith.constant 0 : index
    %c0_9 = arith.constant 0 : index
    %7 = vector.load %arg2[%c0_8, %c0_9] : memref<512x256xbf16, #tpu.memory_space<vmem>>, vector<512x256xbf16>
    %cst = arith.constant dense<0.000000e+00> : vector<8x256xf32>
    %8 = tpu.matmul %1, %7, %cst {dimension_numbers = #tpu.dot_dimension_numbers<[1], [0], [0], [1], [0, 0, 1, 1], [], []>} : vector<8x512xbf16>, vector<512x256xbf16>, vector<8x256xf32> -> vector<8x256xf32>
    %c0_10 = arith.constant 0 : index
    %c0_11 = arith.constant 0 : index
    %9 = vector.load %arg3[%c0_10, %c0_11] : memref<512x256xbf16, #tpu.memory_space<vmem>>, vector<512x256xbf16>
    %cst_12 = arith.constant dense<0.000000e+00> : vector<8x256xf32>
    %10 = tpu.matmul %3, %9, %cst_12 {dimension_numbers = #tpu.dot_dimension_numbers<[1], [0], [0], [1], [0, 0, 1, 1], [], []>} : vector<8x512xbf16>, vector<512x256xbf16>, vector<8x256xf32> -> vector<8x256xf32>
    %11 = arith.addf %8, %10 : vector<8x256xf32>
    %12 = vector.broadcast %6 : vector<1x256xf32> to vector<8x256xf32>
    %13 = arith.addf %11, %12 : vector<8x256xf32>
    %c0_13 = arith.constant 0 : index
    %c0_14 = arith.constant 0 : index
    %14 = vector.load %arg4[%c0_13, %c0_14] : memref<512x256xbf16, #tpu.memory_space<vmem>>, vector<512x256xbf16>
    %cst_15 = arith.constant dense<0.000000e+00> : vector<8x256xf32>
    %15 = tpu.matmul %3, %14, %cst_15 {dimension_numbers = #tpu.dot_dimension_numbers<[1], [0], [0], [1], [0, 0, 1, 1], [], []>} : vector<8x512xbf16>, vector<512x256xbf16>, vector<8x256xf32> -> vector<8x256xf32>
    %c0_16 = arith.constant 0 : index
    %c0_17 = arith.constant 0 : index
    %16 = vector.load %arg5[%c0_16, %c0_17] : memref<512x256xbf16, #tpu.memory_space<vmem>>, vector<512x256xbf16>
    %cst_18 = arith.constant dense<0.000000e+00> : vector<8x256xf32>
    %17 = tpu.matmul %5, %16, %cst_18 {dimension_numbers = #tpu.dot_dimension_numbers<[1], [0], [0], [1], [0, 0, 1, 1], [], []>} : vector<8x512xbf16>, vector<512x256xbf16>, vector<8x256xf32> -> vector<8x256xf32>
    %18 = arith.addf %15, %17 : vector<8x256xf32>
    %19 = vector.broadcast %6 : vector<1x256xf32> to vector<8x256xf32>
    %20 = arith.addf %18, %19 : vector<8x256xf32>
    %cst_19 = arith.constant 0.000000e+00 : f32
    %21 = vector.broadcast %cst_19 : f32 to vector<8x256xf32>
    %22 = arith.cmpf ogt, %13, %21 : vector<8x256xf32>
    %cst_20 = arith.constant 2.000000e-01 : f32
    %23 = vector.broadcast %cst_20 : f32 to vector<8x256xf32>
    %24 = arith.mulf %23, %13 : vector<8x256xf32>
    %25 = arith.select %22, %13, %24 : vector<8x256xi1>, vector<8x256xf32>
    %cst_21 = arith.constant 0.000000e+00 : f32
    %26 = vector.broadcast %cst_21 : f32 to vector<8x256xf32>
    %27 = arith.cmpf ogt, %20, %26 : vector<8x256xf32>
    %cst_22 = arith.constant 2.000000e-01 : f32
    %28 = vector.broadcast %cst_22 : f32 to vector<8x256xf32>
    %29 = arith.mulf %28, %20 : vector<8x256xf32>
    %30 = arith.select %27, %20, %29 : vector<8x256xi1>, vector<8x256xf32>
    %31 = tpu.concatenate %25, %30 in 1 : vector<8x256xf32>, vector<8x256xf32> -> vector<8x512xf32>
    %32 = arith.truncf %31 : vector<8x512xf32> to vector<8x512xbf16>
    %c0_23 = arith.constant 0 : index
    %c0_24 = arith.constant 0 : index
    %c0_25 = arith.constant 0 : index
    %33 = vector.load %arg7[%c0_23, %c0_24, %c0_25] : memref<1x8x512xbf16, #tpu.memory_space<vmem>>, vector<1x8x512xbf16>
    %34 = vector.shape_cast %33 : vector<1x8x512xbf16> to vector<8x512xbf16>
    %35 = vector.shape_cast %32 : vector<8x512xbf16> to vector<1x8x512xbf16>
    tpu.vector_store %arg7[%c0_23, %c0_24, %c0_25], %35 {strides = array<i32>} : memref<1x8x512xbf16, #tpu.memory_space<vmem>>, vector<1x8x512xbf16>,
    return
  }
  func.func @transform_0(%arg0: i32) -> (i32, i32, i32) {
    %c0_i32 = arith.constant 0 : i32
    %c0_i32_0 = arith.constant 0 : i32
    %c0_i32_1 = arith.constant 0 : i32
    return %arg0, %c0_i32, %c0_i32_0 : i32, i32, i32
  }
  func.func @transform_1(%arg0: i32) -> (i32, i32) {
    %c0_i32 = arith.constant 0 : i32
    %c0_i32_0 = arith.constant 0 : i32
    %c0_i32_1 = arith.constant 0 : i32
    return %c0_i32, %c0_i32_0 : i32, i32
  }
  func.func @transform_2(%arg0: i32) -> (i32, i32) {
    %c0_i32 = arith.constant 0 : i32
    %c0_i32_0 = arith.constant 0 : i32
    %c0_i32_1 = arith.constant 0 : i32
    return %c0_i32, %c0_i32_0 : i32, i32
  }
  func.func @transform_3(%arg0: i32) -> (i32, i32) {
    %c0_i32 = arith.constant 0 : i32
    %c0_i32_0 = arith.constant 0 : i32
    %c0_i32_1 = arith.constant 0 : i32
    return %c0_i32, %c0_i32_0 : i32, i32
  }
  func.func @transform_4(%arg0: i32) -> (i32, i32) {
    %c0_i32 = arith.constant 0 : i32
    %c0_i32_0 = arith.constant 0 : i32
    %c0_i32_1 = arith.constant 0 : i32
    return %c0_i32, %c0_i32_0 : i32, i32
  }
  func.func @transform_5(%arg0: i32) -> (i32, i32) {
    %c0_i32 = arith.constant 0 : i32
    %c0_i32_0 = arith.constant 0 : i32
    %c0_i32_1 = arith.constant 0 : i32
    return %c0_i32, %c0_i32_0 : i32, i32
  }
  func.func @transform_6(%arg0: i32) -> (i32, i32, i32) {
    %c0_i32 = arith.constant 0 : i32
    %c0_i32_0 = arith.constant 0 : i32
    %c0_i32_1 = arith.constant 0 : i32
    return %arg0, %c0_i32, %c0_i32_0 : i32, i32, i32
  }
}

module attributes {stable_mosaic.version = 11 : i64} {
  func.func @_dec_conv_kernel(%arg0: i32, %arg1: memref<1x18x256xbf16, #tpu.memory_space<vmem>>, %arg2: memref<256x256xbf16, #tpu.memory_space<vmem>>, %arg3: memref<256x256xbf16, #tpu.memory_space<vmem>>, %arg4: memref<256x256xbf16, #tpu.memory_space<vmem>>, %arg5: memref<256x256xbf16, #tpu.memory_space<vmem>>, %arg6: memref<1x256xf32, #tpu.memory_space<vmem>>, %arg7: memref<1x16x512xbf16, #tpu.memory_space<vmem>>) attributes {dimension_semantics = [#tpu.dimension_semantics<parallel>], iteration_bounds = array<i64: 2>, scalar_prefetch = 0 : i64, scratch_operands = 0 : i64, tpu.core_type = #tpu.core_type<tc>, window_params = [{transform_indices = @transform_0, window_bounds = array<i64: 1, 18, 256>}, {pipeline_mode = #tpu.pipeline_mode<synchronous>, transform_indices = @transform_1, window_bounds = array<i64: 256, 256>}, {pipeline_mode = #tpu.pipeline_mode<synchronous>, transform_indices = @transform_2, window_bounds = array<i64: 256, 256>}, {pipeline_mode = #tpu.pipeline_mode<synchronous>, transform_indices = @transform_3, window_bounds = array<i64: 256, 256>}, {pipeline_mode = #tpu.pipeline_mode<synchronous>, transform_indices = @transform_4, window_bounds = array<i64: 256, 256>}, {pipeline_mode = #tpu.pipeline_mode<synchronous>, transform_indices = @transform_5, window_bounds = array<i64: 1, 256>}, {transform_indices = @transform_6, window_bounds = array<i64: 1, 16, 512>}]} {
    %c0 = arith.constant 0 : index
    %c0_0 = arith.constant 0 : index
    %c0_1 = arith.constant 0 : index
    %0 = vector.load %arg1[%c0, %c0_0, %c0_1] : memref<1x18x256xbf16, #tpu.memory_space<vmem>>, vector<1x16x256xbf16>
    %1 = vector.shape_cast %0 : vector<1x16x256xbf16> to vector<16x256xbf16>
    %c0_2 = arith.constant 0 : index
    %c1 = arith.constant 1 : index
    %c0_3 = arith.constant 0 : index
    %2 = vector.load %arg1[%c0_2, %c1, %c0_3] : memref<1x18x256xbf16, #tpu.memory_space<vmem>>, vector<1x16x256xbf16>
    %3 = vector.shape_cast %2 : vector<1x16x256xbf16> to vector<16x256xbf16>
    %c0_4 = arith.constant 0 : index
    %c2 = arith.constant 2 : index
    %c0_5 = arith.constant 0 : index
    %4 = vector.load %arg1[%c0_4, %c2, %c0_5] : memref<1x18x256xbf16, #tpu.memory_space<vmem>>, vector<1x16x256xbf16>
    %5 = vector.shape_cast %4 : vector<1x16x256xbf16> to vector<16x256xbf16>
    %c0_6 = arith.constant 0 : index
    %c0_7 = arith.constant 0 : index
    %6 = vector.load %arg6[%c0_6, %c0_7] : memref<1x256xf32, #tpu.memory_space<vmem>>, vector<1x256xf32>
    %c0_8 = arith.constant 0 : index
    %c0_9 = arith.constant 0 : index
    %7 = vector.load %arg2[%c0_8, %c0_9] : memref<256x256xbf16, #tpu.memory_space<vmem>>, vector<256x256xbf16>
    %cst = arith.constant dense<0.000000e+00> : vector<16x256xf32>
    %8 = tpu.matmul %1, %7, %cst {dimension_numbers = #tpu.dot_dimension_numbers<[1], [0], [0], [1], [0, 0, 1, 1], [], []>} : vector<16x256xbf16>, vector<256x256xbf16>, vector<16x256xf32> -> vector<16x256xf32>
    %c0_10 = arith.constant 0 : index
    %c0_11 = arith.constant 0 : index
    %9 = vector.load %arg3[%c0_10, %c0_11] : memref<256x256xbf16, #tpu.memory_space<vmem>>, vector<256x256xbf16>
    %cst_12 = arith.constant dense<0.000000e+00> : vector<16x256xf32>
    %10 = tpu.matmul %3, %9, %cst_12 {dimension_numbers = #tpu.dot_dimension_numbers<[1], [0], [0], [1], [0, 0, 1, 1], [], []>} : vector<16x256xbf16>, vector<256x256xbf16>, vector<16x256xf32> -> vector<16x256xf32>
    %11 = arith.addf %8, %10 : vector<16x256xf32>
    %12 = vector.broadcast %6 : vector<1x256xf32> to vector<16x256xf32>
    %13 = arith.addf %11, %12 : vector<16x256xf32>
    %c0_13 = arith.constant 0 : index
    %c0_14 = arith.constant 0 : index
    %14 = vector.load %arg4[%c0_13, %c0_14] : memref<256x256xbf16, #tpu.memory_space<vmem>>, vector<256x256xbf16>
    %cst_15 = arith.constant dense<0.000000e+00> : vector<16x256xf32>
    %15 = tpu.matmul %3, %14, %cst_15 {dimension_numbers = #tpu.dot_dimension_numbers<[1], [0], [0], [1], [0, 0, 1, 1], [], []>} : vector<16x256xbf16>, vector<256x256xbf16>, vector<16x256xf32> -> vector<16x256xf32>
    %c0_16 = arith.constant 0 : index
    %c0_17 = arith.constant 0 : index
    %16 = vector.load %arg5[%c0_16, %c0_17] : memref<256x256xbf16, #tpu.memory_space<vmem>>, vector<256x256xbf16>
    %cst_18 = arith.constant dense<0.000000e+00> : vector<16x256xf32>
    %17 = tpu.matmul %5, %16, %cst_18 {dimension_numbers = #tpu.dot_dimension_numbers<[1], [0], [0], [1], [0, 0, 1, 1], [], []>} : vector<16x256xbf16>, vector<256x256xbf16>, vector<16x256xf32> -> vector<16x256xf32>
    %18 = arith.addf %15, %17 : vector<16x256xf32>
    %19 = vector.broadcast %6 : vector<1x256xf32> to vector<16x256xf32>
    %20 = arith.addf %18, %19 : vector<16x256xf32>
    %cst_19 = arith.constant 0.000000e+00 : f32
    %21 = vector.broadcast %cst_19 : f32 to vector<16x256xf32>
    %22 = arith.cmpf ogt, %13, %21 : vector<16x256xf32>
    %cst_20 = arith.constant 2.000000e-01 : f32
    %23 = vector.broadcast %cst_20 : f32 to vector<16x256xf32>
    %24 = arith.mulf %23, %13 : vector<16x256xf32>
    %25 = arith.select %22, %13, %24 : vector<16x256xi1>, vector<16x256xf32>
    %cst_21 = arith.constant 0.000000e+00 : f32
    %26 = vector.broadcast %cst_21 : f32 to vector<16x256xf32>
    %27 = arith.cmpf ogt, %20, %26 : vector<16x256xf32>
    %cst_22 = arith.constant 2.000000e-01 : f32
    %28 = vector.broadcast %cst_22 : f32 to vector<16x256xf32>
    %29 = arith.mulf %28, %20 : vector<16x256xf32>
    %30 = arith.select %27, %20, %29 : vector<16x256xi1>, vector<16x256xf32>
    %31 = tpu.concatenate %25, %30 in 1 : vector<16x256xf32>, vector<16x256xf32> -> vector<16x512xf32>
    %32 = arith.truncf %31 : vector<16x512xf32> to vector<16x512xbf16>
    %c0_23 = arith.constant 0 : index
    %c0_24 = arith.constant 0 : index
    %c0_25 = arith.constant 0 : index
    %33 = vector.load %arg7[%c0_23, %c0_24, %c0_25] : memref<1x16x512xbf16, #tpu.memory_space<vmem>>, vector<1x16x512xbf16>
    %34 = vector.shape_cast %33 : vector<1x16x512xbf16> to vector<16x512xbf16>
    %35 = vector.shape_cast %32 : vector<16x512xbf16> to vector<1x16x512xbf16>
    tpu.vector_store %arg7[%c0_23, %c0_24, %c0_25], %35 {strides = array<i32>} : memref<1x16x512xbf16, #tpu.memory_space<vmem>>, vector<1x16x512xbf16>,
    return
  }
  func.func @transform_0(%arg0: i32) -> (i32, i32, i32) {
    %c0_i32 = arith.constant 0 : i32
    %c0_i32_0 = arith.constant 0 : i32
    %c0_i32_1 = arith.constant 0 : i32
    return %arg0, %c0_i32, %c0_i32_0 : i32, i32, i32
  }
  func.func @transform_1(%arg0: i32) -> (i32, i32) {
    %c0_i32 = arith.constant 0 : i32
    %c0_i32_0 = arith.constant 0 : i32
    %c0_i32_1 = arith.constant 0 : i32
    return %c0_i32, %c0_i32_0 : i32, i32
  }
  func.func @transform_2(%arg0: i32) -> (i32, i32) {
    %c0_i32 = arith.constant 0 : i32
    %c0_i32_0 = arith.constant 0 : i32
    %c0_i32_1 = arith.constant 0 : i32
    return %c0_i32, %c0_i32_0 : i32, i32
  }
  func.func @transform_3(%arg0: i32) -> (i32, i32) {
    %c0_i32 = arith.constant 0 : i32
    %c0_i32_0 = arith.constant 0 : i32
    %c0_i32_1 = arith.constant 0 : i32
    return %c0_i32, %c0_i32_0 : i32, i32
  }
  func.func @transform_4(%arg0: i32) -> (i32, i32) {
    %c0_i32 = arith.constant 0 : i32
    %c0_i32_0 = arith.constant 0 : i32
    %c0_i32_1 = arith.constant 0 : i32
    return %c0_i32, %c0_i32_0 : i32, i32
  }
  func.func @transform_5(%arg0: i32) -> (i32, i32) {
    %c0_i32 = arith.constant 0 : i32
    %c0_i32_0 = arith.constant 0 : i32
    %c0_i32_1 = arith.constant 0 : i32
    return %c0_i32, %c0_i32_0 : i32, i32
  }
  func.func @transform_6(%arg0: i32) -> (i32, i32, i32) {
    %c0_i32 = arith.constant 0 : i32
    %c0_i32_0 = arith.constant 0 : i32
    %c0_i32_1 = arith.constant 0 : i32
    return %arg0, %c0_i32, %c0_i32_0 : i32, i32, i32
  }
}

module attributes {stable_mosaic.version = 11 : i64} {
  func.func @_dec_conv_kernel(%arg0: i32, %arg1: memref<1x34x256xbf16, #tpu.memory_space<vmem>>, %arg2: memref<256x64xbf16, #tpu.memory_space<vmem>>, %arg3: memref<256x64xbf16, #tpu.memory_space<vmem>>, %arg4: memref<256x64xbf16, #tpu.memory_space<vmem>>, %arg5: memref<256x64xbf16, #tpu.memory_space<vmem>>, %arg6: memref<1x64xf32, #tpu.memory_space<vmem>>, %arg7: memref<1x32x128xf32, #tpu.memory_space<vmem>>) attributes {dimension_semantics = [#tpu.dimension_semantics<parallel>], iteration_bounds = array<i64: 2>, scalar_prefetch = 0 : i64, scratch_operands = 0 : i64, tpu.core_type = #tpu.core_type<tc>, window_params = [{transform_indices = @transform_0, window_bounds = array<i64: 1, 34, 256>}, {pipeline_mode = #tpu.pipeline_mode<synchronous>, transform_indices = @transform_1, window_bounds = array<i64: 256, 64>}, {pipeline_mode = #tpu.pipeline_mode<synchronous>, transform_indices = @transform_2, window_bounds = array<i64: 256, 64>}, {pipeline_mode = #tpu.pipeline_mode<synchronous>, transform_indices = @transform_3, window_bounds = array<i64: 256, 64>}, {pipeline_mode = #tpu.pipeline_mode<synchronous>, transform_indices = @transform_4, window_bounds = array<i64: 256, 64>}, {pipeline_mode = #tpu.pipeline_mode<synchronous>, transform_indices = @transform_5, window_bounds = array<i64: 1, 64>}, {transform_indices = @transform_6, window_bounds = array<i64: 1, 32, 128>}]} {
    %c0 = arith.constant 0 : index
    %c0_0 = arith.constant 0 : index
    %c0_1 = arith.constant 0 : index
    %0 = vector.load %arg1[%c0, %c0_0, %c0_1] : memref<1x34x256xbf16, #tpu.memory_space<vmem>>, vector<1x32x256xbf16>
    %1 = vector.shape_cast %0 : vector<1x32x256xbf16> to vector<32x256xbf16>
    %c0_2 = arith.constant 0 : index
    %c1 = arith.constant 1 : index
    %c0_3 = arith.constant 0 : index
    %2 = vector.load %arg1[%c0_2, %c1, %c0_3] : memref<1x34x256xbf16, #tpu.memory_space<vmem>>, vector<1x32x256xbf16>
    %3 = vector.shape_cast %2 : vector<1x32x256xbf16> to vector<32x256xbf16>
    %c0_4 = arith.constant 0 : index
    %c2 = arith.constant 2 : index
    %c0_5 = arith.constant 0 : index
    %4 = vector.load %arg1[%c0_4, %c2, %c0_5] : memref<1x34x256xbf16, #tpu.memory_space<vmem>>, vector<1x32x256xbf16>
    %5 = vector.shape_cast %4 : vector<1x32x256xbf16> to vector<32x256xbf16>
    %c0_6 = arith.constant 0 : index
    %c0_7 = arith.constant 0 : index
    %6 = vector.load %arg6[%c0_6, %c0_7] : memref<1x64xf32, #tpu.memory_space<vmem>>, vector<1x64xf32>
    %c0_8 = arith.constant 0 : index
    %c0_9 = arith.constant 0 : index
    %7 = vector.load %arg2[%c0_8, %c0_9] : memref<256x64xbf16, #tpu.memory_space<vmem>>, vector<256x64xbf16>
    %cst = arith.constant dense<0.000000e+00> : vector<32x64xf32>
    %8 = tpu.matmul %1, %7, %cst {dimension_numbers = #tpu.dot_dimension_numbers<[1], [0], [0], [1], [0, 0, 1, 1], [], []>} : vector<32x256xbf16>, vector<256x64xbf16>, vector<32x64xf32> -> vector<32x64xf32>
    %c0_10 = arith.constant 0 : index
    %c0_11 = arith.constant 0 : index
    %9 = vector.load %arg3[%c0_10, %c0_11] : memref<256x64xbf16, #tpu.memory_space<vmem>>, vector<256x64xbf16>
    %cst_12 = arith.constant dense<0.000000e+00> : vector<32x64xf32>
    %10 = tpu.matmul %3, %9, %cst_12 {dimension_numbers = #tpu.dot_dimension_numbers<[1], [0], [0], [1], [0, 0, 1, 1], [], []>} : vector<32x256xbf16>, vector<256x64xbf16>, vector<32x64xf32> -> vector<32x64xf32>
    %11 = arith.addf %8, %10 : vector<32x64xf32>
    %12 = vector.broadcast %6 : vector<1x64xf32> to vector<32x64xf32>
    %13 = arith.addf %11, %12 : vector<32x64xf32>
    %c0_13 = arith.constant 0 : index
    %c0_14 = arith.constant 0 : index
    %14 = vector.load %arg4[%c0_13, %c0_14] : memref<256x64xbf16, #tpu.memory_space<vmem>>, vector<256x64xbf16>
    %cst_15 = arith.constant dense<0.000000e+00> : vector<32x64xf32>
    %15 = tpu.matmul %3, %14, %cst_15 {dimension_numbers = #tpu.dot_dimension_numbers<[1], [0], [0], [1], [0, 0, 1, 1], [], []>} : vector<32x256xbf16>, vector<256x64xbf16>, vector<32x64xf32> -> vector<32x64xf32>
    %c0_16 = arith.constant 0 : index
    %c0_17 = arith.constant 0 : index
    %16 = vector.load %arg5[%c0_16, %c0_17] : memref<256x64xbf16, #tpu.memory_space<vmem>>, vector<256x64xbf16>
    %cst_18 = arith.constant dense<0.000000e+00> : vector<32x64xf32>
    %17 = tpu.matmul %5, %16, %cst_18 {dimension_numbers = #tpu.dot_dimension_numbers<[1], [0], [0], [1], [0, 0, 1, 1], [], []>} : vector<32x256xbf16>, vector<256x64xbf16>, vector<32x64xf32> -> vector<32x64xf32>
    %18 = arith.addf %15, %17 : vector<32x64xf32>
    %19 = vector.broadcast %6 : vector<1x64xf32> to vector<32x64xf32>
    %20 = arith.addf %18, %19 : vector<32x64xf32>
    %21 = math.tanh %13 : vector<32x64xf32>
    %22 = math.tanh %20 : vector<32x64xf32>
    %23 = tpu.concatenate %21, %22 in 1 : vector<32x64xf32>, vector<32x64xf32> -> vector<32x128xf32>
    %c0_19 = arith.constant 0 : index
    %c0_20 = arith.constant 0 : index
    %c0_21 = arith.constant 0 : index
    %24 = vector.load %arg7[%c0_19, %c0_20, %c0_21] : memref<1x32x128xf32, #tpu.memory_space<vmem>>, vector<1x32x128xf32>
    %25 = vector.shape_cast %24 : vector<1x32x128xf32> to vector<32x128xf32>
    %26 = vector.shape_cast %23 : vector<32x128xf32> to vector<1x32x128xf32>
    tpu.vector_store %arg7[%c0_19, %c0_20, %c0_21], %26 {strides = array<i32>} : memref<1x32x128xf32, #tpu.memory_space<vmem>>, vector<1x32x128xf32>,
    return
  }
  func.func @transform_0(%arg0: i32) -> (i32, i32, i32) {
    %c0_i32 = arith.constant 0 : i32
    %c0_i32_0 = arith.constant 0 : i32
    %c0_i32_1 = arith.constant 0 : i32
    return %arg0, %c0_i32, %c0_i32_0 : i32, i32, i32
  }
  func.func @transform_1(%arg0: i32) -> (i32, i32) {
    %c0_i32 = arith.constant 0 : i32
    %c0_i32_0 = arith.constant 0 : i32
    %c0_i32_1 = arith.constant 0 : i32
    return %c0_i32, %c0_i32_0 : i32, i32
  }
  func.func @transform_2(%arg0: i32) -> (i32, i32) {
    %c0_i32 = arith.constant 0 : i32
    %c0_i32_0 = arith.constant 0 : i32
    %c0_i32_1 = arith.constant 0 : i32
    return %c0_i32, %c0_i32_0 : i32, i32
  }
  func.func @transform_3(%arg0: i32) -> (i32, i32) {
    %c0_i32 = arith.constant 0 : i32
    %c0_i32_0 = arith.constant 0 : i32
    %c0_i32_1 = arith.constant 0 : i32
    return %c0_i32, %c0_i32_0 : i32, i32
  }
  func.func @transform_4(%arg0: i32) -> (i32, i32) {
    %c0_i32 = arith.constant 0 : i32
    %c0_i32_0 = arith.constant 0 : i32
    %c0_i32_1 = arith.constant 0 : i32
    return %c0_i32, %c0_i32_0 : i32, i32
  }
  func.func @transform_5(%arg0: i32) -> (i32, i32) {
    %c0_i32 = arith.constant 0 : i32
    %c0_i32_0 = arith.constant 0 : i32
    %c0_i32_1 = arith.constant 0 : i32
    return %c0_i32, %c0_i32_0 : i32, i32
  }
  func.func @transform_6(%arg0: i32) -> (i32, i32, i32) {
    %c0_i32 = arith.constant 0 : i32
    %c0_i32_0 = arith.constant 0 : i32
    %c0_i32_1 = arith.constant 0 : i32
    return %arg0, %c0_i32, %c0_i32_0 : i32, i32, i32
  }
}

</mosaic_0001>

<bundles_post_ra>
// kernel: wnet_forward.12
= control target key start
LH: loop header
LB: loop body
LE: loop exit
PB: predicated region body
PF: predicated region fallthrough
CT: control target
= control target key end

     0   :  { %s967_s21 = smov 0   ;;  %s1082_s0 = inlined_call_operand.vmem [shape: bf16[10,33,64], index: 0, kind: input, shape index: {}]   ;;  %s1083_s1 = inlined_call_operand.vmem [shape: bf16[10,33,64], index: 1, kind: input, shape index: {}]   ;;  %s1084_s2 = inlined_call_operand.vmem [shape: bf16[64,256], index: 2, kind: input, shape index: {}]   ;;  %s1085_s3 = inlined_call_operand.vmem [shape: bf16[64,256], index: 3, kind: input, shape index: {}]   ;;  %s1086_s4 = inlined_call_operand.vmem [shape: bf16[64,256], index: 4, kind: input, shape index: {}]   ;;  %s1087_s5 = inlined_call_operand.vmem [shape: f32[1,256], index: 5, kind: input, shape index: {}]   ;;  %s1088_s6 = inlined_call_operand.vmem [shape: bf16[10,32,256], index: 6, kind: output, shape index: {}]  }
   0x1 LB: > { %s793_s22 = sadd.s32 4294967295, %s929_s21   ;;  %p797_p0 = scmp.ge.s32.totalorder %s929_s21, 1  ;;  %s929_s21 = sphi %s967_s21, %s16_s21  }
   0x2   : > { %p222_p1 = scmp.lt.s32.totalorder %s929_s21, 11 }
   0x4   : > { %p223_p2 = pnand %p797_p0, %p222_p1 }
   0x5   : > { %v882_v0 = vld [vmem:[%s1085_s3 + $0x4] ss:$8 sps:$4 sm:$0xff] (!%p223_p2)   ;;  %p257_p3 = scmp.lt.s32.totalorder (!%p223_p2), %s793_s22, 9  ;;  %v931_v2 = vmov (!%p223_p2), 0   ;;  %v886_v3 = vld [vmem:[%s1085_s3] ss:$8 sps:$4 sm:$0xff] (!%p223_p2)   ;;  %v656_v46 = vlaneseq (!%p223_p2) }
   0x6   : > { %226 = sbr.rel (%p223_p2) target bundleno = 267 (0x10b), region = 44  ;;  %v884_v1 = vld [vmem:[%s1084_s2 + $0x4] ss:$8 sps:$4 sm:$0xff] (!%p223_p2)   ;;  %387 = vmatprep.mubr.bf16.mxu1 (!%p223_p2), %v931_v2  ;;  %496 = vmatprep.mubr.bf16.mxu0 (!%p223_p2), %v931_v2  ;;  %v887_v4 = vld [vmem:[%s1084_s2] ss:$8 sps:$4 sm:$0xff] (!%p223_p2)   ;;  %vm348_vm0 = vcmask (!%p223_p2), 523264  }
   0x7   : > { %355 = vmatprep.subr.bf16.mxu1 (!%p223_p2), %v882_v0  ;;  %464 = vmatprep.subr.bf16.mxu0 (!%p223_p2), %v884_v1  ;;  %v888_v5 = vld [vmem:[%s1085_s3 + $0x14] ss:$8 sps:$4 sm:$0xff] (!%p223_p2)   ;;  %v892_v7 = vld [vmem:[%s1085_s3 + $0x10] ss:$8 sps:$4 sm:$0xff] (!%p223_p2)   ;;  %v894_v9 = vld [vmem:[%s1085_s3 + $0x24] ss:$8 sps:$4 sm:$0xff] (!%p223_p2)  }
   0x8   : > { %356 = vmatpush1.bf16.msra.mxu1 (!%p223_p2), %v886_v3  ;;  %465 = vmatpush1.bf16.msra.mxu0 (!%p223_p2), %v887_v4  ;;  %v890_v6 = vld [vmem:[%s1084_s2 + $0x14] ss:$8 sps:$4 sm:$0xff] (!%p223_p2)   ;;  %v893_v8 = vld [vmem:[%s1084_s2 + $0x10] ss:$8 sps:$4 sm:$0xff] (!%p223_p2)   ;;  %v896_v10 = vld [vmem:[%s1084_s2 + $0x24] ss:$8 sps:$4 sm:$0xff] (!%p223_p2)  }
   0x9   : > { %357 = vmatprep.subr.bf16.mxu1 (!%p223_p2), %v888_v5  ;;  %466 = vmatprep.subr.bf16.mxu0 (!%p223_p2), %v890_v6  ;;  %v898_v11 = vld [vmem:[%s1085_s3 + $0x20] ss:$8 sps:$4 sm:$0xff] (!%p223_p2)   ;;  %v900_v13 = vld [vmem:[%s1085_s3 + $0x34] ss:$8 sps:$4 sm:$0xff] (!%p223_p2)   ;;  %v904_v15 = vld [vmem:[%s1085_s3 + $0x30] ss:$8 sps:$4 sm:$0xff] (!%p223_p2)  }
   0xa   : > { %v899_v12 = vld [vmem:[%s1084_s2 + $0x20] ss:$8 sps:$4 sm:$0xff] (!%p223_p2)   ;;  %v902_v14 = vld [vmem:[%s1084_s2 + $0x34] ss:$8 sps:$4 sm:$0xff] (!%p223_p2)   ;;  %v905_v16 = vld [vmem:[%s1084_s2 + $0x30] ss:$8 sps:$4 sm:$0xff] (!%p223_p2)  }
   0xb   : > { %v910_v18 = vld [vmem:[%s1086_s4 + $0x4] ss:$8 sps:$4 sm:$0xff] (!%p223_p2)   ;;  %v908_v20 = vld [vmem:[%s1086_s4] ss:$8 sps:$4 sm:$0xff] (!%p223_p2)   ;;  %v913_v21 = vld [vmem:[%s1086_s4 + $0x14] ss:$8 sps:$4 sm:$0xff] (!%p223_p2)  }
   0xc   : > { %358 = vmatpush1.bf16.msra.mxu1 (!%p223_p2), %v892_v7  ;;  %467 = vmatpush1.bf16.msra.mxu0 (!%p223_p2), %v893_v8  ;;  %v911_v24 = vld [vmem:[%s1086_s4 + $0x10] ss:$8 sps:$4 sm:$0xff] (!%p223_p2)   ;;  %v918_v26 = vld [vmem:[%s1086_s4 + $0x24] ss:$8 sps:$4 sm:$0xff] (!%p223_p2)   ;;  %v916_v33 = vld [vmem:[%s1086_s4 + $0x20] ss:$8 sps:$4 sm:$0xff] (!%p223_p2)  }
   0xd   : > { %s1090_s22 = smov (!%p257_p3, %s793_s22), 9  ;;  %359 = vmatprep.subr.bf16.mxu1 %v894_v9  ;;  %468 = vmatprep.subr.bf16.mxu0 %v896_v10  ;;  %v921_v35 = vld [vmem:[%s1086_s4 + $0x34] ss:$8 sps:$4 sm:$0xff]   ;;  %v919_v36 = vld [vmem:[%s1086_s4 + $0x30] ss:$8 sps:$4 sm:$0xff]   ;;  %v657_v47 = vshrl.u32 %v656_v46, 7 }
   0xe   : > { %s872_s15 = smul.u32 20, %s1090_s22  ;;  %vm528_vm1 = vsmask.f32 7424  ;;  %v654_v61 = vld [vmem:[%s1087_s5] sm:$0x3]  ;;  %s843_s12 = sshll.u32 %s1090_s22, 5 }
   0xf   : > { %v658_v59 = vsub.s32 0, %v657_v47  ;;  %v662_v62 = vsub.s32 1, %v657_v47  ;;  %s271_s22 = scalar_lea.vmem %s1088_s6, %s843_s12 }
  0x10   : > { %s1025_s8 = scalar_lea.vmem %s1083_s1, %s872_s15  ;;  %s261_s11 = scalar_lea.vmem %s1082_s0, %s872_s15  ;;  %360 = vmatpush1.bf16.msra.mxu1 %v898_v11  ;;  %469 = vmatpush1.bf16.msra.mxu0 %v899_v12 }
  0x11   : > { %361 = vmatprep.subr.bf16.mxu1 %v900_v13  ;;  %470 = vmatprep.subr.bf16.mxu0 %v902_v14  ;;  %v906_v17 = vld [vmem:[%s1025_s8] sm:$0xff]   ;;  %v915_v22 = vld [vmem:[%s261_s11 + $0x8] sm:$0xff]   ;;  %v922_v27 = vld [vmem:[%s261_s11 + $0x10] ss:$0 sps:$4 sm:$0x11]   ;;  %v659_v63 = vrot.slane %v654_v61, %v658_v59 }
  0x12   : > { %v907_v19 = vld [vmem:[%s261_s11] sm:$0xff]   ;;  %v535_v25 = vshll.u32 %v915_v22, 16  ;;  %v914_v29 = vld [vmem:[%s1025_s8 + $0x8] sm:$0xff]   ;;  %v539_v32 = vshrl.u32 %v915_v22, 16  ;;  %v543_v34 = vshll.u32 %v922_v27, 16 }
  0x13   : > { %v531_v23 = vshll.u32 %v907_v19, 16  ;;  %v529_v28 = vshrl.u32 %v907_v19, 16 }
  0x14   : > { %362 = vmatpush1.bf16.msra.mxu1 %v904_v15  ;;  %471 = vmatpush1.bf16.msra.mxu0 %v905_v16  ;;  %v537_v31 = vrot.slane %v535_v25, 1  ;;  %v545_v39 = vrot.slane %v543_v34, 1 }
  0x15   : > { %593 = vmatprep.subr.bf16.mxu0 %v910_v18  ;;  %848 = vmatprep.subr.bf16.mxu1 %v910_v18  ;;  %v533_v30 = vrot.slane %v531_v23, 1 }
  0x16   : > { %v541_v38 = vor.u32 %v539_v32, %v537_v31 }
  0x17   : > { %812 = vmatmul.mubr.msk.bf16.vlgmr.msra.gmra.mrb[0].mxu1 %vm348_vm0, %v906_v17  ;;  %824 = vmatmul.mubr.msk.bf16.vlgmr.msra.gmra.mrb[0].mxu0 %vm348_vm0, %v907_v19  ;;  %v534_v37 = vor.u32 %v533_v30, %v529_v28 }
  0x18   : > { %594 = vmatpush1.bf16.msra.mxu0 %v908_v20  ;;  %852 = vmatpush1.bf16.msra.mxu1 %v908_v20  ;;  %v546_v41 = vsel %vm528_vm1, %v541_v38, %v545_v39 }
  0x19   : > { %595 = vmatprep.subr.bf16.mxu0 %v913_v21  ;;  %849 = vmatprep.subr.bf16.mxu1 %v913_v21  ;;  %v538_v40 = vsel %vm528_vm1, %v534_v37, %v537_v31 }
  0x1a   : > { %397 = vmatprep.mubr.bf16.mxu1 %v931_v2  ;;  %506 = vmatprep.mubr.bf16.mxu0 %v931_v2 }
  0x1c   : > { %596 = vmatpush1.bf16.msra.mxu0 %v911_v24  ;;  %853 = vmatpush1.bf16.msra.mxu1 %v911_v24 }
  0x1d   : > { %597 = vmatprep.subr.bf16.mxu0 %v918_v26  ;;  %850 = vmatprep.subr.bf16.mxu1 %v918_v26 }
  0x1f   : > { %813 = vmatmul.mubr.msk.bf16.gmra.mrb[4].mxu1 %vm348_vm0, %v914_v29  ;;  %825 = vmatmul.mubr.msk.bf16.gmra.mrb[4].mxu0 %vm348_vm0, %v915_v22 }
  0x20   : > { %598 = vmatpush1.bf16.msra.mxu0 %v916_v33  ;;  %854 = vmatpush1.bf16.msra.mxu1 %v916_v33 }
  0x21   : > { %599 = vmatprep.subr.bf16.mxu0 %v921_v35  ;;  %851 = vmatprep.subr.bf16.mxu1 %v921_v35 }
  0x22   : > { %625 = vmatprep.mubr.bf16.mxu0 %v931_v2  ;;  %635 = vmatprep.mubr.bf16.mxu1 %v931_v2  ;;  %v663_v2 = vrot.slane %v654_v61, %v662_v62 }
  0x24   : > { %600 = vmatpush1.bf16.msra.mxu0 %v919_v36  ;;  %855 = vmatpush1.bf16.msra.mxu1 %v919_v36 }
  0x27   : > { %835 = vmatmul.mubr.msk.bf16.vlgmr.msra.gmra.mrb[0].mxu0 %vm348_vm0, %v538_v40  ;;  %836 = vmatmul.mubr.msk.bf16.vlgmr.msra.gmra.mrb[8].mxu1 %vm348_vm0, %v546_v41 }
  0xea   : > { %v389_v42 = vpop.f32.mrb[0].mxu1 }
  0xeb   : > { %v391_v43 = vpop.f32.mrb[1].mxu1 }
  0xec   : > { %v393_v44 = vpop.f32.mrb[2].mxu1 }
  0xed   : > { %v395_v45 = vpop.f32.mrb[3].mxu1 }
  0xf2   : > { %v399_v48 = vpop.f32.mrb[4].mxu1  ;;  %v508_v49 = vpop.f32.mrb[4].mxu0 }
  0xf3   : > { %v509_v50 = vadd.f32 %v508_v49, %v399_v48  ;;  %v401_v51 = vpop.f32.mrb[5].mxu1  ;;  %v510_v52 = vpop.f32.mrb[5].mxu0 }
  0xf4   : > { %v511_v53 = vadd.f32 %v510_v52, %v401_v51  ;;  %v403_v54 = vpop.f32.mrb[6].mxu1  ;;  %v512_v55 = vpop.f32.mrb[6].mxu0 }
  0xf5   : > { %v513_v56 = vadd.f32 %v512_v55, %v403_v54  ;;  %v405_v57 = vpop.f32.mrb[7].mxu1  ;;  %v514_v58 = vpop.f32.mrb[7].mxu0 }
  0xf6   : > { %v515_v60 = vadd.f32 %v514_v58, %v405_v57 }
  0xfa   : > { %v627_v0 = vpop.f32.mrb[0].mxu0  ;;  %v637_v1 = vpop.f32.mrb[8].mxu1 }
  0xfb   : > { %v856_v3 = vadd.f32 %v627_v0, %v389_v42  ;;  %v650_v4 = vadd.f32 %v637_v1, %v509_v50  ;;  %v629_v5 = vpop.f32.mrb[1].mxu0  ;;  %v639_v6 = vpop.f32.mrb[9].mxu1 }
  0xfc   : > { %v857_v7 = vadd.f32 %v629_v5, %v391_v43  ;;  %v651_v8 = vadd.f32 %v639_v6, %v511_v53  ;;  %v631_v9 = vpop.f32.mrb[2].mxu0  ;;  %v641_v10 = vpop.f32.mrb[10].mxu1 }
  0xfd   : > { %v666_v11 = vadd.f32 %v856_v3, %v659_v63  ;;  %v670_v12 = vadd.f32 %v659_v63, %v650_v4  ;;  %v858_v13 = vadd.f32 %v631_v9, %v393_v44  ;;  %v652_v14 = vadd.f32 %v641_v10, %v513_v56  ;;  %v633_v15 = vpop.f32.mrb[3].mxu0  ;;  %v643_v16 = vpop.f32.mrb[11].mxu1 }
  0xfe   : > { %v667_v17 = vadd.f32 %v857_v7, %v663_v2  ;;  %v671_v18 = vadd.f32 %v663_v2, %v651_v8  ;;  %v859_v19 = vadd.f32 %v633_v15, %v395_v45  ;;  %v653_v20 = vadd.f32 %v643_v16, %v515_v60 }
  0xff   : > { %vm674_vm2 = vcmp.gt.f32.partialorder %v666_v11, 0.0  ;;  %v682_v21 = vmul.f32 0.2, %v666_v11  ;;  %vm678_vm3 = vcmp.gt.f32.partialorder %v670_v12, 0.0  ;;  %v686_v22 = vmul.f32 0.2, %v670_v12 }
 0x100   : > { %vm675_vm4 = vcmp.gt.f32.partialorder %v667_v17, 0.0  ;;  %v683_v23 = vmul.f32 0.2, %v667_v17  ;;  %vm679_vm5 = vcmp.gt.f32.partialorder %v671_v18, 0.0  ;;  %v687_v24 = vmul.f32 0.2, %v671_v18 }
 0x101   : > { %v690_v25 = vsel %vm674_vm2, %v666_v11, %v682_v21  ;;  %v694_v26 = vsel %vm678_vm3, %v670_v12, %v686_v22  ;;  %v668_v27 = vadd.f32 %v858_v13, %v659_v63  ;;  %v672_v28 = vadd.f32 %v659_v63, %v652_v14 }
 0x102   : > { %v691_v29 = vsel %vm675_vm4, %v667_v17, %v683_v23  ;;  %v695_v30 = vsel %vm679_vm5, %v671_v18, %v687_v24  ;;  %v669_v31 = vadd.f32 %v859_v19, %v663_v2  ;;  %v673_v32 = vadd.f32 %v663_v2, %v653_v20 }
 0x103   : > { %v844_v33 = vpack.c.bf16 %v691_v29, %v690_v25  ;;  %v846_v34 = vpack.c.bf16 %v695_v30, %v694_v26  ;;  %vm676_vm6 = vcmp.gt.f32.partialorder %v668_v27, 0.0  ;;  %v684_v35 = vmul.f32 0.2, %v668_v27 }
 0x104   : > { %vm680_vm7 = vcmp.gt.f32.partialorder %v672_v28, 0.0  ;;  %v688_v36 = vmul.f32 0.2, %v672_v28  ;;  %vm677_vm8 = vcmp.gt.f32.partialorder %v669_v31, 0.0  ;;  %v685_v37 = vmul.f32 0.2, %v669_v31 }
 0x105   : > { %722 = vst [vmem:[%s271_s22] sm:$0xff] %v844_v33  ;;  %724 = vst [vmem:[%s271_s22 + $0x10] sm:$0xff] %v846_v34  ;;  %v692_v38 = vsel %vm676_vm6, %v668_v27, %v684_v35  ;;  %vm681_vm9 = vcmp.gt.f32.partialorder %v673_v32, 0.0  ;;  %v689_v39 = vmul.f32 0.2, %v673_v32 }
 0x106   : > { %v696_v40 = vsel %vm680_vm7, %v672_v28, %v688_v36  ;;  %v693_v41 = vsel %vm677_vm8, %v669_v31, %v685_v37 }
 0x107   : > { %v845_v42 = vpack.c.bf16 %v693_v41, %v692_v38  ;;  %v697_v43 = vsel %vm681_vm9, %v673_v32, %v689_v39 }
 0x108   : > { %v847_v44 = vpack.c.bf16 %v697_v43, %v696_v40 }
 0x109   : > { %723 = vst [vmem:[%s271_s22 + $0x8] sm:$0xff] %v845_v42 }
 0x10a   : > { %725 = vst [vmem:[%s271_s22 + $0x18] sm:$0xff] %v847_v44 }
 0x10b PF: > { %s16_s21 = sadd.s32 1, %s929_s21  }
 0x10c   : > { %p13_p4 = scmp.ge.s32.totalorder %s16_s21, 12  }
 0x10e   :  { %15 = sbr.rel (!%p13_p4) target bundleno = 1 (0x1), region = 77 }

// kernel: wnet_forward.13
= control target key start
LH: loop header
LB: loop body
LE: loop exit
PB: predicated region body
PF: predicated region fallthrough
CT: control target
= control target key end

     0   :  { %s1477_s21 = smov 0   ;;  %s1823_s0 = inlined_call_operand.vmem [shape: bf16[10,17,256], index: 0, kind: input, shape index: {}]   ;;  %s1824_s1 = inlined_call_operand.vmem [shape: bf16[10,17,256], index: 1, kind: input, shape index: {}]   ;;  %s1825_s2 = inlined_call_operand.vmem [shape: bf16[256,256], index: 2, kind: input, shape index: {}]   ;;  %s1826_s3 = inlined_call_operand.vmem [shape: bf16[256,256], index: 3, kind: input, shape index: {}]   ;;  %s1827_s4 = inlined_call_operand.vmem [shape: bf16[256,256], index: 4, kind: input, shape index: {}]   ;;  %s1828_s5 = inlined_call_operand.vmem [shape: f32[1,256], index: 5, kind: input, shape index: {}]   ;;  %s1829_s6 = inlined_call_operand.vmem [shape: bf16[10,16,256], index: 6, kind: output, shape index: {}]  }
   0x1 LB: > { %s1147_s22 = sadd.s32 4294967295, %s1440_s21   ;;  %p1151_p0 = scmp.ge.s32.totalorder %s1440_s21, 1  ;;  %s1440_s21 = sphi %s1477_s21, %s16_s21  }
   0x2   : > { %p222_p1 = scmp.lt.s32.totalorder %s1440_s21, 11 }
   0x4   : > { %p223_p2 = pnand %p1151_p0, %p222_p1 }
   0x5   : > { %v1282_v0 = vld [vmem:[%s1825_s2 + $0x4] ss:$8 sps:$4 sm:$0xff] (!%p223_p2)   ;;  %v1284_v1 = vld [vmem:[%s1825_s2] ss:$8 sps:$4 sm:$0xff] (!%p223_p2)   ;;  %v1285_v2 = vld [vmem:[%s1825_s2 + $0x14] ss:$8 sps:$4 sm:$0xff] (!%p223_p2)  }
   0x6   : > { %226 = sbr.rel (%p223_p2) target bundleno = 359 (0x167), region = 44  ;;  %724 = vmatprep.subr.bf16.mxu0 (!%p223_p2), %v1282_v0  ;;  %v1287_v3 = vld [vmem:[%s1825_s2 + $0x10] ss:$8 sps:$4 sm:$0xff] (!%p223_p2)   ;;  %v1288_v4 = vld [vmem:[%s1825_s2 + $0x24] ss:$8 sps:$4 sm:$0xff] (!%p223_p2)   ;;  %p257_p3 = scmp.lt.s32.totalorder (!%p223_p2), %s1147_s22, 9 }
   0x7   : > { %725 = vmatpush1.bf16.msra.mxu0 (!%p223_p2), %v1284_v1  ;;  %v1290_v5 = vld [vmem:[%s1825_s2 + $0x20] ss:$8 sps:$4 sm:$0xff] (!%p223_p2)   ;;  %v1291_v6 = vld [vmem:[%s1825_s2 + $0x34] ss:$8 sps:$4 sm:$0xff] (!%p223_p2)   ;;  %v1293_v7 = vld [vmem:[%s1825_s2 + $0x30] ss:$8 sps:$4 sm:$0xff] (!%p223_p2)  }
   0x8   : > { %726 = vmatprep.subr.bf16.mxu0 (!%p223_p2), %v1285_v2  ;;  %v1294_v8 = vld [vmem:[%s1825_s2 + $0x44] ss:$8 sps:$4 sm:$0xff] (!%p223_p2)   ;;  %v1296_v9 = vld [vmem:[%s1825_s2 + $0x40] ss:$8 sps:$4 sm:$0xff] (!%p223_p2)   ;;  %v1297_v10 = vld [vmem:[%s1825_s2 + $0x54] ss:$8 sps:$4 sm:$0xff] (!%p223_p2)  }
   0x9   : > { %v1299_v11 = vld [vmem:[%s1825_s2 + $0x50] ss:$8 sps:$4 sm:$0xff] (!%p223_p2)   ;;  %v1300_v12 = vld [vmem:[%s1825_s2 + $0x64] ss:$8 sps:$4 sm:$0xff] (!%p223_p2)   ;;  %v1302_v14 = vld [vmem:[%s1825_s2 + $0x60] ss:$8 sps:$4 sm:$0xff] (!%p223_p2)  }
   0xa   : > { %v1329_v13 = vld [vmem:[%s1826_s3 + $0x4] ss:$8 sps:$4 sm:$0xff] (!%p223_p2)   ;;  %v1332_v15 = vld [vmem:[%s1826_s3] ss:$8 sps:$4 sm:$0xff] (!%p223_p2)   ;;  %v1303_v17 = vld [vmem:[%s1825_s2 + $0x74] ss:$8 sps:$4 sm:$0xff] (!%p223_p2)  }
   0xb   : > { %727 = vmatpush1.bf16.msra.mxu0 (!%p223_p2), %v1287_v3  ;;  %511 = vmatprep.subr.bf16.mxu1 (!%p223_p2), %v1329_v13  ;;  %v1338_v18 = vld [vmem:[%s1826_s3 + $0x14] ss:$8 sps:$4 sm:$0xff] (!%p223_p2)   ;;  %v1341_v19 = vld [vmem:[%s1826_s3 + $0x10] ss:$8 sps:$4 sm:$0xff] (!%p223_p2)   ;;  %v1306_v21 = vld [vmem:[%s1825_s2 + $0x84] ss:$8 sps:$4 sm:$0xff] (!%p223_p2)  }
   0xc   : > { %728 = vmatprep.subr.bf16.mxu0 (!%p223_p2), %v1288_v4  ;;  %512 = vmatpush1.bf16.msra.mxu1 (!%p223_p2), %v1332_v15  ;;  %v1305_v20 = vld [vmem:[%s1825_s2 + $0x70] ss:$8 sps:$4 sm:$0xff] (!%p223_p2)   ;;  %v1345_v22 = vld [vmem:[%s1826_s3 + $0x24] ss:$8 sps:$4 sm:$0xff] (!%p223_p2)   ;;  %v1347_v23 = vld [vmem:[%s1826_s3 + $0x20] ss:$8 sps:$4 sm:$0xff] (!%p223_p2)  }
   0xd   : > { %s1831_s22 = smov (!%p257_p3, %s1147_s22), 9  ;;  %513 = vmatprep.subr.bf16.mxu1 %v1338_v18  ;;  %v1308_v24 = vld [vmem:[%s1825_s2 + $0x80] ss:$8 sps:$4 sm:$0xff]   ;;  %v1309_v25 = vld [vmem:[%s1825_s2 + $0x94] ss:$8 sps:$4 sm:$0xff]  }
   0xe   : > { %s1273_s23 = smul.u32 24, %s1831_s22  ;;  %v1351_v26 = vld [vmem:[%s1826_s3 + $0x34] ss:$8 sps:$4 sm:$0xff]   ;;  %v1353_v27 = vld [vmem:[%s1826_s3 + $0x30] ss:$8 sps:$4 sm:$0xff]   ;;  %s1262_s11 = sshll.u32 %s1831_s22, 4 }
   0xf   : > { %729 = vmatpush1.bf16.msra.mxu0 %v1290_v5  ;;  %v1357_v28 = vld [vmem:[%s1826_s3 + $0x44] ss:$8 sps:$4 sm:$0xff]   ;;  %v1311_v29 = vld [vmem:[%s1825_s2 + $0x90] ss:$8 sps:$4 sm:$0xff]   ;;  %v1359_v31 = vld [vmem:[%s1826_s3 + $0x40] ss:$8 sps:$4 sm:$0xff]   ;;  %s271_s14 = scalar_lea.vmem %s1829_s6, %s1262_s11 }
  0x10   : > { %730 = vmatprep.subr.bf16.mxu0 %v1291_v6  ;;  %s1532_s30 = scalar_lea.vmem %s1823_s0, %s1273_s23  ;;  %514 = vmatpush1.bf16.msra.mxu1 %v1341_v19  ;;  %v1312_v30 = vld [vmem:[%s1825_s2 + $0xa4] ss:$8 sps:$4 sm:$0xff]   ;;  %v1363_v32 = vld [vmem:[%s1826_s3 + $0x54] ss:$8 sps:$4 sm:$0xff]   ;;  %v1314_v33 = vld [vmem:[%s1825_s2 + $0xa0] ss:$8 sps:$4 sm:$0xff]   ;;  %s1679_s17 = scalar_lea.vmem %s1824_s1, %s1273_s23 }
  0x11   : > { %v1544_v16 = vld [vmem:[%s1532_s30 + $0x4] ss:$8 sps:$4 sm:$0xff]   ;;  %515 = vmatprep.subr.bf16.mxu1 %v1345_v22  ;;  %v1315_v34 = vld [vmem:[%s1825_s2 + $0xb4] ss:$8 sps:$4 sm:$0xff]   ;;  %v1365_v35 = vld [vmem:[%s1826_s3 + $0x50] ss:$8 sps:$4 sm:$0xff]  }
  0x12   : > { %756 = vmatprep.mubr.bf16.mxu0 %v1544_v16  ;;  %v1369_v36 = vld [vmem:[%s1826_s3 + $0x64] ss:$8 sps:$4 sm:$0xff]   ;;  %v1317_v37 = vld [vmem:[%s1825_s2 + $0xb0] ss:$8 sps:$4 sm:$0xff]   ;;  %v1371_v39 = vld [vmem:[%s1826_s3 + $0x60] ss:$8 sps:$4 sm:$0xff]  }
  0x13   : > { %731 = vmatpush1.bf16.msra.mxu0 %v1293_v7  ;;  %v1318_v38 = vld [vmem:[%s1825_s2 + $0xc4] ss:$8 sps:$4 sm:$0xff]   ;;  %v1375_v40 = vld [vmem:[%s1826_s3 + $0x74] ss:$8 sps:$4 sm:$0xff]   ;;  %v1320_v41 = vld [vmem:[%s1825_s2 + $0xc0] ss:$8 sps:$4 sm:$0xff]  }
  0x14   : > { %732 = vmatprep.subr.bf16.mxu0 %v1294_v8  ;;  %516 = vmatpush1.bf16.msra.mxu1 %v1347_v23  ;;  %v1321_v42 = vld [vmem:[%s1825_s2 + $0xd4] ss:$8 sps:$4 sm:$0xff]   ;;  %v1377_v43 = vld [vmem:[%s1826_s3 + $0x70] ss:$8 sps:$4 sm:$0xff]   ;;  %v1381_v44 = vld [vmem:[%s1826_s3 + $0x84] ss:$8 sps:$4 sm:$0xff]  }
  0x15   : > { %517 = vmatprep.subr.bf16.mxu1 %v1351_v26  ;;  %v1323_v45 = vld [vmem:[%s1825_s2 + $0xd0] ss:$8 sps:$4 sm:$0xff]   ;;  %v1324_v46 = vld [vmem:[%s1825_s2 + $0xe4] ss:$8 sps:$4 sm:$0xff]   ;;  %v1383_v47 = vld [vmem:[%s1826_s3 + $0x80] ss:$8 sps:$4 sm:$0xff]  }
  0x16   : > { %v1387_v48 = vld [vmem:[%s1826_s3 + $0x94] ss:$8 sps:$4 sm:$0xff]   ;;  %v1326_v49 = vld [vmem:[%s1825_s2 + $0xe0] ss:$8 sps:$4 sm:$0xff]   ;;  %v1389_v51 = vld [vmem:[%s1826_s3 + $0x90] ss:$8 sps:$4 sm:$0xff]  }
  0x17   : > { %733 = vmatpush1.bf16.msra.mxu0 %v1296_v9  ;;  %v1327_v50 = vld [vmem:[%s1825_s2 + $0xf4] ss:$8 sps:$4 sm:$0xff]   ;;  %v1393_v52 = vld [vmem:[%s1826_s3 + $0xa4] ss:$8 sps:$4 sm:$0xff]   ;;  %v1331_v53 = vld [vmem:[%s1825_s2 + $0xf0] ss:$8 sps:$4 sm:$0xff]  }
  0x18   : > { %734 = vmatprep.subr.bf16.mxu0 %v1297_v10  ;;  %518 = vmatpush1.bf16.msra.mxu1 %v1353_v27  ;;  %v1337_v54 = vld [vmem:[%s1827_s4 + $0x4] ss:$8 sps:$4 sm:$0xff]   ;;  %v1395_v55 = vld [vmem:[%s1826_s3 + $0xa0] ss:$8 sps:$4 sm:$0xff]   ;;  %v820_v56 = vshll.u32 %v1544_v16, 16  ;;  %v818_v0 = vshrl.u32 %v1544_v16, 16 }
  0x19   : > { %519 = vmatprep.subr.bf16.mxu1 %v1357_v28  ;;  %v1399_v57 = vld [vmem:[%s1826_s3 + $0xb4] ss:$8 sps:$4 sm:$0xff]   ;;  %v1335_v58 = vld [vmem:[%s1827_s4] ss:$8 sps:$4 sm:$0xff]   ;;  %v1401_v61 = vld [vmem:[%s1826_s3 + $0xb0] ss:$8 sps:$4 sm:$0xff]  }
  0x1a   : > { %v1672_v59 = vld [vmem:[%s1532_s30] ss:$8 sps:$4 sm:$0xff]   ;;  %v1344_v60 = vld [vmem:[%s1827_s4 + $0x14] ss:$8 sps:$4 sm:$0xff]   ;;  %v1405_v62 = vld [vmem:[%s1826_s3 + $0xc4] ss:$8 sps:$4 sm:$0xff]  }
  0x1b   : > { %735 = vmatpush1.bf16.msra.mxu0 %v1299_v11  ;;  %v1428_v63 = vld [vmem:[%s1679_s17 + $0x4] ss:$8 sps:$4 sm:$0xff]   ;;  %v822_v1 = vrot.slane %v820_v56, 1  ;;  %v1694_v2 = vld [vmem:[%s1532_s30 + $0x10] sm:$0x11] }
  0x1c   : > { %736 = vmatprep.subr.bf16.mxu0 %v1300_v12  ;;  %520 = vmatpush1.bf16.msra.mxu1 %v1359_v31  ;;  %v1342_v3 = vld [vmem:[%s1827_s4 + $0x10] ss:$8 sps:$4 sm:$0xff]   ;;  %v1225_v4 = vcombine.high %v1694_v2, %v1694_v2  ;;  %v1350_v5 = vld [vmem:[%s1827_s4 + $0x24] ss:$8 sps:$4 sm:$0xff]   ;;  %v1407_v6 = vld [vmem:[%s1826_s3 + $0xc0] ss:$8 sps:$4 sm:$0xff]  }
  0x1d   : > { %521 = vmatprep.subr.bf16.mxu1 %v1363_v32  ;;  %543 = vmatprep.mubr.bf16.mxu1 %v1428_v63  ;;  %v1411_v7 = vld [vmem:[%s1826_s3 + $0xd4] ss:$8 sps:$4 sm:$0xff]   ;;  %v823_v8 = vor.u32 %v822_v1, %v818_v0  ;;  %vm804_vm0 = vsmask.f32 7424  ;;  %v1348_v10 = vld [vmem:[%s1827_s4 + $0x20] ss:$8 sps:$4 sm:$0xff]  }
  0x1e   : > { %v825_v9 = vshll.u32 %v1225_v4, 16  ;;  %v1356_v12 = vld [vmem:[%s1827_s4 + $0x34] ss:$8 sps:$4 sm:$0xff]   ;;  %v1413_v13 = vld [vmem:[%s1826_s3 + $0xd0] ss:$8 sps:$4 sm:$0xff]  }
  0x1f   : > { %737 = vmatpush1.bf16.msra.mxu0 %v1302_v14  ;;  %v1417_v14 = vld [vmem:[%s1826_s3 + $0xe4] ss:$8 sps:$4 sm:$0xff]   ;;  %v1354_v16 = vld [vmem:[%s1827_s4 + $0x30] ss:$8 sps:$4 sm:$0xff]   ;;  %v1419_v18 = vld [vmem:[%s1826_s3 + $0xe0] ss:$8 sps:$4 sm:$0xff]  }
  0x20   : > { %738 = vmatprep.subr.bf16.mxu0 %v1303_v17  ;;  %522 = vmatpush1.bf16.msra.mxu1 %v1365_v35  ;;  %v827_v11 = vrot.slane %v825_v9, 1  ;;  %v1362_v17 = vld [vmem:[%s1827_s4 + $0x44] ss:$8 sps:$4 sm:$0xff]   ;;  %v1423_v19 = vld [vmem:[%s1826_s3 + $0xf4] ss:$8 sps:$4 sm:$0xff]  }
  0x21   : > { %523 = vmatprep.subr.bf16.mxu1 %v1369_v36  ;;  %v1425_v22 = vld [vmem:[%s1826_s3 + $0xf0] ss:$8 sps:$4 sm:$0xff]   ;;  %v1372_v26 = vld [vmem:[%s1827_s4 + $0x60] ss:$8 sps:$4 sm:$0xff]   ;;  %v1380_v27 = vld [vmem:[%s1827_s4 + $0x74] ss:$8 sps:$4 sm:$0xff]  }
  0x22   : > { %v828_v15 = vsel %vm804_vm0, %v823_v8, %v827_v11  ;;  %v1366_v23 = vld [vmem:[%s1827_s4 + $0x50] ss:$8 sps:$4 sm:$0xff]   ;;  %v1392_v31 = vld [vmem:[%s1827_s4 + $0x94] ss:$8 sps:$4 sm:$0xff]  }
  0x23   : > { %739 = vmatpush1.bf16.msra.mxu0 %v1305_v20  ;;  %v1360_v20 = vld [vmem:[%s1827_s4 + $0x40] ss:$8 sps:$4 sm:$0xff]   ;;  %v1378_v28 = vld [vmem:[%s1827_s4 + $0x70] ss:$8 sps:$4 sm:$0xff]   ;;  %v1404_v35 = vld [vmem:[%s1827_s4 + $0xb4] ss:$8 sps:$4 sm:$0xff]  }
  0x24   : > { %740 = vmatprep.subr.bf16.mxu0 %v1306_v21  ;;  %524 = vmatpush1.bf16.msra.mxu1 %v1371_v39  ;;  %v1368_v21 = vld [vmem:[%s1827_s4 + $0x54] ss:$8 sps:$4 sm:$0xff]   ;;  %v1390_v32 = vld [vmem:[%s1827_s4 + $0x90] ss:$8 sps:$4 sm:$0xff]  }
  0x25   : > { %525 = vmatprep.subr.bf16.mxu1 %v1375_v40  ;;  %v1402_v36 = vld [vmem:[%s1827_s4 + $0xb0] ss:$8 sps:$4 sm:$0xff]   ;;  %v1416_v39 = vld [vmem:[%s1827_s4 + $0xd4] ss:$8 sps:$4 sm:$0xff]   ;;  %v808_v40 = vshll.u32 %v1672_v59, 16 }
  0x27   : > { %741 = vmatpush1.bf16.msra.mxu0 %v1308_v24  ;;  %v1426_v24 = vld [vmem:[%s1679_s17] ss:$8 sps:$4 sm:$0xff]  }
  0x28   : > { %742 = vmatprep.subr.bf16.mxu0 %v1309_v25  ;;  %526 = vmatpush1.bf16.msra.mxu1 %v1377_v43  ;;  %v1374_v25 = vld [vmem:[%s1827_s4 + $0x64] ss:$8 sps:$4 sm:$0xff]  }
  0x29   : > { %527 = vmatprep.subr.bf16.mxu1 %v1381_v44  ;;  %v1422_v43 = vld [vmem:[%s1827_s4 + $0xe4] ss:$8 sps:$4 sm:$0xff]   ;;  %v806_v44 = vshrl.u32 %v1672_v59, 16 }
  0x2b   : > { %743 = vmatpush1.bf16.msra.mxu0 %v1311_v29  ;;  %v1386_v29 = vld [vmem:[%s1827_s4 + $0x84] ss:$8 sps:$4 sm:$0xff]  }
  0x2c   : > { %744 = vmatprep.subr.bf16.mxu0 %v1312_v30  ;;  %528 = vmatpush1.bf16.msra.mxu1 %v1383_v47  ;;  %v1384_v30 = vld [vmem:[%s1827_s4 + $0x80] ss:$8 sps:$4 sm:$0xff]  }
  0x2d   : > { %529 = vmatprep.subr.bf16.mxu1 %v1387_v48  ;;  %v1431_v48 = vld [vmem:[%s1827_s4 + $0xf4] ss:$8 sps:$4 sm:$0xff]  }
  0x2f   : > { %745 = vmatpush1.bf16.msra.mxu0 %v1314_v33  ;;  %v1398_v33 = vld [vmem:[%s1827_s4 + $0xa4] ss:$8 sps:$4 sm:$0xff]  }
  0x30   : > { %746 = vmatprep.subr.bf16.mxu0 %v1315_v34  ;;  %530 = vmatpush1.bf16.msra.mxu1 %v1389_v51  ;;  %v1396_v34 = vld [vmem:[%s1827_s4 + $0xa0] ss:$8 sps:$4 sm:$0xff]  }
  0x31   : > { %531 = vmatprep.subr.bf16.mxu1 %v1393_v52 }
  0x33   : > { %747 = vmatpush1.bf16.msra.mxu0 %v1317_v37  ;;  %v1410_v37 = vld [vmem:[%s1827_s4 + $0xc4] ss:$8 sps:$4 sm:$0xff]  }
  0x34   : > { %748 = vmatprep.subr.bf16.mxu0 %v1318_v38  ;;  %532 = vmatpush1.bf16.msra.mxu1 %v1395_v55  ;;  %v1408_v38 = vld [vmem:[%s1827_s4 + $0xc0] ss:$8 sps:$4 sm:$0xff]  }
  0x35   : > { %533 = vmatprep.subr.bf16.mxu1 %v1399_v57  ;;  %v1040_v57 = vlaneseq }
  0x37   : > { %749 = vmatpush1.bf16.msra.mxu0 %v1320_v41  ;;  %v1414_v41 = vld [vmem:[%s1827_s4 + $0xd0] ss:$8 sps:$4 sm:$0xff]  }
  0x38   : > { %750 = vmatprep.subr.bf16.mxu0 %v1321_v42  ;;  %534 = vmatpush1.bf16.msra.mxu1 %v1401_v61  ;;  %v1224_v42 = vcombine.low %v1694_v2, %v1694_v2 }
  0x39   : > { %535 = vmatprep.subr.bf16.mxu1 %v1405_v62 }
  0x3a   : > { %v813_v47 = vshll.u32 %v1224_v42, 16 }
  0x3b   : > { %751 = vmatpush1.bf16.msra.mxu0 %v1323_v45  ;;  %v810_v45 = vrot.slane %v808_v40, 1 }
  0x3c   : > { %752 = vmatprep.subr.bf16.mxu0 %v1324_v46  ;;  %536 = vmatpush1.bf16.msra.mxu1 %v1407_v6  ;;  %v1420_v46 = vld [vmem:[%s1827_s4 + $0xe0] ss:$8 sps:$4 sm:$0xff]   ;;  %v815_v51 = vrot.slane %v813_v47, 1 }
  0x3d   : > { %537 = vmatprep.subr.bf16.mxu1 %v1411_v7 }
  0x3f   : > { %753 = vmatpush1.bf16.msra.mxu0 %v1326_v49  ;;  %v1429_v49 = vld [vmem:[%s1827_s4 + $0xf0] ss:$8 sps:$4 sm:$0xff]  }
  0x40   : > { %754 = vmatprep.subr.bf16.mxu0 %v1327_v50  ;;  %538 = vmatpush1.bf16.msra.mxu1 %v1413_v13  ;;  %v811_v50 = vor.u32 %v810_v45, %v806_v44 }
  0x41   : > { %539 = vmatprep.subr.bf16.mxu1 %v1417_v14 }
  0x42   : > { %v816_v52 = vsel %vm804_vm0, %v811_v50, %v815_v51 }
  0x43   : > { %755 = vmatpush1.bf16.msra.mxu0 %v1331_v53 }
  0x44   : > { %991 = vmatprep.subr.bf16.mxu0 %v1337_v54  ;;  %540 = vmatpush1.bf16.msra.mxu1 %v1419_v18 }
  0x45   : > { %541 = vmatprep.subr.bf16.mxu1 %v1423_v19 }
  0x46   : > { %757 = vmatmul.mubr.bf16.vlgmr.msra.gmra.mrb[0].mxu0 %v1672_v59 }
  0x47   : > { %992 = vmatpush1.bf16.msra.mxu0 %v1335_v58  ;;  %1023 = vmatprep.mubr.bf16.mxu0 %v828_v15  ;;  %v1041_v58 = vshrl.u32 %v1040_v57, 7 }
  0x48   : > { %993 = vmatprep.subr.bf16.mxu0 %v1344_v60  ;;  %542 = vmatpush1.bf16.msra.mxu1 %v1425_v22  ;;  %v1038_v60 = vld [vmem:[%s1828_s5] sm:$0x3] }
  0x49   : > { %v1042_v59 = vsub.s32 0, %v1041_v58  ;;  %v1046_v61 = vsub.s32 1, %v1041_v58 }
  0x4b   : > { %994 = vmatpush1.bf16.msra.mxu0 %v1342_v3  ;;  %544 = vmatmul.mubr.bf16.vlgmr.msra.gmra.mrb[0].mxu1 %v1426_v24  ;;  %v1043_v62 = vrot.slane %v1038_v60, %v1042_v59  ;;  %v1047_v0 = vrot.slane %v1038_v60, %v1046_v61 }
  0x4c   : > { %995 = vmatprep.subr.bf16.mxu0 %v1350_v5 }
  0x4f   : > { %996 = vmatpush1.bf16.msra.mxu0 %v1348_v10 }
  0x50   : > { %997 = vmatprep.subr.bf16.mxu0 %v1356_v12 }
  0x53   : > { %998 = vmatpush1.bf16.msra.mxu0 %v1354_v16 }
  0x54   : > { %999 = vmatprep.subr.bf16.mxu0 %v1362_v17 }
  0x57   : > { %1000 = vmatpush1.bf16.msra.mxu0 %v1360_v20 }
  0x58   : > { %1001 = vmatprep.subr.bf16.mxu0 %v1368_v21 }
  0x5b   : > { %1002 = vmatpush1.bf16.msra.mxu0 %v1366_v23 }
  0x5c   : > { %1003 = vmatprep.subr.bf16.mxu0 %v1374_v25 }
  0x5f   : > { %1004 = vmatpush1.bf16.msra.mxu0 %v1372_v26 }
  0x60   : > { %1005 = vmatprep.subr.bf16.mxu0 %v1380_v27 }
  0x63   : > { %1006 = vmatpush1.bf16.msra.mxu0 %v1378_v28 }
  0x64   : > { %1007 = vmatprep.subr.bf16.mxu0 %v1386_v29 }
  0x67   : > { %1008 = vmatpush1.bf16.msra.mxu0 %v1384_v30 }
  0x68   : > { %1009 = vmatprep.subr.bf16.mxu0 %v1392_v31 }
  0x6b   : > { %1010 = vmatpush1.bf16.msra.mxu0 %v1390_v32 }
  0x6c   : > { %1011 = vmatprep.subr.bf16.mxu0 %v1398_v33 }
  0x6f   : > { %1012 = vmatpush1.bf16.msra.mxu0 %v1396_v34 }
  0x70   : > { %1013 = vmatprep.subr.bf16.mxu0 %v1404_v35 }
  0x73   : > { %1014 = vmatpush1.bf16.msra.mxu0 %v1402_v36 }
  0x74   : > { %1015 = vmatprep.subr.bf16.mxu0 %v1410_v37 }
  0x77   : > { %1016 = vmatpush1.bf16.msra.mxu0 %v1408_v38 }
  0x78   : > { %1017 = vmatprep.subr.bf16.mxu0 %v1416_v39 }
  0x7b   : > { %1018 = vmatpush1.bf16.msra.mxu0 %v1414_v41 }
  0x7c   : > { %1019 = vmatprep.subr.bf16.mxu0 %v1422_v43 }
  0x7f   : > { %1020 = vmatpush1.bf16.msra.mxu0 %v1420_v46 }
  0x80   : > { %1021 = vmatprep.subr.bf16.mxu0 %v1431_v48 }
  0x83   : > { %1022 = vmatpush1.bf16.msra.mxu0 %v1429_v49 }
  0x86   : > { %1024 = vmatmul.mubr.bf16.vlgmr.msra.gmra.mrb[0].mxu0 %v816_v52 }
 0x11e   : > { %v545_v53 = vpop.f32.mrb[0].mxu1 }
 0x11f   : > { %v547_v54 = vpop.f32.mrb[1].mxu1 }
 0x120   : > { %v549_v55 = vpop.f32.mrb[2].mxu1 }
 0x121   : > { %v551_v56 = vpop.f32.mrb[3].mxu1 }
 0x159   : > { %v1025_v63 = vpop.f32.mrb[0].mxu0 }
 0x15a   : > { %v1265_v1 = vadd.f32 %v1025_v63, %v545_v53  ;;  %v1027_v2 = vpop.f32.mrb[1].mxu0 }
 0x15b   : > { %v1266_v3 = vadd.f32 %v1027_v2, %v547_v54  ;;  %v1029_v4 = vpop.f32.mrb[2].mxu0 }
 0x15c   : > { %v1050_v5 = vadd.f32 %v1265_v1, %v1043_v62  ;;  %v1267_v6 = vadd.f32 %v1029_v4, %v549_v55  ;;  %v1031_v7 = vpop.f32.mrb[3].mxu0 }
 0x15d   : > { %v1051_v8 = vadd.f32 %v1266_v3, %v1047_v0  ;;  %v1268_v9 = vadd.f32 %v1031_v7, %v551_v56 }
 0x15e   : > { %vm1054_vm1 = vcmp.gt.f32.partialorder %v1050_v5, 0.0  ;;  %v1058_v10 = vmul.f32 0.2, %v1050_v5  ;;  %v1052_v11 = vadd.f32 %v1267_v6, %v1043_v62 }
 0x15f   : > { %vm1055_vm2 = vcmp.gt.f32.partialorder %v1051_v8, 0.0  ;;  %v1059_v12 = vmul.f32 0.2, %v1051_v8  ;;  %v1053_v13 = vadd.f32 %v1268_v9, %v1047_v0 }
 0x160   : > { %v1062_v14 = vsel %vm1054_vm1, %v1050_v5, %v1058_v10  ;;  %vm1056_vm3 = vcmp.gt.f32.partialorder %v1052_v11, 0.0  ;;  %v1060_v15 = vmul.f32 0.2, %v1052_v11 }
 0x161   : > { %v1063_v16 = vsel %vm1055_vm2, %v1051_v8, %v1059_v12  ;;  %vm1057_vm4 = vcmp.gt.f32.partialorder %v1053_v13, 0.0  ;;  %v1061_v17 = vmul.f32 0.2, %v1053_v13 }
 0x162   : > { %v1263_v18 = vpack.c.bf16 %v1063_v16, %v1062_v14  ;;  %v1064_v19 = vsel %vm1056_vm3, %v1052_v11, %v1060_v15 }
 0x163   : > { %v1065_v20 = vsel %vm1057_vm4, %v1053_v13, %v1061_v17 }
 0x164   : > { %1078 = vst [vmem:[%s271_s14] sm:$0xff] %v1263_v18  ;;  %v1264_v21 = vpack.c.bf16 %v1065_v20, %v1064_v19 }
 0x166   : > { %1079 = vst [vmem:[%s271_s14 + $0x8] sm:$0xff] %v1264_v21 }
 0x167 PF: > { %s16_s21 = sadd.s32 1, %s1440_s21  }
 0x168   : > { %p13_p4 = scmp.ge.s32.totalorder %s16_s21, 12  }
 0x16a   :  { %15 = sbr.rel (!%p13_p4) target bundleno = 1 (0x1), region = 77 }

// kernel: wnet_forward.14
= control target key start
LH: loop header
LB: loop body
LE: loop exit
PB: predicated region body
PF: predicated region fallthrough
CT: control target
= control target key end

     0   :  { %s1428_s21 = smov 0   ;;  %s1759_s0 = inlined_call_operand.vmem [shape: bf16[10,9,256], index: 0, kind: input, shape index: {}]   ;;  %s1760_s1 = inlined_call_operand.vmem [shape: bf16[10,9,256], index: 1, kind: input, shape index: {}]   ;;  %s1761_s2 = inlined_call_operand.vmem [shape: bf16[256,256], index: 2, kind: input, shape index: {}]   ;;  %s1762_s3 = inlined_call_operand.vmem [shape: bf16[256,256], index: 3, kind: input, shape index: {}]   ;;  %s1763_s4 = inlined_call_operand.vmem [shape: bf16[256,256], index: 4, kind: input, shape index: {}]   ;;  %s1764_s5 = inlined_call_operand.vmem [shape: f32[1,256], index: 5, kind: input, shape index: {}]   ;;  %s1765_s6 = inlined_call_operand.vmem [shape: bf16[10,8,256], index: 6, kind: output, shape index: {}]  }
   0x1 LB: > { %s1107_s22 = sadd.s32 4294967295, %s1391_s21   ;;  %p1111_p0 = scmp.ge.s32.totalorder %s1391_s21, 1  ;;  %s1391_s21 = sphi %s1428_s21, %s16_s21  }
   0x2   : > { %p222_p1 = scmp.lt.s32.totalorder %s1391_s21, 11 }
   0x4   : > { %p223_p2 = pnand %p1111_p0, %p222_p1 }
   0x5   : > { %v1235_v0 = vld [vmem:[%s1762_s3 + $0x4] ss:$8 sps:$4 sm:$0xff] (!%p223_p2)   ;;  %v1239_v2 = vld [vmem:[%s1762_s3] ss:$8 sps:$4 sm:$0xff] (!%p223_p2)   ;;  %v1241_v4 = vld [vmem:[%s1762_s3 + $0x14] ss:$8 sps:$4 sm:$0xff] (!%p223_p2)  }
   0x6   : > { %226 = sbr.rel (%p223_p2) target bundleno = 357 (0x165), region = 44  ;;  %v1237_v1 = vld [vmem:[%s1761_s2 + $0x4] ss:$8 sps:$4 sm:$0xff] (!%p223_p2)   ;;  %506 = vmatprep.subr.bf16.mxu0 (!%p223_p2), %v1235_v0  ;;  %v1240_v3 = vld [vmem:[%s1761_s2] ss:$8 sps:$4 sm:$0xff] (!%p223_p2)   ;;  %p257_p3 = scmp.lt.s32.totalorder (!%p223_p2), %s1107_s22, 9 }
   0x7   : > { %714 = vmatprep.subr.bf16.mxu1 (!%p223_p2), %v1237_v1  ;;  %507 = vmatpush1.bf16.msra.mxu0 (!%p223_p2), %v1239_v2  ;;  %v1243_v5 = vld [vmem:[%s1761_s2 + $0x14] ss:$8 sps:$4 sm:$0xff] (!%p223_p2)   ;;  %v1245_v6 = vld [vmem:[%s1762_s3 + $0x10] ss:$8 sps:$4 sm:$0xff] (!%p223_p2)   ;;  %v1247_v8 = vld [vmem:[%s1762_s3 + $0x24] ss:$8 sps:$4 sm:$0xff] (!%p223_p2)  }
   0x8   : > { %715 = vmatpush1.bf16.msra.mxu1 (!%p223_p2), %v1240_v3  ;;  %508 = vmatprep.subr.bf16.mxu0 (!%p223_p2), %v1241_v4  ;;  %v1246_v7 = vld [vmem:[%s1761_s2 + $0x10] ss:$8 sps:$4 sm:$0xff] (!%p223_p2)   ;;  %v1249_v9 = vld [vmem:[%s1761_s2 + $0x24] ss:$8 sps:$4 sm:$0xff] (!%p223_p2)   ;;  %v1251_v10 = vld [vmem:[%s1762_s3 + $0x20] ss:$8 sps:$4 sm:$0xff] (!%p223_p2)  }
   0x9   : > { %716 = vmatprep.subr.bf16.mxu1 (!%p223_p2), %v1243_v5  ;;  %v1252_v11 = vld [vmem:[%s1761_s2 + $0x20] ss:$8 sps:$4 sm:$0xff] (!%p223_p2)   ;;  %v1253_v12 = vld [vmem:[%s1762_s3 + $0x34] ss:$8 sps:$4 sm:$0xff] (!%p223_p2)   ;;  %v1257_v14 = vld [vmem:[%s1762_s3 + $0x30] ss:$8 sps:$4 sm:$0xff] (!%p223_p2)  }
   0xa   : > { %v1255_v13 = vld [vmem:[%s1761_s2 + $0x34] ss:$8 sps:$4 sm:$0xff] (!%p223_p2)   ;;  %v1258_v15 = vld [vmem:[%s1761_s2 + $0x30] ss:$8 sps:$4 sm:$0xff] (!%p223_p2)   ;;  %v1259_v16 = vld [vmem:[%s1762_s3 + $0x44] ss:$8 sps:$4 sm:$0xff] (!%p223_p2)  }
   0xb   : > { %509 = vmatpush1.bf16.msra.mxu0 (!%p223_p2), %v1245_v6  ;;  %v1261_v17 = vld [vmem:[%s1761_s2 + $0x44] ss:$8 sps:$4 sm:$0xff] (!%p223_p2)   ;;  %v1263_v18 = vld [vmem:[%s1762_s3 + $0x40] ss:$8 sps:$4 sm:$0xff] (!%p223_p2)   ;;  %v1265_v20 = vld [vmem:[%s1762_s3 + $0x54] ss:$8 sps:$4 sm:$0xff] (!%p223_p2)  }
   0xc   : > { %717 = vmatpush1.bf16.msra.mxu1 (!%p223_p2), %v1246_v7  ;;  %510 = vmatprep.subr.bf16.mxu0 (!%p223_p2), %v1247_v8  ;;  %v1264_v19 = vld [vmem:[%s1761_s2 + $0x40] ss:$8 sps:$4 sm:$0xff] (!%p223_p2)   ;;  %v1267_v21 = vld [vmem:[%s1761_s2 + $0x54] ss:$8 sps:$4 sm:$0xff] (!%p223_p2)   ;;  %v1269_v22 = vld [vmem:[%s1762_s3 + $0x50] ss:$8 sps:$4 sm:$0xff] (!%p223_p2)  }
   0xd   : > { %718 = vmatprep.subr.bf16.mxu1 %v1249_v9  ;;  %v1270_v23 = vld [vmem:[%s1761_s2 + $0x50] ss:$8 sps:$4 sm:$0xff]   ;;  %v1271_v24 = vld [vmem:[%s1762_s3 + $0x64] ss:$8 sps:$4 sm:$0xff]   ;;  %v1275_v26 = vld [vmem:[%s1762_s3 + $0x60] ss:$8 sps:$4 sm:$0xff]  }
   0xe   : > { %v1273_v25 = vld [vmem:[%s1761_s2 + $0x64] ss:$8 sps:$4 sm:$0xff]   ;;  %v1276_v27 = vld [vmem:[%s1761_s2 + $0x60] ss:$8 sps:$4 sm:$0xff]   ;;  %v1277_v28 = vld [vmem:[%s1762_s3 + $0x74] ss:$8 sps:$4 sm:$0xff]  }
   0xf   : > { %511 = vmatpush1.bf16.msra.mxu0 %v1251_v10  ;;  %v1279_v29 = vld [vmem:[%s1761_s2 + $0x74] ss:$8 sps:$4 sm:$0xff]   ;;  %v1281_v30 = vld [vmem:[%s1762_s3 + $0x70] ss:$8 sps:$4 sm:$0xff]   ;;  %v1283_v32 = vld [vmem:[%s1762_s3 + $0x84] ss:$8 sps:$4 sm:$0xff]  }
  0x10   : > { %719 = vmatpush1.bf16.msra.mxu1 %v1252_v11  ;;  %512 = vmatprep.subr.bf16.mxu0 %v1253_v12  ;;  %v1282_v31 = vld [vmem:[%s1761_s2 + $0x70] ss:$8 sps:$4 sm:$0xff]   ;;  %v1285_v33 = vld [vmem:[%s1761_s2 + $0x84] ss:$8 sps:$4 sm:$0xff]   ;;  %v1287_v34 = vld [vmem:[%s1762_s3 + $0x80] ss:$8 sps:$4 sm:$0xff]  }
  0x11   : > { %720 = vmatprep.subr.bf16.mxu1 %v1255_v13  ;;  %v1288_v35 = vld [vmem:[%s1761_s2 + $0x80] ss:$8 sps:$4 sm:$0xff]   ;;  %v1289_v36 = vld [vmem:[%s1762_s3 + $0x94] ss:$8 sps:$4 sm:$0xff]   ;;  %s1767_s22 = smov (!%p257_p3, %s1107_s22), 9 }
  0x12   : > { %v1291_v37 = vld [vmem:[%s1761_s2 + $0x94] ss:$8 sps:$4 sm:$0xff]   ;;  %v1293_v38 = vld [vmem:[%s1762_s3 + $0x90] ss:$8 sps:$4 sm:$0xff]   ;;  %v1295_v40 = vld [vmem:[%s1762_s3 + $0xa4] ss:$8 sps:$4 sm:$0xff]  }
  0x13   : > { %513 = vmatpush1.bf16.msra.mxu0 %v1257_v14  ;;  %v1294_v39 = vld [vmem:[%s1761_s2 + $0x90] ss:$8 sps:$4 sm:$0xff]   ;;  %s1223_s15 = sshll.u32 %s1767_s22, 4  ;;  %v1297_v41 = vld [vmem:[%s1761_s2 + $0xa4] ss:$8 sps:$4 sm:$0xff]  }
  0x14   : > { %721 = vmatpush1.bf16.msra.mxu1 %v1258_v15  ;;  %514 = vmatprep.subr.bf16.mxu0 %v1259_v16  ;;  %v1299_v42 = vld [vmem:[%s1762_s3 + $0xa0] ss:$8 sps:$4 sm:$0xff]   ;;  %s266_s26 = scalar_lea.vmem %s1760_s1, %s1223_s15  ;;  %v1301_v44 = vld [vmem:[%s1762_s3 + $0xb4] ss:$8 sps:$4 sm:$0xff]   ;;  %s261_s7 = scalar_lea.vmem %s1759_s0, %s1223_s15  ;;  %v1305_v47 = vld [vmem:[%s1762_s3 + $0xb0] ss:$8 sps:$4 sm:$0xff]  }
  0x15   : > { %722 = vmatprep.subr.bf16.mxu1 %v1261_v17  ;;  %v1300_v43 = vld [vmem:[%s1761_s2 + $0xa0] ss:$8 sps:$4 sm:$0xff]   ;;  %v1303_v45 = vld [vmem:[%s1761_s2 + $0xb4] ss:$8 sps:$4 sm:$0xff]   ;;  %v1306_v50 = vld [vmem:[%s1761_s2 + $0xb0] ss:$8 sps:$4 sm:$0xff]  }
  0x16   : > { %v273_v46 = vld [vmem:[%s266_s26] sm:$0xff]  ;;  %v1313_v56 = vld [vmem:[%s1762_s3 + $0xd4] ss:$8 sps:$4 sm:$0xff]   ;;  %v1615_v58 = vld [vmem:[%s261_s7 + $0x8] sm:$0x11]  ;;  %s1225_s26 = sshll.u32 %s1767_s22, 3 }
  0x17   : > { %515 = vmatpush1.bf16.msra.mxu0 %v1263_v18  ;;  %v1119_v48 = vcombine.high %v273_v46, %v273_v46  ;;  %v1590_v49 = vld [vmem:[%s261_s7] sm:$0xff]  ;;  %v1315_v57 = vld [vmem:[%s1761_s2 + $0xd4] ss:$8 sps:$4 sm:$0xff]   ;;  %v1317_v59 = vld [vmem:[%s1762_s3 + $0xd0] ss:$8 sps:$4 sm:$0xff]   ;;  %v1118_v10 = vcombine.low %v273_v46, %v273_v46  ;;  %s271_s29 = scalar_lea.vmem %s1765_s6, %s1225_s26 }
  0x18   : > { %723 = vmatpush1.bf16.msra.mxu1 %v1264_v19  ;;  %516 = vmatprep.subr.bf16.mxu0 %v1265_v20  ;;  %v1307_v51 = vld [vmem:[%s1762_s3 + $0xc4] ss:$8 sps:$4 sm:$0xff]   ;;  %v1153_v52 = vcombine.high %v1590_v49, %v1590_v49  ;;  %v1311_v54 = vld [vmem:[%s1762_s3 + $0xc0] ss:$8 sps:$4 sm:$0xff]   ;;  %v1318_v60 = vld [vmem:[%s1761_s2 + $0xd0] ss:$8 sps:$4 sm:$0xff]   ;;  %v1187_v62 = vcombine.high %v1590_v49, %v1615_v58  ;;  %v1152_v11 = vcombine.low %v1590_v49, %v1590_v49 }
  0x19   : > { %724 = vmatprep.subr.bf16.mxu1 %v1267_v21  ;;  %v1309_v53 = vld [vmem:[%s1761_s2 + $0xc4] ss:$8 sps:$4 sm:$0xff]   ;;  %538 = vmatprep.mubr.bf16.mxu0 %v1119_v48  ;;  %v1312_v55 = vld [vmem:[%s1761_s2 + $0xc0] ss:$8 sps:$4 sm:$0xff]   ;;  %v1325_v2 = vld [vmem:[%s1762_s3 + $0xf4] ss:$8 sps:$4 sm:$0xff]  }
  0x1a   : > { %746 = vmatprep.mubr.bf16.mxu1 %v1153_v52  ;;  %v1319_v61 = vld [vmem:[%s1762_s3 + $0xe4] ss:$8 sps:$4 sm:$0xff]   ;;  %v1323_v0 = vld [vmem:[%s1762_s3 + $0xe0] ss:$8 sps:$4 sm:$0xff]   ;;  %v802_v3 = vshll.u32 %v1187_v62, 16  ;;  %v800_v7 = vshrl.u32 %v1187_v62, 16 }
  0x1b   : > { %517 = vmatpush1.bf16.msra.mxu0 %v1269_v22  ;;  %v1321_v63 = vld [vmem:[%s1761_s2 + $0xe4] ss:$8 sps:$4 sm:$0xff]   ;;  %v1324_v1 = vld [vmem:[%s1761_s2 + $0xe0] ss:$8 sps:$4 sm:$0xff]   ;;  %v1327_v4 = vld [vmem:[%s1761_s2 + $0xf4] ss:$8 sps:$4 sm:$0xff]  }
  0x1c   : > { %725 = vmatpush1.bf16.msra.mxu1 %v1270_v23  ;;  %518 = vmatprep.subr.bf16.mxu0 %v1271_v24  ;;  %v1329_v5 = vld [vmem:[%s1762_s3 + $0xf0] ss:$8 sps:$4 sm:$0xff]   ;;  %v804_v8 = vrot.slane %v802_v3, 1  ;;  %v1338_v9 = vld [vmem:[%s1763_s4 + $0x4] ss:$8 sps:$4 sm:$0xff]  }
  0x1d   : > { %726 = vmatprep.subr.bf16.mxu1 %v1273_v25  ;;  %v1330_v6 = vld [vmem:[%s1761_s2 + $0xf0] ss:$8 sps:$4 sm:$0xff]   ;;  %v1336_v12 = vld [vmem:[%s1763_s4] ss:$8 sps:$4 sm:$0xff]   ;;  %v1341_v14 = vld [vmem:[%s1763_s4 + $0x14] ss:$8 sps:$4 sm:$0xff]  }
  0x1e   : > { %v805_v13 = vor.u32 %v804_v8, %v800_v7  ;;  %v1339_v15 = vld [vmem:[%s1763_s4 + $0x10] ss:$8 sps:$4 sm:$0xff]   ;;  %v1344_v16 = vld [vmem:[%s1763_s4 + $0x24] ss:$8 sps:$4 sm:$0xff]   ;;  %v1342_v17 = vld [vmem:[%s1763_s4 + $0x20] ss:$8 sps:$4 sm:$0xff]  }
  0x1f   : > { %519 = vmatpush1.bf16.msra.mxu0 %v1275_v26  ;;  %v1347_v18 = vld [vmem:[%s1763_s4 + $0x34] ss:$8 sps:$4 sm:$0xff]   ;;  %v1345_v19 = vld [vmem:[%s1763_s4 + $0x30] ss:$8 sps:$4 sm:$0xff]   ;;  %v1350_v20 = vld [vmem:[%s1763_s4 + $0x44] ss:$8 sps:$4 sm:$0xff]  }
  0x20   : > { %727 = vmatpush1.bf16.msra.mxu1 %v1276_v27  ;;  %520 = vmatprep.subr.bf16.mxu0 %v1277_v28  ;;  %v1348_v21 = vld [vmem:[%s1763_s4 + $0x40] ss:$8 sps:$4 sm:$0xff]   ;;  %v1353_v22 = vld [vmem:[%s1763_s4 + $0x54] ss:$8 sps:$4 sm:$0xff]   ;;  %v1351_v23 = vld [vmem:[%s1763_s4 + $0x50] ss:$8 sps:$4 sm:$0xff]  }
  0x21   : > { %728 = vmatprep.subr.bf16.mxu1 %v1279_v29  ;;  %v1356_v24 = vld [vmem:[%s1763_s4 + $0x64] ss:$8 sps:$4 sm:$0xff]   ;;  %v1354_v25 = vld [vmem:[%s1763_s4 + $0x60] ss:$8 sps:$4 sm:$0xff]   ;;  %v1359_v26 = vld [vmem:[%s1763_s4 + $0x74] ss:$8 sps:$4 sm:$0xff]  }
  0x22   : > { %v1357_v27 = vld [vmem:[%s1763_s4 + $0x70] ss:$8 sps:$4 sm:$0xff]   ;;  %v1362_v28 = vld [vmem:[%s1763_s4 + $0x84] ss:$8 sps:$4 sm:$0xff]   ;;  %v1360_v29 = vld [vmem:[%s1763_s4 + $0x80] ss:$8 sps:$4 sm:$0xff]  }
  0x23   : > { %521 = vmatpush1.bf16.msra.mxu0 %v1281_v30  ;;  %v1365_v30 = vld [vmem:[%s1763_s4 + $0x94] ss:$8 sps:$4 sm:$0xff]   ;;  %v1011_v62 = vld [vmem:[%s1764_s5] sm:$0x3] }
  0x24   : > { %729 = vmatpush1.bf16.msra.mxu1 %v1282_v31  ;;  %522 = vmatprep.subr.bf16.mxu0 %v1283_v32  ;;  %v1363_v31 = vld [vmem:[%s1763_s4 + $0x90] ss:$8 sps:$4 sm:$0xff]   ;;  %v1368_v32 = vld [vmem:[%s1763_s4 + $0xa4] ss:$8 sps:$4 sm:$0xff]  }
  0x25   : > { %730 = vmatprep.subr.bf16.mxu1 %v1285_v33  ;;  %v1366_v33 = vld [vmem:[%s1763_s4 + $0xa0] ss:$8 sps:$4 sm:$0xff]  }
  0x27   : > { %523 = vmatpush1.bf16.msra.mxu0 %v1287_v34  ;;  %v1371_v34 = vld [vmem:[%s1763_s4 + $0xb4] ss:$8 sps:$4 sm:$0xff]  }
  0x28   : > { %731 = vmatpush1.bf16.msra.mxu1 %v1288_v35  ;;  %524 = vmatprep.subr.bf16.mxu0 %v1289_v36  ;;  %v1369_v35 = vld [vmem:[%s1763_s4 + $0xb0] ss:$8 sps:$4 sm:$0xff]   ;;  %v1374_v36 = vld [vmem:[%s1763_s4 + $0xc4] ss:$8 sps:$4 sm:$0xff]  }
  0x29   : > { %732 = vmatprep.subr.bf16.mxu1 %v1291_v37  ;;  %v1372_v37 = vld [vmem:[%s1763_s4 + $0xc0] ss:$8 sps:$4 sm:$0xff]  }
  0x2b   : > { %525 = vmatpush1.bf16.msra.mxu0 %v1293_v38  ;;  %v1377_v38 = vld [vmem:[%s1763_s4 + $0xd4] ss:$8 sps:$4 sm:$0xff]  }
  0x2c   : > { %733 = vmatpush1.bf16.msra.mxu1 %v1294_v39  ;;  %526 = vmatprep.subr.bf16.mxu0 %v1295_v40  ;;  %v1186_v39 = vcombine.low %v1590_v49, %v1615_v58  ;;  %v1375_v40 = vld [vmem:[%s1763_s4 + $0xd0] ss:$8 sps:$4 sm:$0xff]  }
  0x2d   : > { %734 = vmatprep.subr.bf16.mxu1 %v1297_v41  ;;  %v1380_v41 = vld [vmem:[%s1763_s4 + $0xe4] ss:$8 sps:$4 sm:$0xff]  }
  0x2f   : > { %527 = vmatpush1.bf16.msra.mxu0 %v1299_v42  ;;  %v795_v42 = vshll.u32 %v1186_v39, 16 }
  0x30   : > { %735 = vmatpush1.bf16.msra.mxu1 %v1300_v43  ;;  %528 = vmatprep.subr.bf16.mxu0 %v1301_v44  ;;  %v1378_v43 = vld [vmem:[%s1763_s4 + $0xe0] ss:$8 sps:$4 sm:$0xff]   ;;  %v1383_v44 = vld [vmem:[%s1763_s4 + $0xf4] ss:$8 sps:$4 sm:$0xff]  }
  0x31   : > { %736 = vmatprep.subr.bf16.mxu1 %v1303_v45  ;;  %v793_v45 = vshrl.u32 %v1186_v39, 16  ;;  %v797_v46 = vrot.slane %v795_v42, 1 }
  0x33   : > { %529 = vmatpush1.bf16.msra.mxu0 %v1305_v47  ;;  %v1381_v47 = vld [vmem:[%s1763_s4 + $0xf0] ss:$8 sps:$4 sm:$0xff]   ;;  %v798_v48 = vor.u32 %v797_v46, %v793_v45 }
  0x34   : > { %737 = vmatpush1.bf16.msra.mxu1 %v1306_v50  ;;  %530 = vmatprep.subr.bf16.mxu0 %v1307_v51 }
  0x35   : > { %738 = vmatprep.subr.bf16.mxu1 %v1309_v53 }
  0x37   : > { %531 = vmatpush1.bf16.msra.mxu0 %v1311_v54 }
  0x38   : > { %739 = vmatpush1.bf16.msra.mxu1 %v1312_v55  ;;  %532 = vmatprep.subr.bf16.mxu0 %v1313_v56 }
  0x39   : > { %740 = vmatprep.subr.bf16.mxu1 %v1315_v57 }
  0x3b   : > { %533 = vmatpush1.bf16.msra.mxu0 %v1317_v59  ;;  %v1013_v59 = vlaneseq }
  0x3c   : > { %741 = vmatpush1.bf16.msra.mxu1 %v1318_v60  ;;  %534 = vmatprep.subr.bf16.mxu0 %v1319_v61 }
  0x3d   : > { %742 = vmatprep.subr.bf16.mxu1 %v1321_v63  ;;  %v1014_v60 = vshrl.u32 %v1013_v59, 7 }
  0x3f   : > { %535 = vmatpush1.bf16.msra.mxu0 %v1323_v0  ;;  %v1015_v61 = vsub.s32 0, %v1014_v60  ;;  %v1019_v63 = vsub.s32 1, %v1014_v60 }
  0x40   : > { %743 = vmatpush1.bf16.msra.mxu1 %v1324_v1  ;;  %536 = vmatprep.subr.bf16.mxu0 %v1325_v2 }
  0x41   : > { %744 = vmatprep.subr.bf16.mxu1 %v1327_v4  ;;  %v1016_v0 = vrot.slane %v1011_v62, %v1015_v61  ;;  %v1020_v2 = vrot.slane %v1011_v62, %v1019_v63 }
  0x43   : > { %537 = vmatpush1.bf16.msra.mxu0 %v1329_v5 }
  0x44   : > { %745 = vmatpush1.bf16.msra.mxu1 %v1330_v6  ;;  %968 = vmatprep.subr.bf16.mxu0 %v1338_v9 }
  0x46   : > { %539 = vmatmul.mubr.bf16.vlgmr.msra.gmra.mrb[0].mxu0 %v1118_v10 }
  0x47   : > { %747 = vmatmul.mubr.bf16.vlgmr.msra.gmra.mrb[0].mxu1 %v1152_v11  ;;  %969 = vmatpush1.bf16.msra.mxu0 %v1336_v12 }
  0x48   : > { %1000 = vmatprep.mubr.bf16.mxu0 %v805_v13  ;;  %970 = vmatprep.subr.bf16.mxu0 %v1341_v14 }
  0x4b   : > { %971 = vmatpush1.bf16.msra.mxu0 %v1339_v15 }
  0x4c   : > { %972 = vmatprep.subr.bf16.mxu0 %v1344_v16 }
  0x4f   : > { %973 = vmatpush1.bf16.msra.mxu0 %v1342_v17 }
  0x50   : > { %974 = vmatprep.subr.bf16.mxu0 %v1347_v18 }
  0x53   : > { %975 = vmatpush1.bf16.msra.mxu0 %v1345_v19 }
  0x54   : > { %976 = vmatprep.subr.bf16.mxu0 %v1350_v20 }
  0x57   : > { %977 = vmatpush1.bf16.msra.mxu0 %v1348_v21 }
  0x58   : > { %978 = vmatprep.subr.bf16.mxu0 %v1353_v22 }
  0x5b   : > { %979 = vmatpush1.bf16.msra.mxu0 %v1351_v23 }
  0x5c   : > { %980 = vmatprep.subr.bf16.mxu0 %v1356_v24 }
  0x5f   : > { %981 = vmatpush1.bf16.msra.mxu0 %v1354_v25 }
  0x60   : > { %982 = vmatprep.subr.bf16.mxu0 %v1359_v26 }
  0x63   : > { %983 = vmatpush1.bf16.msra.mxu0 %v1357_v27 }
  0x64   : > { %984 = vmatprep.subr.bf16.mxu0 %v1362_v28 }
  0x67   : > { %985 = vmatpush1.bf16.msra.mxu0 %v1360_v29 }
  0x68   : > { %986 = vmatprep.subr.bf16.mxu0 %v1365_v30 }
  0x6b   : > { %987 = vmatpush1.bf16.msra.mxu0 %v1363_v31 }
  0x6c   : > { %988 = vmatprep.subr.bf16.mxu0 %v1368_v32 }
  0x6f   : > { %989 = vmatpush1.bf16.msra.mxu0 %v1366_v33 }
  0x70   : > { %990 = vmatprep.subr.bf16.mxu0 %v1371_v34 }
  0x73   : > { %991 = vmatpush1.bf16.msra.mxu0 %v1369_v35 }
  0x74   : > { %992 = vmatprep.subr.bf16.mxu0 %v1374_v36 }
  0x77   : > { %993 = vmatpush1.bf16.msra.mxu0 %v1372_v37 }
  0x78   : > { %994 = vmatprep.subr.bf16.mxu0 %v1377_v38 }
  0x7b   : > { %995 = vmatpush1.bf16.msra.mxu0 %v1375_v40 }
  0x7c   : > { %996 = vmatprep.subr.bf16.mxu0 %v1380_v41 }
  0x7f   : > { %997 = vmatpush1.bf16.msra.mxu0 %v1378_v43 }
  0x80   : > { %998 = vmatprep.subr.bf16.mxu0 %v1383_v44 }
  0x83   : > { %999 = vmatpush1.bf16.msra.mxu0 %v1381_v47 }
  0x86   : > { %1001 = vmatmul.mubr.bf16.vlgmr.msra.gmra.mrb[4].mxu0 %v798_v48 }
 0x119   : > { %v540_v49 = vpop.f32.mrb[0].mxu0 }
 0x11a   : > { %v748_v50 = vpop.f32.mrb[0].mxu1  ;;  %v542_v52 = vpop.f32.mrb[1].mxu0 }
 0x11b   : > { %v749_v51 = vadd.f32 %v748_v50, %v540_v49  ;;  %v750_v53 = vpop.f32.mrb[1].mxu1  ;;  %v544_v55 = vpop.f32.mrb[2].mxu0 }
 0x11c   : > { %v751_v54 = vadd.f32 %v750_v53, %v542_v52  ;;  %v752_v56 = vpop.f32.mrb[2].mxu1  ;;  %v545_v57 = vpop.f32.mrb[3].mxu0 }
 0x11d   : > { %v753_v58 = vpop.f32.mrb[3].mxu1 }
 0x159   : > { %v1002_v1 = vpop.f32.mrb[4].mxu0 }
 0x15a   : > { %v1009_v3 = vadd.f32 %v1002_v1, %v749_v51  ;;  %v1004_v4 = vpop.f32.mrb[5].mxu0 }
 0x15b   : > { %v1010_v5 = vadd.f32 %v1004_v4, %v751_v54  ;;  %v1006_v6 = vpop.f32.mrb[6].mxu0 }
 0x15c   : > { %v1023_v7 = vadd.f32 %v1016_v0, %v1009_v3  ;;  %v1007_v8 = vpop.f32.mrb[7].mxu0 }
 0x15d   : > { %v1024_v9 = vadd.f32 %v1020_v2, %v1010_v5 }
 0x15e   : > { %vm1025_vm0 = vcmp.gt.f32.partialorder %v1023_v7, 0.0  ;;  %v1027_v10 = vmul.f32 0.2, %v1023_v7 }
 0x15f   : > { %vm1026_vm1 = vcmp.gt.f32.partialorder %v1024_v9, 0.0  ;;  %v1028_v11 = vmul.f32 0.2, %v1024_v9 }
 0x160   : > { %v1029_v12 = vsel %vm1025_vm0, %v1023_v7, %v1027_v10 }
 0x161   : > { %v1030_v13 = vsel %vm1026_vm1, %v1024_v9, %v1028_v11 }
 0x162   : > { %v1226_v14 = vpack.c.bf16 %v1030_v13, %v1029_v12 }
 0x164   : > { %1039 = vst [vmem:[%s271_s29] sm:$0xff] %v1226_v14 }
 0x165 PF: > { %s16_s21 = sadd.s32 1, %s1391_s21  }
 0x166   : > { %p13_p4 = scmp.ge.s32.totalorder %s16_s21, 12  }
 0x168   :  { %15 = sbr.rel (!%p13_p4) target bundleno = 1 (0x1), region = 77 }

// kernel: wnet_forward.10
= control target key start
LH: loop header
LB: loop body
LE: loop exit
PB: predicated region body
PF: predicated region fallthrough
CT: control target
= control target key end

     0   :  { %s1477_s21 = smov 0   ;;  %s1823_s0 = inlined_call_operand.vmem [shape: bf16[2,17,256], index: 0, kind: input, shape index: {}]   ;;  %s1824_s1 = inlined_call_operand.vmem [shape: bf16[2,17,256], index: 1, kind: input, shape index: {}]   ;;  %s1825_s2 = inlined_call_operand.vmem [shape: bf16[256,256], index: 2, kind: input, shape index: {}]   ;;  %s1826_s3 = inlined_call_operand.vmem [shape: bf16[256,256], index: 3, kind: input, shape index: {}]   ;;  %s1827_s4 = inlined_call_operand.vmem [shape: bf16[256,256], index: 4, kind: input, shape index: {}]   ;;  %s1828_s5 = inlined_call_operand.vmem [shape: f32[1,256], index: 5, kind: input, shape index: {}]   ;;  %s1829_s6 = inlined_call_operand.vmem [shape: bf16[2,16,256], index: 6, kind: output, shape index: {}]  }
   0x1 LB: > { %s1147_s22 = sadd.s32 4294967295, %s1440_s21   ;;  %p1151_p0 = scmp.ge.s32.totalorder %s1440_s21, 1  ;;  %s1440_s21 = sphi %s1477_s21, %s16_s21  }
   0x2   : > { %p222_p1 = scmp.lt.s32.totalorder %s1440_s21, 3 }
   0x4   : > { %p223_p2 = pnand %p1151_p0, %p222_p1 }
   0x5   : > { %v1282_v0 = vld [vmem:[%s1825_s2 + $0x4] ss:$8 sps:$4 sm:$0xff] (!%p223_p2)   ;;  %v1284_v1 = vld [vmem:[%s1825_s2] ss:$8 sps:$4 sm:$0xff] (!%p223_p2)   ;;  %v1285_v2 = vld [vmem:[%s1825_s2 + $0x14] ss:$8 sps:$4 sm:$0xff] (!%p223_p2)  }
   0x6   : > { %226 = sbr.rel (%p223_p2) target bundleno = 359 (0x167), region = 44  ;;  %724 = vmatprep.subr.bf16.mxu0 (!%p223_p2), %v1282_v0  ;;  %v1287_v3 = vld [vmem:[%s1825_s2 + $0x10] ss:$8 sps:$4 sm:$0xff] (!%p223_p2)   ;;  %v1288_v4 = vld [vmem:[%s1825_s2 + $0x24] ss:$8 sps:$4 sm:$0xff] (!%p223_p2)   ;;  %p257_p3 = scmp.lt.s32.totalorder (!%p223_p2), %s1147_s22, 1 }
   0x7   : > { %725 = vmatpush1.bf16.msra.mxu0 (!%p223_p2), %v1284_v1  ;;  %v1290_v5 = vld [vmem:[%s1825_s2 + $0x20] ss:$8 sps:$4 sm:$0xff] (!%p223_p2)   ;;  %v1291_v6 = vld [vmem:[%s1825_s2 + $0x34] ss:$8 sps:$4 sm:$0xff] (!%p223_p2)   ;;  %v1293_v7 = vld [vmem:[%s1825_s2 + $0x30] ss:$8 sps:$4 sm:$0xff] (!%p223_p2)  }
   0x8   : > { %726 = vmatprep.subr.bf16.mxu0 (!%p223_p2), %v1285_v2  ;;  %v1294_v8 = vld [vmem:[%s1825_s2 + $0x44] ss:$8 sps:$4 sm:$0xff] (!%p223_p2)   ;;  %v1296_v9 = vld [vmem:[%s1825_s2 + $0x40] ss:$8 sps:$4 sm:$0xff] (!%p223_p2)   ;;  %v1297_v10 = vld [vmem:[%s1825_s2 + $0x54] ss:$8 sps:$4 sm:$0xff] (!%p223_p2)  }
   0x9   : > { %v1299_v11 = vld [vmem:[%s1825_s2 + $0x50] ss:$8 sps:$4 sm:$0xff] (!%p223_p2)   ;;  %v1300_v12 = vld [vmem:[%s1825_s2 + $0x64] ss:$8 sps:$4 sm:$0xff] (!%p223_p2)   ;;  %v1302_v14 = vld [vmem:[%s1825_s2 + $0x60] ss:$8 sps:$4 sm:$0xff] (!%p223_p2)  }
   0xa   : > { %v1329_v13 = vld [vmem:[%s1826_s3 + $0x4] ss:$8 sps:$4 sm:$0xff] (!%p223_p2)   ;;  %v1332_v15 = vld [vmem:[%s1826_s3] ss:$8 sps:$4 sm:$0xff] (!%p223_p2)   ;;  %v1303_v17 = vld [vmem:[%s1825_s2 + $0x74] ss:$8 sps:$4 sm:$0xff] (!%p223_p2)  }
   0xb   : > { %727 = vmatpush1.bf16.msra.mxu0 (!%p223_p2), %v1287_v3  ;;  %511 = vmatprep.subr.bf16.mxu1 (!%p223_p2), %v1329_v13  ;;  %v1338_v18 = vld [vmem:[%s1826_s3 + $0x14] ss:$8 sps:$4 sm:$0xff] (!%p223_p2)   ;;  %v1341_v19 = vld [vmem:[%s1826_s3 + $0x10] ss:$8 sps:$4 sm:$0xff] (!%p223_p2)   ;;  %v1306_v21 = vld [vmem:[%s1825_s2 + $0x84] ss:$8 sps:$4 sm:$0xff] (!%p223_p2)  }
   0xc   : > { %728 = vmatprep.subr.bf16.mxu0 (!%p223_p2), %v1288_v4  ;;  %512 = vmatpush1.bf16.msra.mxu1 (!%p223_p2), %v1332_v15  ;;  %v1305_v20 = vld [vmem:[%s1825_s2 + $0x70] ss:$8 sps:$4 sm:$0xff] (!%p223_p2)   ;;  %v1345_v22 = vld [vmem:[%s1826_s3 + $0x24] ss:$8 sps:$4 sm:$0xff] (!%p223_p2)   ;;  %v1347_v23 = vld [vmem:[%s1826_s3 + $0x20] ss:$8 sps:$4 sm:$0xff] (!%p223_p2)  }
   0xd   : > { %s1831_s22 = smov (!%p257_p3, %s1147_s22), 1  ;;  %513 = vmatprep.subr.bf16.mxu1 %v1338_v18  ;;  %v1308_v24 = vld [vmem:[%s1825_s2 + $0x80] ss:$8 sps:$4 sm:$0xff]   ;;  %v1309_v25 = vld [vmem:[%s1825_s2 + $0x94] ss:$8 sps:$4 sm:$0xff]  }
   0xe   : > { %s1273_s23 = smul.u32 24, %s1831_s22  ;;  %v1351_v26 = vld [vmem:[%s1826_s3 + $0x34] ss:$8 sps:$4 sm:$0xff]   ;;  %v1353_v27 = vld [vmem:[%s1826_s3 + $0x30] ss:$8 sps:$4 sm:$0xff]   ;;  %s1262_s11 = sshll.u32 %s1831_s22, 4 }
   0xf   : > { %729 = vmatpush1.bf16.msra.mxu0 %v1290_v5  ;;  %v1357_v28 = vld [vmem:[%s1826_s3 + $0x44] ss:$8 sps:$4 sm:$0xff]   ;;  %v1311_v29 = vld [vmem:[%s1825_s2 + $0x90] ss:$8 sps:$4 sm:$0xff]   ;;  %v1359_v31 = vld [vmem:[%s1826_s3 + $0x40] ss:$8 sps:$4 sm:$0xff]   ;;  %s271_s14 = scalar_lea.vmem %s1829_s6, %s1262_s11 }
  0x10   : > { %730 = vmatprep.subr.bf16.mxu0 %v1291_v6  ;;  %s1532_s30 = scalar_lea.vmem %s1823_s0, %s1273_s23  ;;  %514 = vmatpush1.bf16.msra.mxu1 %v1341_v19  ;;  %v1312_v30 = vld [vmem:[%s1825_s2 + $0xa4] ss:$8 sps:$4 sm:$0xff]   ;;  %v1363_v32 = vld [vmem:[%s1826_s3 + $0x54] ss:$8 sps:$4 sm:$0xff]   ;;  %v1314_v33 = vld [vmem:[%s1825_s2 + $0xa0] ss:$8 sps:$4 sm:$0xff]   ;;  %s1679_s17 = scalar_lea.vmem %s1824_s1, %s1273_s23 }
  0x11   : > { %v1544_v16 = vld [vmem:[%s1532_s30 + $0x4] ss:$8 sps:$4 sm:$0xff]   ;;  %515 = vmatprep.subr.bf16.mxu1 %v1345_v22  ;;  %v1315_v34 = vld [vmem:[%s1825_s2 + $0xb4] ss:$8 sps:$4 sm:$0xff]   ;;  %v1365_v35 = vld [vmem:[%s1826_s3 + $0x50] ss:$8 sps:$4 sm:$0xff]  }
  0x12   : > { %756 = vmatprep.mubr.bf16.mxu0 %v1544_v16  ;;  %v1369_v36 = vld [vmem:[%s1826_s3 + $0x64] ss:$8 sps:$4 sm:$0xff]   ;;  %v1317_v37 = vld [vmem:[%s1825_s2 + $0xb0] ss:$8 sps:$4 sm:$0xff]   ;;  %v1371_v39 = vld [vmem:[%s1826_s3 + $0x60] ss:$8 sps:$4 sm:$0xff]  }
  0x13   : > { %731 = vmatpush1.bf16.msra.mxu0 %v1293_v7  ;;  %v1318_v38 = vld [vmem:[%s1825_s2 + $0xc4] ss:$8 sps:$4 sm:$0xff]   ;;  %v1375_v40 = vld [vmem:[%s1826_s3 + $0x74] ss:$8 sps:$4 sm:$0xff]   ;;  %v1320_v41 = vld [vmem:[%s1825_s2 + $0xc0] ss:$8 sps:$4 sm:$0xff]  }
  0x14   : > { %732 = vmatprep.subr.bf16.mxu0 %v1294_v8  ;;  %516 = vmatpush1.bf16.msra.mxu1 %v1347_v23  ;;  %v1321_v42 = vld [vmem:[%s1825_s2 + $0xd4] ss:$8 sps:$4 sm:$0xff]   ;;  %v1377_v43 = vld [vmem:[%s1826_s3 + $0x70] ss:$8 sps:$4 sm:$0xff]   ;;  %v1381_v44 = vld [vmem:[%s1826_s3 + $0x84] ss:$8 sps:$4 sm:$0xff]  }
  0x15   : > { %517 = vmatprep.subr.bf16.mxu1 %v1351_v26  ;;  %v1323_v45 = vld [vmem:[%s1825_s2 + $0xd0] ss:$8 sps:$4 sm:$0xff]   ;;  %v1324_v46 = vld [vmem:[%s1825_s2 + $0xe4] ss:$8 sps:$4 sm:$0xff]   ;;  %v1383_v47 = vld [vmem:[%s1826_s3 + $0x80] ss:$8 sps:$4 sm:$0xff]  }
  0x16   : > { %v1387_v48 = vld [vmem:[%s1826_s3 + $0x94] ss:$8 sps:$4 sm:$0xff]   ;;  %v1326_v49 = vld [vmem:[%s1825_s2 + $0xe0] ss:$8 sps:$4 sm:$0xff]   ;;  %v1389_v51 = vld [vmem:[%s1826_s3 + $0x90] ss:$8 sps:$4 sm:$0xff]  }
  0x17   : > { %733 = vmatpush1.bf16.msra.mxu0 %v1296_v9  ;;  %v1327_v50 = vld [vmem:[%s1825_s2 + $0xf4] ss:$8 sps:$4 sm:$0xff]   ;;  %v1393_v52 = vld [vmem:[%s1826_s3 + $0xa4] ss:$8 sps:$4 sm:$0xff]   ;;  %v1331_v53 = vld [vmem:[%s1825_s2 + $0xf0] ss:$8 sps:$4 sm:$0xff]  }
  0x18   : > { %734 = vmatprep.subr.bf16.mxu0 %v1297_v10  ;;  %518 = vmatpush1.bf16.msra.mxu1 %v1353_v27  ;;  %v1337_v54 = vld [vmem:[%s1827_s4 + $0x4] ss:$8 sps:$4 sm:$0xff]   ;;  %v1395_v55 = vld [vmem:[%s1826_s3 + $0xa0] ss:$8 sps:$4 sm:$0xff]   ;;  %v820_v56 = vshll.u32 %v1544_v16, 16  ;;  %v818_v0 = vshrl.u32 %v1544_v16, 16 }
  0x19   : > { %519 = vmatprep.subr.bf16.mxu1 %v1357_v28  ;;  %v1399_v57 = vld [vmem:[%s1826_s3 + $0xb4] ss:$8 sps:$4 sm:$0xff]   ;;  %v1335_v58 = vld [vmem:[%s1827_s4] ss:$8 sps:$4 sm:$0xff]   ;;  %v1401_v61 = vld [vmem:[%s1826_s3 + $0xb0] ss:$8 sps:$4 sm:$0xff]  }
  0x1a   : > { %v1672_v59 = vld [vmem:[%s1532_s30] ss:$8 sps:$4 sm:$0xff]   ;;  %v1344_v60 = vld [vmem:[%s1827_s4 + $0x14] ss:$8 sps:$4 sm:$0xff]   ;;  %v1405_v62 = vld [vmem:[%s1826_s3 + $0xc4] ss:$8 sps:$4 sm:$0xff]  }
  0x1b   : > { %735 = vmatpush1.bf16.msra.mxu0 %v1299_v11  ;;  %v1428_v63 = vld [vmem:[%s1679_s17 + $0x4] ss:$8 sps:$4 sm:$0xff]   ;;  %v822_v1 = vrot.slane %v820_v56, 1  ;;  %v1694_v2 = vld [vmem:[%s1532_s30 + $0x10] sm:$0x11] }
  0x1c   : > { %736 = vmatprep.subr.bf16.mxu0 %v1300_v12  ;;  %520 = vmatpush1.bf16.msra.mxu1 %v1359_v31  ;;  %v1342_v3 = vld [vmem:[%s1827_s4 + $0x10] ss:$8 sps:$4 sm:$0xff]   ;;  %v1225_v4 = vcombine.high %v1694_v2, %v1694_v2  ;;  %v1350_v5 = vld [vmem:[%s1827_s4 + $0x24] ss:$8 sps:$4 sm:$0xff]   ;;  %v1407_v6 = vld [vmem:[%s1826_s3 + $0xc0] ss:$8 sps:$4 sm:$0xff]  }
  0x1d   : > { %521 = vmatprep.subr.bf16.mxu1 %v1363_v32  ;;  %543 = vmatprep.mubr.bf16.mxu1 %v1428_v63  ;;  %v1411_v7 = vld [vmem:[%s1826_s3 + $0xd4] ss:$8 sps:$4 sm:$0xff]   ;;  %v823_v8 = vor.u32 %v822_v1, %v818_v0  ;;  %vm804_vm0 = vsmask.f32 7424  ;;  %v1348_v10 = vld [vmem:[%s1827_s4 + $0x20] ss:$8 sps:$4 sm:$0xff]  }
  0x1e   : > { %v825_v9 = vshll.u32 %v1225_v4, 16  ;;  %v1356_v12 = vld [vmem:[%s1827_s4 + $0x34] ss:$8 sps:$4 sm:$0xff]   ;;  %v1413_v13 = vld [vmem:[%s1826_s3 + $0xd0] ss:$8 sps:$4 sm:$0xff]  }
  0x1f   : > { %737 = vmatpush1.bf16.msra.mxu0 %v1302_v14  ;;  %v1417_v14 = vld [vmem:[%s1826_s3 + $0xe4] ss:$8 sps:$4 sm:$0xff]   ;;  %v1354_v16 = vld [vmem:[%s1827_s4 + $0x30] ss:$8 sps:$4 sm:$0xff]   ;;  %v1419_v18 = vld [vmem:[%s1826_s3 + $0xe0] ss:$8 sps:$4 sm:$0xff]  }
  0x20   : > { %738 = vmatprep.subr.bf16.mxu0 %v1303_v17  ;;  %522 = vmatpush1.bf16.msra.mxu1 %v1365_v35  ;;  %v827_v11 = vrot.slane %v825_v9, 1  ;;  %v1362_v17 = vld [vmem:[%s1827_s4 + $0x44] ss:$8 sps:$4 sm:$0xff]   ;;  %v1423_v19 = vld [vmem:[%s1826_s3 + $0xf4] ss:$8 sps:$4 sm:$0xff]  }
  0x21   : > { %523 = vmatprep.subr.bf16.mxu1 %v1369_v36  ;;  %v1425_v22 = vld [vmem:[%s1826_s3 + $0xf0] ss:$8 sps:$4 sm:$0xff]   ;;  %v1372_v26 = vld [vmem:[%s1827_s4 + $0x60] ss:$8 sps:$4 sm:$0xff]   ;;  %v1380_v27 = vld [vmem:[%s1827_s4 + $0x74] ss:$8 sps:$4 sm:$0xff]  }
  0x22   : > { %v828_v15 = vsel %vm804_vm0, %v823_v8, %v827_v11  ;;  %v1366_v23 = vld [vmem:[%s1827_s4 + $0x50] ss:$8 sps:$4 sm:$0xff]   ;;  %v1392_v31 = vld [vmem:[%s1827_s4 + $0x94] ss:$8 sps:$4 sm:$0xff]  }
  0x23   : > { %739 = vmatpush1.bf16.msra.mxu0 %v1305_v20  ;;  %v1360_v20 = vld [vmem:[%s1827_s4 + $0x40] ss:$8 sps:$4 sm:$0xff]   ;;  %v1378_v28 = vld [vmem:[%s1827_s4 + $0x70] ss:$8 sps:$4 sm:$0xff]   ;;  %v1404_v35 = vld [vmem:[%s1827_s4 + $0xb4] ss:$8 sps:$4 sm:$0xff]  }
  0x24   : > { %740 = vmatprep.subr.bf16.mxu0 %v1306_v21  ;;  %524 = vmatpush1.bf16.msra.mxu1 %v1371_v39  ;;  %v1368_v21 = vld [vmem:[%s1827_s4 + $0x54] ss:$8 sps:$4 sm:$0xff]   ;;  %v1390_v32 = vld [vmem:[%s1827_s4 + $0x90] ss:$8 sps:$4 sm:$0xff]  }
  0x25   : > { %525 = vmatprep.subr.bf16.mxu1 %v1375_v40  ;;  %v1402_v36 = vld [vmem:[%s1827_s4 + $0xb0] ss:$8 sps:$4 sm:$0xff]   ;;  %v1416_v39 = vld [vmem:[%s1827_s4 + $0xd4] ss:$8 sps:$4 sm:$0xff]   ;;  %v808_v40 = vshll.u32 %v1672_v59, 16 }
  0x27   : > { %741 = vmatpush1.bf16.msra.mxu0 %v1308_v24  ;;  %v1426_v24 = vld [vmem:[%s1679_s17] ss:$8 sps:$4 sm:$0xff]  }
  0x28   : > { %742 = vmatprep.subr.bf16.mxu0 %v1309_v25  ;;  %526 = vmatpush1.bf16.msra.mxu1 %v1377_v43  ;;  %v1374_v25 = vld [vmem:[%s1827_s4 + $0x64] ss:$8 sps:$4 sm:$0xff]  }
  0x29   : > { %527 = vmatprep.subr.bf16.mxu1 %v1381_v44  ;;  %v1422_v43 = vld [vmem:[%s1827_s4 + $0xe4] ss:$8 sps:$4 sm:$0xff]   ;;  %v806_v44 = vshrl.u32 %v1672_v59, 16 }
  0x2b   : > { %743 = vmatpush1.bf16.msra.mxu0 %v1311_v29  ;;  %v1386_v29 = vld [vmem:[%s1827_s4 + $0x84] ss:$8 sps:$4 sm:$0xff]  }
  0x2c   : > { %744 = vmatprep.subr.bf16.mxu0 %v1312_v30  ;;  %528 = vmatpush1.bf16.msra.mxu1 %v1383_v47  ;;  %v1384_v30 = vld [vmem:[%s1827_s4 + $0x80] ss:$8 sps:$4 sm:$0xff]  }
  0x2d   : > { %529 = vmatprep.subr.bf16.mxu1 %v1387_v48  ;;  %v1431_v48 = vld [vmem:[%s1827_s4 + $0xf4] ss:$8 sps:$4 sm:$0xff]  }
  0x2f   : > { %745 = vmatpush1.bf16.msra.mxu0 %v1314_v33  ;;  %v1398_v33 = vld [vmem:[%s1827_s4 + $0xa4] ss:$8 sps:$4 sm:$0xff]  }
  0x30   : > { %746 = vmatprep.subr.bf16.mxu0 %v1315_v34  ;;  %530 = vmatpush1.bf16.msra.mxu1 %v1389_v51  ;;  %v1396_v34 = vld [vmem:[%s1827_s4 + $0xa0] ss:$8 sps:$4 sm:$0xff]  }
  0x31   : > { %531 = vmatprep.subr.bf16.mxu1 %v1393_v52 }
  0x33   : > { %747 = vmatpush1.bf16.msra.mxu0 %v1317_v37  ;;  %v1410_v37 = vld [vmem:[%s1827_s4 + $0xc4] ss:$8 sps:$4 sm:$0xff]  }
  0x34   : > { %748 = vmatprep.subr.bf16.mxu0 %v1318_v38  ;;  %532 = vmatpush1.bf16.msra.mxu1 %v1395_v55  ;;  %v1408_v38 = vld [vmem:[%s1827_s4 + $0xc0] ss:$8 sps:$4 sm:$0xff]  }
  0x35   : > { %533 = vmatprep.subr.bf16.mxu1 %v1399_v57  ;;  %v1040_v57 = vlaneseq }
  0x37   : > { %749 = vmatpush1.bf16.msra.mxu0 %v1320_v41  ;;  %v1414_v41 = vld [vmem:[%s1827_s4 + $0xd0] ss:$8 sps:$4 sm:$0xff]  }
  0x38   : > { %750 = vmatprep.subr.bf16.mxu0 %v1321_v42  ;;  %534 = vmatpush1.bf16.msra.mxu1 %v1401_v61  ;;  %v1224_v42 = vcombine.low %v1694_v2, %v1694_v2 }
  0x39   : > { %535 = vmatprep.subr.bf16.mxu1 %v1405_v62 }
  0x3a   : > { %v813_v47 = vshll.u32 %v1224_v42, 16 }
  0x3b   : > { %751 = vmatpush1.bf16.msra.mxu0 %v1323_v45  ;;  %v810_v45 = vrot.slane %v808_v40, 1 }
  0x3c   : > { %752 = vmatprep.subr.bf16.mxu0 %v1324_v46  ;;  %536 = vmatpush1.bf16.msra.mxu1 %v1407_v6  ;;  %v1420_v46 = vld [vmem:[%s1827_s4 + $0xe0] ss:$8 sps:$4 sm:$0xff]   ;;  %v815_v51 = vrot.slane %v813_v47, 1 }
  0x3d   : > { %537 = vmatprep.subr.bf16.mxu1 %v1411_v7 }
  0x3f   : > { %753 = vmatpush1.bf16.msra.mxu0 %v1326_v49  ;;  %v1429_v49 = vld [vmem:[%s1827_s4 + $0xf0] ss:$8 sps:$4 sm:$0xff]  }
  0x40   : > { %754 = vmatprep.subr.bf16.mxu0 %v1327_v50  ;;  %538 = vmatpush1.bf16.msra.mxu1 %v1413_v13  ;;  %v811_v50 = vor.u32 %v810_v45, %v806_v44 }
  0x41   : > { %539 = vmatprep.subr.bf16.mxu1 %v1417_v14 }
  0x42   : > { %v816_v52 = vsel %vm804_vm0, %v811_v50, %v815_v51 }
  0x43   : > { %755 = vmatpush1.bf16.msra.mxu0 %v1331_v53 }
  0x44   : > { %991 = vmatprep.subr.bf16.mxu0 %v1337_v54  ;;  %540 = vmatpush1.bf16.msra.mxu1 %v1419_v18 }
  0x45   : > { %541 = vmatprep.subr.bf16.mxu1 %v1423_v19 }
  0x46   : > { %757 = vmatmul.mubr.bf16.vlgmr.msra.gmra.mrb[0].mxu0 %v1672_v59 }
  0x47   : > { %992 = vmatpush1.bf16.msra.mxu0 %v1335_v58  ;;  %1023 = vmatprep.mubr.bf16.mxu0 %v828_v15  ;;  %v1041_v58 = vshrl.u32 %v1040_v57, 7 }
  0x48   : > { %993 = vmatprep.subr.bf16.mxu0 %v1344_v60  ;;  %542 = vmatpush1.bf16.msra.mxu1 %v1425_v22  ;;  %v1038_v60 = vld [vmem:[%s1828_s5] sm:$0x3] }
  0x49   : > { %v1042_v59 = vsub.s32 0, %v1041_v58  ;;  %v1046_v61 = vsub.s32 1, %v1041_v58 }
  0x4b   : > { %994 = vmatpush1.bf16.msra.mxu0 %v1342_v3  ;;  %544 = vmatmul.mubr.bf16.vlgmr.msra.gmra.mrb[0].mxu1 %v1426_v24  ;;  %v1043_v62 = vrot.slane %v1038_v60, %v1042_v59  ;;  %v1047_v0 = vrot.slane %v1038_v60, %v1046_v61 }
  0x4c   : > { %995 = vmatprep.subr.bf16.mxu0 %v1350_v5 }
  0x4f   : > { %996 = vmatpush1.bf16.msra.mxu0 %v1348_v10 }
  0x50   : > { %997 = vmatprep.subr.bf16.mxu0 %v1356_v12 }
  0x53   : > { %998 = vmatpush1.bf16.msra.mxu0 %v1354_v16 }
  0x54   : > { %999 = vmatprep.subr.bf16.mxu0 %v1362_v17 }
  0x57   : > { %1000 = vmatpush1.bf16.msra.mxu0 %v1360_v20 }
  0x58   : > { %1001 = vmatprep.subr.bf16.mxu0 %v1368_v21 }
  0x5b   : > { %1002 = vmatpush1.bf16.msra.mxu0 %v1366_v23 }
  0x5c   : > { %1003 = vmatprep.subr.bf16.mxu0 %v1374_v25 }
  0x5f   : > { %1004 = vmatpush1.bf16.msra.mxu0 %v1372_v26 }
  0x60   : > { %1005 = vmatprep.subr.bf16.mxu0 %v1380_v27 }
  0x63   : > { %1006 = vmatpush1.bf16.msra.mxu0 %v1378_v28 }
  0x64   : > { %1007 = vmatprep.subr.bf16.mxu0 %v1386_v29 }
  0x67   : > { %1008 = vmatpush1.bf16.msra.mxu0 %v1384_v30 }
  0x68   : > { %1009 = vmatprep.subr.bf16.mxu0 %v1392_v31 }
  0x6b   : > { %1010 = vmatpush1.bf16.msra.mxu0 %v1390_v32 }
  0x6c   : > { %1011 = vmatprep.subr.bf16.mxu0 %v1398_v33 }
  0x6f   : > { %1012 = vmatpush1.bf16.msra.mxu0 %v1396_v34 }
  0x70   : > { %1013 = vmatprep.subr.bf16.mxu0 %v1404_v35 }
  0x73   : > { %1014 = vmatpush1.bf16.msra.mxu0 %v1402_v36 }
  0x74   : > { %1015 = vmatprep.subr.bf16.mxu0 %v1410_v37 }
  0x77   : > { %1016 = vmatpush1.bf16.msra.mxu0 %v1408_v38 }
  0x78   : > { %1017 = vmatprep.subr.bf16.mxu0 %v1416_v39 }
  0x7b   : > { %1018 = vmatpush1.bf16.msra.mxu0 %v1414_v41 }
  0x7c   : > { %1019 = vmatprep.subr.bf16.mxu0 %v1422_v43 }
  0x7f   : > { %1020 = vmatpush1.bf16.msra.mxu0 %v1420_v46 }
  0x80   : > { %1021 = vmatprep.subr.bf16.mxu0 %v1431_v48 }
  0x83   : > { %1022 = vmatpush1.bf16.msra.mxu0 %v1429_v49 }
  0x86   : > { %1024 = vmatmul.mubr.bf16.vlgmr.msra.gmra.mrb[0].mxu0 %v816_v52 }
 0x11e   : > { %v545_v53 = vpop.f32.mrb[0].mxu1 }
 0x11f   : > { %v547_v54 = vpop.f32.mrb[1].mxu1 }
 0x120   : > { %v549_v55 = vpop.f32.mrb[2].mxu1 }
 0x121   : > { %v551_v56 = vpop.f32.mrb[3].mxu1 }
 0x159   : > { %v1025_v63 = vpop.f32.mrb[0].mxu0 }
 0x15a   : > { %v1265_v1 = vadd.f32 %v1025_v63, %v545_v53  ;;  %v1027_v2 = vpop.f32.mrb[1].mxu0 }
 0x15b   : > { %v1266_v3 = vadd.f32 %v1027_v2, %v547_v54  ;;  %v1029_v4 = vpop.f32.mrb[2].mxu0 }
 0x15c   : > { %v1050_v5 = vadd.f32 %v1265_v1, %v1043_v62  ;;  %v1267_v6 = vadd.f32 %v1029_v4, %v549_v55  ;;  %v1031_v7 = vpop.f32.mrb[3].mxu0 }
 0x15d   : > { %v1051_v8 = vadd.f32 %v1266_v3, %v1047_v0  ;;  %v1268_v9 = vadd.f32 %v1031_v7, %v551_v56 }
 0x15e   : > { %vm1054_vm1 = vcmp.gt.f32.partialorder %v1050_v5, 0.0  ;;  %v1058_v10 = vmul.f32 0.2, %v1050_v5  ;;  %v1052_v11 = vadd.f32 %v1267_v6, %v1043_v62 }
 0x15f   : > { %vm1055_vm2 = vcmp.gt.f32.partialorder %v1051_v8, 0.0  ;;  %v1059_v12 = vmul.f32 0.2, %v1051_v8  ;;  %v1053_v13 = vadd.f32 %v1268_v9, %v1047_v0 }
 0x160   : > { %v1062_v14 = vsel %vm1054_vm1, %v1050_v5, %v1058_v10  ;;  %vm1056_vm3 = vcmp.gt.f32.partialorder %v1052_v11, 0.0  ;;  %v1060_v15 = vmul.f32 0.2, %v1052_v11 }
 0x161   : > { %v1063_v16 = vsel %vm1055_vm2, %v1051_v8, %v1059_v12  ;;  %vm1057_vm4 = vcmp.gt.f32.partialorder %v1053_v13, 0.0  ;;  %v1061_v17 = vmul.f32 0.2, %v1053_v13 }
 0x162   : > { %v1263_v18 = vpack.c.bf16 %v1063_v16, %v1062_v14  ;;  %v1064_v19 = vsel %vm1056_vm3, %v1052_v11, %v1060_v15 }
 0x163   : > { %v1065_v20 = vsel %vm1057_vm4, %v1053_v13, %v1061_v17 }
 0x164   : > { %1078 = vst [vmem:[%s271_s14] sm:$0xff] %v1263_v18  ;;  %v1264_v21 = vpack.c.bf16 %v1065_v20, %v1064_v19 }
 0x166   : > { %1079 = vst [vmem:[%s271_s14 + $0x8] sm:$0xff] %v1264_v21 }
 0x167 PF: > { %s16_s21 = sadd.s32 1, %s1440_s21  }
 0x168   : > { %p13_p4 = scmp.ge.s32.totalorder %s16_s21, 4  }
 0x16a   :  { %15 = sbr.rel (!%p13_p4) target bundleno = 1 (0x1), region = 77 }

// kernel: wnet_forward.9
= control target key start
LH: loop header
LB: loop body
LE: loop exit
PB: predicated region body
PF: predicated region fallthrough
CT: control target
= control target key end

     0   :  { %s1637_s21 = smov 0   ;;  %s1994_s0 = inlined_call_operand.vmem [shape: bf16[2,33,256], index: 0, kind: input, shape index: {}]   ;;  %s1995_s1 = inlined_call_operand.vmem [shape: bf16[2,33,256], index: 1, kind: input, shape index: {}]   ;;  %s1996_s2 = inlined_call_operand.vmem [shape: bf16[256,256], index: 2, kind: input, shape index: {}]   ;;  %s1997_s3 = inlined_call_operand.vmem [shape: bf16[256,256], index: 3, kind: input, shape index: {}]   ;;  %s1998_s4 = inlined_call_operand.vmem [shape: bf16[256,256], index: 4, kind: input, shape index: {}]   ;;  %s1999_s5 = inlined_call_operand.vmem [shape: f32[1,256], index: 5, kind: input, shape index: {}]   ;;  %s2000_s6 = inlined_call_operand.vmem [shape: bf16[2,32,256], index: 6, kind: output, shape index: {}]  }
   0x1 LB: > { %s1253_s22 = sadd.s32 4294967295, %s1600_s21   ;;  %p1257_p0 = scmp.ge.s32.totalorder %s1600_s21, 1  ;;  %s1600_s21 = sphi %s1637_s21, %s16_s21  }
   0x2   : > { %p222_p1 = scmp.lt.s32.totalorder %s1600_s21, 3 }
   0x4   : > { %p223_p2 = pnand %p1257_p0, %p222_p1 }
   0x5   : > { %v1436_v0 = vld [vmem:[%s1997_s3 + $0x4] ss:$8 sps:$4 sm:$0xff] (!%p223_p2)   ;;  %v1440_v2 = vld [vmem:[%s1997_s3] ss:$8 sps:$4 sm:$0xff] (!%p223_p2)   ;;  %v1442_v4 = vld [vmem:[%s1997_s3 + $0x14] ss:$8 sps:$4 sm:$0xff] (!%p223_p2)  }
   0x6   : > { %226 = sbr.rel (%p223_p2) target bundleno = 363 (0x16b), region = 44  ;;  %v1438_v1 = vld [vmem:[%s1996_s2 + $0x4] ss:$8 sps:$4 sm:$0xff] (!%p223_p2)   ;;  %525 = vmatprep.subr.bf16.mxu1 (!%p223_p2), %v1436_v0  ;;  %v1441_v3 = vld [vmem:[%s1996_s2] ss:$8 sps:$4 sm:$0xff] (!%p223_p2)   ;;  %p257_p3 = scmp.lt.s32.totalorder (!%p223_p2), %s1253_s22, 1 }
   0x7   : > { %758 = vmatprep.subr.bf16.mxu0 (!%p223_p2), %v1438_v1  ;;  %526 = vmatpush1.bf16.msra.mxu1 (!%p223_p2), %v1440_v2  ;;  %v1444_v5 = vld [vmem:[%s1996_s2 + $0x14] ss:$8 sps:$4 sm:$0xff] (!%p223_p2)   ;;  %v1446_v6 = vld [vmem:[%s1997_s3 + $0x10] ss:$8 sps:$4 sm:$0xff] (!%p223_p2)   ;;  %v1448_v8 = vld [vmem:[%s1997_s3 + $0x24] ss:$8 sps:$4 sm:$0xff] (!%p223_p2)  }
   0x8   : > { %759 = vmatpush1.bf16.msra.mxu0 (!%p223_p2), %v1441_v3  ;;  %527 = vmatprep.subr.bf16.mxu1 (!%p223_p2), %v1442_v4  ;;  %v1447_v7 = vld [vmem:[%s1996_s2 + $0x10] ss:$8 sps:$4 sm:$0xff] (!%p223_p2)   ;;  %v1450_v9 = vld [vmem:[%s1996_s2 + $0x24] ss:$8 sps:$4 sm:$0xff] (!%p223_p2)   ;;  %v1452_v10 = vld [vmem:[%s1997_s3 + $0x20] ss:$8 sps:$4 sm:$0xff] (!%p223_p2)  }
   0x9   : > { %760 = vmatprep.subr.bf16.mxu0 (!%p223_p2), %v1444_v5  ;;  %v1453_v11 = vld [vmem:[%s1996_s2 + $0x20] ss:$8 sps:$4 sm:$0xff] (!%p223_p2)   ;;  %v1454_v12 = vld [vmem:[%s1997_s3 + $0x34] ss:$8 sps:$4 sm:$0xff] (!%p223_p2)   ;;  %v1458_v14 = vld [vmem:[%s1997_s3 + $0x30] ss:$8 sps:$4 sm:$0xff] (!%p223_p2)  }
   0xa   : > { %v1456_v13 = vld [vmem:[%s1996_s2 + $0x34] ss:$8 sps:$4 sm:$0xff] (!%p223_p2)   ;;  %v1459_v15 = vld [vmem:[%s1996_s2 + $0x30] ss:$8 sps:$4 sm:$0xff] (!%p223_p2)   ;;  %v1460_v16 = vld [vmem:[%s1997_s3 + $0x44] ss:$8 sps:$4 sm:$0xff] (!%p223_p2)  }
   0xb   : > { %528 = vmatpush1.bf16.msra.mxu1 (!%p223_p2), %v1446_v6  ;;  %v1462_v17 = vld [vmem:[%s1996_s2 + $0x44] ss:$8 sps:$4 sm:$0xff] (!%p223_p2)   ;;  %v1464_v18 = vld [vmem:[%s1997_s3 + $0x40] ss:$8 sps:$4 sm:$0xff] (!%p223_p2)   ;;  %v1466_v20 = vld [vmem:[%s1997_s3 + $0x54] ss:$8 sps:$4 sm:$0xff] (!%p223_p2)  }
   0xc   : > { %761 = vmatpush1.bf16.msra.mxu0 (!%p223_p2), %v1447_v7  ;;  %529 = vmatprep.subr.bf16.mxu1 (!%p223_p2), %v1448_v8  ;;  %v1465_v19 = vld [vmem:[%s1996_s2 + $0x40] ss:$8 sps:$4 sm:$0xff] (!%p223_p2)   ;;  %v1468_v21 = vld [vmem:[%s1996_s2 + $0x54] ss:$8 sps:$4 sm:$0xff] (!%p223_p2)   ;;  %v1470_v22 = vld [vmem:[%s1997_s3 + $0x50] ss:$8 sps:$4 sm:$0xff] (!%p223_p2)  }
   0xd   : > { %762 = vmatprep.subr.bf16.mxu0 %v1450_v9  ;;  %v1471_v23 = vld [vmem:[%s1996_s2 + $0x50] ss:$8 sps:$4 sm:$0xff]   ;;  %v1472_v24 = vld [vmem:[%s1997_s3 + $0x64] ss:$8 sps:$4 sm:$0xff]   ;;  %v1476_v26 = vld [vmem:[%s1997_s3 + $0x60] ss:$8 sps:$4 sm:$0xff]  }
   0xe   : > { %v1474_v25 = vld [vmem:[%s1996_s2 + $0x64] ss:$8 sps:$4 sm:$0xff]   ;;  %v1477_v27 = vld [vmem:[%s1996_s2 + $0x60] ss:$8 sps:$4 sm:$0xff]   ;;  %v1478_v28 = vld [vmem:[%s1997_s3 + $0x74] ss:$8 sps:$4 sm:$0xff]  }
   0xf   : > { %530 = vmatpush1.bf16.msra.mxu1 %v1452_v10  ;;  %v1480_v29 = vld [vmem:[%s1996_s2 + $0x74] ss:$8 sps:$4 sm:$0xff]   ;;  %v1482_v30 = vld [vmem:[%s1997_s3 + $0x70] ss:$8 sps:$4 sm:$0xff]   ;;  %v1484_v32 = vld [vmem:[%s1997_s3 + $0x84] ss:$8 sps:$4 sm:$0xff]  }
  0x10   : > { %763 = vmatpush1.bf16.msra.mxu0 %v1453_v11  ;;  %531 = vmatprep.subr.bf16.mxu1 %v1454_v12  ;;  %v1483_v31 = vld [vmem:[%s1996_s2 + $0x70] ss:$8 sps:$4 sm:$0xff]   ;;  %v1486_v33 = vld [vmem:[%s1996_s2 + $0x84] ss:$8 sps:$4 sm:$0xff]   ;;  %v1488_v34 = vld [vmem:[%s1997_s3 + $0x80] ss:$8 sps:$4 sm:$0xff]  }
  0x11   : > { %764 = vmatprep.subr.bf16.mxu0 %v1456_v13  ;;  %v1489_v35 = vld [vmem:[%s1996_s2 + $0x80] ss:$8 sps:$4 sm:$0xff]   ;;  %v1490_v36 = vld [vmem:[%s1997_s3 + $0x94] ss:$8 sps:$4 sm:$0xff]   ;;  %s2002_s22 = smov (!%p257_p3, %s1253_s22), 1 }
  0x12   : > { %v1492_v37 = vld [vmem:[%s1996_s2 + $0x94] ss:$8 sps:$4 sm:$0xff]   ;;  %v1494_v38 = vld [vmem:[%s1997_s3 + $0x90] ss:$8 sps:$4 sm:$0xff]   ;;  %v1496_v40 = vld [vmem:[%s1997_s3 + $0xa4] ss:$8 sps:$4 sm:$0xff]  }
  0x13   : > { %532 = vmatpush1.bf16.msra.mxu1 %v1458_v14  ;;  %v1495_v39 = vld [vmem:[%s1996_s2 + $0x90] ss:$8 sps:$4 sm:$0xff]   ;;  %s1427_s15 = smul.u32 40, %s2002_s22  ;;  %v1498_v41 = vld [vmem:[%s1996_s2 + $0xa4] ss:$8 sps:$4 sm:$0xff]   ;;  %s1374_s29 = sshll.u32 %s2002_s22, 5 }
  0x14   : > { %765 = vmatpush1.bf16.msra.mxu0 %v1459_v15  ;;  %533 = vmatprep.subr.bf16.mxu1 %v1460_v16  ;;  %v1500_v42 = vld [vmem:[%s1997_s3 + $0xa0] ss:$8 sps:$4 sm:$0xff]   ;;  %v1502_v44 = vld [vmem:[%s1997_s3 + $0xb4] ss:$8 sps:$4 sm:$0xff]   ;;  %v1506_v46 = vld [vmem:[%s1997_s3 + $0xb0] ss:$8 sps:$4 sm:$0xff]   ;;  %s271_s22 = scalar_lea.vmem %s2000_s6, %s1374_s29 }
  0x15   : > { %766 = vmatprep.subr.bf16.mxu0 %v1462_v17  ;;  %v1501_v43 = vld [vmem:[%s1996_s2 + $0xa0] ss:$8 sps:$4 sm:$0xff]   ;;  %s1790_s28 = scalar_lea.vmem %s1995_s1, %s1427_s15  ;;  %v1504_v45 = vld [vmem:[%s1996_s2 + $0xb4] ss:$8 sps:$4 sm:$0xff]   ;;  %s1798_s9 = scalar_lea.vmem %s1994_s0, %s1427_s15  ;;  %v1507_v47 = vld [vmem:[%s1996_s2 + $0xb0] ss:$8 sps:$4 sm:$0xff]  }
  0x16   : > { %v1508_v48 = vld [vmem:[%s1997_s3 + $0xc4] ss:$8 sps:$4 sm:$0xff]   ;;  %v1512_v52 = vld [vmem:[%s1997_s3 + $0xc0] ss:$8 sps:$4 sm:$0xff]   ;;  %v1514_v54 = vld [vmem:[%s1997_s3 + $0xd4] ss:$8 sps:$4 sm:$0xff]  }
  0x17   : > { %534 = vmatpush1.bf16.msra.mxu1 %v1464_v18  ;;  %v1534_v49 = vld [vmem:[%s1790_s28 + $0x4] ss:$8 sps:$4 sm:$0xff]   ;;  %v1513_v53 = vld [vmem:[%s1996_s2 + $0xc0] ss:$8 sps:$4 sm:$0xff]   ;;  %v1516_v55 = vld [vmem:[%s1996_s2 + $0xd4] ss:$8 sps:$4 sm:$0xff]  }
  0x18   : > { %767 = vmatpush1.bf16.msra.mxu0 %v1465_v19  ;;  %535 = vmatprep.subr.bf16.mxu1 %v1466_v20  ;;  %v1811_v50 = vld [vmem:[%s1798_s9 + $0x4] ss:$8 sps:$4 sm:$0xff]   ;;  %v1518_v56 = vld [vmem:[%s1997_s3 + $0xd0] ss:$8 sps:$4 sm:$0xff]   ;;  %v1524_v60 = vld [vmem:[%s1997_s3 + $0xe0] ss:$8 sps:$4 sm:$0xff]  }
  0x19   : > { %768 = vmatprep.subr.bf16.mxu0 %v1468_v21  ;;  %v1510_v51 = vld [vmem:[%s1996_s2 + $0xc4] ss:$8 sps:$4 sm:$0xff]   ;;  %557 = vmatprep.mubr.bf16.mxu1 %v1534_v49  ;;  %v1519_v57 = vld [vmem:[%s1996_s2 + $0xd0] ss:$8 sps:$4 sm:$0xff]   ;;  %v1525_v61 = vld [vmem:[%s1996_s2 + $0xe0] ss:$8 sps:$4 sm:$0xff]  }
  0x1a   : > { %790 = vmatprep.mubr.bf16.mxu0 %v1811_v50  ;;  %v1520_v58 = vld [vmem:[%s1997_s3 + $0xe4] ss:$8 sps:$4 sm:$0xff]   ;;  %v1526_v62 = vld [vmem:[%s1997_s3 + $0xf4] ss:$8 sps:$4 sm:$0xff]   ;;  %v1530_v0 = vld [vmem:[%s1997_s3 + $0xf0] ss:$8 sps:$4 sm:$0xff]  }
  0x1b   : > { %536 = vmatpush1.bf16.msra.mxu1 %v1470_v22  ;;  %v1522_v59 = vld [vmem:[%s1996_s2 + $0xe4] ss:$8 sps:$4 sm:$0xff]   ;;  %v1528_v63 = vld [vmem:[%s1996_s2 + $0xf4] ss:$8 sps:$4 sm:$0xff]   ;;  %v1531_v1 = vld [vmem:[%s1996_s2 + $0xf0] ss:$8 sps:$4 sm:$0xff]  }
  0x1c   : > { %769 = vmatpush1.bf16.msra.mxu0 %v1471_v23  ;;  %537 = vmatprep.subr.bf16.mxu1 %v1472_v24  ;;  %v1539_v2 = vld [vmem:[%s1998_s4 + $0x4] ss:$8 sps:$4 sm:$0xff]   ;;  %v1532_v3 = vld [vmem:[%s1790_s28] ss:$8 sps:$4 sm:$0xff]   ;;  %v864_v5 = vshll.u32 %v1811_v50, 16  ;;  %v862_v11 = vshrl.u32 %v1811_v50, 16 }
  0x1d   : > { %770 = vmatprep.subr.bf16.mxu0 %v1474_v25  ;;  %v1537_v4 = vld [vmem:[%s1998_s4] ss:$8 sps:$4 sm:$0xff]   ;;  %v1579_v7 = vld [vmem:[%s1798_s9 + $0x14] ss:$8 sps:$4 sm:$0xff]   ;;  %v1541_v13 = vld [vmem:[%s1998_s4 + $0x10] ss:$8 sps:$4 sm:$0xff]  }
  0x1e   : > { %v1868_v6 = vld [vmem:[%s1798_s9] ss:$8 sps:$4 sm:$0xff]   ;;  %v1543_v8 = vld [vmem:[%s1998_s4 + $0x14] ss:$8 sps:$4 sm:$0xff]   ;;  %v869_v10 = vshll.u32 %v1579_v7, 16  ;;  %v866_v12 = vrot.slane %v864_v5, 1 }
  0x1f   : > { %538 = vmatpush1.bf16.msra.mxu1 %v1476_v26  ;;  %v1577_v9 = vld [vmem:[%s1790_s28 + $0x14] ss:$8 sps:$4 sm:$0xff]   ;;  %v881_v14 = vshrl.u32 %v1579_v7, 16  ;;  %v1546_v15 = vld [vmem:[%s1998_s4 + $0x24] ss:$8 sps:$4 sm:$0xff]   ;;  %v852_v49 = vshll.u32 %v1868_v6, 16 }
  0x20   : > { %771 = vmatpush1.bf16.msra.mxu0 %v1477_v27  ;;  %539 = vmatprep.subr.bf16.mxu1 %v1478_v28  ;;  %v871_v16 = vrot.slane %v869_v10, 1  ;;  %v1884_v17 = vld [vmem:[%s1798_s9 + $0x20] sm:$0x11]  ;;  %v1584_v19 = vld [vmem:[%s1790_s28 + $0x10] ss:$8 sps:$4 sm:$0xff]   ;;  %v867_v21 = vor.u32 %v866_v12, %v862_v11 }
  0x21   : > { %772 = vmatprep.subr.bf16.mxu0 %v1480_v29  ;;  %v1335_v18 = vcombine.high %v1884_v17, %v1884_v17  ;;  %v1890_v20 = vld [vmem:[%s1798_s9 + $0x10] ss:$8 sps:$4 sm:$0xff]   ;;  %v1544_v22 = vld [vmem:[%s1998_s4 + $0x20] ss:$8 sps:$4 sm:$0xff]   ;;  %vm848_vm0 = vsmask.f32 7424 }
  0x22   : > { %v883_v23 = vor.u32 %v881_v14, %v871_v16  ;;  %v1549_v25 = vld [vmem:[%s1998_s4 + $0x34] ss:$8 sps:$4 sm:$0xff]   ;;  %v872_v27 = vsel %vm848_vm0, %v867_v21, %v871_v16  ;;  %v1547_v28 = vld [vmem:[%s1998_s4 + $0x30] ss:$8 sps:$4 sm:$0xff]  }
  0x23   : > { %540 = vmatpush1.bf16.msra.mxu1 %v1482_v30  ;;  %v885_v24 = vshll.u32 %v1335_v18, 16  ;;  %v1552_v30 = vld [vmem:[%s1998_s4 + $0x44] ss:$8 sps:$4 sm:$0xff]   ;;  %v1581_v50 = vld [vmem:[%s1998_s4 + $0xd0] ss:$8 sps:$4 sm:$0xff]  }
  0x24   : > { %773 = vmatpush1.bf16.msra.mxu0 %v1483_v31  ;;  %541 = vmatprep.subr.bf16.mxu1 %v1484_v32  ;;  %v1550_v31 = vld [vmem:[%s1998_s4 + $0x40] ss:$8 sps:$4 sm:$0xff]   ;;  %v1555_v32 = vld [vmem:[%s1998_s4 + $0x54] ss:$8 sps:$4 sm:$0xff]  }
  0x25   : > { %774 = vmatprep.subr.bf16.mxu0 %v1486_v33  ;;  %v887_v26 = vrot.slane %v885_v24, 1  ;;  %v1553_v33 = vld [vmem:[%s1998_s4 + $0x50] ss:$8 sps:$4 sm:$0xff]  }
  0x27   : > { %542 = vmatpush1.bf16.msra.mxu1 %v1488_v34  ;;  %v888_v29 = vsel %vm848_vm0, %v883_v23, %v887_v26  ;;  %v1558_v34 = vld [vmem:[%s1998_s4 + $0x64] ss:$8 sps:$4 sm:$0xff]  }
  0x28   : > { %775 = vmatpush1.bf16.msra.mxu0 %v1489_v35  ;;  %543 = vmatprep.subr.bf16.mxu1 %v1490_v36  ;;  %v1556_v35 = vld [vmem:[%s1998_s4 + $0x60] ss:$8 sps:$4 sm:$0xff]   ;;  %v1561_v36 = vld [vmem:[%s1998_s4 + $0x74] ss:$8 sps:$4 sm:$0xff]  }
  0x29   : > { %776 = vmatprep.subr.bf16.mxu0 %v1492_v37  ;;  %v1559_v37 = vld [vmem:[%s1998_s4 + $0x70] ss:$8 sps:$4 sm:$0xff]  }
  0x2b   : > { %544 = vmatpush1.bf16.msra.mxu1 %v1494_v38  ;;  %v1564_v38 = vld [vmem:[%s1998_s4 + $0x84] ss:$8 sps:$4 sm:$0xff]  }
  0x2c   : > { %777 = vmatpush1.bf16.msra.mxu0 %v1495_v39  ;;  %545 = vmatprep.subr.bf16.mxu1 %v1496_v40  ;;  %v1562_v39 = vld [vmem:[%s1998_s4 + $0x80] ss:$8 sps:$4 sm:$0xff]   ;;  %v1567_v40 = vld [vmem:[%s1998_s4 + $0x94] ss:$8 sps:$4 sm:$0xff]  }
  0x2d   : > { %778 = vmatprep.subr.bf16.mxu0 %v1498_v41  ;;  %v1565_v41 = vld [vmem:[%s1998_s4 + $0x90] ss:$8 sps:$4 sm:$0xff]  }
  0x2f   : > { %546 = vmatpush1.bf16.msra.mxu1 %v1500_v42  ;;  %v1570_v42 = vld [vmem:[%s1998_s4 + $0xa4] ss:$8 sps:$4 sm:$0xff]  }
  0x30   : > { %779 = vmatpush1.bf16.msra.mxu0 %v1501_v43  ;;  %547 = vmatprep.subr.bf16.mxu1 %v1502_v44  ;;  %v1568_v43 = vld [vmem:[%s1998_s4 + $0xa0] ss:$8 sps:$4 sm:$0xff]   ;;  %v1573_v44 = vld [vmem:[%s1998_s4 + $0xb4] ss:$8 sps:$4 sm:$0xff]  }
  0x31   : > { %780 = vmatprep.subr.bf16.mxu0 %v1504_v45  ;;  %v1571_v45 = vld [vmem:[%s1998_s4 + $0xb0] ss:$8 sps:$4 sm:$0xff]  }
  0x33   : > { %548 = vmatpush1.bf16.msra.mxu1 %v1506_v46  ;;  %v1576_v46 = vld [vmem:[%s1998_s4 + $0xc4] ss:$8 sps:$4 sm:$0xff]  }
  0x34   : > { %781 = vmatpush1.bf16.msra.mxu0 %v1507_v47  ;;  %549 = vmatprep.subr.bf16.mxu1 %v1508_v48  ;;  %v1574_v47 = vld [vmem:[%s1998_s4 + $0xc0] ss:$8 sps:$4 sm:$0xff]   ;;  %v1583_v48 = vld [vmem:[%s1998_s4 + $0xd4] ss:$8 sps:$4 sm:$0xff]  }
  0x35   : > { %782 = vmatprep.subr.bf16.mxu0 %v1510_v51  ;;  %v857_v51 = vshll.u32 %v1890_v20, 16 }
  0x37   : > { %550 = vmatpush1.bf16.msra.mxu1 %v1512_v52  ;;  %v1334_v52 = vcombine.low %v1884_v17, %v1884_v17 }
  0x38   : > { %783 = vmatpush1.bf16.msra.mxu0 %v1513_v53  ;;  %551 = vmatprep.subr.bf16.mxu1 %v1514_v54  ;;  %v1588_v53 = vld [vmem:[%s1998_s4 + $0xe4] ss:$8 sps:$4 sm:$0xff]   ;;  %v850_v54 = vshrl.u32 %v1868_v6, 16 }
  0x39   : > { %784 = vmatprep.subr.bf16.mxu0 %v1516_v55  ;;  %v854_v55 = vrot.slane %v852_v49, 1 }
  0x3b   : > { %552 = vmatpush1.bf16.msra.mxu1 %v1518_v56  ;;  %v859_v56 = vrot.slane %v857_v51, 1 }
  0x3c   : > { %785 = vmatpush1.bf16.msra.mxu0 %v1519_v57  ;;  %553 = vmatprep.subr.bf16.mxu1 %v1520_v58  ;;  %v873_v57 = vshrl.u32 %v1890_v20, 16  ;;  %v1586_v58 = vld [vmem:[%s1998_s4 + $0xe0] ss:$8 sps:$4 sm:$0xff]  }
  0x3d   : > { %786 = vmatprep.subr.bf16.mxu0 %v1522_v59  ;;  %v877_v59 = vshll.u32 %v1334_v52, 16 }
  0x3f   : > { %554 = vmatpush1.bf16.msra.mxu1 %v1524_v60  ;;  %v1591_v60 = vld [vmem:[%s1998_s4 + $0xf4] ss:$8 sps:$4 sm:$0xff]  }
  0x40   : > { %787 = vmatpush1.bf16.msra.mxu0 %v1525_v61  ;;  %555 = vmatprep.subr.bf16.mxu1 %v1526_v62  ;;  %v1589_v61 = vld [vmem:[%s1998_s4 + $0xf0] ss:$8 sps:$4 sm:$0xff]   ;;  %v855_v62 = vor.u32 %v854_v55, %v850_v54 }
  0x41   : > { %788 = vmatprep.subr.bf16.mxu0 %v1528_v63  ;;  %v875_v63 = vor.u32 %v873_v57, %v859_v56 }
  0x43   : > { %556 = vmatpush1.bf16.msra.mxu1 %v1530_v0  ;;  %v879_v0 = vrot.slane %v877_v59, 1 }
  0x44   : > { %789 = vmatpush1.bf16.msra.mxu0 %v1531_v1  ;;  %1379 = vmatprep.subr.bf16.mxu1 %v1539_v2  ;;  %v860_v1 = vsel %vm848_vm0, %v855_v62, %v859_v56 }
  0x45   : > { %1053 = vmatprep.subr.bf16.mxu0 %v1539_v2  ;;  %v880_v2 = vsel %vm848_vm0, %v875_v63, %v879_v0 }
  0x46   : > { %558 = vmatmul.mubr.bf16.vlgmr.msra.gmra.mrb[0].mxu1 %v1532_v3 }
  0x47   : > { %791 = vmatmul.mubr.bf16.vlgmr.msra.gmra.mrb[0].mxu0 %v1868_v6  ;;  %1395 = vmatpush1.bf16.msra.mxu1 %v1537_v4 }
  0x48   : > { %1054 = vmatpush1.bf16.msra.mxu0 %v1537_v4  ;;  %1380 = vmatprep.subr.bf16.mxu1 %v1543_v8 }
  0x49   : > { %1055 = vmatprep.subr.bf16.mxu0 %v1543_v8  ;;  %567 = vmatprep.mubr.bf16.mxu1 %v1577_v9 }
  0x4a   : > { %800 = vmatprep.mubr.bf16.mxu0 %v1579_v7 }
  0x4b   : > { %1396 = vmatpush1.bf16.msra.mxu1 %v1541_v13 }
  0x4c   : > { %1056 = vmatpush1.bf16.msra.mxu0 %v1541_v13  ;;  %1381 = vmatprep.subr.bf16.mxu1 %v1546_v15 }
  0x4d   : > { %1057 = vmatprep.subr.bf16.mxu0 %v1546_v15 }
  0x4e   : > { %568 = vmatmul.mubr.bf16.gmra.mrb[4].mxu1 %v1584_v19  ;;  %v1116_v19 = vlaneseq }
  0x4f   : > { %801 = vmatmul.mubr.bf16.gmra.mrb[4].mxu0 %v1890_v20  ;;  %1397 = vmatpush1.bf16.msra.mxu1 %v1544_v22 }
  0x50   : > { %1058 = vmatpush1.bf16.msra.mxu0 %v1544_v22  ;;  %1382 = vmatprep.subr.bf16.mxu1 %v1549_v25  ;;  %v1117_v20 = vshrl.u32 %v1116_v19, 7  ;;  %v1114_v22 = vld [vmem:[%s1999_s5] sm:$0x3] }
  0x51   : > { %1059 = vmatprep.subr.bf16.mxu0 %v1549_v25  ;;  %1085 = vmatprep.mubr.bf16.mxu0 %v872_v27 }
  0x52   : > { %1095 = vmatprep.mubr.bf16.mxu1 %v888_v29  ;;  %v1118_v21 = vsub.s32 0, %v1117_v20  ;;  %v1122_v23 = vsub.s32 1, %v1117_v20 }
  0x53   : > { %1398 = vmatpush1.bf16.msra.mxu1 %v1547_v28 }
  0x54   : > { %1060 = vmatpush1.bf16.msra.mxu0 %v1547_v28  ;;  %1383 = vmatprep.subr.bf16.mxu1 %v1552_v30  ;;  %v1119_v24 = vrot.slane %v1114_v22, %v1118_v21  ;;  %v1123_v27 = vrot.slane %v1114_v22, %v1122_v23 }
  0x55   : > { %1061 = vmatprep.subr.bf16.mxu0 %v1552_v30 }
  0x57   : > { %1399 = vmatpush1.bf16.msra.mxu1 %v1550_v31 }
  0x58   : > { %1062 = vmatpush1.bf16.msra.mxu0 %v1550_v31  ;;  %1384 = vmatprep.subr.bf16.mxu1 %v1555_v32 }
  0x59   : > { %1063 = vmatprep.subr.bf16.mxu0 %v1555_v32 }
  0x5b   : > { %1400 = vmatpush1.bf16.msra.mxu1 %v1553_v33 }
  0x5c   : > { %1064 = vmatpush1.bf16.msra.mxu0 %v1553_v33  ;;  %1385 = vmatprep.subr.bf16.mxu1 %v1558_v34 }
  0x5d   : > { %1065 = vmatprep.subr.bf16.mxu0 %v1558_v34 }
  0x5f   : > { %1401 = vmatpush1.bf16.msra.mxu1 %v1556_v35 }
  0x60   : > { %1066 = vmatpush1.bf16.msra.mxu0 %v1556_v35  ;;  %1386 = vmatprep.subr.bf16.mxu1 %v1561_v36 }
  0x61   : > { %1067 = vmatprep.subr.bf16.mxu0 %v1561_v36 }
  0x63   : > { %1402 = vmatpush1.bf16.msra.mxu1 %v1559_v37 }
  0x64   : > { %1068 = vmatpush1.bf16.msra.mxu0 %v1559_v37  ;;  %1387 = vmatprep.subr.bf16.mxu1 %v1564_v38 }
  0x65   : > { %1069 = vmatprep.subr.bf16.mxu0 %v1564_v38 }
  0x67   : > { %1403 = vmatpush1.bf16.msra.mxu1 %v1562_v39 }
  0x68   : > { %1070 = vmatpush1.bf16.msra.mxu0 %v1562_v39  ;;  %1388 = vmatprep.subr.bf16.mxu1 %v1567_v40 }
  0x69   : > { %1071 = vmatprep.subr.bf16.mxu0 %v1567_v40 }
  0x6b   : > { %1404 = vmatpush1.bf16.msra.mxu1 %v1565_v41 }
  0x6c   : > { %1072 = vmatpush1.bf16.msra.mxu0 %v1565_v41  ;;  %1389 = vmatprep.subr.bf16.mxu1 %v1570_v42 }
  0x6d   : > { %1073 = vmatprep.subr.bf16.mxu0 %v1570_v42 }
  0x6f   : > { %1405 = vmatpush1.bf16.msra.mxu1 %v1568_v43 }
  0x70   : > { %1074 = vmatpush1.bf16.msra.mxu0 %v1568_v43  ;;  %1390 = vmatprep.subr.bf16.mxu1 %v1573_v44 }
  0x71   : > { %1075 = vmatprep.subr.bf16.mxu0 %v1573_v44 }
  0x73   : > { %1406 = vmatpush1.bf16.msra.mxu1 %v1571_v45 }
  0x74   : > { %1076 = vmatpush1.bf16.msra.mxu0 %v1571_v45  ;;  %1391 = vmatprep.subr.bf16.mxu1 %v1576_v46 }
  0x75   : > { %1077 = vmatprep.subr.bf16.mxu0 %v1576_v46 }
  0x77   : > { %1407 = vmatpush1.bf16.msra.mxu1 %v1574_v47 }
  0x78   : > { %1078 = vmatpush1.bf16.msra.mxu0 %v1574_v47  ;;  %1392 = vmatprep.subr.bf16.mxu1 %v1583_v48 }
  0x79   : > { %1079 = vmatprep.subr.bf16.mxu0 %v1583_v48 }
  0x7b   : > { %1408 = vmatpush1.bf16.msra.mxu1 %v1581_v50 }
  0x7c   : > { %1080 = vmatpush1.bf16.msra.mxu0 %v1581_v50  ;;  %1393 = vmatprep.subr.bf16.mxu1 %v1588_v53 }
  0x7d   : > { %1081 = vmatprep.subr.bf16.mxu0 %v1588_v53 }
  0x7f   : > { %1409 = vmatpush1.bf16.msra.mxu1 %v1586_v58 }
  0x80   : > { %1082 = vmatpush1.bf16.msra.mxu0 %v1586_v58  ;;  %1394 = vmatprep.subr.bf16.mxu1 %v1591_v60 }
  0x81   : > { %1083 = vmatprep.subr.bf16.mxu0 %v1591_v60 }
  0x83   : > { %1410 = vmatpush1.bf16.msra.mxu1 %v1589_v61 }
  0x84   : > { %1084 = vmatpush1.bf16.msra.mxu0 %v1589_v61 }
  0x86   : > { %1096 = vmatmul.mubr.bf16.vlgmr.msra.gmra.mrb[8].mxu1 %v880_v2 }
  0x87   : > { %1086 = vmatmul.mubr.bf16.vlgmr.msra.gmra.mrb[0].mxu0 %v860_v1 }
 0x119   : > { %v559_v3 = vpop.f32.mrb[0].mxu1 }
 0x11a   : > { %v561_v4 = vpop.f32.mrb[1].mxu1 }
 0x11b   : > { %v563_v5 = vpop.f32.mrb[2].mxu1 }
 0x11c   : > { %v565_v6 = vpop.f32.mrb[3].mxu1 }
 0x121   : > { %v569_v7 = vpop.f32.mrb[4].mxu1 }
 0x122   : > { %v802_v8 = vpop.f32.mrb[4].mxu0  ;;  %v571_v10 = vpop.f32.mrb[5].mxu1 }
 0x123   : > { %v803_v9 = vadd.f32 %v802_v8, %v569_v7  ;;  %v804_v11 = vpop.f32.mrb[5].mxu0  ;;  %v573_v13 = vpop.f32.mrb[6].mxu1 }
 0x124   : > { %v805_v12 = vadd.f32 %v804_v11, %v571_v10  ;;  %v806_v14 = vpop.f32.mrb[6].mxu0  ;;  %v575_v16 = vpop.f32.mrb[7].mxu1 }
 0x125   : > { %v807_v15 = vadd.f32 %v806_v14, %v573_v13  ;;  %v808_v17 = vpop.f32.mrb[7].mxu0 }
 0x126   : > { %v809_v18 = vadd.f32 %v808_v17, %v575_v16 }
 0x159   : > { %v1097_v26 = vpop.f32.mrb[8].mxu1 }
 0x15a   : > { %v1087_v25 = vpop.f32.mrb[0].mxu0  ;;  %v1110_v29 = vadd.f32 %v1097_v26, %v803_v9  ;;  %v1099_v31 = vpop.f32.mrb[9].mxu1 }
 0x15b   : > { %v1411_v28 = vadd.f32 %v1087_v25, %v559_v3  ;;  %v1089_v30 = vpop.f32.mrb[1].mxu0  ;;  %v1111_v33 = vadd.f32 %v1099_v31, %v805_v12  ;;  %v1101_v35 = vpop.f32.mrb[10].mxu1 }
 0x15c   : > { %v1412_v32 = vadd.f32 %v1089_v30, %v561_v4  ;;  %v1091_v34 = vpop.f32.mrb[2].mxu0  ;;  %v1130_v37 = vadd.f32 %v1119_v24, %v1110_v29  ;;  %v1112_v39 = vadd.f32 %v1101_v35, %v807_v15  ;;  %v1103_v41 = vpop.f32.mrb[11].mxu1 }
 0x15d   : > { %v1126_v36 = vadd.f32 %v1411_v28, %v1119_v24  ;;  %v1413_v38 = vadd.f32 %v1091_v34, %v563_v5  ;;  %v1093_v40 = vpop.f32.mrb[3].mxu0  ;;  %v1131_v43 = vadd.f32 %v1123_v27, %v1111_v33  ;;  %v1113_v45 = vadd.f32 %v1103_v41, %v809_v18 }
 0x15e   : > { %v1127_v42 = vadd.f32 %v1412_v32, %v1123_v27  ;;  %v1414_v44 = vadd.f32 %v1093_v40, %v565_v6  ;;  %vm1138_vm2 = vcmp.gt.f32.partialorder %v1130_v37, 0.0  ;;  %v1146_v47 = vmul.f32 0.2, %v1130_v37 }
 0x15f   : > { %vm1134_vm1 = vcmp.gt.f32.partialorder %v1126_v36, 0.0  ;;  %v1142_v46 = vmul.f32 0.2, %v1126_v36  ;;  %vm1139_vm4 = vcmp.gt.f32.partialorder %v1131_v43, 0.0  ;;  %v1147_v49 = vmul.f32 0.2, %v1131_v43 }
 0x160   : > { %vm1135_vm3 = vcmp.gt.f32.partialorder %v1127_v42, 0.0  ;;  %v1143_v48 = vmul.f32 0.2, %v1127_v42  ;;  %v1154_v51 = vsel %vm1138_vm2, %v1130_v37, %v1146_v47  ;;  %v1128_v52 = vadd.f32 %v1413_v38, %v1119_v24 }
 0x161   : > { %v1150_v50 = vsel %vm1134_vm1, %v1126_v36, %v1142_v46  ;;  %v1132_v53 = vadd.f32 %v1119_v24, %v1112_v39  ;;  %v1155_v55 = vsel %vm1139_vm4, %v1131_v43, %v1147_v49  ;;  %v1129_v56 = vadd.f32 %v1414_v44, %v1123_v27 }
 0x162   : > { %v1151_v54 = vsel %vm1135_vm3, %v1127_v42, %v1143_v48  ;;  %v1133_v57 = vadd.f32 %v1123_v27, %v1113_v45  ;;  %v1377_v59 = vpack.c.bf16 %v1155_v55, %v1154_v51  ;;  %vm1136_vm5 = vcmp.gt.f32.partialorder %v1128_v52, 0.0 }
 0x163   : > { %v1375_v58 = vpack.c.bf16 %v1151_v54, %v1150_v50  ;;  %v1144_v60 = vmul.f32 0.2, %v1128_v52  ;;  %vm1140_vm6 = vcmp.gt.f32.partialorder %v1132_v53, 0.0  ;;  %v1148_v61 = vmul.f32 0.2, %v1132_v53 }
 0x164   : > { %vm1137_vm7 = vcmp.gt.f32.partialorder %v1129_v56, 0.0  ;;  %v1145_v62 = vmul.f32 0.2, %v1129_v56  ;;  %1184 = vst [vmem:[%s271_s22 + $0x10] sm:$0xff] %v1377_v59  ;;  %vm1141_vm8 = vcmp.gt.f32.partialorder %v1133_v57, 0.0 }
 0x165   : > { %1182 = vst [vmem:[%s271_s22] sm:$0xff] %v1375_v58  ;;  %v1152_v63 = vsel %vm1136_vm5, %v1128_v52, %v1144_v60  ;;  %v1149_v0 = vmul.f32 0.2, %v1133_v57  ;;  %v1156_v1 = vsel %vm1140_vm6, %v1132_v53, %v1148_v61 }
 0x166   : > { %v1153_v2 = vsel %vm1137_vm7, %v1129_v56, %v1145_v62 }
 0x167   : > { %v1376_v3 = vpack.c.bf16 %v1153_v2, %v1152_v63  ;;  %v1157_v4 = vsel %vm1141_vm8, %v1133_v57, %v1149_v0 }
 0x168   : > { %v1378_v5 = vpack.c.bf16 %v1157_v4, %v1156_v1 }
 0x169   : > { %1183 = vst [vmem:[%s271_s22 + $0x8] sm:$0xff] %v1376_v3 }
 0x16a   : > { %1185 = vst [vmem:[%s271_s22 + $0x18] sm:$0xff] %v1378_v5 }
 0x16b PF: > { %s16_s21 = sadd.s32 1, %s1600_s21  }
 0x16c   : > { %p13_p4 = scmp.ge.s32.totalorder %s16_s21, 4  }
 0x16e   :  { %15 = sbr.rel (!%p13_p4) target bundleno = 1 (0x1), region = 77 }

// kernel: wnet_forward.11
= control target key start
LH: loop header
LB: loop body
LE: loop exit
PB: predicated region body
PF: predicated region fallthrough
CT: control target
= control target key end

     0   :  { %s1428_s21 = smov 0   ;;  %s1759_s0 = inlined_call_operand.vmem [shape: bf16[2,9,256], index: 0, kind: input, shape index: {}]   ;;  %s1760_s1 = inlined_call_operand.vmem [shape: bf16[2,9,256], index: 1, kind: input, shape index: {}]   ;;  %s1761_s2 = inlined_call_operand.vmem [shape: bf16[256,256], index: 2, kind: input, shape index: {}]   ;;  %s1762_s3 = inlined_call_operand.vmem [shape: bf16[256,256], index: 3, kind: input, shape index: {}]   ;;  %s1763_s4 = inlined_call_operand.vmem [shape: bf16[256,256], index: 4, kind: input, shape index: {}]   ;;  %s1764_s5 = inlined_call_operand.vmem [shape: f32[1,256], index: 5, kind: input, shape index: {}]   ;;  %s1765_s6 = inlined_call_operand.vmem [shape: bf16[2,8,256], index: 6, kind: output, shape index: {}]  }
   0x1 LB: > { %s1107_s22 = sadd.s32 4294967295, %s1391_s21   ;;  %p1111_p0 = scmp.ge.s32.totalorder %s1391_s21, 1  ;;  %s1391_s21 = sphi %s1428_s21, %s16_s21  }
   0x2   : > { %p222_p1 = scmp.lt.s32.totalorder %s1391_s21, 3 }
   0x4   : > { %p223_p2 = pnand %p1111_p0, %p222_p1 }
   0x5   : > { %v1235_v0 = vld [vmem:[%s1762_s3 + $0x4] ss:$8 sps:$4 sm:$0xff] (!%p223_p2)   ;;  %v1239_v2 = vld [vmem:[%s1762_s3] ss:$8 sps:$4 sm:$0xff] (!%p223_p2)   ;;  %v1241_v4 = vld [vmem:[%s1762_s3 + $0x14] ss:$8 sps:$4 sm:$0xff] (!%p223_p2)  }
   0x6   : > { %226 = sbr.rel (%p223_p2) target bundleno = 357 (0x165), region = 44  ;;  %v1237_v1 = vld [vmem:[%s1761_s2 + $0x4] ss:$8 sps:$4 sm:$0xff] (!%p223_p2)   ;;  %506 = vmatprep.subr.bf16.mxu0 (!%p223_p2), %v1235_v0  ;;  %v1240_v3 = vld [vmem:[%s1761_s2] ss:$8 sps:$4 sm:$0xff] (!%p223_p2)   ;;  %p257_p3 = scmp.lt.s32.totalorder (!%p223_p2), %s1107_s22, 1 }
   0x7   : > { %714 = vmatprep.subr.bf16.mxu1 (!%p223_p2), %v1237_v1  ;;  %507 = vmatpush1.bf16.msra.mxu0 (!%p223_p2), %v1239_v2  ;;  %v1243_v5 = vld [vmem:[%s1761_s2 + $0x14] ss:$8 sps:$4 sm:$0xff] (!%p223_p2)   ;;  %v1245_v6 = vld [vmem:[%s1762_s3 + $0x10] ss:$8 sps:$4 sm:$0xff] (!%p223_p2)   ;;  %v1247_v8 = vld [vmem:[%s1762_s3 + $0x24] ss:$8 sps:$4 sm:$0xff] (!%p223_p2)  }
   0x8   : > { %715 = vmatpush1.bf16.msra.mxu1 (!%p223_p2), %v1240_v3  ;;  %508 = vmatprep.subr.bf16.mxu0 (!%p223_p2), %v1241_v4  ;;  %v1246_v7 = vld [vmem:[%s1761_s2 + $0x10] ss:$8 sps:$4 sm:$0xff] (!%p223_p2)   ;;  %v1249_v9 = vld [vmem:[%s1761_s2 + $0x24] ss:$8 sps:$4 sm:$0xff] (!%p223_p2)   ;;  %v1251_v10 = vld [vmem:[%s1762_s3 + $0x20] ss:$8 sps:$4 sm:$0xff] (!%p223_p2)  }
   0x9   : > { %716 = vmatprep.subr.bf16.mxu1 (!%p223_p2), %v1243_v5  ;;  %v1252_v11 = vld [vmem:[%s1761_s2 + $0x20] ss:$8 sps:$4 sm:$0xff] (!%p223_p2)   ;;  %v1253_v12 = vld [vmem:[%s1762_s3 + $0x34] ss:$8 sps:$4 sm:$0xff] (!%p223_p2)   ;;  %v1257_v14 = vld [vmem:[%s1762_s3 + $0x30] ss:$8 sps:$4 sm:$0xff] (!%p223_p2)  }
   0xa   : > { %v1255_v13 = vld [vmem:[%s1761_s2 + $0x34] ss:$8 sps:$4 sm:$0xff] (!%p223_p2)   ;;  %v1258_v15 = vld [vmem:[%s1761_s2 + $0x30] ss:$8 sps:$4 sm:$0xff] (!%p223_p2)   ;;  %v1259_v16 = vld [vmem:[%s1762_s3 + $0x44] ss:$8 sps:$4 sm:$0xff] (!%p223_p2)  }
   0xb   : > { %509 = vmatpush1.bf16.msra.mxu0 (!%p223_p2), %v1245_v6  ;;  %v1261_v17 = vld [vmem:[%s1761_s2 + $0x44] ss:$8 sps:$4 sm:$0xff] (!%p223_p2)   ;;  %v1263_v18 = vld [vmem:[%s1762_s3 + $0x40] ss:$8 sps:$4 sm:$0xff] (!%p223_p2)   ;;  %v1265_v20 = vld [vmem:[%s1762_s3 + $0x54] ss:$8 sps:$4 sm:$0xff] (!%p223_p2)  }
   0xc   : > { %717 = vmatpush1.bf16.msra.mxu1 (!%p223_p2), %v1246_v7  ;;  %510 = vmatprep.subr.bf16.mxu0 (!%p223_p2), %v1247_v8  ;;  %v1264_v19 = vld [vmem:[%s1761_s2 + $0x40] ss:$8 sps:$4 sm:$0xff] (!%p223_p2)   ;;  %v1267_v21 = vld [vmem:[%s1761_s2 + $0x54] ss:$8 sps:$4 sm:$0xff] (!%p223_p2)   ;;  %v1269_v22 = vld [vmem:[%s1762_s3 + $0x50] ss:$8 sps:$4 sm:$0xff] (!%p223_p2)  }
   0xd   : > { %718 = vmatprep.subr.bf16.mxu1 %v1249_v9  ;;  %v1270_v23 = vld [vmem:[%s1761_s2 + $0x50] ss:$8 sps:$4 sm:$0xff]   ;;  %v1271_v24 = vld [vmem:[%s1762_s3 + $0x64] ss:$8 sps:$4 sm:$0xff]   ;;  %v1275_v26 = vld [vmem:[%s1762_s3 + $0x60] ss:$8 sps:$4 sm:$0xff]  }
   0xe   : > { %v1273_v25 = vld [vmem:[%s1761_s2 + $0x64] ss:$8 sps:$4 sm:$0xff]   ;;  %v1276_v27 = vld [vmem:[%s1761_s2 + $0x60] ss:$8 sps:$4 sm:$0xff]   ;;  %v1277_v28 = vld [vmem:[%s1762_s3 + $0x74] ss:$8 sps:$4 sm:$0xff]  }
   0xf   : > { %511 = vmatpush1.bf16.msra.mxu0 %v1251_v10  ;;  %v1279_v29 = vld [vmem:[%s1761_s2 + $0x74] ss:$8 sps:$4 sm:$0xff]   ;;  %v1281_v30 = vld [vmem:[%s1762_s3 + $0x70] ss:$8 sps:$4 sm:$0xff]   ;;  %v1283_v32 = vld [vmem:[%s1762_s3 + $0x84] ss:$8 sps:$4 sm:$0xff]  }
  0x10   : > { %719 = vmatpush1.bf16.msra.mxu1 %v1252_v11  ;;  %512 = vmatprep.subr.bf16.mxu0 %v1253_v12  ;;  %v1282_v31 = vld [vmem:[%s1761_s2 + $0x70] ss:$8 sps:$4 sm:$0xff]   ;;  %v1285_v33 = vld [vmem:[%s1761_s2 + $0x84] ss:$8 sps:$4 sm:$0xff]   ;;  %v1287_v34 = vld [vmem:[%s1762_s3 + $0x80] ss:$8 sps:$4 sm:$0xff]  }
  0x11   : > { %720 = vmatprep.subr.bf16.mxu1 %v1255_v13  ;;  %v1288_v35 = vld [vmem:[%s1761_s2 + $0x80] ss:$8 sps:$4 sm:$0xff]   ;;  %v1289_v36 = vld [vmem:[%s1762_s3 + $0x94] ss:$8 sps:$4 sm:$0xff]   ;;  %s1767_s22 = smov (!%p257_p3, %s1107_s22), 1 }
  0x12   : > { %v1291_v37 = vld [vmem:[%s1761_s2 + $0x94] ss:$8 sps:$4 sm:$0xff]   ;;  %v1293_v38 = vld [vmem:[%s1762_s3 + $0x90] ss:$8 sps:$4 sm:$0xff]   ;;  %v1295_v40 = vld [vmem:[%s1762_s3 + $0xa4] ss:$8 sps:$4 sm:$0xff]  }
  0x13   : > { %513 = vmatpush1.bf16.msra.mxu0 %v1257_v14  ;;  %v1294_v39 = vld [vmem:[%s1761_s2 + $0x90] ss:$8 sps:$4 sm:$0xff]   ;;  %s1223_s15 = sshll.u32 %s1767_s22, 4  ;;  %v1297_v41 = vld [vmem:[%s1761_s2 + $0xa4] ss:$8 sps:$4 sm:$0xff]  }
  0x14   : > { %721 = vmatpush1.bf16.msra.mxu1 %v1258_v15  ;;  %514 = vmatprep.subr.bf16.mxu0 %v1259_v16  ;;  %v1299_v42 = vld [vmem:[%s1762_s3 + $0xa0] ss:$8 sps:$4 sm:$0xff]   ;;  %s266_s26 = scalar_lea.vmem %s1760_s1, %s1223_s15  ;;  %v1301_v44 = vld [vmem:[%s1762_s3 + $0xb4] ss:$8 sps:$4 sm:$0xff]   ;;  %s261_s7 = scalar_lea.vmem %s1759_s0, %s1223_s15  ;;  %v1305_v47 = vld [vmem:[%s1762_s3 + $0xb0] ss:$8 sps:$4 sm:$0xff]  }
  0x15   : > { %722 = vmatprep.subr.bf16.mxu1 %v1261_v17  ;;  %v1300_v43 = vld [vmem:[%s1761_s2 + $0xa0] ss:$8 sps:$4 sm:$0xff]   ;;  %v1303_v45 = vld [vmem:[%s1761_s2 + $0xb4] ss:$8 sps:$4 sm:$0xff]   ;;  %v1306_v50 = vld [vmem:[%s1761_s2 + $0xb0] ss:$8 sps:$4 sm:$0xff]  }
  0x16   : > { %v273_v46 = vld [vmem:[%s266_s26] sm:$0xff]  ;;  %v1313_v56 = vld [vmem:[%s1762_s3 + $0xd4] ss:$8 sps:$4 sm:$0xff]   ;;  %v1615_v58 = vld [vmem:[%s261_s7 + $0x8] sm:$0x11]  ;;  %s1225_s26 = sshll.u32 %s1767_s22, 3 }
  0x17   : > { %515 = vmatpush1.bf16.msra.mxu0 %v1263_v18  ;;  %v1119_v48 = vcombine.high %v273_v46, %v273_v46  ;;  %v1590_v49 = vld [vmem:[%s261_s7] sm:$0xff]  ;;  %v1315_v57 = vld [vmem:[%s1761_s2 + $0xd4] ss:$8 sps:$4 sm:$0xff]   ;;  %v1317_v59 = vld [vmem:[%s1762_s3 + $0xd0] ss:$8 sps:$4 sm:$0xff]   ;;  %v1118_v10 = vcombine.low %v273_v46, %v273_v46  ;;  %s271_s29 = scalar_lea.vmem %s1765_s6, %s1225_s26 }
  0x18   : > { %723 = vmatpush1.bf16.msra.mxu1 %v1264_v19  ;;  %516 = vmatprep.subr.bf16.mxu0 %v1265_v20  ;;  %v1307_v51 = vld [vmem:[%s1762_s3 + $0xc4] ss:$8 sps:$4 sm:$0xff]   ;;  %v1153_v52 = vcombine.high %v1590_v49, %v1590_v49  ;;  %v1311_v54 = vld [vmem:[%s1762_s3 + $0xc0] ss:$8 sps:$4 sm:$0xff]   ;;  %v1318_v60 = vld [vmem:[%s1761_s2 + $0xd0] ss:$8 sps:$4 sm:$0xff]   ;;  %v1187_v62 = vcombine.high %v1590_v49, %v1615_v58  ;;  %v1152_v11 = vcombine.low %v1590_v49, %v1590_v49 }
  0x19   : > { %724 = vmatprep.subr.bf16.mxu1 %v1267_v21  ;;  %v1309_v53 = vld [vmem:[%s1761_s2 + $0xc4] ss:$8 sps:$4 sm:$0xff]   ;;  %538 = vmatprep.mubr.bf16.mxu0 %v1119_v48  ;;  %v1312_v55 = vld [vmem:[%s1761_s2 + $0xc0] ss:$8 sps:$4 sm:$0xff]   ;;  %v1325_v2 = vld [vmem:[%s1762_s3 + $0xf4] ss:$8 sps:$4 sm:$0xff]  }
  0x1a   : > { %746 = vmatprep.mubr.bf16.mxu1 %v1153_v52  ;;  %v1319_v61 = vld [vmem:[%s1762_s3 + $0xe4] ss:$8 sps:$4 sm:$0xff]   ;;  %v1323_v0 = vld [vmem:[%s1762_s3 + $0xe0] ss:$8 sps:$4 sm:$0xff]   ;;  %v802_v3 = vshll.u32 %v1187_v62, 16  ;;  %v800_v7 = vshrl.u32 %v1187_v62, 16 }
  0x1b   : > { %517 = vmatpush1.bf16.msra.mxu0 %v1269_v22  ;;  %v1321_v63 = vld [vmem:[%s1761_s2 + $0xe4] ss:$8 sps:$4 sm:$0xff]   ;;  %v1324_v1 = vld [vmem:[%s1761_s2 + $0xe0] ss:$8 sps:$4 sm:$0xff]   ;;  %v1327_v4 = vld [vmem:[%s1761_s2 + $0xf4] ss:$8 sps:$4 sm:$0xff]  }
  0x1c   : > { %725 = vmatpush1.bf16.msra.mxu1 %v1270_v23  ;;  %518 = vmatprep.subr.bf16.mxu0 %v1271_v24  ;;  %v1329_v5 = vld [vmem:[%s1762_s3 + $0xf0] ss:$8 sps:$4 sm:$0xff]   ;;  %v804_v8 = vrot.slane %v802_v3, 1  ;;  %v1338_v9 = vld [vmem:[%s1763_s4 + $0x4] ss:$8 sps:$4 sm:$0xff]  }
  0x1d   : > { %726 = vmatprep.subr.bf16.mxu1 %v1273_v25  ;;  %v1330_v6 = vld [vmem:[%s1761_s2 + $0xf0] ss:$8 sps:$4 sm:$0xff]   ;;  %v1336_v12 = vld [vmem:[%s1763_s4] ss:$8 sps:$4 sm:$0xff]   ;;  %v1341_v14 = vld [vmem:[%s1763_s4 + $0x14] ss:$8 sps:$4 sm:$0xff]  }
  0x1e   : > { %v805_v13 = vor.u32 %v804_v8, %v800_v7  ;;  %v1339_v15 = vld [vmem:[%s1763_s4 + $0x10] ss:$8 sps:$4 sm:$0xff]   ;;  %v1344_v16 = vld [vmem:[%s1763_s4 + $0x24] ss:$8 sps:$4 sm:$0xff]   ;;  %v1342_v17 = vld [vmem:[%s1763_s4 + $0x20] ss:$8 sps:$4 sm:$0xff]  }
  0x1f   : > { %519 = vmatpush1.bf16.msra.mxu0 %v1275_v26  ;;  %v1347_v18 = vld [vmem:[%s1763_s4 + $0x34] ss:$8 sps:$4 sm:$0xff]   ;;  %v1345_v19 = vld [vmem:[%s1763_s4 + $0x30] ss:$8 sps:$4 sm:$0xff]   ;;  %v1350_v20 = vld [vmem:[%s1763_s4 + $0x44] ss:$8 sps:$4 sm:$0xff]  }
  0x20   : > { %727 = vmatpush1.bf16.msra.mxu1 %v1276_v27  ;;  %520 = vmatprep.subr.bf16.mxu0 %v1277_v28  ;;  %v1348_v21 = vld [vmem:[%s1763_s4 + $0x40] ss:$8 sps:$4 sm:$0xff]   ;;  %v1353_v22 = vld [vmem:[%s1763_s4 + $0x54] ss:$8 sps:$4 sm:$0xff]   ;;  %v1351_v23 = vld [vmem:[%s1763_s4 + $0x50] ss:$8 sps:$4 sm:$0xff]  }
  0x21   : > { %728 = vmatprep.subr.bf16.mxu1 %v1279_v29  ;;  %v1356_v24 = vld [vmem:[%s1763_s4 + $0x64] ss:$8 sps:$4 sm:$0xff]   ;;  %v1354_v25 = vld [vmem:[%s1763_s4 + $0x60] ss:$8 sps:$4 sm:$0xff]   ;;  %v1359_v26 = vld [vmem:[%s1763_s4 + $0x74] ss:$8 sps:$4 sm:$0xff]  }
  0x22   : > { %v1357_v27 = vld [vmem:[%s1763_s4 + $0x70] ss:$8 sps:$4 sm:$0xff]   ;;  %v1362_v28 = vld [vmem:[%s1763_s4 + $0x84] ss:$8 sps:$4 sm:$0xff]   ;;  %v1360_v29 = vld [vmem:[%s1763_s4 + $0x80] ss:$8 sps:$4 sm:$0xff]  }
  0x23   : > { %521 = vmatpush1.bf16.msra.mxu0 %v1281_v30  ;;  %v1365_v30 = vld [vmem:[%s1763_s4 + $0x94] ss:$8 sps:$4 sm:$0xff]   ;;  %v1011_v62 = vld [vmem:[%s1764_s5] sm:$0x3] }
  0x24   : > { %729 = vmatpush1.bf16.msra.mxu1 %v1282_v31  ;;  %522 = vmatprep.subr.bf16.mxu0 %v1283_v32  ;;  %v1363_v31 = vld [vmem:[%s1763_s4 + $0x90] ss:$8 sps:$4 sm:$0xff]   ;;  %v1368_v32 = vld [vmem:[%s1763_s4 + $0xa4] ss:$8 sps:$4 sm:$0xff]  }
  0x25   : > { %730 = vmatprep.subr.bf16.mxu1 %v1285_v33  ;;  %v1366_v33 = vld [vmem:[%s1763_s4 + $0xa0] ss:$8 sps:$4 sm:$0xff]  }
  0x27   : > { %523 = vmatpush1.bf16.msra.mxu0 %v1287_v34  ;;  %v1371_v34 = vld [vmem:[%s1763_s4 + $0xb4] ss:$8 sps:$4 sm:$0xff]  }
  0x28   : > { %731 = vmatpush1.bf16.msra.mxu1 %v1288_v35  ;;  %524 = vmatprep.subr.bf16.mxu0 %v1289_v36  ;;  %v1369_v35 = vld [vmem:[%s1763_s4 + $0xb0] ss:$8 sps:$4 sm:$0xff]   ;;  %v1374_v36 = vld [vmem:[%s1763_s4 + $0xc4] ss:$8 sps:$4 sm:$0xff]  }
  0x29   : > { %732 = vmatprep.subr.bf16.mxu1 %v1291_v37  ;;  %v1372_v37 = vld [vmem:[%s1763_s4 + $0xc0] ss:$8 sps:$4 sm:$0xff]  }
  0x2b   : > { %525 = vmatpush1.bf16.msra.mxu0 %v1293_v38  ;;  %v1377_v38 = vld [vmem:[%s1763_s4 + $0xd4] ss:$8 sps:$4 sm:$0xff]  }
  0x2c   : > { %733 = vmatpush1.bf16.msra.mxu1 %v1294_v39  ;;  %526 = vmatprep.subr.bf16.mxu0 %v1295_v40  ;;  %v1186_v39 = vcombine.low %v1590_v49, %v1615_v58  ;;  %v1375_v40 = vld [vmem:[%s1763_s4 + $0xd0] ss:$8 sps:$4 sm:$0xff]  }
  0x2d   : > { %734 = vmatprep.subr.bf16.mxu1 %v1297_v41  ;;  %v1380_v41 = vld [vmem:[%s1763_s4 + $0xe4] ss:$8 sps:$4 sm:$0xff]  }
  0x2f   : > { %527 = vmatpush1.bf16.msra.mxu0 %v1299_v42  ;;  %v795_v42 = vshll.u32 %v1186_v39, 16 }
  0x30   : > { %735 = vmatpush1.bf16.msra.mxu1 %v1300_v43  ;;  %528 = vmatprep.subr.bf16.mxu0 %v1301_v44  ;;  %v1378_v43 = vld [vmem:[%s1763_s4 + $0xe0] ss:$8 sps:$4 sm:$0xff]   ;;  %v1383_v44 = vld [vmem:[%s1763_s4 + $0xf4] ss:$8 sps:$4 sm:$0xff]  }
  0x31   : > { %736 = vmatprep.subr.bf16.mxu1 %v1303_v45  ;;  %v793_v45 = vshrl.u32 %v1186_v39, 16  ;;  %v797_v46 = vrot.slane %v795_v42, 1 }
  0x33   : > { %529 = vmatpush1.bf16.msra.mxu0 %v1305_v47  ;;  %v1381_v47 = vld [vmem:[%s1763_s4 + $0xf0] ss:$8 sps:$4 sm:$0xff]   ;;  %v798_v48 = vor.u32 %v797_v46, %v793_v45 }
  0x34   : > { %737 = vmatpush1.bf16.msra.mxu1 %v1306_v50  ;;  %530 = vmatprep.subr.bf16.mxu0 %v1307_v51 }
  0x35   : > { %738 = vmatprep.subr.bf16.mxu1 %v1309_v53 }
  0x37   : > { %531 = vmatpush1.bf16.msra.mxu0 %v1311_v54 }
  0x38   : > { %739 = vmatpush1.bf16.msra.mxu1 %v1312_v55  ;;  %532 = vmatprep.subr.bf16.mxu0 %v1313_v56 }
  0x39   : > { %740 = vmatprep.subr.bf16.mxu1 %v1315_v57 }
  0x3b   : > { %533 = vmatpush1.bf16.msra.mxu0 %v1317_v59  ;;  %v1013_v59 = vlaneseq }
  0x3c   : > { %741 = vmatpush1.bf16.msra.mxu1 %v1318_v60  ;;  %534 = vmatprep.subr.bf16.mxu0 %v1319_v61 }
  0x3d   : > { %742 = vmatprep.subr.bf16.mxu1 %v1321_v63  ;;  %v1014_v60 = vshrl.u32 %v1013_v59, 7 }
  0x3f   : > { %535 = vmatpush1.bf16.msra.mxu0 %v1323_v0  ;;  %v1015_v61 = vsub.s32 0, %v1014_v60  ;;  %v1019_v63 = vsub.s32 1, %v1014_v60 }
  0x40   : > { %743 = vmatpush1.bf16.msra.mxu1 %v1324_v1  ;;  %536 = vmatprep.subr.bf16.mxu0 %v1325_v2 }
  0x41   : > { %744 = vmatprep.subr.bf16.mxu1 %v1327_v4  ;;  %v1016_v0 = vrot.slane %v1011_v62, %v1015_v61  ;;  %v1020_v2 = vrot.slane %v1011_v62, %v1019_v63 }
  0x43   : > { %537 = vmatpush1.bf16.msra.mxu0 %v1329_v5 }
  0x44   : > { %745 = vmatpush1.bf16.msra.mxu1 %v1330_v6  ;;  %968 = vmatprep.subr.bf16.mxu0 %v1338_v9 }
  0x46   : > { %539 = vmatmul.mubr.bf16.vlgmr.msra.gmra.mrb[0].mxu0 %v1118_v10 }
  0x47   : > { %747 = vmatmul.mubr.bf16.vlgmr.msra.gmra.mrb[0].mxu1 %v1152_v11  ;;  %969 = vmatpush1.bf16.msra.mxu0 %v1336_v12 }
  0x48   : > { %1000 = vmatprep.mubr.bf16.mxu0 %v805_v13  ;;  %970 = vmatprep.subr.bf16.mxu0 %v1341_v14 }
  0x4b   : > { %971 = vmatpush1.bf16.msra.mxu0 %v1339_v15 }
  0x4c   : > { %972 = vmatprep.subr.bf16.mxu0 %v1344_v16 }
  0x4f   : > { %973 = vmatpush1.bf16.msra.mxu0 %v1342_v17 }
  0x50   : > { %974 = vmatprep.subr.bf16.mxu0 %v1347_v18 }
  0x53   : > { %975 = vmatpush1.bf16.msra.mxu0 %v1345_v19 }
  0x54   : > { %976 = vmatprep.subr.bf16.mxu0 %v1350_v20 }
  0x57   : > { %977 = vmatpush1.bf16.msra.mxu0 %v1348_v21 }
  0x58   : > { %978 = vmatprep.subr.bf16.mxu0 %v1353_v22 }
  0x5b   : > { %979 = vmatpush1.bf16.msra.mxu0 %v1351_v23 }
  0x5c   : > { %980 = vmatprep.subr.bf16.mxu0 %v1356_v24 }
  0x5f   : > { %981 = vmatpush1.bf16.msra.mxu0 %v1354_v25 }
  0x60   : > { %982 = vmatprep.subr.bf16.mxu0 %v1359_v26 }
  0x63   : > { %983 = vmatpush1.bf16.msra.mxu0 %v1357_v27 }
  0x64   : > { %984 = vmatprep.subr.bf16.mxu0 %v1362_v28 }
  0x67   : > { %985 = vmatpush1.bf16.msra.mxu0 %v1360_v29 }
  0x68   : > { %986 = vmatprep.subr.bf16.mxu0 %v1365_v30 }
  0x6b   : > { %987 = vmatpush1.bf16.msra.mxu0 %v1363_v31 }
  0x6c   : > { %988 = vmatprep.subr.bf16.mxu0 %v1368_v32 }
  0x6f   : > { %989 = vmatpush1.bf16.msra.mxu0 %v1366_v33 }
  0x70   : > { %990 = vmatprep.subr.bf16.mxu0 %v1371_v34 }
  0x73   : > { %991 = vmatpush1.bf16.msra.mxu0 %v1369_v35 }
  0x74   : > { %992 = vmatprep.subr.bf16.mxu0 %v1374_v36 }
  0x77   : > { %993 = vmatpush1.bf16.msra.mxu0 %v1372_v37 }
  0x78   : > { %994 = vmatprep.subr.bf16.mxu0 %v1377_v38 }
  0x7b   : > { %995 = vmatpush1.bf16.msra.mxu0 %v1375_v40 }
  0x7c   : > { %996 = vmatprep.subr.bf16.mxu0 %v1380_v41 }
  0x7f   : > { %997 = vmatpush1.bf16.msra.mxu0 %v1378_v43 }
  0x80   : > { %998 = vmatprep.subr.bf16.mxu0 %v1383_v44 }
  0x83   : > { %999 = vmatpush1.bf16.msra.mxu0 %v1381_v47 }
  0x86   : > { %1001 = vmatmul.mubr.bf16.vlgmr.msra.gmra.mrb[4].mxu0 %v798_v48 }
 0x119   : > { %v540_v49 = vpop.f32.mrb[0].mxu0 }
 0x11a   : > { %v748_v50 = vpop.f32.mrb[0].mxu1  ;;  %v542_v52 = vpop.f32.mrb[1].mxu0 }
 0x11b   : > { %v749_v51 = vadd.f32 %v748_v50, %v540_v49  ;;  %v750_v53 = vpop.f32.mrb[1].mxu1  ;;  %v544_v55 = vpop.f32.mrb[2].mxu0 }
 0x11c   : > { %v751_v54 = vadd.f32 %v750_v53, %v542_v52  ;;  %v752_v56 = vpop.f32.mrb[2].mxu1  ;;  %v545_v57 = vpop.f32.mrb[3].mxu0 }
 0x11d   : > { %v753_v58 = vpop.f32.mrb[3].mxu1 }
 0x159   : > { %v1002_v1 = vpop.f32.mrb[4].mxu0 }
 0x15a   : > { %v1009_v3 = vadd.f32 %v1002_v1, %v749_v51  ;;  %v1004_v4 = vpop.f32.mrb[5].mxu0 }
 0x15b   : > { %v1010_v5 = vadd.f32 %v1004_v4, %v751_v54  ;;  %v1006_v6 = vpop.f32.mrb[6].mxu0 }
 0x15c   : > { %v1023_v7 = vadd.f32 %v1016_v0, %v1009_v3  ;;  %v1007_v8 = vpop.f32.mrb[7].mxu0 }
 0x15d   : > { %v1024_v9 = vadd.f32 %v1020_v2, %v1010_v5 }
 0x15e   : > { %vm1025_vm0 = vcmp.gt.f32.partialorder %v1023_v7, 0.0  ;;  %v1027_v10 = vmul.f32 0.2, %v1023_v7 }
 0x15f   : > { %vm1026_vm1 = vcmp.gt.f32.partialorder %v1024_v9, 0.0  ;;  %v1028_v11 = vmul.f32 0.2, %v1024_v9 }
 0x160   : > { %v1029_v12 = vsel %vm1025_vm0, %v1023_v7, %v1027_v10 }
 0x161   : > { %v1030_v13 = vsel %vm1026_vm1, %v1024_v9, %v1028_v11 }
 0x162   : > { %v1226_v14 = vpack.c.bf16 %v1030_v13, %v1029_v12 }
 0x164   : > { %1039 = vst [vmem:[%s271_s29] sm:$0xff] %v1226_v14 }
 0x165 PF: > { %s16_s21 = sadd.s32 1, %s1391_s21  }
 0x166   : > { %p13_p4 = scmp.ge.s32.totalorder %s16_s21, 4  }
 0x168   :  { %15 = sbr.rel (!%p13_p4) target bundleno = 1 (0x1), region = 77 }

// kernel: wnet_forward.16
= control target key start
LH: loop header
LB: loop body
LE: loop exit
PB: predicated region body
PF: predicated region fallthrough
CT: control target
= control target key end

     0   :  { %s1790_s21 = smov 0   ;;  %s2226_s0 = inlined_call_operand.vmem [shape: bf16[2,18,256], index: 0, kind: input, shape index: {}]   ;;  %s2227_s1 = inlined_call_operand.vmem [shape: bf16[256,256], index: 1, kind: input, shape index: {}]   ;;  %s2228_s2 = inlined_call_operand.vmem [shape: bf16[256,256], index: 2, kind: input, shape index: {}]   ;;  %s2229_s3 = inlined_call_operand.vmem [shape: bf16[256,256], index: 3, kind: input, shape index: {}]   ;;  %s2230_s4 = inlined_call_operand.vmem [shape: bf16[256,256], index: 4, kind: input, shape index: {}]   ;;  %s2231_s5 = inlined_call_operand.vmem [shape: f32[1,256], index: 5, kind: input, shape index: {}]   ;;  %s2232_s6 = inlined_call_operand.vmem [shape: bf16[2,16,512], index: 6, kind: output, shape index: {}]  }
   0x1 LB: > { %s1379_s22 = sadd.s32 4294967295, %s1753_s21   ;;  %p1383_p0 = scmp.ge.s32.totalorder %s1753_s21, 1  ;;  %s1753_s21 = sphi %s1790_s21, %s16_s21  }
   0x2   : > { %p212_p1 = scmp.lt.s32.totalorder %s1753_s21, 3 }
   0x4   : > { %p213_p2 = pnand %p1383_p0, %p212_p1 }
   0x5   : > { %v1549_v0 = vld [vmem:[%s2228_s2 + $0x4] ss:$8 sps:$4 sm:$0xff] (!%p213_p2)   ;;  %v1553_v2 = vld [vmem:[%s2228_s2] ss:$8 sps:$4 sm:$0xff] (!%p213_p2)   ;;  %v1555_v4 = vld [vmem:[%s2228_s2 + $0x14] ss:$8 sps:$4 sm:$0xff] (!%p213_p2)  }
   0x6   : > { %216 = sbr.rel (%p213_p2) target bundleno = 360 (0x168), region = 44  ;;  %v1551_v1 = vld [vmem:[%s2230_s4 + $0x4] ss:$8 sps:$4 sm:$0xff] (!%p213_p2)   ;;  %521 = vmatprep.subr.bf16.mxu0 (!%p213_p2), %v1549_v0  ;;  %v1554_v3 = vld [vmem:[%s2230_s4] ss:$8 sps:$4 sm:$0xff] (!%p213_p2)   ;;  %p242_p3 = scmp.lt.s32.totalorder (!%p213_p2), %s1379_s22, 1 }
   0x7   : > { %1022 = vmatprep.subr.bf16.mxu1 (!%p213_p2), %v1551_v1  ;;  %522 = vmatpush1.bf16.msra.mxu0 (!%p213_p2), %v1553_v2  ;;  %v1557_v5 = vld [vmem:[%s2230_s4 + $0x14] ss:$8 sps:$4 sm:$0xff] (!%p213_p2)   ;;  %v1559_v6 = vld [vmem:[%s2228_s2 + $0x10] ss:$8 sps:$4 sm:$0xff] (!%p213_p2)   ;;  %v1561_v8 = vld [vmem:[%s2228_s2 + $0x24] ss:$8 sps:$4 sm:$0xff] (!%p213_p2)  }
   0x8   : > { %1023 = vmatpush1.bf16.msra.mxu1 (!%p213_p2), %v1554_v3  ;;  %523 = vmatprep.subr.bf16.mxu0 (!%p213_p2), %v1555_v4  ;;  %v1560_v7 = vld [vmem:[%s2230_s4 + $0x10] ss:$8 sps:$4 sm:$0xff] (!%p213_p2)   ;;  %v1563_v9 = vld [vmem:[%s2230_s4 + $0x24] ss:$8 sps:$4 sm:$0xff] (!%p213_p2)   ;;  %v1565_v10 = vld [vmem:[%s2228_s2 + $0x20] ss:$8 sps:$4 sm:$0xff] (!%p213_p2)  }
   0x9   : > { %1024 = vmatprep.subr.bf16.mxu1 (!%p213_p2), %v1557_v5  ;;  %v1566_v11 = vld [vmem:[%s2230_s4 + $0x20] ss:$8 sps:$4 sm:$0xff] (!%p213_p2)   ;;  %v1567_v12 = vld [vmem:[%s2228_s2 + $0x34] ss:$8 sps:$4 sm:$0xff] (!%p213_p2)   ;;  %v1571_v14 = vld [vmem:[%s2228_s2 + $0x30] ss:$8 sps:$4 sm:$0xff] (!%p213_p2)  }
   0xa   : > { %v1569_v13 = vld [vmem:[%s2230_s4 + $0x34] ss:$8 sps:$4 sm:$0xff] (!%p213_p2)   ;;  %v1572_v15 = vld [vmem:[%s2230_s4 + $0x30] ss:$8 sps:$4 sm:$0xff] (!%p213_p2)   ;;  %v1573_v16 = vld [vmem:[%s2228_s2 + $0x44] ss:$8 sps:$4 sm:$0xff] (!%p213_p2)  }
   0xb   : > { %524 = vmatpush1.bf16.msra.mxu0 (!%p213_p2), %v1559_v6  ;;  %v1575_v17 = vld [vmem:[%s2230_s4 + $0x44] ss:$8 sps:$4 sm:$0xff] (!%p213_p2)   ;;  %v1577_v18 = vld [vmem:[%s2228_s2 + $0x40] ss:$8 sps:$4 sm:$0xff] (!%p213_p2)   ;;  %v1579_v20 = vld [vmem:[%s2228_s2 + $0x54] ss:$8 sps:$4 sm:$0xff] (!%p213_p2)  }
   0xc   : > { %1025 = vmatpush1.bf16.msra.mxu1 (!%p213_p2), %v1560_v7  ;;  %525 = vmatprep.subr.bf16.mxu0 (!%p213_p2), %v1561_v8  ;;  %v1578_v19 = vld [vmem:[%s2230_s4 + $0x40] ss:$8 sps:$4 sm:$0xff] (!%p213_p2)   ;;  %v1581_v21 = vld [vmem:[%s2230_s4 + $0x54] ss:$8 sps:$4 sm:$0xff] (!%p213_p2)   ;;  %v1583_v22 = vld [vmem:[%s2228_s2 + $0x50] ss:$8 sps:$4 sm:$0xff] (!%p213_p2)  }
   0xd   : > { %1026 = vmatprep.subr.bf16.mxu1 %v1563_v9  ;;  %v1584_v23 = vld [vmem:[%s2230_s4 + $0x50] ss:$8 sps:$4 sm:$0xff]   ;;  %v1585_v24 = vld [vmem:[%s2228_s2 + $0x64] ss:$8 sps:$4 sm:$0xff]   ;;  %v1589_v26 = vld [vmem:[%s2228_s2 + $0x60] ss:$8 sps:$4 sm:$0xff]  }
   0xe   : > { %v1587_v25 = vld [vmem:[%s2230_s4 + $0x64] ss:$8 sps:$4 sm:$0xff]   ;;  %v1590_v27 = vld [vmem:[%s2230_s4 + $0x60] ss:$8 sps:$4 sm:$0xff]   ;;  %v1591_v28 = vld [vmem:[%s2228_s2 + $0x74] ss:$8 sps:$4 sm:$0xff]  }
   0xf   : > { %526 = vmatpush1.bf16.msra.mxu0 %v1565_v10  ;;  %v1593_v29 = vld [vmem:[%s2230_s4 + $0x74] ss:$8 sps:$4 sm:$0xff]   ;;  %v1595_v30 = vld [vmem:[%s2228_s2 + $0x70] ss:$8 sps:$4 sm:$0xff]   ;;  %v1597_v32 = vld [vmem:[%s2228_s2 + $0x84] ss:$8 sps:$4 sm:$0xff]  }
  0x10   : > { %1027 = vmatpush1.bf16.msra.mxu1 %v1566_v11  ;;  %527 = vmatprep.subr.bf16.mxu0 %v1567_v12  ;;  %v1596_v31 = vld [vmem:[%s2230_s4 + $0x70] ss:$8 sps:$4 sm:$0xff]   ;;  %v1599_v33 = vld [vmem:[%s2230_s4 + $0x84] ss:$8 sps:$4 sm:$0xff]   ;;  %v1601_v34 = vld [vmem:[%s2228_s2 + $0x80] ss:$8 sps:$4 sm:$0xff]  }
  0x11   : > { %1028 = vmatprep.subr.bf16.mxu1 %v1569_v13  ;;  %v1602_v35 = vld [vmem:[%s2230_s4 + $0x80] ss:$8 sps:$4 sm:$0xff]   ;;  %s2234_s22 = smov (!%p242_p3, %s1379_s22), 1  ;;  %v1603_v36 = vld [vmem:[%s2228_s2 + $0x94] ss:$8 sps:$4 sm:$0xff]   ;;  %vm853_vm1 = vcmask 1046528  }
  0x12   : > { %v1605_v37 = vld [vmem:[%s2230_s4 + $0x94] ss:$8 sps:$4 sm:$0xff]   ;;  %v1607_v38 = vld [vmem:[%s2228_s2 + $0x90] ss:$8 sps:$4 sm:$0xff]   ;;  %s1540_s11 = smul.u32 24, %s2234_s22  ;;  %s1527_s19 = sshll.u32 %s2234_s22, 5 }
  0x13   : > { %528 = vmatpush1.bf16.msra.mxu0 %v1571_v14  ;;  %v1608_v39 = vld [vmem:[%s2230_s4 + $0x90] ss:$8 sps:$4 sm:$0xff]   ;;  %v1609_v40 = vld [vmem:[%s2228_s2 + $0xa4] ss:$8 sps:$4 sm:$0xff]   ;;  %v1613_v42 = vld [vmem:[%s2228_s2 + $0xa0] ss:$8 sps:$4 sm:$0xff]   ;;  %s251_s23 = scalar_lea.vmem %s2232_s6, %s1527_s19 }
  0x14   : > { %1029 = vmatpush1.bf16.msra.mxu1 %v1572_v15  ;;  %529 = vmatprep.subr.bf16.mxu0 %v1573_v16  ;;  %v1611_v41 = vld [vmem:[%s2230_s4 + $0xa4] ss:$8 sps:$4 sm:$0xff]   ;;  %v1614_v43 = vld [vmem:[%s2230_s4 + $0xa0] ss:$8 sps:$4 sm:$0xff]   ;;  %s246_s26 = scalar_lea.vmem %s2226_s0, %s1540_s11  ;;  %v1615_v44 = vld [vmem:[%s2228_s2 + $0xb4] ss:$8 sps:$4 sm:$0xff]  }
  0x15   : > { %1030 = vmatprep.subr.bf16.mxu1 %v1575_v17  ;;  %v1617_v45 = vld [vmem:[%s2230_s4 + $0xb4] ss:$8 sps:$4 sm:$0xff]   ;;  %v1619_v46 = vld [vmem:[%s2228_s2 + $0xb0] ss:$8 sps:$4 sm:$0xff]   ;;  %v252_v48 = vld [vmem:[%s246_s26] sm:$0xff] }
  0x16   : > { %v1620_v47 = vld [vmem:[%s2230_s4 + $0xb0] ss:$8 sps:$4 sm:$0xff]   ;;  %v1952_v49 = vld [vmem:[%s246_s26 + $0x8] sm:$0xff]  ;;  %v255_v55 = vld [vmem:[%s246_s26] sm:$0xee] }
  0x17   : > { %530 = vmatpush1.bf16.msra.mxu0 %v1577_v18  ;;  %v254_v50 = vld [vmem:[%s246_s26 + $0x10] sm:$0x11]  ;;  %v1621_v51 = vld [vmem:[%s2228_s2 + $0xc4] ss:$8 sps:$4 sm:$0xff]   ;;  %v1961_v53 = vcombine.high %v252_v48, %v1952_v49  ;;  %v1456_v59 = vcombine.high %v255_v55, %v1952_v49  ;;  %v1625_v60 = vld [vmem:[%s2228_s2 + $0xc0] ss:$8 sps:$4 sm:$0xff]   ;;  %v1973_v2 = vcombine.low %v252_v48, %v1952_v49 }
  0x18   : > { %1031 = vmatpush1.bf16.msra.mxu1 %v1578_v19  ;;  %531 = vmatprep.subr.bf16.mxu0 %v1579_v20  ;;  %v1623_v52 = vld [vmem:[%s2230_s4 + $0xc4] ss:$8 sps:$4 sm:$0xff]   ;;  %v1390_v54 = vcombine.high %v254_v50, %v254_v50  ;;  %vm334_vm0 = vsmask.f32 7424  ;;  %v1626_v62 = vld [vmem:[%s2230_s4 + $0xc0] ss:$8 sps:$4 sm:$0xff]   ;;  %v1389_v10 = vcombine.low %v254_v50, %v254_v50  ;;  %v1455_v19 = vcombine.low %v255_v55, %v1952_v49 }
  0x19   : > { %1032 = vmatprep.subr.bf16.mxu1 %v1581_v21  ;;  %v348_v56 = vshrl.u32 %v1961_v53, 16  ;;  %v350_v57 = vshll.u32 %v1961_v53, 16  ;;  %v857_v1 = vrot.slane %v1456_v59, 1  ;;  %v1627_v3 = vld [vmem:[%s2228_s2 + $0xd4] ss:$8 sps:$4 sm:$0xff]   ;;  %v338_v11 = vshll.u32 %v1973_v2, 16 }
  0x1a   : > { %v355_v58 = vshll.u32 %v1390_v54, 16  ;;  %v858_v61 = vrot.slane %v1390_v54, 1  ;;  %v1629_v4 = vld [vmem:[%s2230_s4 + $0xd4] ss:$8 sps:$4 sm:$0xff]   ;;  %v1631_v7 = vld [vmem:[%s2228_s2 + $0xd0] ss:$8 sps:$4 sm:$0xff]  }
  0x1b   : > { %532 = vmatpush1.bf16.msra.mxu0 %v1583_v22  ;;  %v352_v63 = vrot.slane %v350_v57, 1  ;;  %v1632_v8 = vld [vmem:[%s2230_s4 + $0xd0] ss:$8 sps:$4 sm:$0xff]   ;;  %v1633_v12 = vld [vmem:[%s2228_s2 + $0xe4] ss:$8 sps:$4 sm:$0xff]   ;;  %v336_v16 = vshrl.u32 %v1973_v2, 16 }
  0x1c   : > { %1033 = vmatpush1.bf16.msra.mxu1 %v1584_v23  ;;  %533 = vmatprep.subr.bf16.mxu0 %v1585_v24  ;;  %v357_v0 = vrot.slane %v355_v58, 1  ;;  %v859_v6 = vsel %vm853_vm1, %v857_v1, %v858_v61  ;;  %v1635_v13 = vld [vmem:[%s2230_s4 + $0xe4] ss:$8 sps:$4 sm:$0xff]   ;;  %v1637_v14 = vld [vmem:[%s2228_s2 + $0xe0] ss:$8 sps:$4 sm:$0xff]   ;;  %v340_v17 = vrot.slane %v338_v11, 1 }
  0x1d   : > { %1034 = vmatprep.subr.bf16.mxu1 %v1587_v25  ;;  %v353_v5 = vor.u32 %v352_v63, %v348_v56  ;;  %1054 = vmatprep.mubr.bf16.mxu1 %v859_v6  ;;  %v1638_v15 = vld [vmem:[%s2230_s4 + $0xe0] ss:$8 sps:$4 sm:$0xff]   ;;  %v343_v18 = vshll.u32 %v1389_v10, 16  ;;  %v1639_v20 = vld [vmem:[%s2228_s2 + $0xf4] ss:$8 sps:$4 sm:$0xff]  }
  0x1e   : > { %v1641_v21 = vld [vmem:[%s2230_s4 + $0xf4] ss:$8 sps:$4 sm:$0xff]   ;;  %v1643_v22 = vld [vmem:[%s2228_s2 + $0xf0] ss:$8 sps:$4 sm:$0xff]   ;;  %v341_v24 = vor.u32 %v340_v17, %v336_v16  ;;  %v1675_v48 = vld [vmem:[%s2227_s1 + $0x40] ss:$8 sps:$4 sm:$0xff]  }
  0x1f   : > { %534 = vmatpush1.bf16.msra.mxu0 %v1589_v26  ;;  %v358_v9 = vsel %vm334_vm0, %v353_v5, %v357_v0  ;;  %v1644_v23 = vld [vmem:[%s2230_s4 + $0xf0] ss:$8 sps:$4 sm:$0xff]   ;;  %v345_v25 = vrot.slane %v343_v18, 1  ;;  %v854_v26 = vrot.slane %v1455_v19, 1  ;;  %v1678_v49 = vld [vmem:[%s2229_s3 + $0x40] ss:$8 sps:$4 sm:$0xff]  }
  0x20   : > { %1035 = vmatpush1.bf16.msra.mxu1 %v1590_v27  ;;  %535 = vmatprep.subr.bf16.mxu0 %v1591_v28  ;;  %v855_v27 = vrot.slane %v1389_v10, 1  ;;  %v1649_v28 = vld [vmem:[%s2227_s1 + $0x4] ss:$8 sps:$4 sm:$0xff]   ;;  %v1683_v50 = vld [vmem:[%s2227_s1 + $0x54] ss:$8 sps:$4 sm:$0xff]  }
  0x21   : > { %1036 = vmatprep.subr.bf16.mxu1 %v1593_v29  ;;  %553 = vmatprep.mubr.bf16.mxu0 %v358_v9  ;;  %v1653_v29 = vld [vmem:[%s2229_s3 + $0x4] ss:$8 sps:$4 sm:$0xff]   ;;  %v1687_v56 = vld [vmem:[%s2227_s1 + $0x60] ss:$8 sps:$4 sm:$0xff]   ;;  %v1695_v58 = vld [vmem:[%s2227_s1 + $0x74] ss:$8 sps:$4 sm:$0xff]  }
  0x22   : > { %v1689_v54 = vld [vmem:[%s2227_s1 + $0x64] ss:$8 sps:$4 sm:$0xff]   ;;  %v1690_v57 = vld [vmem:[%s2229_s3 + $0x60] ss:$8 sps:$4 sm:$0xff]   ;;  %v1698_v59 = vld [vmem:[%s2229_s3 + $0x74] ss:$8 sps:$4 sm:$0xff]  }
  0x23   : > { %536 = vmatpush1.bf16.msra.mxu0 %v1595_v30  ;;  %v1647_v30 = vld [vmem:[%s2227_s1] ss:$8 sps:$4 sm:$0xff]   ;;  %v1692_v55 = vld [vmem:[%s2229_s3 + $0x64] ss:$8 sps:$4 sm:$0xff]   ;;  %v1696_v61 = vld [vmem:[%s2229_s3 + $0x70] ss:$8 sps:$4 sm:$0xff]  }
  0x24   : > { %1037 = vmatpush1.bf16.msra.mxu1 %v1596_v31  ;;  %537 = vmatprep.subr.bf16.mxu0 %v1597_v32  ;;  %v1651_v31 = vld [vmem:[%s2229_s3] ss:$8 sps:$4 sm:$0xff]   ;;  %v2029_v32 = vsel %vm334_vm0, %v341_v24, %v345_v25  ;;  %v1704_v63 = vld [vmem:[%s2229_s3 + $0x84] ss:$8 sps:$4 sm:$0xff]   ;;  %v1705_v5 = vld [vmem:[%s2227_s1 + $0x90] ss:$8 sps:$4 sm:$0xff]  }
  0x25   : > { %1038 = vmatprep.subr.bf16.mxu1 %v1599_v33  ;;  %v856_v33 = vsel %vm853_vm1, %v854_v26, %v855_v27  ;;  %v1699_v0 = vld [vmem:[%s2227_s1 + $0x80] ss:$8 sps:$4 sm:$0xff]   ;;  %v1708_v6 = vld [vmem:[%s2229_s3 + $0x90] ss:$8 sps:$4 sm:$0xff]   ;;  %v1719_v11 = vld [vmem:[%s2227_s1 + $0xb4] ss:$8 sps:$4 sm:$0xff]  }
  0x26   : > { %v1702_v1 = vld [vmem:[%s2229_s3 + $0x80] ss:$8 sps:$4 sm:$0xff]   ;;  %v1728_v16 = vld [vmem:[%s2229_s3 + $0xc4] ss:$8 sps:$4 sm:$0xff]   ;;  %v1731_v19 = vld [vmem:[%s2227_s1 + $0xd4] ss:$8 sps:$4 sm:$0xff]  }
  0x27   : > { %538 = vmatpush1.bf16.msra.mxu0 %v1601_v34  ;;  %v1659_v34 = vld [vmem:[%s2227_s1 + $0x14] ss:$8 sps:$4 sm:$0xff]   ;;  %v1714_v10 = vld [vmem:[%s2229_s3 + $0xa0] ss:$8 sps:$4 sm:$0xff]   ;;  %v1740_v24 = vld [vmem:[%s2229_s3 + $0xe4] ss:$8 sps:$4 sm:$0xff]  }
  0x28   : > { %1039 = vmatpush1.bf16.msra.mxu1 %v1602_v35  ;;  %539 = vmatprep.subr.bf16.mxu0 %v1603_v36  ;;  %v1662_v35 = vld [vmem:[%s2229_s3 + $0x14] ss:$8 sps:$4 sm:$0xff]   ;;  %v1657_v36 = vld [vmem:[%s2227_s1 + $0x10] ss:$8 sps:$4 sm:$0xff]   ;;  %v1723_v17 = vld [vmem:[%s2227_s1 + $0xc0] ss:$8 sps:$4 sm:$0xff]  }
  0x29   : > { %1040 = vmatprep.subr.bf16.mxu1 %v1605_v37  ;;  %v1660_v37 = vld [vmem:[%s2229_s3 + $0x10] ss:$8 sps:$4 sm:$0xff]   ;;  %v1726_v18 = vld [vmem:[%s2229_s3 + $0xc0] ss:$8 sps:$4 sm:$0xff]   ;;  %v1743_v27 = vld [vmem:[%s2227_s1 + $0xf4] ss:$8 sps:$4 sm:$0xff]  }
  0x2a   : > { %v1735_v25 = vld [vmem:[%s2227_s1 + $0xe0] ss:$8 sps:$4 sm:$0xff]  }
  0x2b   : > { %540 = vmatpush1.bf16.msra.mxu0 %v1607_v38  ;;  %v1665_v38 = vld [vmem:[%s2227_s1 + $0x24] ss:$8 sps:$4 sm:$0xff]   ;;  %v1738_v26 = vld [vmem:[%s2229_s3 + $0xe0] ss:$8 sps:$4 sm:$0xff]  }
  0x2c   : > { %1041 = vmatpush1.bf16.msra.mxu1 %v1608_v39  ;;  %541 = vmatprep.subr.bf16.mxu0 %v1609_v40  ;;  %v1668_v39 = vld [vmem:[%s2229_s3 + $0x24] ss:$8 sps:$4 sm:$0xff]   ;;  %v1663_v40 = vld [vmem:[%s2227_s1 + $0x20] ss:$8 sps:$4 sm:$0xff]  }
  0x2d   : > { %1042 = vmatprep.subr.bf16.mxu1 %v1611_v41  ;;  %v1666_v41 = vld [vmem:[%s2229_s3 + $0x20] ss:$8 sps:$4 sm:$0xff]  }
  0x2f   : > { %542 = vmatpush1.bf16.msra.mxu0 %v1613_v42  ;;  %v1671_v42 = vld [vmem:[%s2227_s1 + $0x34] ss:$8 sps:$4 sm:$0xff]  }
  0x30   : > { %1043 = vmatpush1.bf16.msra.mxu1 %v1614_v43  ;;  %543 = vmatprep.subr.bf16.mxu0 %v1615_v44  ;;  %v1674_v43 = vld [vmem:[%s2229_s3 + $0x34] ss:$8 sps:$4 sm:$0xff]   ;;  %v1669_v44 = vld [vmem:[%s2227_s1 + $0x30] ss:$8 sps:$4 sm:$0xff]  }
  0x31   : > { %1044 = vmatprep.subr.bf16.mxu1 %v1617_v45  ;;  %v1672_v45 = vld [vmem:[%s2229_s3 + $0x30] ss:$8 sps:$4 sm:$0xff]  }
  0x33   : > { %544 = vmatpush1.bf16.msra.mxu0 %v1619_v46  ;;  %v1677_v46 = vld [vmem:[%s2227_s1 + $0x44] ss:$8 sps:$4 sm:$0xff]  }
  0x34   : > { %1045 = vmatpush1.bf16.msra.mxu1 %v1620_v47  ;;  %545 = vmatprep.subr.bf16.mxu0 %v1621_v51  ;;  %v1680_v47 = vld [vmem:[%s2229_s3 + $0x44] ss:$8 sps:$4 sm:$0xff]   ;;  %v1686_v51 = vld [vmem:[%s2229_s3 + $0x54] ss:$8 sps:$4 sm:$0xff]  }
  0x35   : > { %1046 = vmatprep.subr.bf16.mxu1 %v1623_v52  ;;  %v1681_v52 = vld [vmem:[%s2227_s1 + $0x50] ss:$8 sps:$4 sm:$0xff]  }
  0x37   : > { %546 = vmatpush1.bf16.msra.mxu0 %v1625_v60  ;;  %v1693_v60 = vld [vmem:[%s2227_s1 + $0x70] ss:$8 sps:$4 sm:$0xff]  }
  0x38   : > { %1047 = vmatpush1.bf16.msra.mxu1 %v1626_v62  ;;  %547 = vmatprep.subr.bf16.mxu0 %v1627_v3  ;;  %v1701_v62 = vld [vmem:[%s2227_s1 + $0x84] ss:$8 sps:$4 sm:$0xff]   ;;  %v1707_v3 = vld [vmem:[%s2227_s1 + $0x94] ss:$8 sps:$4 sm:$0xff]  }
  0x39   : > { %1048 = vmatprep.subr.bf16.mxu1 %v1629_v4  ;;  %v1710_v4 = vld [vmem:[%s2229_s3 + $0x94] ss:$8 sps:$4 sm:$0xff]  }
  0x3b   : > { %548 = vmatpush1.bf16.msra.mxu0 %v1631_v7  ;;  %v1713_v7 = vld [vmem:[%s2227_s1 + $0xa4] ss:$8 sps:$4 sm:$0xff]  }
  0x3c   : > { %1049 = vmatpush1.bf16.msra.mxu1 %v1632_v8  ;;  %549 = vmatprep.subr.bf16.mxu0 %v1633_v12  ;;  %v1716_v8 = vld [vmem:[%s2229_s3 + $0xa4] ss:$8 sps:$4 sm:$0xff]   ;;  %v1722_v12 = vld [vmem:[%s2229_s3 + $0xb4] ss:$8 sps:$4 sm:$0xff]  }
  0x3d   : > { %1050 = vmatprep.subr.bf16.mxu1 %v1635_v13  ;;  %v1717_v13 = vld [vmem:[%s2227_s1 + $0xb0] ss:$8 sps:$4 sm:$0xff]  }
  0x3f   : > { %550 = vmatpush1.bf16.msra.mxu0 %v1637_v14  ;;  %v1720_v14 = vld [vmem:[%s2229_s3 + $0xb0] ss:$8 sps:$4 sm:$0xff]  }
  0x40   : > { %1051 = vmatpush1.bf16.msra.mxu1 %v1638_v15  ;;  %551 = vmatprep.subr.bf16.mxu0 %v1639_v20  ;;  %v1725_v15 = vld [vmem:[%s2227_s1 + $0xc4] ss:$8 sps:$4 sm:$0xff]   ;;  %v1734_v20 = vld [vmem:[%s2229_s3 + $0xd4] ss:$8 sps:$4 sm:$0xff]  }
  0x41   : > { %1052 = vmatprep.subr.bf16.mxu1 %v1641_v21  ;;  %v1729_v21 = vld [vmem:[%s2227_s1 + $0xd0] ss:$8 sps:$4 sm:$0xff]  }
  0x43   : > { %552 = vmatpush1.bf16.msra.mxu0 %v1643_v22  ;;  %v1732_v22 = vld [vmem:[%s2229_s3 + $0xd0] ss:$8 sps:$4 sm:$0xff]  }
  0x44   : > { %1053 = vmatpush1.bf16.msra.mxu1 %v1644_v23  ;;  %726 = vmatprep.subr.bf16.mxu0 %v1649_v28  ;;  %v1737_v23 = vld [vmem:[%s2227_s1 + $0xe4] ss:$8 sps:$4 sm:$0xff]   ;;  %v1746_v28 = vld [vmem:[%s2229_s3 + $0xf4] ss:$8 sps:$4 sm:$0xff]  }
  0x45   : > { %1225 = vmatprep.subr.bf16.mxu1 %v1653_v29  ;;  %v1741_v29 = vld [vmem:[%s2227_s1 + $0xf0] ss:$8 sps:$4 sm:$0xff]  }
  0x46   : > { %554 = vmatmul.mubr.bf16.vlgmr.msra.gmra.mrb[0].mxu0 %v2029_v32 }
  0x47   : > { %1055 = vmatmul.mubr.bf16.vlgmr.msra.gmra.mrb[0].mxu1 %v856_v33  ;;  %727 = vmatpush1.bf16.msra.mxu0 %v1647_v30  ;;  %v1744_v30 = vld [vmem:[%s2229_s3 + $0xf0] ss:$8 sps:$4 sm:$0xff]  }
  0x48   : > { %1226 = vmatpush1.bf16.msra.mxu1 %v1651_v31  ;;  %728 = vmatprep.subr.bf16.mxu0 %v1659_v34  ;;  %v770_v31 = vlaneseq }
  0x49   : > { %1227 = vmatprep.subr.bf16.mxu1 %v1662_v35  ;;  %758 = vmatprep.mubr.bf16.mxu0 %v1961_v53  ;;  %v1684_v53 = vld [vmem:[%s2229_s3 + $0x50] ss:$8 sps:$4 sm:$0xff]   ;;  %v256_v35 = vld [vmem:[%s2231_s5] sm:$0x3] }
  0x4a   : > { %1257 = vmatprep.mubr.bf16.mxu1 %v358_v9  ;;  %v1711_v9 = vld [vmem:[%s2227_s1 + $0xa0] ss:$8 sps:$4 sm:$0xff]   ;;  %v771_v33 = vshrl.u32 %v770_v31, 7 }
  0x4b   : > { %729 = vmatpush1.bf16.msra.mxu0 %v1657_v36 }
  0x4c   : > { %1228 = vmatpush1.bf16.msra.mxu1 %v1660_v37  ;;  %730 = vmatprep.subr.bf16.mxu0 %v1665_v38  ;;  %v772_v34 = vsub.s32 0, %v771_v33  ;;  %v776_v36 = vsub.s32 1, %v771_v33 }
  0x4d   : > { %1229 = vmatprep.subr.bf16.mxu1 %v1668_v39 }
  0x4e   : > { %v773_v37 = vrot.slane %v256_v35, %v772_v34  ;;  %v777_v38 = vrot.slane %v256_v35, %v776_v36 }
  0x4f   : > { %731 = vmatpush1.bf16.msra.mxu0 %v1663_v40 }
  0x50   : > { %1230 = vmatpush1.bf16.msra.mxu1 %v1666_v41  ;;  %732 = vmatprep.subr.bf16.mxu0 %v1671_v42 }
  0x51   : > { %1231 = vmatprep.subr.bf16.mxu1 %v1674_v43 }
  0x53   : > { %733 = vmatpush1.bf16.msra.mxu0 %v1669_v44 }
  0x54   : > { %1232 = vmatpush1.bf16.msra.mxu1 %v1672_v45  ;;  %734 = vmatprep.subr.bf16.mxu0 %v1677_v46 }
  0x55   : > { %1233 = vmatprep.subr.bf16.mxu1 %v1680_v47 }
  0x57   : > { %735 = vmatpush1.bf16.msra.mxu0 %v1675_v48 }
  0x58   : > { %1234 = vmatpush1.bf16.msra.mxu1 %v1678_v49  ;;  %736 = vmatprep.subr.bf16.mxu0 %v1683_v50 }
  0x59   : > { %1235 = vmatprep.subr.bf16.mxu1 %v1686_v51 }
  0x5b   : > { %737 = vmatpush1.bf16.msra.mxu0 %v1681_v52 }
  0x5c   : > { %1236 = vmatpush1.bf16.msra.mxu1 %v1684_v53  ;;  %738 = vmatprep.subr.bf16.mxu0 %v1689_v54 }
  0x5d   : > { %1237 = vmatprep.subr.bf16.mxu1 %v1692_v55 }
  0x5f   : > { %739 = vmatpush1.bf16.msra.mxu0 %v1687_v56 }
  0x60   : > { %1238 = vmatpush1.bf16.msra.mxu1 %v1690_v57  ;;  %740 = vmatprep.subr.bf16.mxu0 %v1695_v58 }
  0x61   : > { %1239 = vmatprep.subr.bf16.mxu1 %v1698_v59 }
  0x63   : > { %741 = vmatpush1.bf16.msra.mxu0 %v1693_v60 }
  0x64   : > { %1240 = vmatpush1.bf16.msra.mxu1 %v1696_v61  ;;  %742 = vmatprep.subr.bf16.mxu0 %v1701_v62 }
  0x65   : > { %1241 = vmatprep.subr.bf16.mxu1 %v1704_v63 }
  0x67   : > { %743 = vmatpush1.bf16.msra.mxu0 %v1699_v0 }
  0x68   : > { %1242 = vmatpush1.bf16.msra.mxu1 %v1702_v1  ;;  %744 = vmatprep.subr.bf16.mxu0 %v1707_v3 }
  0x69   : > { %1243 = vmatprep.subr.bf16.mxu1 %v1710_v4 }
  0x6b   : > { %745 = vmatpush1.bf16.msra.mxu0 %v1705_v5 }
  0x6c   : > { %1244 = vmatpush1.bf16.msra.mxu1 %v1708_v6  ;;  %746 = vmatprep.subr.bf16.mxu0 %v1713_v7 }
  0x6d   : > { %1245 = vmatprep.subr.bf16.mxu1 %v1716_v8 }
  0x6f   : > { %747 = vmatpush1.bf16.msra.mxu0 %v1711_v9 }
  0x70   : > { %1246 = vmatpush1.bf16.msra.mxu1 %v1714_v10  ;;  %748 = vmatprep.subr.bf16.mxu0 %v1719_v11 }
  0x71   : > { %1247 = vmatprep.subr.bf16.mxu1 %v1722_v12 }
  0x73   : > { %749 = vmatpush1.bf16.msra.mxu0 %v1717_v13 }
  0x74   : > { %1248 = vmatpush1.bf16.msra.mxu1 %v1720_v14  ;;  %750 = vmatprep.subr.bf16.mxu0 %v1725_v15 }
  0x75   : > { %1249 = vmatprep.subr.bf16.mxu1 %v1728_v16 }
  0x77   : > { %751 = vmatpush1.bf16.msra.mxu0 %v1723_v17 }
  0x78   : > { %1250 = vmatpush1.bf16.msra.mxu1 %v1726_v18  ;;  %752 = vmatprep.subr.bf16.mxu0 %v1731_v19 }
  0x79   : > { %1251 = vmatprep.subr.bf16.mxu1 %v1734_v20 }
  0x7b   : > { %753 = vmatpush1.bf16.msra.mxu0 %v1729_v21 }
  0x7c   : > { %1252 = vmatpush1.bf16.msra.mxu1 %v1732_v22  ;;  %754 = vmatprep.subr.bf16.mxu0 %v1737_v23 }
  0x7d   : > { %1253 = vmatprep.subr.bf16.mxu1 %v1740_v24 }
  0x7f   : > { %755 = vmatpush1.bf16.msra.mxu0 %v1735_v25 }
  0x80   : > { %1254 = vmatpush1.bf16.msra.mxu1 %v1738_v26  ;;  %756 = vmatprep.subr.bf16.mxu0 %v1743_v27 }
  0x81   : > { %1255 = vmatprep.subr.bf16.mxu1 %v1746_v28 }
  0x83   : > { %757 = vmatpush1.bf16.msra.mxu0 %v1741_v29 }
  0x84   : > { %1256 = vmatpush1.bf16.msra.mxu1 %v1744_v30 }
  0x86   : > { %759 = vmatmul.mubr.bf16.vlgmr.msra.gmra.mrb[0].mxu0 %v1973_v2 }
  0x87   : > { %1258 = vmatmul.mubr.bf16.vlgmr.msra.gmra.mrb[0].mxu1 %v2029_v32 }
 0x159   : > { %v760_v39 = vpop.f32.mrb[0].mxu0 }
 0x15a   : > { %v1259_v40 = vpop.f32.mrb[0].mxu1  ;;  %v780_v41 = vadd.f32 %v773_v37, %v760_v39  ;;  %v762_v43 = vpop.f32.mrb[1].mxu0 }
 0x15b   : > { %v1268_v42 = vadd.f32 %v1259_v40, %v773_v37  ;;  %v1261_v44 = vpop.f32.mrb[1].mxu1  ;;  %v781_v2 = vadd.f32 %v777_v38, %v762_v43  ;;  %v764_v32 = vpop.f32.mrb[2].mxu0 }
 0x15c   : > { %v1269_v45 = vadd.f32 %v1261_v44, %v777_v38  ;;  %v1263_v46 = vpop.f32.mrb[2].mxu1  ;;  %vm1272_vm2 = vcmp.gt.f32.partialorder %v780_v41, 0.0  ;;  %v1276_v47 = vmul.f32 0.2, %v780_v41  ;;  %v782_v53 = vadd.f32 %v773_v37, %v764_v32  ;;  %v766_v55 = vpop.f32.mrb[3].mxu0 }
 0x15d   : > { %vm1284_vm3 = vcmp.gt.f32.partialorder %v1268_v42, 0.0  ;;  %v1288_v48 = vmul.f32 0.2, %v1268_v42  ;;  %vm1273_vm4 = vcmp.gt.f32.partialorder %v781_v2, 0.0  ;;  %v1277_v49 = vmul.f32 0.2, %v781_v2 }
 0x15e   : > { %vm1285_vm5 = vcmp.gt.f32.partialorder %v1269_v45, 0.0  ;;  %v1289_v50 = vmul.f32 0.2, %v1269_v45  ;;  %v1280_v51 = vsel %vm1272_vm2, %v780_v41, %v1276_v47  ;;  %v1270_v54 = vadd.f32 %v1263_v46, %v773_v37  ;;  %v1265_v56 = vpop.f32.mrb[3].mxu1 }
 0x15f   : > { %v1292_v52 = vsel %vm1284_vm3, %v1268_v42, %v1288_v48  ;;  %v1281_v57 = vsel %vm1273_vm4, %v781_v2, %v1277_v49  ;;  %v783_v59 = vadd.f32 %v777_v38, %v766_v55  ;;  %v1271_v60 = vadd.f32 %v1265_v56, %v777_v38 }
 0x160   : > { %v1293_v58 = vsel %vm1285_vm5, %v1269_v45, %v1289_v50  ;;  %v1528_v61 = vpack.c.bf16 %v1281_v57, %v1280_v51  ;;  %vm1274_vm6 = vcmp.gt.f32.partialorder %v782_v53, 0.0  ;;  %v1278_v63 = vmul.f32 0.2, %v782_v53 }
 0x161   : > { %v1529_v62 = vpack.c.bf16 %v1293_v58, %v1292_v52  ;;  %vm1286_vm7 = vcmp.gt.f32.partialorder %v1270_v54, 0.0  ;;  %v1290_v0 = vmul.f32 0.2, %v1270_v54  ;;  %vm1275_vm8 = vcmp.gt.f32.partialorder %v783_v59, 0.0 }
 0x162   : > { %v1279_v1 = vmul.f32 0.2, %v783_v59  ;;  %1320 = vst [vmem:[%s251_s23] sm:$0xff] %v1528_v61  ;;  %v1282_v3 = vsel %vm1274_vm6, %v782_v53, %v1278_v63  ;;  %vm1287_vm9 = vcmp.gt.f32.partialorder %v1271_v60, 0.0  ;;  %v1291_v4 = vmul.f32 0.2, %v1271_v60 }
 0x163   : > { %1321 = vst [vmem:[%s251_s23 + $0x8] sm:$0xff] %v1529_v62  ;;  %v1294_v5 = vsel %vm1286_vm7, %v1270_v54, %v1290_v0 }
 0x164   : > { %v1283_v6 = vsel %vm1275_vm8, %v783_v59, %v1279_v1  ;;  %v1295_v8 = vsel %vm1287_vm9, %v1271_v60, %v1291_v4 }
 0x165   : > { %v1530_v7 = vpack.c.bf16 %v1283_v6, %v1282_v3  ;;  %v1531_v9 = vpack.c.bf16 %v1295_v8, %v1294_v5 }
 0x167   : > { %1322 = vst [vmem:[%s251_s23 + $0x10] sm:$0xff] %v1530_v7  ;;  %1323 = vst [vmem:[%s251_s23 + $0x18] sm:$0xff] %v1531_v9 }
 0x168 PF: > { %s16_s21 = sadd.s32 1, %s1753_s21  }
 0x169   : > { %p13_p4 = scmp.ge.s32.totalorder %s16_s21, 4  }
 0x16b   :  { %15 = sbr.rel (!%p13_p4) target bundleno = 1 (0x1), region = 74 }

// kernel: wnet_forward.15
= control target key start
LH: loop header
LB: loop body
LE: loop exit
PB: predicated region body
PF: predicated region fallthrough
CT: control target
= control target key end

     0   :  { %s3031_s21 = smov 0   ;;  %s3891_s0 = inlined_call_operand.vmem [shape: bf16[2,10,512], index: 0, kind: input, shape index: {}]   ;;  %s3892_s1 = inlined_call_operand.vmem [shape: bf16[512,256], index: 1, kind: input, shape index: {}]   ;;  %s3893_s2 = inlined_call_operand.vmem [shape: bf16[512,256], index: 2, kind: input, shape index: {}]   ;;  %s3894_s3 = inlined_call_operand.vmem [shape: bf16[512,256], index: 3, kind: input, shape index: {}]   ;;  %s3895_s4 = inlined_call_operand.vmem [shape: bf16[512,256], index: 4, kind: input, shape index: {}]   ;;  %s3896_s5 = inlined_call_operand.vmem [shape: f32[1,256], index: 5, kind: input, shape index: {}]   ;;  %s3897_s6 = inlined_call_operand.vmem [shape: bf16[2,8,512], index: 6, kind: output, shape index: {}]  }
   0x1 LB: > { %s2297_s22 = sadd.s32 4294967295, %s2994_s21   ;;  %p2301_p0 = scmp.ge.s32.totalorder %s2994_s21, 1  ;;  %s2994_s21 = sphi %s3031_s21, %s16_s21  }
   0x2   : > { %p212_p1 = scmp.lt.s32.totalorder %s2994_s21, 3 }
   0x4   : > { %p213_p2 = pnand %p2301_p0, %p212_p1 }
   0x5   : > { %v2590_v0 = vld [vmem:[%s3893_s2 + $0x4] ss:$8 sps:$4 sm:$0xff] (!%p213_p2)   ;;  %v2594_v2 = vld [vmem:[%s3893_s2] ss:$8 sps:$4 sm:$0xff] (!%p213_p2)   ;;  %v2596_v4 = vld [vmem:[%s3893_s2 + $0x14] ss:$8 sps:$4 sm:$0xff] (!%p213_p2)  }
   0x6   : > { %216 = sbr.rel (%p213_p2) target bundleno = 487 (0x1e7), region = 44  ;;  %v2592_v1 = vld [vmem:[%s3893_s2 + $0x104] ss:$8 sps:$4 sm:$0xff] (!%p213_p2)   ;;  %755 = vmatprep.subr.bf16.mxu0 (!%p213_p2), %v2590_v0  ;;  %v2595_v3 = vld [vmem:[%s3893_s2 + $0x100] ss:$8 sps:$4 sm:$0xff] (!%p213_p2)   ;;  %p242_p3 = scmp.lt.s32.totalorder (!%p213_p2), %s2297_s22, 1 }
   0x7   : > { %796 = vmatprep.subr.bf16.mxu1 (!%p213_p2), %v2592_v1  ;;  %756 = vmatpush1.bf16.msra.mxu0 (!%p213_p2), %v2594_v2  ;;  %v2598_v5 = vld [vmem:[%s3893_s2 + $0x114] ss:$8 sps:$4 sm:$0xff] (!%p213_p2)   ;;  %v2600_v6 = vld [vmem:[%s3893_s2 + $0x10] ss:$8 sps:$4 sm:$0xff] (!%p213_p2)   ;;  %v2602_v8 = vld [vmem:[%s3893_s2 + $0x24] ss:$8 sps:$4 sm:$0xff] (!%p213_p2)  }
   0x8   : > { %797 = vmatpush1.bf16.msra.mxu1 (!%p213_p2), %v2595_v3  ;;  %757 = vmatprep.subr.bf16.mxu0 (!%p213_p2), %v2596_v4  ;;  %v2601_v7 = vld [vmem:[%s3893_s2 + $0x110] ss:$8 sps:$4 sm:$0xff] (!%p213_p2)   ;;  %v2604_v9 = vld [vmem:[%s3893_s2 + $0x124] ss:$8 sps:$4 sm:$0xff] (!%p213_p2)   ;;  %v2606_v10 = vld [vmem:[%s3893_s2 + $0x20] ss:$8 sps:$4 sm:$0xff] (!%p213_p2)  }
   0x9   : > { %798 = vmatprep.subr.bf16.mxu1 (!%p213_p2), %v2598_v5  ;;  %v2607_v11 = vld [vmem:[%s3893_s2 + $0x120] ss:$8 sps:$4 sm:$0xff] (!%p213_p2)   ;;  %v2608_v12 = vld [vmem:[%s3893_s2 + $0x34] ss:$8 sps:$4 sm:$0xff] (!%p213_p2)   ;;  %v2612_v14 = vld [vmem:[%s3893_s2 + $0x30] ss:$8 sps:$4 sm:$0xff] (!%p213_p2)  }
   0xa   : > { %v2610_v13 = vld [vmem:[%s3893_s2 + $0x134] ss:$8 sps:$4 sm:$0xff] (!%p213_p2)   ;;  %v2613_v15 = vld [vmem:[%s3893_s2 + $0x130] ss:$8 sps:$4 sm:$0xff] (!%p213_p2)   ;;  %v2614_v16 = vld [vmem:[%s3893_s2 + $0x44] ss:$8 sps:$4 sm:$0xff] (!%p213_p2)  }
   0xb   : > { %758 = vmatpush1.bf16.msra.mxu0 (!%p213_p2), %v2600_v6  ;;  %v2616_v17 = vld [vmem:[%s3893_s2 + $0x144] ss:$8 sps:$4 sm:$0xff] (!%p213_p2)   ;;  %v2618_v18 = vld [vmem:[%s3893_s2 + $0x40] ss:$8 sps:$4 sm:$0xff] (!%p213_p2)   ;;  %v2620_v20 = vld [vmem:[%s3893_s2 + $0x54] ss:$8 sps:$4 sm:$0xff] (!%p213_p2)  }
   0xc   : > { %799 = vmatpush1.bf16.msra.mxu1 (!%p213_p2), %v2601_v7  ;;  %759 = vmatprep.subr.bf16.mxu0 (!%p213_p2), %v2602_v8  ;;  %v2619_v19 = vld [vmem:[%s3893_s2 + $0x140] ss:$8 sps:$4 sm:$0xff] (!%p213_p2)   ;;  %v2622_v21 = vld [vmem:[%s3893_s2 + $0x154] ss:$8 sps:$4 sm:$0xff] (!%p213_p2)   ;;  %v2624_v22 = vld [vmem:[%s3893_s2 + $0x50] ss:$8 sps:$4 sm:$0xff] (!%p213_p2)  }
   0xd   : > { %800 = vmatprep.subr.bf16.mxu1 %v2604_v9  ;;  %v2625_v23 = vld [vmem:[%s3893_s2 + $0x150] ss:$8 sps:$4 sm:$0xff]   ;;  %v2626_v24 = vld [vmem:[%s3893_s2 + $0x64] ss:$8 sps:$4 sm:$0xff]   ;;  %v2630_v26 = vld [vmem:[%s3893_s2 + $0x60] ss:$8 sps:$4 sm:$0xff]  }
   0xe   : > { %v2628_v25 = vld [vmem:[%s3893_s2 + $0x164] ss:$8 sps:$4 sm:$0xff]   ;;  %v2631_v27 = vld [vmem:[%s3893_s2 + $0x160] ss:$8 sps:$4 sm:$0xff]   ;;  %v2632_v28 = vld [vmem:[%s3893_s2 + $0x74] ss:$8 sps:$4 sm:$0xff]  }
   0xf   : > { %760 = vmatpush1.bf16.msra.mxu0 %v2606_v10  ;;  %v2634_v29 = vld [vmem:[%s3893_s2 + $0x174] ss:$8 sps:$4 sm:$0xff]   ;;  %v2636_v30 = vld [vmem:[%s3893_s2 + $0x70] ss:$8 sps:$4 sm:$0xff]   ;;  %v2638_v32 = vld [vmem:[%s3893_s2 + $0x84] ss:$8 sps:$4 sm:$0xff]  }
  0x10   : > { %801 = vmatpush1.bf16.msra.mxu1 %v2607_v11  ;;  %761 = vmatprep.subr.bf16.mxu0 %v2608_v12  ;;  %v2637_v31 = vld [vmem:[%s3893_s2 + $0x170] ss:$8 sps:$4 sm:$0xff]   ;;  %v2640_v33 = vld [vmem:[%s3893_s2 + $0x184] ss:$8 sps:$4 sm:$0xff]   ;;  %v2642_v34 = vld [vmem:[%s3893_s2 + $0x80] ss:$8 sps:$4 sm:$0xff]  }
  0x11   : > { %802 = vmatprep.subr.bf16.mxu1 %v2610_v13  ;;  %v2643_v35 = vld [vmem:[%s3893_s2 + $0x180] ss:$8 sps:$4 sm:$0xff]   ;;  %v2644_v36 = vld [vmem:[%s3893_s2 + $0x94] ss:$8 sps:$4 sm:$0xff]   ;;  %s3899_s22 = smov (!%p242_p3, %s2297_s22), 1 }
  0x12   : > { %v2646_v37 = vld [vmem:[%s3893_s2 + $0x194] ss:$8 sps:$4 sm:$0xff]   ;;  %v2648_v38 = vld [vmem:[%s3893_s2 + $0x90] ss:$8 sps:$4 sm:$0xff]   ;;  %v2650_v40 = vld [vmem:[%s3893_s2 + $0xa4] ss:$8 sps:$4 sm:$0xff]  }
  0x13   : > { %762 = vmatpush1.bf16.msra.mxu0 %v2612_v14  ;;  %v2649_v39 = vld [vmem:[%s3893_s2 + $0x190] ss:$8 sps:$4 sm:$0xff]   ;;  %s2578_s15 = sshll.u32 %s3899_s22, 5  ;;  %v2652_v41 = vld [vmem:[%s3893_s2 + $0x1a4] ss:$8 sps:$4 sm:$0xff]   ;;  %s2579_s27 = sshll.u32 %s3899_s22, 4 }
  0x14   : > { %803 = vmatpush1.bf16.msra.mxu1 %v2613_v15  ;;  %763 = vmatprep.subr.bf16.mxu0 %v2614_v16  ;;  %v2654_v42 = vld [vmem:[%s3893_s2 + $0xa0] ss:$8 sps:$4 sm:$0xff]   ;;  %s3181_s26 = scalar_lea.vmem %s3891_s0, %s2578_s15  ;;  %v2656_v44 = vld [vmem:[%s3893_s2 + $0xb4] ss:$8 sps:$4 sm:$0xff]   ;;  %v2660_v46 = vld [vmem:[%s3893_s2 + $0xb0] ss:$8 sps:$4 sm:$0xff]   ;;  %s3884_s30 = scalar_lea.vmem %s3897_s6, %s2579_s27 }
  0x15   : > { %804 = vmatprep.subr.bf16.mxu1 %v2616_v17  ;;  %v2655_v43 = vld [vmem:[%s3893_s2 + $0x1a0] ss:$8 sps:$4 sm:$0xff]   ;;  %v2658_v45 = vld [vmem:[%s3893_s2 + $0x1b4] ss:$8 sps:$4 sm:$0xff]   ;;  %v2661_v47 = vld [vmem:[%s3893_s2 + $0x1b0] ss:$8 sps:$4 sm:$0xff]  }
  0x16   : > { %v3196_v48 = vld [vmem:[%s3181_s26] sm:$0xff]  ;;  %v3199_v49 = vld [vmem:[%s3181_s26 + $0x10] sm:$0x11]  ;;  %v3202_v50 = vld [vmem:[%s3181_s26 + $0x8] sm:$0xff] }
  0x17   : > { %764 = vmatpush1.bf16.msra.mxu0 %v2618_v18  ;;  %v3205_v51 = vld [vmem:[%s3181_s26 + $0x18] sm:$0x11]  ;;  %v2662_v52 = vld [vmem:[%s3893_s2 + $0xc4] ss:$8 sps:$4 sm:$0xff]   ;;  %v2307_v53 = vcombine.high %v3196_v48, %v3199_v49  ;;  %v2666_v60 = vld [vmem:[%s3893_s2 + $0xc0] ss:$8 sps:$4 sm:$0xff]   ;;  %v2306_v6 = vcombine.low %v3196_v48, %v3199_v49 }
  0x18   : > { %805 = vmatpush1.bf16.msra.mxu1 %v2619_v19  ;;  %765 = vmatprep.subr.bf16.mxu0 %v2620_v20  ;;  %v2309_v54 = vcombine.high %v3202_v50, %v3205_v51  ;;  %v2664_v55 = vld [vmem:[%s3893_s2 + $0x1c4] ss:$8 sps:$4 sm:$0xff]   ;;  %v2667_v61 = vld [vmem:[%s3893_s2 + $0x1c0] ss:$8 sps:$4 sm:$0xff]   ;;  %v2668_v62 = vld [vmem:[%s3893_s2 + $0xd4] ss:$8 sps:$4 sm:$0xff]   ;;  %v2308_v7 = vcombine.low %v3202_v50, %v3205_v51 }
  0x19   : > { %806 = vmatprep.subr.bf16.mxu1 %v2622_v21  ;;  %v411_v56 = vshrl.u32 %v2307_v53, 16  ;;  %v413_v57 = vshll.u32 %v2307_v53, 16  ;;  %v2670_v1 = vld [vmem:[%s3893_s2 + $0x1d4] ss:$8 sps:$4 sm:$0xff]   ;;  %v2672_v4 = vld [vmem:[%s3893_s2 + $0xd0] ss:$8 sps:$4 sm:$0xff]  }
  0x1a   : > { %v425_v58 = vshrl.u32 %v2309_v54, 16  ;;  %v427_v59 = vshll.u32 %v2309_v54, 16  ;;  %v2673_v5 = vld [vmem:[%s3893_s2 + $0x1d0] ss:$8 sps:$4 sm:$0xff]   ;;  %v2674_v8 = vld [vmem:[%s3893_s2 + $0xe4] ss:$8 sps:$4 sm:$0xff]  }
  0x1b   : > { %766 = vmatpush1.bf16.msra.mxu0 %v2624_v22  ;;  %v415_v63 = vrot.slane %v413_v57, 1  ;;  %v2676_v9 = vld [vmem:[%s3893_s2 + $0x1e4] ss:$8 sps:$4 sm:$0xff]   ;;  %v2678_v10 = vld [vmem:[%s3893_s2 + $0xe0] ss:$8 sps:$4 sm:$0xff]   ;;  %v406_v12 = vshll.u32 %v2306_v6, 16 }
  0x1c   : > { %807 = vmatpush1.bf16.msra.mxu1 %v2625_v23  ;;  %767 = vmatprep.subr.bf16.mxu0 %v2626_v24  ;;  %v429_v0 = vrot.slane %v427_v59, 1  ;;  %v2679_v11 = vld [vmem:[%s3893_s2 + $0x1e0] ss:$8 sps:$4 sm:$0xff]   ;;  %v420_v13 = vshll.u32 %v2308_v7, 16  ;;  %v2680_v14 = vld [vmem:[%s3893_s2 + $0xf4] ss:$8 sps:$4 sm:$0xff]  }
  0x1d   : > { %808 = vmatprep.subr.bf16.mxu1 %v2628_v25  ;;  %v3229_v2 = vor.u32 %v415_v63, %v411_v56  ;;  %v2682_v15 = vld [vmem:[%s3893_s2 + $0x1f4] ss:$8 sps:$4 sm:$0xff]   ;;  %v2684_v16 = vld [vmem:[%s3893_s2 + $0xf0] ss:$8 sps:$4 sm:$0xff]   ;;  %v404_v18 = vshrl.u32 %v2306_v6, 16  ;;  %v408_v19 = vrot.slane %v406_v12, 1 }
  0x1e   : > { %v3231_v3 = vor.u32 %v429_v0, %v425_v58  ;;  %v2685_v17 = vld [vmem:[%s3893_s2 + $0x1f0] ss:$8 sps:$4 sm:$0xff]   ;;  %v418_v20 = vshrl.u32 %v2308_v7, 16  ;;  %v422_v21 = vrot.slane %v420_v13, 1  ;;  %v2692_v22 = vld [vmem:[%s3892_s1 + $0x4] ss:$8 sps:$4 sm:$0xff]  }
  0x1f   : > { %768 = vmatpush1.bf16.msra.mxu0 %v2630_v26  ;;  %787 = vmatprep.mubr.bf16.mxu0 %v3229_v2  ;;  %v2695_v23 = vld [vmem:[%s3892_s1 + $0x104] ss:$8 sps:$4 sm:$0xff]   ;;  %v3275_v24 = vor.u32 %v408_v19, %v404_v18  ;;  %v2690_v26 = vld [vmem:[%s3892_s1] ss:$8 sps:$4 sm:$0xff]   ;;  %v2723_v53 = vld [vmem:[%s3892_s1 + $0x150] ss:$8 sps:$4 sm:$0xff]  }
  0x20   : > { %809 = vmatpush1.bf16.msra.mxu1 %v2631_v27  ;;  %769 = vmatprep.subr.bf16.mxu0 %v2632_v28  ;;  %v3277_v25 = vor.u32 %v422_v21, %v418_v20  ;;  %v2693_v27 = vld [vmem:[%s3892_s1 + $0x100] ss:$8 sps:$4 sm:$0xff]   ;;  %v2698_v28 = vld [vmem:[%s3892_s1 + $0x14] ss:$8 sps:$4 sm:$0xff]   ;;  %v2728_v54 = vld [vmem:[%s3892_s1 + $0x64] ss:$8 sps:$4 sm:$0xff]  }
  0x21   : > { %810 = vmatprep.subr.bf16.mxu1 %v2634_v29  ;;  %828 = vmatprep.mubr.bf16.mxu1 %v3231_v3  ;;  %v2701_v29 = vld [vmem:[%s3892_s1 + $0x114] ss:$8 sps:$4 sm:$0xff]   ;;  %v2726_v56 = vld [vmem:[%s3892_s1 + $0x60] ss:$8 sps:$4 sm:$0xff]   ;;  %v2743_v63 = vld [vmem:[%s3892_s1 + $0x184] ss:$8 sps:$4 sm:$0xff]  }
  0x22   : > { %v2729_v57 = vld [vmem:[%s3892_s1 + $0x160] ss:$8 sps:$4 sm:$0xff]   ;;  %v2734_v58 = vld [vmem:[%s3892_s1 + $0x74] ss:$8 sps:$4 sm:$0xff]   ;;  %v2744_v6 = vld [vmem:[%s3892_s1 + $0x90] ss:$8 sps:$4 sm:$0xff]  }
  0x23   : > { %770 = vmatpush1.bf16.msra.mxu0 %v2636_v30  ;;  %v2375_v30 = vcombine.high %v3196_v48, %v3196_v48  ;;  %v2737_v59 = vld [vmem:[%s3892_s1 + $0x174] ss:$8 sps:$4 sm:$0xff]   ;;  %v2738_v0 = vld [vmem:[%s3892_s1 + $0x80] ss:$8 sps:$4 sm:$0xff]   ;;  %v2747_v7 = vld [vmem:[%s3892_s1 + $0x190] ss:$8 sps:$4 sm:$0xff]  }
  0x24   : > { %811 = vmatpush1.bf16.msra.mxu1 %v2637_v31  ;;  %771 = vmatprep.subr.bf16.mxu0 %v2638_v32  ;;  %v2377_v31 = vcombine.high %v3202_v50, %v3202_v50  ;;  %v2696_v32 = vld [vmem:[%s3892_s1 + $0x10] ss:$8 sps:$4 sm:$0xff]   ;;  %v2758_v12 = vld [vmem:[%s3892_s1 + $0xb4] ss:$8 sps:$4 sm:$0xff]   ;;  %v2762_v18 = vld [vmem:[%s3892_s1 + $0xc0] ss:$8 sps:$4 sm:$0xff]  }
  0x25   : > { %812 = vmatprep.subr.bf16.mxu1 %v2640_v33  ;;  %v2699_v33 = vld [vmem:[%s3892_s1 + $0x110] ss:$8 sps:$4 sm:$0xff]   ;;  %v2761_v13 = vld [vmem:[%s3892_s1 + $0x1b4] ss:$8 sps:$4 sm:$0xff]   ;;  %v2765_v19 = vld [vmem:[%s3892_s1 + $0x1c0] ss:$8 sps:$4 sm:$0xff]  }
  0x26   : > { %v2770_v20 = vld [vmem:[%s3892_s1 + $0xd4] ss:$8 sps:$4 sm:$0xff]  }
  0x27   : > { %772 = vmatpush1.bf16.msra.mxu0 %v2642_v34  ;;  %v2704_v34 = vld [vmem:[%s3892_s1 + $0x24] ss:$8 sps:$4 sm:$0xff]   ;;  %v2773_v21 = vld [vmem:[%s3892_s1 + $0x1d4] ss:$8 sps:$4 sm:$0xff]  }
  0x28   : > { %813 = vmatpush1.bf16.msra.mxu1 %v2643_v35  ;;  %773 = vmatprep.subr.bf16.mxu0 %v2644_v36  ;;  %v2707_v35 = vld [vmem:[%s3892_s1 + $0x124] ss:$8 sps:$4 sm:$0xff]   ;;  %v2702_v36 = vld [vmem:[%s3892_s1 + $0x20] ss:$8 sps:$4 sm:$0xff]  }
  0x29   : > { %814 = vmatprep.subr.bf16.mxu1 %v2646_v37  ;;  %v2705_v37 = vld [vmem:[%s3892_s1 + $0x120] ss:$8 sps:$4 sm:$0xff]  }
  0x2b   : > { %774 = vmatpush1.bf16.msra.mxu0 %v2648_v38  ;;  %v2710_v38 = vld [vmem:[%s3892_s1 + $0x34] ss:$8 sps:$4 sm:$0xff]  }
  0x2c   : > { %815 = vmatpush1.bf16.msra.mxu1 %v2649_v39  ;;  %775 = vmatprep.subr.bf16.mxu0 %v2650_v40  ;;  %v2713_v39 = vld [vmem:[%s3892_s1 + $0x134] ss:$8 sps:$4 sm:$0xff]   ;;  %v2708_v40 = vld [vmem:[%s3892_s1 + $0x30] ss:$8 sps:$4 sm:$0xff]  }
  0x2d   : > { %816 = vmatprep.subr.bf16.mxu1 %v2652_v41  ;;  %v2711_v41 = vld [vmem:[%s3892_s1 + $0x130] ss:$8 sps:$4 sm:$0xff]  }
  0x2f   : > { %776 = vmatpush1.bf16.msra.mxu0 %v2654_v42  ;;  %v2716_v42 = vld [vmem:[%s3892_s1 + $0x44] ss:$8 sps:$4 sm:$0xff]  }
  0x30   : > { %817 = vmatpush1.bf16.msra.mxu1 %v2655_v43  ;;  %777 = vmatprep.subr.bf16.mxu0 %v2656_v44  ;;  %v2719_v43 = vld [vmem:[%s3892_s1 + $0x144] ss:$8 sps:$4 sm:$0xff]   ;;  %v2714_v44 = vld [vmem:[%s3892_s1 + $0x40] ss:$8 sps:$4 sm:$0xff]  }
  0x31   : > { %818 = vmatprep.subr.bf16.mxu1 %v2658_v45  ;;  %v2717_v45 = vld [vmem:[%s3892_s1 + $0x140] ss:$8 sps:$4 sm:$0xff]  }
  0x33   : > { %778 = vmatpush1.bf16.msra.mxu0 %v2660_v46  ;;  %v2722_v46 = vld [vmem:[%s3892_s1 + $0x54] ss:$8 sps:$4 sm:$0xff]  }
  0x34   : > { %819 = vmatpush1.bf16.msra.mxu1 %v2661_v47  ;;  %779 = vmatprep.subr.bf16.mxu0 %v2662_v52  ;;  %v2725_v47 = vld [vmem:[%s3892_s1 + $0x154] ss:$8 sps:$4 sm:$0xff]   ;;  %v2720_v52 = vld [vmem:[%s3892_s1 + $0x50] ss:$8 sps:$4 sm:$0xff]  }
  0x35   : > { %820 = vmatprep.subr.bf16.mxu1 %v2664_v55  ;;  %v2731_v55 = vld [vmem:[%s3892_s1 + $0x164] ss:$8 sps:$4 sm:$0xff]  }
  0x37   : > { %780 = vmatpush1.bf16.msra.mxu0 %v2666_v60  ;;  %v2732_v60 = vld [vmem:[%s3892_s1 + $0x70] ss:$8 sps:$4 sm:$0xff]  }
  0x38   : > { %821 = vmatpush1.bf16.msra.mxu1 %v2667_v61  ;;  %781 = vmatprep.subr.bf16.mxu0 %v2668_v62  ;;  %v2735_v61 = vld [vmem:[%s3892_s1 + $0x170] ss:$8 sps:$4 sm:$0xff]   ;;  %v2740_v62 = vld [vmem:[%s3892_s1 + $0x84] ss:$8 sps:$4 sm:$0xff]  }
  0x39   : > { %822 = vmatprep.subr.bf16.mxu1 %v2670_v1  ;;  %v2741_v1 = vld [vmem:[%s3892_s1 + $0x180] ss:$8 sps:$4 sm:$0xff]  }
  0x3b   : > { %782 = vmatpush1.bf16.msra.mxu0 %v2672_v4  ;;  %v2746_v4 = vld [vmem:[%s3892_s1 + $0x94] ss:$8 sps:$4 sm:$0xff]  }
  0x3c   : > { %823 = vmatpush1.bf16.msra.mxu1 %v2673_v5  ;;  %783 = vmatprep.subr.bf16.mxu0 %v2674_v8  ;;  %v2749_v5 = vld [vmem:[%s3892_s1 + $0x194] ss:$8 sps:$4 sm:$0xff]   ;;  %v2752_v8 = vld [vmem:[%s3892_s1 + $0xa4] ss:$8 sps:$4 sm:$0xff]  }
  0x3d   : > { %824 = vmatprep.subr.bf16.mxu1 %v2676_v9  ;;  %v2755_v9 = vld [vmem:[%s3892_s1 + $0x1a4] ss:$8 sps:$4 sm:$0xff]  }
  0x3f   : > { %784 = vmatpush1.bf16.msra.mxu0 %v2678_v10  ;;  %v2750_v10 = vld [vmem:[%s3892_s1 + $0xa0] ss:$8 sps:$4 sm:$0xff]  }
  0x40   : > { %825 = vmatpush1.bf16.msra.mxu1 %v2679_v11  ;;  %785 = vmatprep.subr.bf16.mxu0 %v2680_v14  ;;  %v2753_v11 = vld [vmem:[%s3892_s1 + $0x1a0] ss:$8 sps:$4 sm:$0xff]   ;;  %v2756_v14 = vld [vmem:[%s3892_s1 + $0xb0] ss:$8 sps:$4 sm:$0xff]  }
  0x41   : > { %826 = vmatprep.subr.bf16.mxu1 %v2682_v15  ;;  %v2759_v15 = vld [vmem:[%s3892_s1 + $0x1b0] ss:$8 sps:$4 sm:$0xff]  }
  0x43   : > { %786 = vmatpush1.bf16.msra.mxu0 %v2684_v16  ;;  %v2764_v16 = vld [vmem:[%s3892_s1 + $0xc4] ss:$8 sps:$4 sm:$0xff]  }
  0x44   : > { %827 = vmatpush1.bf16.msra.mxu1 %v2685_v17  ;;  %1165 = vmatprep.subr.bf16.mxu0 %v2692_v22  ;;  %v2767_v17 = vld [vmem:[%s3892_s1 + $0x1c4] ss:$8 sps:$4 sm:$0xff]   ;;  %v2768_v22 = vld [vmem:[%s3892_s1 + $0xd0] ss:$8 sps:$4 sm:$0xff]  }
  0x45   : > { %1206 = vmatprep.subr.bf16.mxu1 %v2695_v23  ;;  %v2771_v23 = vld [vmem:[%s3892_s1 + $0x1d0] ss:$8 sps:$4 sm:$0xff]  }
  0x46   : > { %788 = vmatmul.mubr.bf16.vlgmr.msra.gmra.mrb[0].mxu0 %v3275_v24 }
  0x47   : > { %829 = vmatmul.mubr.bf16.vlgmr.msra.gmra.mrb[0].mxu1 %v3277_v25  ;;  %1166 = vmatpush1.bf16.msra.mxu0 %v2690_v26  ;;  %v2776_v26 = vld [vmem:[%s3892_s1 + $0xe4] ss:$8 sps:$4 sm:$0xff]  }
  0x48   : > { %1207 = vmatpush1.bf16.msra.mxu1 %v2693_v27  ;;  %1167 = vmatprep.subr.bf16.mxu0 %v2698_v28  ;;  %v2779_v27 = vld [vmem:[%s3892_s1 + $0x1e4] ss:$8 sps:$4 sm:$0xff]   ;;  %v2774_v28 = vld [vmem:[%s3892_s1 + $0xe0] ss:$8 sps:$4 sm:$0xff]  }
  0x49   : > { %1208 = vmatprep.subr.bf16.mxu1 %v2701_v29  ;;  %1197 = vmatprep.mubr.bf16.mxu0 %v2375_v30  ;;  %v2777_v29 = vld [vmem:[%s3892_s1 + $0x1e0] ss:$8 sps:$4 sm:$0xff]   ;;  %v2782_v30 = vld [vmem:[%s3892_s1 + $0xf4] ss:$8 sps:$4 sm:$0xff]  }
  0x4a   : > { %1238 = vmatprep.mubr.bf16.mxu1 %v2377_v31  ;;  %v2785_v31 = vld [vmem:[%s3892_s1 + $0x1f4] ss:$8 sps:$4 sm:$0xff]  }
  0x4b   : > { %1168 = vmatpush1.bf16.msra.mxu0 %v2696_v32  ;;  %v2780_v32 = vld [vmem:[%s3892_s1 + $0xf0] ss:$8 sps:$4 sm:$0xff]  }
  0x4c   : > { %1209 = vmatpush1.bf16.msra.mxu1 %v2699_v33  ;;  %1169 = vmatprep.subr.bf16.mxu0 %v2704_v34  ;;  %v2783_v33 = vld [vmem:[%s3892_s1 + $0x1f0] ss:$8 sps:$4 sm:$0xff]   ;;  %v2792_v34 = vld [vmem:[%s3895_s4 + $0x4] ss:$8 sps:$4 sm:$0xff]  }
  0x4d   : > { %1210 = vmatprep.subr.bf16.mxu1 %v2707_v35  ;;  %v2795_v35 = vld [vmem:[%s3895_s4 + $0x104] ss:$8 sps:$4 sm:$0xff]  }
  0x4f   : > { %1170 = vmatpush1.bf16.msra.mxu0 %v2702_v36  ;;  %v2374_v36 = vcombine.low %v3196_v48, %v3196_v48  ;;  %v2801_v48 = vld [vmem:[%s3895_s4 + $0x114] ss:$8 sps:$4 sm:$0xff]  }
  0x50   : > { %1211 = vmatpush1.bf16.msra.mxu1 %v2705_v37  ;;  %1171 = vmatprep.subr.bf16.mxu0 %v2710_v38  ;;  %v2376_v37 = vcombine.low %v3202_v50, %v3202_v50  ;;  %v2790_v38 = vld [vmem:[%s3895_s4] ss:$8 sps:$4 sm:$0xff]   ;;  %v2796_v50 = vld [vmem:[%s3895_s4 + $0x10] ss:$8 sps:$4 sm:$0xff]  }
  0x51   : > { %1212 = vmatprep.subr.bf16.mxu1 %v2713_v39  ;;  %v2793_v39 = vld [vmem:[%s3895_s4 + $0x100] ss:$8 sps:$4 sm:$0xff]  }
  0x53   : > { %1172 = vmatpush1.bf16.msra.mxu0 %v2708_v40  ;;  %v2798_v40 = vld [vmem:[%s3895_s4 + $0x14] ss:$8 sps:$4 sm:$0xff]  }
  0x54   : > { %1213 = vmatpush1.bf16.msra.mxu1 %v2711_v41  ;;  %1173 = vmatprep.subr.bf16.mxu0 %v2716_v42  ;;  %v3497_v41 = vld [vmem:[%s3181_s26] sm:$0xee] }
  0x55   : > { %1214 = vmatprep.subr.bf16.mxu1 %v2719_v43  ;;  %v2443_v42 = vcombine.high %v3497_v41, %v3199_v49  ;;  %v3502_v43 = vld [vmem:[%s3181_s26 + $0x8] sm:$0xee] }
  0x56   : > { %v2807_v49 = vld [vmem:[%s3895_s4 + $0x124] ss:$8 sps:$4 sm:$0xff]  }
  0x57   : > { %1174 = vmatpush1.bf16.msra.mxu0 %v2714_v44  ;;  %v2799_v44 = vld [vmem:[%s3895_s4 + $0x110] ss:$8 sps:$4 sm:$0xff]  }
  0x58   : > { %1215 = vmatpush1.bf16.msra.mxu1 %v2717_v45  ;;  %1175 = vmatprep.subr.bf16.mxu0 %v2722_v46  ;;  %v2804_v45 = vld [vmem:[%s3895_s4 + $0x24] ss:$8 sps:$4 sm:$0xff]   ;;  %v2445_v46 = vcombine.high %v3502_v43, %v3205_v51  ;;  %v2810_v51 = vld [vmem:[%s3895_s4 + $0x34] ss:$8 sps:$4 sm:$0xff]  }
  0x59   : > { %1216 = vmatprep.subr.bf16.mxu1 %v2725_v47  ;;  %v1399_v47 = vrot.slane %v2443_v42, 1  ;;  %v2885_v42 = vld [vmem:[%s3895_s4 + $0x1f4] ss:$8 sps:$4 sm:$0xff]  }
  0x5b   : > { %1176 = vmatpush1.bf16.msra.mxu0 %v2720_v52  ;;  %v1401_v52 = vrot.slane %v2445_v46, 1  ;;  %v2987_v46 = vld [vmem:[%s3181_s26 + $0x18] sm:$0x11] }
  0x5c   : > { %1217 = vmatpush1.bf16.msra.mxu1 %v2723_v53  ;;  %1177 = vmatprep.subr.bf16.mxu0 %v2728_v54  ;;  %v2802_v53 = vld [vmem:[%s3895_s4 + $0x20] ss:$8 sps:$4 sm:$0xff]  }
  0x5d   : > { %1218 = vmatprep.subr.bf16.mxu1 %v2731_v55  ;;  %v2805_v54 = vld [vmem:[%s3895_s4 + $0x120] ss:$8 sps:$4 sm:$0xff]   ;;  %v2813_v55 = vld [vmem:[%s3895_s4 + $0x134] ss:$8 sps:$4 sm:$0xff]  }
  0x5f   : > { %1178 = vmatpush1.bf16.msra.mxu0 %v2726_v56  ;;  %v2808_v56 = vld [vmem:[%s3895_s4 + $0x30] ss:$8 sps:$4 sm:$0xff]  }
  0x60   : > { %1219 = vmatpush1.bf16.msra.mxu1 %v2729_v57  ;;  %1179 = vmatprep.subr.bf16.mxu0 %v2734_v58  ;;  %v2811_v57 = vld [vmem:[%s3895_s4 + $0x130] ss:$8 sps:$4 sm:$0xff]   ;;  %v2816_v58 = vld [vmem:[%s3895_s4 + $0x44] ss:$8 sps:$4 sm:$0xff]  }
  0x61   : > { %1220 = vmatprep.subr.bf16.mxu1 %v2737_v59  ;;  %v2819_v59 = vld [vmem:[%s3895_s4 + $0x144] ss:$8 sps:$4 sm:$0xff]  }
  0x63   : > { %1180 = vmatpush1.bf16.msra.mxu0 %v2732_v60  ;;  %v2814_v60 = vld [vmem:[%s3895_s4 + $0x40] ss:$8 sps:$4 sm:$0xff]  }
  0x64   : > { %1221 = vmatpush1.bf16.msra.mxu1 %v2735_v61  ;;  %1181 = vmatprep.subr.bf16.mxu0 %v2740_v62  ;;  %v2817_v61 = vld [vmem:[%s3895_s4 + $0x140] ss:$8 sps:$4 sm:$0xff]   ;;  %v2822_v62 = vld [vmem:[%s3895_s4 + $0x54] ss:$8 sps:$4 sm:$0xff]  }
  0x65   : > { %1222 = vmatprep.subr.bf16.mxu1 %v2743_v63  ;;  %v2825_v63 = vld [vmem:[%s3895_s4 + $0x154] ss:$8 sps:$4 sm:$0xff]  }
  0x67   : > { %1182 = vmatpush1.bf16.msra.mxu0 %v2738_v0  ;;  %v2820_v0 = vld [vmem:[%s3895_s4 + $0x50] ss:$8 sps:$4 sm:$0xff]  }
  0x68   : > { %1223 = vmatpush1.bf16.msra.mxu1 %v2741_v1  ;;  %1183 = vmatprep.subr.bf16.mxu0 %v2746_v4  ;;  %v2823_v1 = vld [vmem:[%s3895_s4 + $0x150] ss:$8 sps:$4 sm:$0xff]   ;;  %v2828_v4 = vld [vmem:[%s3895_s4 + $0x64] ss:$8 sps:$4 sm:$0xff]  }
  0x69   : > { %1224 = vmatprep.subr.bf16.mxu1 %v2749_v5  ;;  %v2831_v5 = vld [vmem:[%s3895_s4 + $0x164] ss:$8 sps:$4 sm:$0xff]  }
  0x6b   : > { %1184 = vmatpush1.bf16.msra.mxu0 %v2744_v6  ;;  %v2826_v6 = vld [vmem:[%s3895_s4 + $0x60] ss:$8 sps:$4 sm:$0xff]  }
  0x6c   : > { %1225 = vmatpush1.bf16.msra.mxu1 %v2747_v7  ;;  %1185 = vmatprep.subr.bf16.mxu0 %v2752_v8  ;;  %v2829_v7 = vld [vmem:[%s3895_s4 + $0x160] ss:$8 sps:$4 sm:$0xff]   ;;  %v2834_v8 = vld [vmem:[%s3895_s4 + $0x74] ss:$8 sps:$4 sm:$0xff]  }
  0x6d   : > { %1226 = vmatprep.subr.bf16.mxu1 %v2755_v9  ;;  %v2837_v9 = vld [vmem:[%s3895_s4 + $0x174] ss:$8 sps:$4 sm:$0xff]  }
  0x6f   : > { %1186 = vmatpush1.bf16.msra.mxu0 %v2750_v10  ;;  %v2832_v10 = vld [vmem:[%s3895_s4 + $0x70] ss:$8 sps:$4 sm:$0xff]  }
  0x70   : > { %1227 = vmatpush1.bf16.msra.mxu1 %v2753_v11  ;;  %1187 = vmatprep.subr.bf16.mxu0 %v2758_v12  ;;  %v2835_v11 = vld [vmem:[%s3895_s4 + $0x170] ss:$8 sps:$4 sm:$0xff]   ;;  %v2840_v12 = vld [vmem:[%s3895_s4 + $0x84] ss:$8 sps:$4 sm:$0xff]  }
  0x71   : > { %1228 = vmatprep.subr.bf16.mxu1 %v2761_v13  ;;  %v2843_v13 = vld [vmem:[%s3895_s4 + $0x184] ss:$8 sps:$4 sm:$0xff]  }
  0x73   : > { %1188 = vmatpush1.bf16.msra.mxu0 %v2756_v14  ;;  %v2838_v14 = vld [vmem:[%s3895_s4 + $0x80] ss:$8 sps:$4 sm:$0xff]  }
  0x74   : > { %1229 = vmatpush1.bf16.msra.mxu1 %v2759_v15  ;;  %1189 = vmatprep.subr.bf16.mxu0 %v2764_v16  ;;  %v2841_v15 = vld [vmem:[%s3895_s4 + $0x180] ss:$8 sps:$4 sm:$0xff]   ;;  %v2846_v16 = vld [vmem:[%s3895_s4 + $0x94] ss:$8 sps:$4 sm:$0xff]  }
  0x75   : > { %1230 = vmatprep.subr.bf16.mxu1 %v2767_v17  ;;  %v2849_v17 = vld [vmem:[%s3895_s4 + $0x194] ss:$8 sps:$4 sm:$0xff]  }
  0x77   : > { %1190 = vmatpush1.bf16.msra.mxu0 %v2762_v18  ;;  %v2844_v18 = vld [vmem:[%s3895_s4 + $0x90] ss:$8 sps:$4 sm:$0xff]  }
  0x78   : > { %1231 = vmatpush1.bf16.msra.mxu1 %v2765_v19  ;;  %1191 = vmatprep.subr.bf16.mxu0 %v2770_v20  ;;  %v2847_v19 = vld [vmem:[%s3895_s4 + $0x190] ss:$8 sps:$4 sm:$0xff]   ;;  %v2852_v20 = vld [vmem:[%s3895_s4 + $0xa4] ss:$8 sps:$4 sm:$0xff]  }
  0x79   : > { %1232 = vmatprep.subr.bf16.mxu1 %v2773_v21  ;;  %v2855_v21 = vld [vmem:[%s3895_s4 + $0x1a4] ss:$8 sps:$4 sm:$0xff]  }
  0x7b   : > { %1192 = vmatpush1.bf16.msra.mxu0 %v2768_v22  ;;  %v2850_v22 = vld [vmem:[%s3895_s4 + $0xa0] ss:$8 sps:$4 sm:$0xff]  }
  0x7c   : > { %1233 = vmatpush1.bf16.msra.mxu1 %v2771_v23  ;;  %1193 = vmatprep.subr.bf16.mxu0 %v2776_v26  ;;  %v2853_v23 = vld [vmem:[%s3895_s4 + $0x1a0] ss:$8 sps:$4 sm:$0xff]   ;;  %v2858_v26 = vld [vmem:[%s3895_s4 + $0xb4] ss:$8 sps:$4 sm:$0xff]  }
  0x7d   : > { %1234 = vmatprep.subr.bf16.mxu1 %v2779_v27  ;;  %v2861_v27 = vld [vmem:[%s3895_s4 + $0x1b4] ss:$8 sps:$4 sm:$0xff]  }
  0x7f   : > { %1194 = vmatpush1.bf16.msra.mxu0 %v2774_v28  ;;  %v2856_v28 = vld [vmem:[%s3895_s4 + $0xb0] ss:$8 sps:$4 sm:$0xff]  }
  0x80   : > { %1235 = vmatpush1.bf16.msra.mxu1 %v2777_v29  ;;  %1195 = vmatprep.subr.bf16.mxu0 %v2782_v30  ;;  %v2859_v29 = vld [vmem:[%s3895_s4 + $0x1b0] ss:$8 sps:$4 sm:$0xff]   ;;  %v2864_v30 = vld [vmem:[%s3895_s4 + $0xc4] ss:$8 sps:$4 sm:$0xff]  }
  0x81   : > { %1236 = vmatprep.subr.bf16.mxu1 %v2785_v31  ;;  %v2867_v31 = vld [vmem:[%s3895_s4 + $0x1c4] ss:$8 sps:$4 sm:$0xff]  }
  0x83   : > { %1196 = vmatpush1.bf16.msra.mxu0 %v2780_v32  ;;  %v2862_v32 = vld [vmem:[%s3895_s4 + $0xc0] ss:$8 sps:$4 sm:$0xff]  }
  0x84   : > { %1237 = vmatpush1.bf16.msra.mxu1 %v2783_v33  ;;  %1726 = vmatprep.subr.bf16.mxu0 %v2792_v34  ;;  %v2865_v33 = vld [vmem:[%s3895_s4 + $0x1c0] ss:$8 sps:$4 sm:$0xff]   ;;  %v2870_v34 = vld [vmem:[%s3895_s4 + $0xd4] ss:$8 sps:$4 sm:$0xff]  }
  0x85   : > { %1767 = vmatprep.subr.bf16.mxu1 %v2795_v35  ;;  %v2873_v35 = vld [vmem:[%s3895_s4 + $0x1d4] ss:$8 sps:$4 sm:$0xff]  }
  0x86   : > { %1198 = vmatmul.mubr.bf16.vlgmr.msra.gmra.mrb[4].mxu0 %v2374_v36  ;;  %v2868_v36 = vld [vmem:[%s3895_s4 + $0xd0] ss:$8 sps:$4 sm:$0xff]  }
  0x87   : > { %1239 = vmatmul.mubr.bf16.vlgmr.msra.gmra.mrb[4].mxu1 %v2376_v37  ;;  %1727 = vmatpush1.bf16.msra.mxu0 %v2790_v38  ;;  %v2871_v37 = vld [vmem:[%s3895_s4 + $0x1d0] ss:$8 sps:$4 sm:$0xff]   ;;  %v2876_v38 = vld [vmem:[%s3895_s4 + $0xe4] ss:$8 sps:$4 sm:$0xff]  }
  0x88   : > { %1768 = vmatpush1.bf16.msra.mxu1 %v2793_v39  ;;  %1728 = vmatprep.subr.bf16.mxu0 %v2798_v40  ;;  %v2879_v39 = vld [vmem:[%s3895_s4 + $0x1e4] ss:$8 sps:$4 sm:$0xff]   ;;  %v2874_v40 = vld [vmem:[%s3895_s4 + $0xe0] ss:$8 sps:$4 sm:$0xff]  }
  0x89   : > { %1769 = vmatprep.subr.bf16.mxu1 %v2801_v48  ;;  %1758 = vmatprep.mubr.bf16.mxu0 %v1399_v47  ;;  %v2877_v48 = vld [vmem:[%s3895_s4 + $0x1e0] ss:$8 sps:$4 sm:$0xff]   ;;  %v2880_v47 = vld [vmem:[%s3895_s4 + $0xf0] ss:$8 sps:$4 sm:$0xff]  }
  0x8a   : > { %1799 = vmatprep.mubr.bf16.mxu1 %v1401_v52  ;;  %v2883_v52 = vld [vmem:[%s3895_s4 + $0x1f0] ss:$8 sps:$4 sm:$0xff]  }
  0x8b   : > { %1729 = vmatpush1.bf16.msra.mxu0 %v2796_v50  ;;  %v2882_v50 = vld [vmem:[%s3895_s4 + $0xf4] ss:$8 sps:$4 sm:$0xff]  }
  0x8c   : > { %1770 = vmatpush1.bf16.msra.mxu1 %v2799_v44  ;;  %1730 = vmatprep.subr.bf16.mxu0 %v2804_v45  ;;  %v2986_v44 = vld [vmem:[%s3181_s26 + $0x10] sm:$0x11] }
  0x8d   : > { %1771 = vmatprep.subr.bf16.mxu1 %v2807_v49  ;;  %v2442_v45 = vcombine.low %v3497_v41, %v2986_v44  ;;  %v2444_v49 = vcombine.low %v3502_v43, %v2987_v46  ;;  %v2895_v41 = vld [vmem:[%s3894_s3 + $0x104] ss:$8 sps:$4 sm:$0xff]   ;;  %v2968_v44 = vld [vmem:[%s3894_s3 + $0xd0] ss:$8 sps:$4 sm:$0xff]  }
  0x8e   : > { %v2976_v46 = vld [vmem:[%s3894_s3 + $0xe4] ss:$8 sps:$4 sm:$0xff]  }
  0x8f   : > { %1731 = vmatpush1.bf16.msra.mxu0 %v2802_v53  ;;  %v2892_v53 = vld [vmem:[%s3894_s3 + $0x4] ss:$8 sps:$4 sm:$0xff]   ;;  %v1398_v43 = vrot.slane %v2442_v45, 1  ;;  %v2971_v45 = vld [vmem:[%s3894_s3 + $0x1d0] ss:$8 sps:$4 sm:$0xff]  }
  0x90   : > { %1772 = vmatpush1.bf16.msra.mxu1 %v2805_v54  ;;  %1732 = vmatprep.subr.bf16.mxu0 %v2810_v51  ;;  %v1400_v54 = vrot.slane %v2444_v49, 1  ;;  %v2890_v51 = vld [vmem:[%s3894_s3] ss:$8 sps:$4 sm:$0xff]   ;;  %v2979_v49 = vld [vmem:[%s3894_s3 + $0x1e4] ss:$8 sps:$4 sm:$0xff]  }
  0x91   : > { %1773 = vmatprep.subr.bf16.mxu1 %v2813_v55  ;;  %v2893_v55 = vld [vmem:[%s3894_s3 + $0x100] ss:$8 sps:$4 sm:$0xff]  }
  0x93   : > { %1733 = vmatpush1.bf16.msra.mxu0 %v2808_v56  ;;  %v2898_v56 = vld [vmem:[%s3894_s3 + $0x14] ss:$8 sps:$4 sm:$0xff]  }
  0x94   : > { %1774 = vmatpush1.bf16.msra.mxu1 %v2811_v57  ;;  %1734 = vmatprep.subr.bf16.mxu0 %v2816_v58  ;;  %v2901_v57 = vld [vmem:[%s3894_s3 + $0x114] ss:$8 sps:$4 sm:$0xff]   ;;  %v2896_v58 = vld [vmem:[%s3894_s3 + $0x10] ss:$8 sps:$4 sm:$0xff]  }
  0x95   : > { %1775 = vmatprep.subr.bf16.mxu1 %v2819_v59  ;;  %v2899_v59 = vld [vmem:[%s3894_s3 + $0x110] ss:$8 sps:$4 sm:$0xff]  }
  0x97   : > { %1735 = vmatpush1.bf16.msra.mxu0 %v2814_v60  ;;  %v2904_v60 = vld [vmem:[%s3894_s3 + $0x24] ss:$8 sps:$4 sm:$0xff]  }
  0x98   : > { %1776 = vmatpush1.bf16.msra.mxu1 %v2817_v61  ;;  %1736 = vmatprep.subr.bf16.mxu0 %v2822_v62  ;;  %v2907_v61 = vld [vmem:[%s3894_s3 + $0x124] ss:$8 sps:$4 sm:$0xff]   ;;  %v2902_v62 = vld [vmem:[%s3894_s3 + $0x20] ss:$8 sps:$4 sm:$0xff]  }
  0x99   : > { %1777 = vmatprep.subr.bf16.mxu1 %v2825_v63  ;;  %v2905_v63 = vld [vmem:[%s3894_s3 + $0x120] ss:$8 sps:$4 sm:$0xff]  }
  0x9b   : > { %1737 = vmatpush1.bf16.msra.mxu0 %v2820_v0  ;;  %v2910_v0 = vld [vmem:[%s3894_s3 + $0x34] ss:$8 sps:$4 sm:$0xff]  }
  0x9c   : > { %1778 = vmatpush1.bf16.msra.mxu1 %v2823_v1  ;;  %1738 = vmatprep.subr.bf16.mxu0 %v2828_v4  ;;  %v2911_v1 = vld [vmem:[%s3894_s3 + $0x130] ss:$8 sps:$4 sm:$0xff]   ;;  %v2916_v4 = vld [vmem:[%s3894_s3 + $0x44] ss:$8 sps:$4 sm:$0xff]  }
  0x9d   : > { %1779 = vmatprep.subr.bf16.mxu1 %v2831_v5  ;;  %v2919_v5 = vld [vmem:[%s3894_s3 + $0x144] ss:$8 sps:$4 sm:$0xff]  }
  0x9f   : > { %1739 = vmatpush1.bf16.msra.mxu0 %v2826_v6  ;;  %v2914_v6 = vld [vmem:[%s3894_s3 + $0x40] ss:$8 sps:$4 sm:$0xff]  }
  0xa0   : > { %1780 = vmatpush1.bf16.msra.mxu1 %v2829_v7  ;;  %1740 = vmatprep.subr.bf16.mxu0 %v2834_v8  ;;  %v2917_v7 = vld [vmem:[%s3894_s3 + $0x140] ss:$8 sps:$4 sm:$0xff]   ;;  %v2922_v8 = vld [vmem:[%s3894_s3 + $0x54] ss:$8 sps:$4 sm:$0xff]  }
  0xa1   : > { %1781 = vmatprep.subr.bf16.mxu1 %v2837_v9  ;;  %v2925_v9 = vld [vmem:[%s3894_s3 + $0x154] ss:$8 sps:$4 sm:$0xff]  }
  0xa3   : > { %1741 = vmatpush1.bf16.msra.mxu0 %v2832_v10  ;;  %v2920_v10 = vld [vmem:[%s3894_s3 + $0x50] ss:$8 sps:$4 sm:$0xff]  }
  0xa4   : > { %1782 = vmatpush1.bf16.msra.mxu1 %v2835_v11  ;;  %1742 = vmatprep.subr.bf16.mxu0 %v2840_v12  ;;  %v2923_v11 = vld [vmem:[%s3894_s3 + $0x150] ss:$8 sps:$4 sm:$0xff]   ;;  %v2928_v12 = vld [vmem:[%s3894_s3 + $0x64] ss:$8 sps:$4 sm:$0xff]  }
  0xa5   : > { %1783 = vmatprep.subr.bf16.mxu1 %v2843_v13  ;;  %v2931_v13 = vld [vmem:[%s3894_s3 + $0x164] ss:$8 sps:$4 sm:$0xff]  }
  0xa7   : > { %1743 = vmatpush1.bf16.msra.mxu0 %v2838_v14  ;;  %v2926_v14 = vld [vmem:[%s3894_s3 + $0x60] ss:$8 sps:$4 sm:$0xff]  }
  0xa8   : > { %1784 = vmatpush1.bf16.msra.mxu1 %v2841_v15  ;;  %1744 = vmatprep.subr.bf16.mxu0 %v2846_v16  ;;  %v2929_v15 = vld [vmem:[%s3894_s3 + $0x160] ss:$8 sps:$4 sm:$0xff]   ;;  %v2934_v16 = vld [vmem:[%s3894_s3 + $0x74] ss:$8 sps:$4 sm:$0xff]  }
  0xa9   : > { %1785 = vmatprep.subr.bf16.mxu1 %v2849_v17  ;;  %v2937_v17 = vld [vmem:[%s3894_s3 + $0x174] ss:$8 sps:$4 sm:$0xff]  }
  0xab   : > { %1745 = vmatpush1.bf16.msra.mxu0 %v2844_v18  ;;  %v2932_v18 = vld [vmem:[%s3894_s3 + $0x70] ss:$8 sps:$4 sm:$0xff]  }
  0xac   : > { %1786 = vmatpush1.bf16.msra.mxu1 %v2847_v19  ;;  %1746 = vmatprep.subr.bf16.mxu0 %v2852_v20  ;;  %v2935_v19 = vld [vmem:[%s3894_s3 + $0x170] ss:$8 sps:$4 sm:$0xff]   ;;  %v2940_v20 = vld [vmem:[%s3894_s3 + $0x84] ss:$8 sps:$4 sm:$0xff]  }
  0xad   : > { %1787 = vmatprep.subr.bf16.mxu1 %v2855_v21  ;;  %v2943_v21 = vld [vmem:[%s3894_s3 + $0x184] ss:$8 sps:$4 sm:$0xff]  }
  0xaf   : > { %1747 = vmatpush1.bf16.msra.mxu0 %v2850_v22  ;;  %v2938_v22 = vld [vmem:[%s3894_s3 + $0x80] ss:$8 sps:$4 sm:$0xff]  }
  0xb0   : > { %1788 = vmatpush1.bf16.msra.mxu1 %v2853_v23  ;;  %1748 = vmatprep.subr.bf16.mxu0 %v2858_v26  ;;  %v2941_v23 = vld [vmem:[%s3894_s3 + $0x180] ss:$8 sps:$4 sm:$0xff]   ;;  %v2946_v26 = vld [vmem:[%s3894_s3 + $0x94] ss:$8 sps:$4 sm:$0xff]  }
  0xb1   : > { %1789 = vmatprep.subr.bf16.mxu1 %v2861_v27  ;;  %v2949_v27 = vld [vmem:[%s3894_s3 + $0x194] ss:$8 sps:$4 sm:$0xff]  }
  0xb3   : > { %1749 = vmatpush1.bf16.msra.mxu0 %v2856_v28  ;;  %v2944_v28 = vld [vmem:[%s3894_s3 + $0x90] ss:$8 sps:$4 sm:$0xff]  }
  0xb4   : > { %1790 = vmatpush1.bf16.msra.mxu1 %v2859_v29  ;;  %1750 = vmatprep.subr.bf16.mxu0 %v2864_v30  ;;  %v2947_v29 = vld [vmem:[%s3894_s3 + $0x190] ss:$8 sps:$4 sm:$0xff]   ;;  %v2952_v30 = vld [vmem:[%s3894_s3 + $0xa4] ss:$8 sps:$4 sm:$0xff]  }
  0xb5   : > { %1791 = vmatprep.subr.bf16.mxu1 %v2867_v31  ;;  %v2955_v31 = vld [vmem:[%s3894_s3 + $0x1a4] ss:$8 sps:$4 sm:$0xff]  }
  0xb7   : > { %1751 = vmatpush1.bf16.msra.mxu0 %v2862_v32  ;;  %v2950_v32 = vld [vmem:[%s3894_s3 + $0xa0] ss:$8 sps:$4 sm:$0xff]  }
  0xb8   : > { %1792 = vmatpush1.bf16.msra.mxu1 %v2865_v33  ;;  %1752 = vmatprep.subr.bf16.mxu0 %v2870_v34  ;;  %v2953_v33 = vld [vmem:[%s3894_s3 + $0x1a0] ss:$8 sps:$4 sm:$0xff]   ;;  %v2958_v34 = vld [vmem:[%s3894_s3 + $0xb4] ss:$8 sps:$4 sm:$0xff]  }
  0xb9   : > { %1793 = vmatprep.subr.bf16.mxu1 %v2873_v35  ;;  %v2961_v35 = vld [vmem:[%s3894_s3 + $0x1b4] ss:$8 sps:$4 sm:$0xff]  }
  0xbb   : > { %1753 = vmatpush1.bf16.msra.mxu0 %v2868_v36  ;;  %v2956_v36 = vld [vmem:[%s3894_s3 + $0xb0] ss:$8 sps:$4 sm:$0xff]  }
  0xbc   : > { %1794 = vmatpush1.bf16.msra.mxu1 %v2871_v37  ;;  %1754 = vmatprep.subr.bf16.mxu0 %v2876_v38  ;;  %v2959_v37 = vld [vmem:[%s3894_s3 + $0x1b0] ss:$8 sps:$4 sm:$0xff]   ;;  %v2964_v38 = vld [vmem:[%s3894_s3 + $0xc4] ss:$8 sps:$4 sm:$0xff]  }
  0xbd   : > { %1795 = vmatprep.subr.bf16.mxu1 %v2879_v39  ;;  %v2967_v39 = vld [vmem:[%s3894_s3 + $0x1c4] ss:$8 sps:$4 sm:$0xff]  }
  0xbf   : > { %1755 = vmatpush1.bf16.msra.mxu0 %v2874_v40  ;;  %v2962_v40 = vld [vmem:[%s3894_s3 + $0xc0] ss:$8 sps:$4 sm:$0xff]  }
  0xc0   : > { %1796 = vmatpush1.bf16.msra.mxu1 %v2877_v48  ;;  %1756 = vmatprep.subr.bf16.mxu0 %v2882_v50  ;;  %v2965_v48 = vld [vmem:[%s3894_s3 + $0x1c0] ss:$8 sps:$4 sm:$0xff]   ;;  %v2970_v50 = vld [vmem:[%s3894_s3 + $0xd4] ss:$8 sps:$4 sm:$0xff]  }
  0xc1   : > { %1797 = vmatprep.subr.bf16.mxu1 %v2885_v42  ;;  %v2973_v42 = vld [vmem:[%s3894_s3 + $0x1d4] ss:$8 sps:$4 sm:$0xff]  }
  0xc3   : > { %1757 = vmatpush1.bf16.msra.mxu0 %v2880_v47  ;;  %v2974_v47 = vld [vmem:[%s3894_s3 + $0xe0] ss:$8 sps:$4 sm:$0xff]  }
  0xc4   : > { %1798 = vmatpush1.bf16.msra.mxu1 %v2883_v52  ;;  %2128 = vmatprep.subr.bf16.mxu0 %v2892_v53  ;;  %v2977_v52 = vld [vmem:[%s3894_s3 + $0x1e0] ss:$8 sps:$4 sm:$0xff]   ;;  %v2982_v53 = vld [vmem:[%s3894_s3 + $0xf4] ss:$8 sps:$4 sm:$0xff]  }
  0xc5   : > { %2169 = vmatprep.subr.bf16.mxu1 %v2895_v41  ;;  %v2985_v41 = vld [vmem:[%s3894_s3 + $0x1f4] ss:$8 sps:$4 sm:$0xff]  }
  0xc6   : > { %1759 = vmatmul.mubr.bf16.vlgmr.msra.gmra.mrb[8].mxu0 %v1398_v43  ;;  %v2980_v43 = vld [vmem:[%s3894_s3 + $0xf0] ss:$8 sps:$4 sm:$0xff]  }
  0xc7   : > { %1800 = vmatmul.mubr.bf16.vlgmr.msra.gmra.mrb[8].mxu1 %v1400_v54  ;;  %2129 = vmatpush1.bf16.msra.mxu0 %v2890_v51  ;;  %v2983_v54 = vld [vmem:[%s3894_s3 + $0x1f0] ss:$8 sps:$4 sm:$0xff]  }
  0xc8   : > { %2170 = vmatpush1.bf16.msra.mxu1 %v2893_v55  ;;  %2130 = vmatprep.subr.bf16.mxu0 %v2898_v56 }
  0xc9   : > { %2171 = vmatprep.subr.bf16.mxu1 %v2901_v57  ;;  %2160 = vmatprep.mubr.bf16.mxu0 %v3229_v2  ;;  %v2913_v2 = vld [vmem:[%s3894_s3 + $0x134] ss:$8 sps:$4 sm:$0xff]  }
  0xca   : > { %2201 = vmatprep.mubr.bf16.mxu1 %v3231_v3  ;;  %v2908_v3 = vld [vmem:[%s3894_s3 + $0x30] ss:$8 sps:$4 sm:$0xff]  }
  0xcb   : > { %2131 = vmatpush1.bf16.msra.mxu0 %v2896_v58 }
  0xcc   : > { %2172 = vmatpush1.bf16.msra.mxu1 %v2899_v59  ;;  %2132 = vmatprep.subr.bf16.mxu0 %v2904_v60 }
  0xcd   : > { %2173 = vmatprep.subr.bf16.mxu1 %v2907_v61 }
  0xcf   : > { %2133 = vmatpush1.bf16.msra.mxu0 %v2902_v62 }
  0xd0   : > { %2174 = vmatpush1.bf16.msra.mxu1 %v2905_v63  ;;  %2134 = vmatprep.subr.bf16.mxu0 %v2910_v0  ;;  %v1248_v0 = vlaneseq }
  0xd1   : > { %2175 = vmatprep.subr.bf16.mxu1 %v2913_v2 }
  0xd2   : > { %v1249_v2 = vshrl.u32 %v1248_v0, 7 }
  0xd3   : > { %2135 = vmatpush1.bf16.msra.mxu0 %v2908_v3 }
  0xd4   : > { %2176 = vmatpush1.bf16.msra.mxu1 %v2911_v1  ;;  %2136 = vmatprep.subr.bf16.mxu0 %v2916_v4  ;;  %v1250_v3 = vsub.s32 0, %v1249_v2  ;;  %v258_v1 = vld [vmem:[%s3896_s5] sm:$0x3] }
  0xd5   : > { %2177 = vmatprep.subr.bf16.mxu1 %v2919_v5 }
  0xd7   : > { %2137 = vmatpush1.bf16.msra.mxu0 %v2914_v6  ;;  %v1251_v6 = vrot.slane %v258_v1, %v1250_v3 }
  0xd8   : > { %2178 = vmatpush1.bf16.msra.mxu1 %v2917_v7  ;;  %2138 = vmatprep.subr.bf16.mxu0 %v2922_v8 }
  0xd9   : > { %2179 = vmatprep.subr.bf16.mxu1 %v2925_v9 }
  0xdb   : > { %2139 = vmatpush1.bf16.msra.mxu0 %v2920_v10 }
  0xdc   : > { %2180 = vmatpush1.bf16.msra.mxu1 %v2923_v11  ;;  %2140 = vmatprep.subr.bf16.mxu0 %v2928_v12 }
  0xdd   : > { %2181 = vmatprep.subr.bf16.mxu1 %v2931_v13 }
  0xdf   : > { %2141 = vmatpush1.bf16.msra.mxu0 %v2926_v14 }
  0xe0   : > { %2182 = vmatpush1.bf16.msra.mxu1 %v2929_v15  ;;  %2142 = vmatprep.subr.bf16.mxu0 %v2934_v16 }
  0xe1   : > { %2183 = vmatprep.subr.bf16.mxu1 %v2937_v17 }
  0xe3   : > { %2143 = vmatpush1.bf16.msra.mxu0 %v2932_v18 }
  0xe4   : > { %2184 = vmatpush1.bf16.msra.mxu1 %v2935_v19  ;;  %2144 = vmatprep.subr.bf16.mxu0 %v2940_v20 }
  0xe5   : > { %2185 = vmatprep.subr.bf16.mxu1 %v2943_v21 }
  0xe7   : > { %2145 = vmatpush1.bf16.msra.mxu0 %v2938_v22 }
  0xe8   : > { %2186 = vmatpush1.bf16.msra.mxu1 %v2941_v23  ;;  %2146 = vmatprep.subr.bf16.mxu0 %v2946_v26 }
  0xe9   : > { %2187 = vmatprep.subr.bf16.mxu1 %v2949_v27 }
  0xeb   : > { %2147 = vmatpush1.bf16.msra.mxu0 %v2944_v28 }
  0xec   : > { %2188 = vmatpush1.bf16.msra.mxu1 %v2947_v29  ;;  %2148 = vmatprep.subr.bf16.mxu0 %v2952_v30 }
  0xed   : > { %2189 = vmatprep.subr.bf16.mxu1 %v2955_v31 }
  0xef   : > { %2149 = vmatpush1.bf16.msra.mxu0 %v2950_v32 }
  0xf0   : > { %2190 = vmatpush1.bf16.msra.mxu1 %v2953_v33  ;;  %2150 = vmatprep.subr.bf16.mxu0 %v2958_v34 }
  0xf1   : > { %2191 = vmatprep.subr.bf16.mxu1 %v2961_v35 }
  0xf3   : > { %2151 = vmatpush1.bf16.msra.mxu0 %v2956_v36 }
  0xf4   : > { %2192 = vmatpush1.bf16.msra.mxu1 %v2959_v37  ;;  %2152 = vmatprep.subr.bf16.mxu0 %v2964_v38 }
  0xf5   : > { %2193 = vmatprep.subr.bf16.mxu1 %v2967_v39 }
  0xf7   : > { %2153 = vmatpush1.bf16.msra.mxu0 %v2962_v40 }
  0xf8   : > { %2194 = vmatpush1.bf16.msra.mxu1 %v2965_v48  ;;  %2154 = vmatprep.subr.bf16.mxu0 %v2970_v50 }
  0xf9   : > { %2195 = vmatprep.subr.bf16.mxu1 %v2973_v42 }
  0xfb   : > { %2155 = vmatpush1.bf16.msra.mxu0 %v2968_v44 }
  0xfc   : > { %2196 = vmatpush1.bf16.msra.mxu1 %v2971_v45  ;;  %2156 = vmatprep.subr.bf16.mxu0 %v2976_v46 }
  0xfd   : > { %2197 = vmatprep.subr.bf16.mxu1 %v2979_v49 }
  0xff   : > { %2157 = vmatpush1.bf16.msra.mxu0 %v2974_v47 }
 0x100   : > { %2198 = vmatpush1.bf16.msra.mxu1 %v2977_v52  ;;  %2158 = vmatprep.subr.bf16.mxu0 %v2982_v53 }
 0x101   : > { %2199 = vmatprep.subr.bf16.mxu1 %v2985_v41 }
 0x103   : > { %2159 = vmatpush1.bf16.msra.mxu0 %v2980_v43 }
 0x104   : > { %2200 = vmatpush1.bf16.msra.mxu1 %v2983_v54 }
 0x106   : > { %2161 = vmatmul.mubr.bf16.vlgmr.msra.gmra.mrb[12].mxu0 %v3275_v24  ;;  %v1254_v24 = vsub.s32 1, %v1249_v2 }
 0x107   : > { %2202 = vmatmul.mubr.bf16.vlgmr.msra.gmra.mrb[12].mxu1 %v3277_v25 }
 0x108   : > { %v1255_v10 = vrot.slane %v258_v1, %v1254_v24 }
 0x119   : > { %v789_v51 = vpop.f32.mrb[0].mxu0 }
 0x11a   : > { %v830_v55 = vpop.f32.mrb[0].mxu1  ;;  %v791_v57 = vpop.f32.mrb[1].mxu0 }
 0x11b   : > { %v831_v56 = vadd.f32 %v830_v55, %v789_v51  ;;  %v832_v58 = vpop.f32.mrb[1].mxu1  ;;  %v793_v60 = vpop.f32.mrb[2].mxu0 }
 0x11c   : > { %v833_v59 = vadd.f32 %v832_v58, %v791_v57  ;;  %v834_v61 = vpop.f32.mrb[2].mxu1  ;;  %v794_v62 = vpop.f32.mrb[3].mxu0 }
 0x11d   : > { %v835_v63 = vpop.f32.mrb[3].mxu1 }
 0x159   : > { %v1199_v4 = vpop.f32.mrb[4].mxu0 }
 0x15a   : > { %v1240_v25 = vpop.f32.mrb[4].mxu1  ;;  %v1200_v5 = vadd.f32 %v1199_v4, %v831_v56  ;;  %v1201_v7 = vpop.f32.mrb[5].mxu0 }
 0x15b   : > { %v1242_v8 = vpop.f32.mrb[5].mxu1  ;;  %v1202_v9 = vadd.f32 %v1201_v7, %v833_v59  ;;  %v1203_v11 = vpop.f32.mrb[6].mxu0 }
 0x15c   : > { %v1244_v12 = vpop.f32.mrb[6].mxu1  ;;  %v1241_v13 = vadd.f32 %v1240_v25, %v1200_v5  ;;  %v1204_v14 = vpop.f32.mrb[7].mxu0 }
 0x15d   : > { %v1245_v15 = vpop.f32.mrb[7].mxu1  ;;  %v1243_v16 = vadd.f32 %v1242_v8, %v1202_v9 }
 0x15e   : > { %v1258_v17 = vadd.f32 %v1251_v6, %v1241_v13 }
 0x15f   : > { %v1259_v18 = vadd.f32 %v1255_v10, %v1243_v16 }
 0x160   : > { %vm2212_vm0 = vcmp.gt.f32.partialorder %v1258_v17, 0.0  ;;  %v2214_v19 = vmul.f32 0.2, %v1258_v17 }
 0x161   : > { %vm2213_vm1 = vcmp.gt.f32.partialorder %v1259_v18, 0.0  ;;  %v2215_v20 = vmul.f32 0.2, %v1259_v18 }
 0x162   : > { %v2216_v21 = vsel %vm2212_vm0, %v1258_v17, %v2214_v19 }
 0x163   : > { %v2217_v22 = vsel %vm2213_vm1, %v1259_v18, %v2215_v20 }
 0x164   : > { %v2580_v23 = vpack.c.bf16 %v2217_v22, %v2216_v21 }
 0x166   : > { %2240 = vst [vmem:[%s3884_s30] sm:$0xff] %v2580_v23 }
 0x199   : > { %v1760_v26 = vpop.f32.mrb[8].mxu0 }
 0x19a   : > { %v1801_v27 = vpop.f32.mrb[8].mxu1  ;;  %v1762_v29 = vpop.f32.mrb[9].mxu0 }
 0x19b   : > { %v1802_v28 = vadd.f32 %v1801_v27, %v1760_v26  ;;  %v1803_v30 = vpop.f32.mrb[9].mxu1  ;;  %v1764_v32 = vpop.f32.mrb[10].mxu0 }
 0x19c   : > { %v1804_v31 = vadd.f32 %v1803_v30, %v1762_v29  ;;  %v1805_v33 = vpop.f32.mrb[10].mxu1  ;;  %v1765_v34 = vpop.f32.mrb[11].mxu0 }
 0x19d   : > { %v1806_v35 = vpop.f32.mrb[11].mxu1 }
 0x1d9   : > { %v2162_v36 = vpop.f32.mrb[12].mxu0 }
 0x1da   : > { %v2203_v37 = vpop.f32.mrb[12].mxu1  ;;  %v2163_v38 = vadd.f32 %v2162_v36, %v1802_v28  ;;  %v2164_v39 = vpop.f32.mrb[13].mxu0 }
 0x1db   : > { %v2205_v40 = vpop.f32.mrb[13].mxu1  ;;  %v2165_v48 = vadd.f32 %v2164_v39, %v1804_v31  ;;  %v2166_v50 = vpop.f32.mrb[14].mxu0 }
 0x1dc   : > { %v2207_v42 = vpop.f32.mrb[14].mxu1  ;;  %v2204_v44 = vadd.f32 %v2203_v37, %v2163_v38  ;;  %v2167_v45 = vpop.f32.mrb[15].mxu0 }
 0x1dd   : > { %v2208_v46 = vpop.f32.mrb[15].mxu1  ;;  %v2206_v49 = vadd.f32 %v2205_v40, %v2165_v48 }
 0x1de   : > { %v2210_v47 = vadd.f32 %v2204_v44, %v1251_v6 }
 0x1df   : > { %v2211_v52 = vadd.f32 %v2206_v49, %v1255_v10 }
 0x1e0   : > { %vm2218_vm2 = vcmp.gt.f32.partialorder %v2210_v47, 0.0  ;;  %v2220_v53 = vmul.f32 0.2, %v2210_v47 }
 0x1e1   : > { %vm2219_vm3 = vcmp.gt.f32.partialorder %v2211_v52, 0.0  ;;  %v2221_v41 = vmul.f32 0.2, %v2211_v52 }
 0x1e2   : > { %v2222_v43 = vsel %vm2218_vm2, %v2210_v47, %v2220_v53 }
 0x1e3   : > { %v2223_v54 = vsel %vm2219_vm3, %v2211_v52, %v2221_v41 }
 0x1e4   : > { %v2581_v51 = vpack.c.bf16 %v2223_v54, %v2222_v43 }
 0x1e6   : > { %2241 = vst [vmem:[%s3884_s30 + $0x8] sm:$0xff] %v2581_v51 }
 0x1e7 PF: > { %s16_s21 = sadd.s32 1, %s2994_s21  }
 0x1e8   : > { %p13_p4 = scmp.ge.s32.totalorder %s16_s21, 4  }
 0x1ea   :  { %15 = sbr.rel (!%p13_p4) target bundleno = 1 (0x1), region = 74 }

// kernel: wnet_forward.17
= control target key start
LH: loop header
LB: loop body
LE: loop exit
PB: predicated region body
PF: predicated region fallthrough
CT: control target
= control target key end

     0   :  { %s1499_s21 = smov 0   ;;  %s1761_s0 = inlined_call_operand.vmem [shape: bf16[2,34,256], index: 0, kind: input, shape index: {}]   ;;  %s1762_s1 = inlined_call_operand.vmem [shape: bf16[256,64], index: 1, kind: input, shape index: {}]   ;;  %s1763_s2 = inlined_call_operand.vmem [shape: bf16[256,64], index: 2, kind: input, shape index: {}]   ;;  %s1764_s3 = inlined_call_operand.vmem [shape: bf16[256,64], index: 3, kind: input, shape index: {}]   ;;  %s1765_s4 = inlined_call_operand.vmem [shape: bf16[256,64], index: 4, kind: input, shape index: {}]   ;;  %s1766_s5 = inlined_call_operand.vmem [shape: f32[1,64], index: 5, kind: input, shape index: {}]   ;;  %s1767_s6 = inlined_call_operand.vmem [shape: f32[2,32,128], index: 6, kind: output, shape index: {}]  }
   0x1 LB: > { %s1160_s22 = sadd.s32 4294967295, %s1461_s21   ;;  %p1164_p0 = scmp.ge.s32.totalorder %s1461_s21, 1  ;;  %s1461_s21 = sphi %s1499_s21, %s16_s21  }
   0x2   : > { %p212_p1 = scmp.lt.s32.totalorder %s1461_s21, 3 }
   0x4   : > { %p213_p2 = pnand %p1164_p0, %p212_p1 }
   0x5   : > { %v1366_v0 = vld [vmem:[%s1763_s2 + $0x40] sm:$0xff] (!%p213_p2)   ;;  %v1370_v4 = vld [vmem:[%s1763_s2 + $0x48] sm:$0xff] (!%p213_p2)   ;;  %v1374_v8 = vld [vmem:[%s1763_s2 + $0x50] sm:$0xff] (!%p213_p2)   ;;  %p242_p3 = scmp.lt.s32.totalorder (!%p213_p2), %s1160_s22, 1  ;;  %vm345_vm0 = vsmask.f32 (!%p213_p2), 7424 }
   0x6   : > { %216 = sbr.rel (%p213_p2) target bundleno = 431 (0x1af), region = 44  ;;  %v1367_v1 = vld [vmem:[%s1762_s1 + $0x40] sm:$0xff] (!%p213_p2)   ;;  %1244 = vmatprep.subr.bf16.mxu0 (!%p213_p2), %v1366_v0  ;;  %v1371_v5 = vld [vmem:[%s1762_s1 + $0x48] sm:$0xff] (!%p213_p2)   ;;  %v1375_v9 = vld [vmem:[%s1762_s1 + $0x50] sm:$0xff] (!%p213_p2)   ;;  %vm763_vm1 = vcmask (!%p213_p2), 1046528   ;;  %s1463_s27 = smov (!%p213_p2), 64  }
   0x7   : > { %v1368_v2 = vld [vmem:[%s1763_s2] sm:$0xff] (!%p213_p2)   ;;  %1272 = vmatprep.subr.bf16.mxu1 (!%p213_p2), %v1367_v1  ;;  %v1372_v6 = vld [vmem:[%s1763_s2 + $0x8] sm:$0xff] (!%p213_p2)   ;;  %v1376_v10 = vld [vmem:[%s1763_s2 + $0x10] sm:$0xff] (!%p213_p2)   ;;  %vm1096_vm2 = vcmask (!%p213_p2), 523264  }
   0x8   : > { %v1369_v3 = vld [vmem:[%s1762_s1] sm:$0xff] (!%p213_p2)   ;;  %1245 = vmatpush3.bf16.msra.mxu0 (!%p213_p2), %v1368_v2  ;;  %v1373_v7 = vld [vmem:[%s1762_s1 + $0x8] sm:$0xff] (!%p213_p2)   ;;  %v1377_v11 = vld [vmem:[%s1762_s1 + $0x10] sm:$0xff] (!%p213_p2)  }
   0x9   : > { %1273 = vmatpush3.bf16.msra.mxu1 (!%p213_p2), %v1369_v3  ;;  %1246 = vmatprep.subr.bf16.mxu0 (!%p213_p2), %v1370_v4  ;;  %v1378_v12 = vld [vmem:[%s1763_s2 + $0x58] sm:$0xff] (!%p213_p2)   ;;  %v1382_v16 = vld [vmem:[%s1763_s2 + $0x60] sm:$0xff] (!%p213_p2)   ;;  %v1386_v20 = vld [vmem:[%s1763_s2 + $0x68] sm:$0xff] (!%p213_p2)  }
   0xa   : > { %1274 = vmatprep.subr.bf16.mxu1 (!%p213_p2), %v1371_v5  ;;  %v1379_v13 = vld [vmem:[%s1762_s1 + $0x58] sm:$0xff] (!%p213_p2)   ;;  %v1383_v17 = vld [vmem:[%s1762_s1 + $0x60] sm:$0xff] (!%p213_p2)   ;;  %v1387_v21 = vld [vmem:[%s1762_s1 + $0x68] sm:$0xff] (!%p213_p2)  }
   0xb   : > { %v1380_v14 = vld [vmem:[%s1763_s2 + $0x18] sm:$0xff] (!%p213_p2)   ;;  %v1384_v18 = vld [vmem:[%s1763_s2 + $0x20] sm:$0xff] (!%p213_p2)   ;;  %v1388_v22 = vld [vmem:[%s1763_s2 + $0x28] sm:$0xff] (!%p213_p2)  }
   0xc   : > { %1247 = vmatpush3.bf16.msra.mxu0 (!%p213_p2), %v1372_v6  ;;  %v1381_v15 = vld [vmem:[%s1762_s1 + $0x18] sm:$0xff] (!%p213_p2)   ;;  %v1385_v19 = vld [vmem:[%s1762_s1 + $0x20] sm:$0xff] (!%p213_p2)   ;;  %v1389_v23 = vld [vmem:[%s1762_s1 + $0x28] sm:$0xff] (!%p213_p2)  }
   0xd   : > { %1275 = vmatpush3.bf16.msra.mxu1 %v1373_v7  ;;  %1248 = vmatprep.subr.bf16.mxu0 %v1374_v8  ;;  %s1769_s22 = smov (!%p242_p3, %s1160_s22), 1  ;;  %v1390_v24 = vld [vmem:[%s1763_s2 + $0x70] sm:$0xff]   ;;  %v1394_v28 = vld [vmem:[%s1763_s2 + $0x78] sm:$0xff]   ;;  %v1403_v38 = vld [vmem:[%s1765_s4 + $0x40] sm:$0xff]  }
   0xe   : > { %1276 = vmatprep.subr.bf16.mxu1 %v1375_v9  ;;  %v1391_v25 = vld [vmem:[%s1762_s1 + $0x70] sm:$0xff]   ;;  %s1356_s7 = smul.u32 40, %s1769_s22  ;;  %v1395_v29 = vld [vmem:[%s1762_s1 + $0x78] sm:$0xff]   ;;  %v1404_v45 = vld [vmem:[%s1764_s3 + $0x40] sm:$0xff]   ;;  %s1243_s28 = sshll.u32 %s1769_s22, 5 }
   0xf   : > { %v1392_v26 = vld [vmem:[%s1763_s2 + $0x30] sm:$0xff]   ;;  %v1396_v30 = vld [vmem:[%s1763_s2 + $0x38] sm:$0xff]   ;;  %v1405_v50 = vld [vmem:[%s1765_s4] sm:$0xff]  }
  0x10   : > { %1249 = vmatpush3.bf16.msra.mxu0 %v1376_v10  ;;  %v1393_v27 = vld [vmem:[%s1762_s1 + $0x30] sm:$0xff]   ;;  %s1607_s18 = scalar_lea.vmem %s1761_s0, %s1356_s7  ;;  %v1397_v31 = vld [vmem:[%s1762_s1 + $0x38] sm:$0xff]   ;;  %v1406_v52 = vld [vmem:[%s1764_s3] sm:$0xff]   ;;  %s251_s7 = scalar_lea.vmem %s1767_s6, %s1243_s28 }
  0x11   : > { %1277 = vmatpush3.bf16.msra.mxu1 %v1377_v11  ;;  %1250 = vmatprep.subr.bf16.mxu0 %v1378_v12  ;;  %v253_v32 = vld [vmem:[%s1607_s18] sm:$0xff]  ;;  %v1617_v33 = vld [vmem:[%s1607_s18 + $0x8] sm:$0xff]  ;;  %v1621_v35 = vld [vmem:[%s1607_s18 + $0x14] ss:$8 sps:$4 sm:$0xff]  }
  0x12   : > { %1278 = vmatprep.subr.bf16.mxu1 %v1379_v13  ;;  %v1169_v34 = vcombine.high %v253_v32, %v1617_v33  ;;  %v1168_v36 = vcombine.low %v253_v32, %v1617_v33  ;;  %v1625_v37 = vld [vmem:[%s1607_s18 + $0x10] ss:$8 sps:$4 sm:$0xff]   ;;  %v366_v41 = vshll.u32 %v1621_v35, 16  ;;  %v1407_v54 = vld [vmem:[%s1765_s4 + $0x48] sm:$0xff]   ;;  %v1419_v4 = vld [vmem:[%s1765_s4 + $0x60] sm:$0xff]   ;;  %v378_v6 = vshrl.u32 %v1621_v35, 16 }
  0x13   : > { %v354_v44 = vshll.u32 %v1625_v37, 16  ;;  %v1408_v56 = vld [vmem:[%s1764_s3 + $0x48] sm:$0xff]   ;;  %v1411_v60 = vld [vmem:[%s1765_s4 + $0x50] sm:$0xff]   ;;  %v1415_v0 = vld [vmem:[%s1765_s4 + $0x58] sm:$0xff]   ;;  %v370_v8 = vshrl.u32 %v1625_v37, 16 }
  0x14   : > { %1251 = vmatpush3.bf16.msra.mxu0 %v1380_v14  ;;  %v359_v39 = vshrl.u32 %v1169_v34, 16  ;;  %v361_v40 = vshll.u32 %v1169_v34, 16  ;;  %667 = vmatprep.mubr.bf16.mxu1 %v1169_v34  ;;  %v347_v42 = vshrl.u32 %v1168_v36, 16  ;;  %v349_v43 = vshll.u32 %v1168_v36, 16  ;;  %v1409_v58 = vld [vmem:[%s1765_s4 + $0x8] sm:$0xff]   ;;  %v1412_v61 = vld [vmem:[%s1764_s3 + $0x50] sm:$0xff]  }
  0x15   : > { %1279 = vmatpush3.bf16.msra.mxu1 %v1381_v15  ;;  %1252 = vmatprep.subr.bf16.mxu0 %v1382_v16  ;;  %v368_v47 = vrot.slane %v366_v41, 1  ;;  %v356_v49 = vrot.slane %v354_v44, 1  ;;  %v1410_v59 = vld [vmem:[%s1764_s3 + $0x8] sm:$0xff]   ;;  %v1413_v62 = vld [vmem:[%s1765_s4 + $0x10] sm:$0xff]   ;;  %v1416_v1 = vld [vmem:[%s1764_s3 + $0x58] sm:$0xff]  }
  0x16   : > { %1280 = vmatprep.subr.bf16.mxu1 %v1383_v17  ;;  %v363_v46 = vrot.slane %v361_v40, 1  ;;  %v351_v48 = vrot.slane %v349_v43, 1  ;;  %v1414_v63 = vld [vmem:[%s1764_s3 + $0x10] sm:$0xff]   ;;  %v1417_v2 = vld [vmem:[%s1765_s4 + $0x18] sm:$0xff]   ;;  %v1420_v5 = vld [vmem:[%s1764_s3 + $0x60] sm:$0xff]   ;;  %v765_v40 = vrot.slane %v1625_v37, 1 }
  0x17   : > { %v1418_v3 = vld [vmem:[%s1764_s3 + $0x18] sm:$0xff]   ;;  %v1421_v7 = vld [vmem:[%s1765_s4 + $0x20] sm:$0xff]   ;;  %v1424_v12 = vld [vmem:[%s1765_s4 + $0x68] sm:$0xff]   ;;  %v380_v15 = vor.u32 %v378_v6, %v368_v47  ;;  %v372_v17 = vor.u32 %v370_v8, %v356_v49 }
  0x18   : > { %1253 = vmatpush3.bf16.msra.mxu0 %v1384_v18  ;;  %v364_v51 = vor.u32 %v363_v46, %v359_v39  ;;  %v352_v53 = vor.u32 %v351_v48, %v347_v42  ;;  %v1422_v9 = vld [vmem:[%s1764_s3 + $0x20] sm:$0xff]   ;;  %v1425_v14 = vld [vmem:[%s1764_s3 + $0x68] sm:$0xff]   ;;  %v1435_v39 = vld [vmem:[%s1765_s4 + $0x38] sm:$0xff]  }
  0x19   : > { %1281 = vmatpush3.bf16.msra.mxu1 %v1385_v19  ;;  %1254 = vmatprep.subr.bf16.mxu0 %v1386_v20  ;;  %v257_v10 = vld [vmem:[%s1607_s18 + $0x20] sm:$0x11]  ;;  %v1428_v19 = vld [vmem:[%s1764_s3 + $0x28] sm:$0xff]   ;;  %v258_v32 = vld [vmem:[%s1607_s18] sm:$0xee] }
  0x1a   : > { %1282 = vmatprep.subr.bf16.mxu1 %v1387_v21  ;;  %v369_v55 = vsel %vm345_vm0, %v364_v51, %v368_v47  ;;  %v1650_v57 = vsel %vm345_vm0, %v352_v53, %v356_v49  ;;  %v1173_v11 = vcombine.high %v257_v10, %v257_v10  ;;  %v1172_v13 = vcombine.low %v257_v10, %v257_v10 }
  0x1b   : > { %518 = vmatprep.mubr.bf16.mxu0 %v369_v55  ;;  %v1207_v34 = vcombine.low %v258_v32, %v1617_v33 }
  0x1c   : > { %1255 = vmatpush3.bf16.msra.mxu0 %v1388_v22  ;;  %v382_v16 = vshll.u32 %v1173_v11, 16  ;;  %v374_v18 = vshll.u32 %v1172_v13, 16  ;;  %v1427_v22 = vld [vmem:[%s1765_s4 + $0x28] sm:$0xff]   ;;  %v772_v43 = vrot.slane %v1173_v11, 1 }
  0x1d   : > { %1283 = vmatpush3.bf16.msra.mxu1 %v1389_v23  ;;  %1256 = vmatprep.subr.bf16.mxu0 %v1390_v24  ;;  %v1430_v23 = vld [vmem:[%s1764_s3 + $0x70] sm:$0xff]   ;;  %v764_v41 = vrot.slane %v1207_v34, 1 }
  0x1e   : > { %1284 = vmatprep.subr.bf16.mxu1 %v1391_v25  ;;  %v384_v20 = vrot.slane %v382_v16, 1  ;;  %v376_v21 = vrot.slane %v374_v18, 1 }
  0x20   : > { %1257 = vmatpush3.bf16.msra.mxu0 %v1392_v26  ;;  %v385_v24 = vsel %vm345_vm0, %v380_v15, %v384_v20  ;;  %v377_v25 = vsel %vm345_vm0, %v372_v17, %v376_v21  ;;  %v1429_v26 = vld [vmem:[%s1765_s4 + $0x70] sm:$0xff]  }
  0x21   : > { %1285 = vmatpush3.bf16.msra.mxu1 %v1393_v27  ;;  %1258 = vmatprep.subr.bf16.mxu0 %v1394_v28  ;;  %v1432_v27 = vld [vmem:[%s1764_s3 + $0x30] sm:$0xff]  }
  0x22   : > { %1286 = vmatprep.subr.bf16.mxu1 %v1395_v29  ;;  %v1431_v28 = vld [vmem:[%s1765_s4 + $0x30] sm:$0xff]   ;;  %v1434_v29 = vld [vmem:[%s1764_s3 + $0x78] sm:$0xff]  }
  0x24   : > { %1259 = vmatpush3.bf16.msra.mxu0 %v1396_v30  ;;  %v1433_v30 = vld [vmem:[%s1765_s4 + $0x78] sm:$0xff]  }
  0x25   : > { %1287 = vmatpush3.bf16.msra.mxu1 %v1397_v31  ;;  %1300 = vmatprep.subr.bf16.mxu0 %v1403_v38  ;;  %v1436_v31 = vld [vmem:[%s1764_s3 + $0x38] sm:$0xff]   ;;  %v768_v38 = vrot.slane %v1621_v35, 1 }
  0x26   : > { %1328 = vmatprep.subr.bf16.mxu1 %v1404_v45  ;;  %v770_v45 = vrot.slane %v1172_v13, 1 }
  0x27   : > { %519 = vmatmul.mubr.bf16.vlgmr.msra.gmra.mrb[0].mxu0 %v1650_v57 }
  0x28   : > { %668 = vmatmul.mubr.bf16.vlgmr.msra.gmra.mrb[0].mxu1 %v1168_v36  ;;  %1301 = vmatpush3.bf16.msra.mxu0 %v1405_v50  ;;  %v1208_v36 = vcombine.high %v258_v32, %v1617_v33  ;;  %v766_v33 = vsel %vm763_vm1, %v764_v41, %v765_v40 }
  0x29   : > { %675 = vmatprep.mubr.bf16.mxu1 %v1621_v35  ;;  %1329 = vmatpush3.bf16.msra.mxu1 %v1406_v52  ;;  %v773_v35 = vsel %vm763_vm1, %v768_v38, %v772_v43 }
  0x2a   : > { %1330 = vmatprep.subr.bf16.mxu1 %v1408_v56  ;;  %1302 = vmatprep.subr.bf16.mxu0 %v1407_v54  ;;  %v767_v42 = vrot.slane %v1208_v36, 1 }
  0x2b   : > { %526 = vmatprep.mubr.bf16.mxu0 %v385_v24 }
  0x2c   : > { %1303 = vmatpush3.bf16.msra.mxu0 %v1409_v58  ;;  %v769_v44 = vsel %vm763_vm1, %v767_v42, %v768_v38  ;;  %v1206_v58 = vld [vmem:[%s1766_s5] ss:$0 sm:$0xff] }
  0x2d   : > { %1331 = vmatpush3.bf16.msra.mxu1 %v1410_v59  ;;  %1304 = vmatprep.subr.bf16.mxu0 %v1411_v60 }
  0x2e   : > { %1332 = vmatprep.subr.bf16.mxu1 %v1412_v61 }
  0x2f   : > { %527 = vmatmul.mubr.bf16.gmra.mrb[4].mxu0 %v377_v25 }
  0x30   : > { %676 = vmatmul.mubr.bf16.gmra.mrb[4].mxu1 %v1625_v37  ;;  %1305 = vmatpush3.bf16.msra.mxu0 %v1413_v62  ;;  %v771_v37 = vsel %vm763_vm1, %v765_v40, %v770_v45 }
  0x31   : > { %1051 = vmatprep.mubr.bf16.mxu1 %v369_v55  ;;  %1333 = vmatpush3.bf16.msra.mxu1 %v1414_v63 }
  0x32   : > { %1334 = vmatprep.subr.bf16.mxu1 %v1416_v1  ;;  %1306 = vmatprep.subr.bf16.mxu0 %v1415_v0 }
  0x33   : > { %906 = vmatprep.mubr.bf16.mxu0 %v769_v44 }
  0x34   : > { %1307 = vmatpush3.bf16.msra.mxu0 %v1417_v2 }
  0x35   : > { %1335 = vmatpush3.bf16.msra.mxu1 %v1418_v3  ;;  %1308 = vmatprep.subr.bf16.mxu0 %v1419_v4 }
  0x36   : > { %1336 = vmatprep.subr.bf16.mxu1 %v1420_v5 }
  0x38   : > { %1309 = vmatpush3.bf16.msra.mxu0 %v1421_v7 }
  0x39   : > { %1337 = vmatpush3.bf16.msra.mxu1 %v1422_v9  ;;  %1310 = vmatprep.subr.bf16.mxu0 %v1424_v12 }
  0x3a   : > { %1338 = vmatprep.subr.bf16.mxu1 %v1425_v14 }
  0x3c   : > { %1311 = vmatpush3.bf16.msra.mxu0 %v1427_v22 }
  0x3d   : > { %1339 = vmatpush3.bf16.msra.mxu1 %v1428_v19  ;;  %1312 = vmatprep.subr.bf16.mxu0 %v1429_v26 }
  0x3e   : > { %1340 = vmatprep.subr.bf16.mxu1 %v1430_v23 }
  0x40   : > { %1313 = vmatpush3.bf16.msra.mxu0 %v1431_v28 }
  0x41   : > { %1341 = vmatpush3.bf16.msra.mxu1 %v1432_v27  ;;  %1314 = vmatprep.subr.bf16.mxu0 %v1433_v30 }
  0x42   : > { %1342 = vmatprep.subr.bf16.mxu1 %v1434_v29 }
  0x44   : > { %1315 = vmatpush3.bf16.msra.mxu0 %v1435_v39 }
  0x45   : > { %1343 = vmatpush3.bf16.msra.mxu1 %v1436_v31 }
  0x47   : > { %907 = vmatmul.mubr.bf16.vlgmr.msra.gmra.mrb[8].mxu0 %v766_v33 }
  0x48   : > { %1052 = vmatmul.mubr.bf16.vlgmr.msra.gmra.mrb[8].mxu1 %v1650_v57  ;;  %914 = vmatprep.mubr.bf16.mxu0 %v773_v35 }
  0x49   : > { %1059 = vmatprep.mubr.bf16.mxu1 %v385_v24 }
  0x4f   : > { %915 = vmatmul.mubr.bf16.gmra.mrb[12].mxu0 %v771_v37 }
  0x50   : > { %1060 = vmatmul.mubr.bf16.gmra.mrb[12].mxu1 %v377_v25 }
  0xfa   : > { %v1260_v52 = vpop.f32.mrb[0].mxu0 }
  0xfb   : > { %v1288_v46 = vpop.f32.mrb[0].mxu1  ;;  %v1261_v53 = vpop.f32.mrb[1].mxu0 }
  0xfc   : > { %v1289_v47 = vpop.f32.mrb[1].mxu1  ;;  %v1262_v55 = vadd.f32 %v1261_v53, %v1260_v52  ;;  %v1263_v56 = vpop.f32.mrb[2].mxu0 }
  0xfd   : > { %v1290_v48 = vadd.f32 %v1289_v47, %v1288_v46  ;;  %v1291_v49 = vpop.f32.mrb[2].mxu1  ;;  %v1264_v59 = vpop.f32.mrb[3].mxu0 }
  0xfe   : > { %v1292_v50 = vpop.f32.mrb[3].mxu1  ;;  %v1265_v63 = vadd.f32 %v1264_v59, %v1263_v56 }
  0xff   : > { %v1293_v51 = vadd.f32 %v1292_v50, %v1291_v49  ;;  %v670_v62 = vadd.f32 %v1290_v48, %v1262_v55 }
 0x101   : > { %v690_v2 = vadd.f32 %v1206_v58, %v670_v62  ;;  %v673_v3 = vadd.f32 %v1293_v51, %v1265_v63 }
 0x102   : > { %v1266_v5 = vpop.f32.mrb[4].mxu0 }
 0x103   : > { %v1294_v54 = vpop.f32.mrb[4].mxu1  ;;  %v691_v4 = vadd.f32 %v1206_v58, %v673_v3  ;;  %v1267_v6 = vpop.f32.mrb[5].mxu0 }
 0x104   : > { %v1295_v57 = vpop.f32.mrb[5].mxu1  ;;  %v1268_v7 = vadd.f32 %v1267_v6, %v1266_v5  ;;  %v1269_v8 = vpop.f32.mrb[6].mxu0 }
 0x105   : > { %v1296_v60 = vadd.f32 %v1295_v57, %v1294_v54  ;;  %v1297_v61 = vpop.f32.mrb[6].mxu1  ;;  %v1270_v9 = vpop.f32.mrb[7].mxu0 }
 0x106   : > { %v1298_v0 = vpop.f32.mrb[7].mxu1  ;;  %v1271_v11 = vadd.f32 %v1270_v9, %v1269_v8 }
 0x107   : > { %v1299_v1 = vadd.f32 %v1298_v0, %v1297_v61  ;;  %v678_v10 = vadd.f32 %v1296_v60, %v1268_v7 }
 0x109   : > { %v692_v12 = vadd.f32 %v1206_v58, %v678_v10  ;;  %v681_v13 = vadd.f32 %v1299_v1, %v1271_v11 }
 0x10b   : > { %v693_v14 = vadd.f32 %v1206_v58, %v681_v13 }
 0x11a   : > { %v1316_v20 = vpop.f32.mrb[8].mxu0 }
 0x11b   : > { %v1344_v15 = vpop.f32.mrb[8].mxu1  ;;  %v1317_v22 = vpop.f32.mrb[9].mxu0 }
 0x11c   : > { %v1345_v16 = vpop.f32.mrb[9].mxu1  ;;  %v1318_v23 = vadd.f32 %v1317_v22, %v1316_v20  ;;  %v1319_v24 = vpop.f32.mrb[10].mxu0 }
 0x11d   : > { %v1346_v17 = vadd.f32 %v1345_v16, %v1344_v15  ;;  %v1347_v18 = vpop.f32.mrb[10].mxu1  ;;  %v1320_v25 = vpop.f32.mrb[11].mxu0 }
 0x11e   : > { %v1348_v19 = vpop.f32.mrb[11].mxu1  ;;  %v1321_v27 = vadd.f32 %v1320_v25, %v1319_v24 }
 0x11f   : > { %v1349_v21 = vadd.f32 %v1348_v19, %v1347_v18  ;;  %v1054_v26 = vadd.f32 %v1346_v17, %v1318_v23 }
 0x121   : > { %v1068_v30 = vadd.f32 %v1206_v58, %v1054_v26  ;;  %v1057_v31 = vadd.f32 %v1349_v21, %v1321_v27 }
 0x122   : > { %v1322_v39 = vpop.f32.mrb[12].mxu0 }
 0x123   : > { %v1350_v28 = vpop.f32.mrb[12].mxu1  ;;  %1439 = vtanh.f32 %v1068_v30  ;;  %v1069_v38 = vadd.f32 %v1206_v58, %v1057_v31  ;;  %v1323_v41 = vpop.f32.mrb[13].mxu0 }
 0x124   : > { %v1351_v29 = vpop.f32.mrb[13].mxu1  ;;  %v1324_v42 = vadd.f32 %v1323_v41, %v1322_v39  ;;  %v1325_v43 = vpop.f32.mrb[14].mxu0 }
 0x125   : > { %v1352_v32 = vadd.f32 %v1351_v29, %v1350_v28  ;;  %v1353_v34 = vpop.f32.mrb[14].mxu1  ;;  %v1326_v44 = vpop.f32.mrb[15].mxu0  ;;  %1441 = vtanh.f32 %v1069_v38 }
 0x126   : > { %v1354_v36 = vpop.f32.mrb[15].mxu1  ;;  %v1327_v35 = vadd.f32 %v1326_v44, %v1325_v43 }
 0x127   : > { %v1355_v40 = vadd.f32 %v1354_v36, %v1353_v34  ;;  %v1062_v33 = vadd.f32 %v1352_v32, %v1324_v42 }
 0x129   : > { %v1070_v45 = vadd.f32 %v1206_v58, %v1062_v33  ;;  %v1065_v37 = vadd.f32 %v1355_v40, %v1327_v35 }
 0x12b   : > { %1443 = vtanh.f32 %v1070_v45  ;;  %v1071_v46 = vadd.f32 %v1206_v58, %v1065_v37 }
 0x12d   : > { %v1440_v47 = vpop.eup %1439  ;;  %1445 = vtanh.f32 %v1071_v46 }
 0x12e   : > { %1084 = vrot.lane.b32.xlu0 %v1440_v47, %s1463_s27  ;;  %1447 = vtanh.f32 %v690_v2 }
 0x12f   : > { %v1442_v48 = vpop.eup %1441  ;;  %1449 = vtanh.f32 %v691_v4 }
 0x130   : > { %1451 = vtanh.f32 %v692_v12 }
 0x131   : > { %1453 = vtanh.f32 %v693_v14 }
 0x132   : > { %1086 = vrot.lane.b32.xlu0 %v1442_v48, %s1463_s27 }
 0x135   : > { %v1444_v49 = vpop.eup %1443 }
 0x136   : > { %1088 = vrot.lane.b32.xlu1 %v1444_v49, %s1463_s27 }
 0x137   : > { %v1446_v50 = vpop.eup %1445 }
 0x138   : > { %v1448_v51 = vpop.eup %1447 }
 0x139   : > { %v1450_v54 = vpop.eup %1449 }
 0x13a   : > { %1090 = vrot.lane.b32.xlu1 %v1446_v50, %s1463_s27  ;;  %v1452_v57 = vpop.eup %1451 }
 0x13b   : > { %v1454_v60 = vpop.eup %1453 }
 0x1a0   : > { %v1085_v52 = vpop.permute.xlu0 %1084 }
 0x1a1   : > { %v1097_v53 = vsel %vm1096_vm2, %v1448_v51, %v1085_v52 }
 0x1a2   : > { %1101 = vst [vmem:[%s251_s7] sm:$0xff] %v1097_v53 }
 0x1a4   : > { %v1087_v55 = vpop.permute.xlu0 %1086 }
 0x1a5   : > { %v1098_v56 = vsel %vm1096_vm2, %v1450_v54, %v1087_v55 }
 0x1a6   : > { %1102 = vst [vmem:[%s251_s7 + $0x8] sm:$0xff] %v1098_v56 }
 0x1a8   : > { %v1089_v58 = vpop.permute.xlu1 %1088 }
 0x1a9   : > { %v1099_v59 = vsel %vm1096_vm2, %v1452_v57, %v1089_v58 }
 0x1aa   : > { %1103 = vst [vmem:[%s251_s7 + $0x10] sm:$0xff] %v1099_v59 }
 0x1ac   : > { %v1091_v61 = vpop.permute.xlu1 %1090 }
 0x1ad   : > { %v1100_v62 = vsel %vm1096_vm2, %v1454_v60, %v1091_v61 }
 0x1ae   : > { %1104 = vst [vmem:[%s251_s7 + $0x18] sm:$0xff] %v1100_v62 }
 0x1af PF: > { %s16_s21 = sadd.s32 1, %s1461_s21  }
 0x1b0   : > { %p13_p4 = scmp.ge.s32.totalorder %s16_s21, 4  }
 0x1b2   :  { %15 = sbr.rel (!%p13_p4) target bundleno = 1 (0x1), region = 74 }

</bundles_post_ra>
